<compile_context>
chip_gen: v7x
topology: tpu7x:2x2x1
jax: 0.10.0
libtpu: 0.0.40
codegen_flags: <defaults>
</compile_context>

<pallas_src>
import jax
import jax.numpy as jnp
from jax import lax
from jax.experimental import pallas as pl
from jax.experimental.pallas import tpu as pltpu

# ---- Config mirroring TransformerActor(input_dim=64, num_actions=12) --------
INPUT_DIM = 64          # d_model (must be divisible by nhead)
NUM_ACTIONS = 12
HEAD_PAD = 128          # lane-dense padded width of the action head
NHEAD = 4
NUM_LAYERS = 2
DIM_FF = 2048           # PyTorch TransformerEncoderLayer default dim_feedforward
LN_EPS = 1e-5           # PyTorch LayerNorm default eps
TILE_B = 128            # batch rows per grid step (256 also fine on v6e/v7x)

# Row indices inside the packed per-layer vector array (L, 8, D).
_BATTN, _G1, _BE1, _B2, _G2, _BE2 = 0, 1, 2, 3, 4, 5


def _layer_norm(h, gamma, beta):
    mu = jnp.mean(h, axis=-1, keepdims=True)
    var = jnp.mean((h - mu) ** 2, axis=-1, keepdims=True)
    return (h - mu) * lax.rsqrt(var + LN_EPS) * gamma + beta


def transformer_actor_kernel(x_ref, wattn_ref, vecs_ref, w1_ref, b1_ref, w2_ref,
                             wfc_ref, bfc_ref, out_ref):
    x = x_ref[...]                                     # (TILE_B, D) float32
    for l in range(NUM_LAYERS):
        v = vecs_ref[l]                                # (8, D) f32, VMEM-resident
        battn, g1, be1 = v[_BATTN:_BATTN + 1], v[_G1:_G1 + 1], v[_BE1:_BE1 + 1]
        b2, g2, be2 = v[_B2:_B2 + 1], v[_G2:_G2 + 1], v[_BE2:_BE2 + 1]

        # ---- self-attention block (post-LN) ----
        # seq_len == 1 => softmax over one key is exactly 1.0; out_proj is
        # folded into v_proj at init, so attention == x @ W_attn + b_attn.
        sa = (jnp.dot(x.astype(jnp.bfloat16), wattn_ref[l],
                      preferred_element_type=jnp.float32) + battn)
        x = _layer_norm(x + sa, g1, be1)

        # ---- feed-forward block (ReLU) ----
        h = (jnp.dot(x.astype(jnp.bfloat16), w1_ref[l],
                     preferred_element_type=jnp.float32) + b1_ref[l])
        h = jnp.maximum(h, 0.0)
        # w2 stored in natural (K, N) = (F, D) orientation: plain jnp.dot,
        # no transposed contraction, no XLU work.
        ff = (jnp.dot(h.astype(jnp.bfloat16), w2_ref[l],
                      preferred_element_type=jnp.float32) + b2)
        x = _layer_norm(x + ff, g2, be2)

    # ---- final action head: Linear(D, A), zero-padded to 128 lanes ----
    out_ref[...] = (jnp.dot(x.astype(jnp.bfloat16), wfc_ref[...],
                            preferred_element_type=jnp.float32) + bfc_ref[...])


def _resident_spec(arr):
    """Full-array block with a constant index_map -> fetched once, stays in VMEM."""
    nd = arr.ndim

    def index_map(i):
        return (0,) * nd

    return pl.BlockSpec(arr.shape, index_map)


def transformer_actor_forward(x, params, *, tile_b=TILE_B):
    B, D = x.shape
    assert D == INPUT_DIM
    n_tiles = pl.cdiv(B, tile_b)
    b_pad = n_tiles * tile_b
    if b_pad != B:
        x = jnp.pad(x, ((0, b_pad - B), (0, 0)))

    weights = (params["wattn"], params["vecs"], params["w1"], params["b1"],
               params["w2"], params["wfc_pad"], params["bfc_pad"])

    in_specs = [pl.BlockSpec((tile_b, D), lambda i: (i, 0))]
    in_specs += [_resident_spec(w) for w in weights]

    out_padded = pl.pallas_call(
        transformer_actor_kernel,
        out_shape=jax.ShapeDtypeStruct((b_pad, HEAD_PAD), jnp.float32),
        grid=(n_tiles,),
        in_specs=in_specs,
        out_specs=pl.BlockSpec((tile_b, HEAD_PAD), lambda i: (i, 0)),
        compiler_params=pltpu.CompilerParams(
            dimension_semantics=("parallel",)),
    )(x, *weights)
    return out_padded[:B, :NUM_ACTIONS]


# -------------------- deterministic parameter initialization -----------------
def _uniform(key, shape, bound):
    return jax.random.uniform(key, shape, jnp.float32, -bound, bound)


def init_params(key):
    D, F, A, L = INPUT_DIM, DIM_FF, NUM_ACTIONS, NUM_LAYERS
    keys = iter(jax.random.split(key, 6 * L + 2))

    wattn, vecs, w1, b1, w2 = [], [], [], [], []
    for _ in range(L):
        # in_proj (xavier-uniform bound for the (3D, D) matrix), V slice only.
        xav = (6.0 / (3 * D + D)) ** 0.5
        wv = _uniform(next(keys), (D, D), xav)                 # stored (in, out)
        bv = jnp.zeros((1, D), jnp.float32)                    # PyTorch zeros in_proj bias
        # out_proj: Linear(D, D); PyTorch zeros out_proj.bias in _reset_parameters.
        wo = _uniform(next(keys), (D, D), 1.0 / D ** 0.5)
        bo = jnp.zeros((1, D), jnp.float32)
        # Fold out_proj into v_proj (exact for seq_len == 1 attention).
        wattn.append(wv @ wo)
        battn = bv @ wo + bo   # identically zero for PyTorch init; kept so the
                               # fold stays exact for trained checkpoints.
        g1 = jnp.ones((1, D), jnp.float32)
        be1 = jnp.zeros((1, D), jnp.float32)
        # FFN: Linear(D, F), Linear(F, D).  w2 kept in natural (F, D) layout.
        w1.append(_uniform(next(keys), (D, F), 1.0 / D ** 0.5))
        b1.append(_uniform(next(keys), (1, F), 1.0 / D ** 0.5))
        w2.append(_uniform(next(keys), (F, D), 1.0 / F ** 0.5))
        b2 = _uniform(next(keys), (1, D), 1.0 / F ** 0.5)
        g2 = jnp.ones((1, D), jnp.float32)
        be2 = jnp.zeros((1, D), jnp.float32)
        # Pack all small per-layer f32 vectors into one (8, D) slab (1 DMA).
        vecs.append(jnp.concatenate(
            [battn, g1, be1, b2, g2, be2, jnp.zeros((2, D), jnp.float32)], axis=0))

    # Action head, zero-padded from (D, A)/(1, A) to lane-dense (D, 128)/(1, 128).
    wfc = _uniform(next(keys), (D, A), 1.0 / D ** 0.5)
    bfc = _uniform(next(keys), (1, A), 1.0 / D ** 0.5)
    wfc_pad = jnp.zeros((D, HEAD_PAD), jnp.float32).at[:, :A].set(wfc)
    bfc_pad = jnp.zeros((1, HEAD_PAD), jnp.float32).at[:, :A].set(bfc)

    return {
        "wattn": jnp.stack(wattn).astype(jnp.bfloat16),   # (L, D, D)
        "vecs": jnp.stack(vecs),                          # (L, 8, D) f32
        "w1": jnp.stack(w1).astype(jnp.bfloat16),         # (L, D, F)
        "b1": jnp.stack(b1),                              # (L, 1, F) f32
        "w2": jnp.stack(w2).astype(jnp.bfloat16),         # (L, F, D)
        "wfc_pad": wfc_pad.astype(jnp.bfloat16),          # (D, 128)
        "bfc_pad": bfc_pad,                               # (1, 128) f32
    }


# ------------------------------ pure-JAX reference ----------------------------
def reference_forward(x, p):
    def mm(a, w):
        return jnp.dot(a.astype(jnp.bfloat16), w, preferred_element_type=jnp.float32)

    for l in range(NUM_LAYERS):
        v = p["vecs"][l]
        sa = mm(x, p["wattn"][l]) + v[_BATTN:_BATTN + 1]
        x = _layer_norm(x + sa, v[_G1:_G1 + 1], v[_BE1:_BE1 + 1])
        h = jnp.maximum(mm(x, p["w1"][l]) + p["b1"][l], 0.0)
        ff = mm(h, p["w2"][l]) + v[_B2:_B2 + 1]
        x = _layer_norm(x + ff, v[_G2:_G2 + 1], v[_BE2:_BE2 + 1])
    return (mm(x, p["wfc_pad"]) + p["bfc_pad"])[:, :NUM_ACTIONS]


if __name__ == "__main__":
    key = jax.random.PRNGKey(0)
    k_param, k_x = jax.random.split(key)
    params = init_params(k_param)

    # Non-multiple-of-tile batch to exercise padding; pads to 256 -> grid=(2,).
    B = 200
    x = jax.random.normal(k_x, (B, INPUT_DIM), jnp.float32)

    fwd = jax.jit(lambda xx, pp: transformer_actor_forward(xx, pp, tile_b=TILE_B))
    out = jax.block_until_ready(fwd(x, params))

    ref = reference_forward(x, params)
    assert out.shape == (B, NUM_ACTIONS), out.shape
    assert jnp.all(jnp.isfinite(out))
    assert jnp.allclose(out, ref, atol=2e-2, rtol=2e-2)

    print("KERNEL_OK")
</pallas_src>

<mosaic_0001>
module attributes {stable_mosaic.version = 11 : i64} {
  func.func @transformer_actor_kernel(%arg0: i32, %arg1: memref<128x64xf32, #tpu.memory_space<vmem>>, %arg2: memref<2x64x64xbf16, #tpu.memory_space<vmem>>, %arg3: memref<2x8x64xf32, #tpu.memory_space<vmem>>, %arg4: memref<2x64x2048xbf16, #tpu.memory_space<vmem>>, %arg5: memref<2x1x2048xf32, #tpu.memory_space<vmem>>, %arg6: memref<2x2048x64xbf16, #tpu.memory_space<vmem>>, %arg7: memref<64x128xbf16, #tpu.memory_space<vmem>>, %arg8: memref<1x128xf32, #tpu.memory_space<vmem>>, %arg9: memref<128x128xf32, #tpu.memory_space<vmem>>) attributes {dimension_semantics = [#tpu.dimension_semantics<parallel>], iteration_bounds = array<i64: 2>, scalar_prefetch = 0 : i64, scratch_operands = 0 : i64, tpu.core_type = #tpu.core_type<tc>, window_params = [{transform_indices = @transform_0, window_bounds = array<i64: 128, 64>}, {pipeline_mode = #tpu.pipeline_mode<synchronous>, transform_indices = @transform_1, window_bounds = array<i64: 2, 64, 64>}, {pipeline_mode = #tpu.pipeline_mode<synchronous>, transform_indices = @transform_2, window_bounds = array<i64: 2, 8, 64>}, {pipeline_mode = #tpu.pipeline_mode<synchronous>, transform_indices = @transform_3, window_bounds = array<i64: 2, 64, 2048>}, {pipeline_mode = #tpu.pipeline_mode<synchronous>, transform_indices = @transform_4, window_bounds = array<i64: 2, 1, 2048>}, {pipeline_mode = #tpu.pipeline_mode<synchronous>, transform_indices = @transform_5, window_bounds = array<i64: 2, 2048, 64>}, {pipeline_mode = #tpu.pipeline_mode<synchronous>, transform_indices = @transform_6, window_bounds = array<i64: 64, 128>}, {pipeline_mode = #tpu.pipeline_mode<synchronous>, transform_indices = @transform_7, window_bounds = array<i64: 1, 128>}, {transform_indices = @transform_8, window_bounds = array<i64: 128, 128>}]} {
    %c0 = arith.constant 0 : index
    %c0_0 = arith.constant 0 : index
    %0 = vector.load %arg1[%c0, %c0_0] : memref<128x64xf32, #tpu.memory_space<vmem>>, vector<128x64xf32>
    %c0_1 = arith.constant 0 : index
    %c0_2 = arith.constant 0 : index
    %c0_3 = arith.constant 0 : index
    %1 = vector.load %arg3[%c0_1, %c0_2, %c0_3] : memref<2x8x64xf32, #tpu.memory_space<vmem>>, vector<1x8x64xf32>
    %2 = vector.shape_cast %1 : vector<1x8x64xf32> to vector<8x64xf32>
    %3 = vector.extract_strided_slice %2 {offsets = [0, 0], sizes = [1, 64], strides = [1, 1]} : vector<8x64xf32> to vector<1x64xf32>
    %4 = vector.extract_strided_slice %2 {offsets = [1, 0], sizes = [1, 64], strides = [1, 1]} : vector<8x64xf32> to vector<1x64xf32>
    %5 = vector.extract_strided_slice %2 {offsets = [2, 0], sizes = [1, 64], strides = [1, 1]} : vector<8x64xf32> to vector<1x64xf32>
    %6 = vector.extract_strided_slice %2 {offsets = [3, 0], sizes = [1, 64], strides = [1, 1]} : vector<8x64xf32> to vector<1x64xf32>
    %7 = vector.extract_strided_slice %2 {offsets = [4, 0], sizes = [1, 64], strides = [1, 1]} : vector<8x64xf32> to vector<1x64xf32>
    %8 = vector.extract_strided_slice %2 {offsets = [5, 0], sizes = [1, 64], strides = [1, 1]} : vector<8x64xf32> to vector<1x64xf32>
    %9 = arith.truncf %0 : vector<128x64xf32> to vector<128x64xbf16>
    %c0_4 = arith.constant 0 : index
    %c0_5 = arith.constant 0 : index
    %c0_6 = arith.constant 0 : index
    %10 = vector.load %arg2[%c0_4, %c0_5, %c0_6] : memref<2x64x64xbf16, #tpu.memory_space<vmem>>, vector<1x64x64xbf16>
    %11 = vector.shape_cast %10 : vector<1x64x64xbf16> to vector<64x64xbf16>
    %cst = arith.constant dense<0.000000e+00> : vector<128x64xf32>
    %12 = tpu.matmul %9, %11, %cst {dimension_numbers = #tpu.dot_dimension_numbers<[1], [0], [0], [1], [0, 0, 1, 1], [], []>} : vector<128x64xbf16>, vector<64x64xbf16>, vector<128x64xf32> -> vector<128x64xf32>
    %13 = vector.broadcast %3 : vector<1x64xf32> to vector<128x64xf32>
    %14 = arith.addf %12, %13 : vector<128x64xf32>
    %15 = arith.addf %0, %14 : vector<128x64xf32>
    %cst_7 = arith.constant dense<0.000000e+00> : vector<128xf32>
    %16 = vector.multi_reduction <add>, %15, %cst_7 [1] : vector<128x64xf32> to vector<128xf32>
    %17 = vector.shape_cast %16 : vector<128xf32> to vector<128x1xf32>
    %cst_8 = arith.constant 6.400000e+01 : f32
    %18 = vector.broadcast %cst_8 : f32 to vector<128x1xf32>
    %19 = arith.divf %17, %18 : vector<128x1xf32>
    %20 = vector.broadcast %19 : vector<128x1xf32> to vector<128x64xf32>
    %21 = arith.subf %15, %20 : vector<128x64xf32>
    %22 = arith.mulf %21, %21 : vector<128x64xf32>
    %cst_9 = arith.constant dense<0.000000e+00> : vector<128xf32>
    %23 = vector.multi_reduction <add>, %22, %cst_9 [1] : vector<128x64xf32> to vector<128xf32>
    %24 = vector.shape_cast %23 : vector<128xf32> to vector<128x1xf32>
    %cst_10 = arith.constant 6.400000e+01 : f32
    %25 = vector.broadcast %cst_10 : f32 to vector<128x1xf32>
    %26 = arith.divf %24, %25 : vector<128x1xf32>
    %27 = vector.broadcast %19 : vector<128x1xf32> to vector<128x64xf32>
    %28 = arith.subf %15, %27 : vector<128x64xf32>
    %cst_11 = arith.constant 9.99999974E-6 : f32
    %29 = vector.broadcast %cst_11 : f32 to vector<128x1xf32>
    %30 = arith.addf %26, %29 : vector<128x1xf32>
    %31 = math.rsqrt %30 : vector<128x1xf32>
    %32 = vector.broadcast %31 : vector<128x1xf32> to vector<128x64xf32>
    %33 = arith.mulf %28, %32 : vector<128x64xf32>
    %34 = vector.broadcast %4 : vector<1x64xf32> to vector<128x64xf32>
    %35 = arith.mulf %33, %34 : vector<128x64xf32>
    %36 = vector.broadcast %5 : vector<1x64xf32> to vector<128x64xf32>
    %37 = arith.addf %35, %36 : vector<128x64xf32>
    %38 = arith.truncf %37 : vector<128x64xf32> to vector<128x64xbf16>
    %c0_12 = arith.constant 0 : index
    %c0_13 = arith.constant 0 : index
    %c0_14 = arith.constant 0 : index
    %39 = vector.load %arg4[%c0_12, %c0_13, %c0_14] : memref<2x64x2048xbf16, #tpu.memory_space<vmem>>, vector<1x64x2048xbf16>
    %40 = vector.shape_cast %39 : vector<1x64x2048xbf16> to vector<64x2048xbf16>
    %cst_15 = arith.constant dense<0.000000e+00> : vector<128x2048xf32>
    %41 = tpu.matmul %38, %40, %cst_15 {dimension_numbers = #tpu.dot_dimension_numbers<[1], [0], [0], [1], [0, 0, 1, 1], [], []>} : vector<128x64xbf16>, vector<64x2048xbf16>, vector<128x2048xf32> -> vector<128x2048xf32>
    %c0_16 = arith.constant 0 : index
    %c0_17 = arith.constant 0 : index
    %c0_18 = arith.constant 0 : index
    %42 = vector.load %arg5[%c0_16, %c0_17, %c0_18] : memref<2x1x2048xf32, #tpu.memory_space<vmem>>, vector<1x1x2048xf32>
    %43 = vector.shape_cast %42 : vector<1x1x2048xf32> to vector<1x2048xf32>
    %44 = vector.broadcast %43 : vector<1x2048xf32> to vector<128x2048xf32>
    %45 = arith.addf %41, %44 : vector<128x2048xf32>
    %cst_19 = arith.constant 0.000000e+00 : f32
    %46 = vector.broadcast %cst_19 : f32 to vector<128x2048xf32>
    %47 = arith.maximumf %45, %46 : vector<128x2048xf32>
    %48 = arith.truncf %47 : vector<128x2048xf32> to vector<128x2048xbf16>
    %c0_20 = arith.constant 0 : index
    %c0_21 = arith.constant 0 : index
    %c0_22 = arith.constant 0 : index
    %49 = vector.load %arg6[%c0_20, %c0_21, %c0_22] : memref<2x2048x64xbf16, #tpu.memory_space<vmem>>, vector<1x2048x64xbf16>
    %50 = vector.shape_cast %49 : vector<1x2048x64xbf16> to vector<2048x64xbf16>
    %cst_23 = arith.constant dense<0.000000e+00> : vector<128x64xf32>
    %51 = tpu.matmul %48, %50, %cst_23 {dimension_numbers = #tpu.dot_dimension_numbers<[1], [0], [0], [1], [0, 0, 1, 1], [], []>} : vector<128x2048xbf16>, vector<2048x64xbf16>, vector<128x64xf32> -> vector<128x64xf32>
    %52 = vector.broadcast %6 : vector<1x64xf32> to vector<128x64xf32>
    %53 = arith.addf %51, %52 : vector<128x64xf32>
    %54 = arith.addf %37, %53 : vector<128x64xf32>
    %cst_24 = arith.constant dense<0.000000e+00> : vector<128xf32>
    %55 = vector.multi_reduction <add>, %54, %cst_24 [1] : vector<128x64xf32> to vector<128xf32>
    %56 = vector.shape_cast %55 : vector<128xf32> to vector<128x1xf32>
    %cst_25 = arith.constant 6.400000e+01 : f32
    %57 = vector.broadcast %cst_25 : f32 to vector<128x1xf32>
    %58 = arith.divf %56, %57 : vector<128x1xf32>
    %59 = vector.broadcast %58 : vector<128x1xf32> to vector<128x64xf32>
    %60 = arith.subf %54, %59 : vector<128x64xf32>
    %61 = arith.mulf %60, %60 : vector<128x64xf32>
    %cst_26 = arith.constant dense<0.000000e+00> : vector<128xf32>
    %62 = vector.multi_reduction <add>, %61, %cst_26 [1] : vector<128x64xf32> to vector<128xf32>
    %63 = vector.shape_cast %62 : vector<128xf32> to vector<128x1xf32>
    %cst_27 = arith.constant 6.400000e+01 : f32
    %64 = vector.broadcast %cst_27 : f32 to vector<128x1xf32>
    %65 = arith.divf %63, %64 : vector<128x1xf32>
    %66 = vector.broadcast %58 : vector<128x1xf32> to vector<128x64xf32>
    %67 = arith.subf %54, %66 : vector<128x64xf32>
    %cst_28 = arith.constant 9.99999974E-6 : f32
    %68 = vector.broadcast %cst_28 : f32 to vector<128x1xf32>
    %69 = arith.addf %65, %68 : vector<128x1xf32>
    %70 = math.rsqrt %69 : vector<128x1xf32>
    %71 = vector.broadcast %70 : vector<128x1xf32> to vector<128x64xf32>
    %72 = arith.mulf %67, %71 : vector<128x64xf32>
    %73 = vector.broadcast %7 : vector<1x64xf32> to vector<128x64xf32>
    %74 = arith.mulf %72, %73 : vector<128x64xf32>
    %75 = vector.broadcast %8 : vector<1x64xf32> to vector<128x64xf32>
    %76 = arith.addf %74, %75 : vector<128x64xf32>
    %c1 = arith.constant 1 : index
    %c0_29 = arith.constant 0 : index
    %c0_30 = arith.constant 0 : index
    %77 = vector.load %arg3[%c1, %c0_29, %c0_30] : memref<2x8x64xf32, #tpu.memory_space<vmem>>, vector<1x8x64xf32>
    %78 = vector.shape_cast %77 : vector<1x8x64xf32> to vector<8x64xf32>
    %79 = vector.extract_strided_slice %78 {offsets = [0, 0], sizes = [1, 64], strides = [1, 1]} : vector<8x64xf32> to vector<1x64xf32>
    %80 = vector.extract_strided_slice %78 {offsets = [1, 0], sizes = [1, 64], strides = [1, 1]} : vector<8x64xf32> to vector<1x64xf32>
    %81 = vector.extract_strided_slice %78 {offsets = [2, 0], sizes = [1, 64], strides = [1, 1]} : vector<8x64xf32> to vector<1x64xf32>
    %82 = vector.extract_strided_slice %78 {offsets = [3, 0], sizes = [1, 64], strides = [1, 1]} : vector<8x64xf32> to vector<1x64xf32>
    %83 = vector.extract_strided_slice %78 {offsets = [4, 0], sizes = [1, 64], strides = [1, 1]} : vector<8x64xf32> to vector<1x64xf32>
    %84 = vector.extract_strided_slice %78 {offsets = [5, 0], sizes = [1, 64], strides = [1, 1]} : vector<8x64xf32> to vector<1x64xf32>
    %85 = arith.truncf %76 : vector<128x64xf32> to vector<128x64xbf16>
    %c1_31 = arith.constant 1 : index
    %c0_32 = arith.constant 0 : index
    %c0_33 = arith.constant 0 : index
    %86 = vector.load %arg2[%c1_31, %c0_32, %c0_33] : memref<2x64x64xbf16, #tpu.memory_space<vmem>>, vector<1x64x64xbf16>
    %87 = vector.shape_cast %86 : vector<1x64x64xbf16> to vector<64x64xbf16>
    %cst_34 = arith.constant dense<0.000000e+00> : vector<128x64xf32>
    %88 = tpu.matmul %85, %87, %cst_34 {dimension_numbers = #tpu.dot_dimension_numbers<[1], [0], [0], [1], [0, 0, 1, 1], [], []>} : vector<128x64xbf16>, vector<64x64xbf16>, vector<128x64xf32> -> vector<128x64xf32>
    %89 = vector.broadcast %79 : vector<1x64xf32> to vector<128x64xf32>
    %90 = arith.addf %88, %89 : vector<128x64xf32>
    %91 = arith.addf %76, %90 : vector<128x64xf32>
    %cst_35 = arith.constant dense<0.000000e+00> : vector<128xf32>
    %92 = vector.multi_reduction <add>, %91, %cst_35 [1] : vector<128x64xf32> to vector<128xf32>
    %93 = vector.shape_cast %92 : vector<128xf32> to vector<128x1xf32>
    %cst_36 = arith.constant 6.400000e+01 : f32
    %94 = vector.broadcast %cst_36 : f32 to vector<128x1xf32>
    %95 = arith.divf %93, %94 : vector<128x1xf32>
    %96 = vector.broadcast %95 : vector<128x1xf32> to vector<128x64xf32>
    %97 = arith.subf %91, %96 : vector<128x64xf32>
    %98 = arith.mulf %97, %97 : vector<128x64xf32>
    %cst_37 = arith.constant dense<0.000000e+00> : vector<128xf32>
    %99 = vector.multi_reduction <add>, %98, %cst_37 [1] : vector<128x64xf32> to vector<128xf32>
    %100 = vector.shape_cast %99 : vector<128xf32> to vector<128x1xf32>
    %cst_38 = arith.constant 6.400000e+01 : f32
    %101 = vector.broadcast %cst_38 : f32 to vector<128x1xf32>
    %102 = arith.divf %100, %101 : vector<128x1xf32>
    %103 = vector.broadcast %95 : vector<128x1xf32> to vector<128x64xf32>
    %104 = arith.subf %91, %103 : vector<128x64xf32>
    %cst_39 = arith.constant 9.99999974E-6 : f32
    %105 = vector.broadcast %cst_39 : f32 to vector<128x1xf32>
    %106 = arith.addf %102, %105 : vector<128x1xf32>
    %107 = math.rsqrt %106 : vector<128x1xf32>
    %108 = vector.broadcast %107 : vector<128x1xf32> to vector<128x64xf32>
    %109 = arith.mulf %104, %108 : vector<128x64xf32>
    %110 = vector.broadcast %80 : vector<1x64xf32> to vector<128x64xf32>
    %111 = arith.mulf %109, %110 : vector<128x64xf32>
    %112 = vector.broadcast %81 : vector<1x64xf32> to vector<128x64xf32>
    %113 = arith.addf %111, %112 : vector<128x64xf32>
    %114 = arith.truncf %113 : vector<128x64xf32> to vector<128x64xbf16>
    %c1_40 = arith.constant 1 : index
    %c0_41 = arith.constant 0 : index
    %c0_42 = arith.constant 0 : index
    %115 = vector.load %arg4[%c1_40, %c0_41, %c0_42] : memref<2x64x2048xbf16, #tpu.memory_space<vmem>>, vector<1x64x2048xbf16>
    %116 = vector.shape_cast %115 : vector<1x64x2048xbf16> to vector<64x2048xbf16>
    %cst_43 = arith.constant dense<0.000000e+00> : vector<128x2048xf32>
    %117 = tpu.matmul %114, %116, %cst_43 {dimension_numbers = #tpu.dot_dimension_numbers<[1], [0], [0], [1], [0, 0, 1, 1], [], []>} : vector<128x64xbf16>, vector<64x2048xbf16>, vector<128x2048xf32> -> vector<128x2048xf32>
    %c1_44 = arith.constant 1 : index
    %c0_45 = arith.constant 0 : index
    %c0_46 = arith.constant 0 : index
    %118 = vector.load %arg5[%c1_44, %c0_45, %c0_46] : memref<2x1x2048xf32, #tpu.memory_space<vmem>>, vector<1x1x2048xf32>
    %119 = vector.shape_cast %118 : vector<1x1x2048xf32> to vector<1x2048xf32>
    %120 = vector.broadcast %119 : vector<1x2048xf32> to vector<128x2048xf32>
    %121 = arith.addf %117, %120 : vector<128x2048xf32>
    %cst_47 = arith.constant 0.000000e+00 : f32
    %122 = vector.broadcast %cst_47 : f32 to vector<128x2048xf32>
    %123 = arith.maximumf %121, %122 : vector<128x2048xf32>
    %124 = arith.truncf %123 : vector<128x2048xf32> to vector<128x2048xbf16>
    %c1_48 = arith.constant 1 : index
    %c0_49 = arith.constant 0 : index
    %c0_50 = arith.constant 0 : index
    %125 = vector.load %arg6[%c1_48, %c0_49, %c0_50] : memref<2x2048x64xbf16, #tpu.memory_space<vmem>>, vector<1x2048x64xbf16>
    %126 = vector.shape_cast %125 : vector<1x2048x64xbf16> to vector<2048x64xbf16>
    %cst_51 = arith.constant dense<0.000000e+00> : vector<128x64xf32>
    %127 = tpu.matmul %124, %126, %cst_51 {dimension_numbers = #tpu.dot_dimension_numbers<[1], [0], [0], [1], [0, 0, 1, 1], [], []>} : vector<128x2048xbf16>, vector<2048x64xbf16>, vector<128x64xf32> -> vector<128x64xf32>
    %128 = vector.broadcast %82 : vector<1x64xf32> to vector<128x64xf32>
    %129 = arith.addf %127, %128 : vector<128x64xf32>
    %130 = arith.addf %113, %129 : vector<128x64xf32>
    %cst_52 = arith.constant dense<0.000000e+00> : vector<128xf32>
    %131 = vector.multi_reduction <add>, %130, %cst_52 [1] : vector<128x64xf32> to vector<128xf32>
    %132 = vector.shape_cast %131 : vector<128xf32> to vector<128x1xf32>
    %cst_53 = arith.constant 6.400000e+01 : f32
    %133 = vector.broadcast %cst_53 : f32 to vector<128x1xf32>
    %134 = arith.divf %132, %133 : vector<128x1xf32>
    %135 = vector.broadcast %134 : vector<128x1xf32> to vector<128x64xf32>
    %136 = arith.subf %130, %135 : vector<128x64xf32>
    %137 = arith.mulf %136, %136 : vector<128x64xf32>
    %cst_54 = arith.constant dense<0.000000e+00> : vector<128xf32>
    %138 = vector.multi_reduction <add>, %137, %cst_54 [1] : vector<128x64xf32> to vector<128xf32>
    %139 = vector.shape_cast %138 : vector<128xf32> to vector<128x1xf32>
    %cst_55 = arith.constant 6.400000e+01 : f32
    %140 = vector.broadcast %cst_55 : f32 to vector<128x1xf32>
    %141 = arith.divf %139, %140 : vector<128x1xf32>
    %142 = vector.broadcast %134 : vector<128x1xf32> to vector<128x64xf32>
    %143 = arith.subf %130, %142 : vector<128x64xf32>
    %cst_56 = arith.constant 9.99999974E-6 : f32
    %144 = vector.broadcast %cst_56 : f32 to vector<128x1xf32>
    %145 = arith.addf %141, %144 : vector<128x1xf32>
    %146 = math.rsqrt %145 : vector<128x1xf32>
    %147 = vector.broadcast %146 : vector<128x1xf32> to vector<128x64xf32>
    %148 = arith.mulf %143, %147 : vector<128x64xf32>
    %149 = vector.broadcast %83 : vector<1x64xf32> to vector<128x64xf32>
    %150 = arith.mulf %148, %149 : vector<128x64xf32>
    %151 = vector.broadcast %84 : vector<1x64xf32> to vector<128x64xf32>
    %152 = arith.addf %150, %151 : vector<128x64xf32>
    %153 = arith.truncf %152 : vector<128x64xf32> to vector<128x64xbf16>
    %c0_57 = arith.constant 0 : index
    %c0_58 = arith.constant 0 : index
    %154 = vector.load %arg7[%c0_57, %c0_58] : memref<64x128xbf16, #tpu.memory_space<vmem>>, vector<64x128xbf16>
    %cst_59 = arith.constant dense<0.000000e+00> : vector<128x128xf32>
    %155 = tpu.matmul %153, %154, %cst_59 {dimension_numbers = #tpu.dot_dimension_numbers<[1], [0], [0], [1], [0, 0, 1, 1], [], []>} : vector<128x64xbf16>, vector<64x128xbf16>, vector<128x128xf32> -> vector<128x128xf32>
    %c0_60 = arith.constant 0 : index
    %c0_61 = arith.constant 0 : index
    %156 = vector.load %arg8[%c0_60, %c0_61] : memref<1x128xf32, #tpu.memory_space<vmem>>, vector<1x128xf32>
    %157 = vector.broadcast %156 : vector<1x128xf32> to vector<128x128xf32>
    %158 = arith.addf %155, %157 : vector<128x128xf32>
    %c0_62 = arith.constant 0 : index
    %c0_63 = arith.constant 0 : index
    %159 = vector.load %arg9[%c0_62, %c0_63] : memref<128x128xf32, #tpu.memory_space<vmem>>, vector<128x128xf32>
    tpu.vector_store %arg9[%c0_62, %c0_63], %158 {strides = array<i32>} : memref<128x128xf32, #tpu.memory_space<vmem>>, vector<128x128xf32>,
    return
  }
  func.func @transform_0(%arg0: i32) -> (i32, i32) {
    %c0_i32 = arith.constant 0 : i32
    %c0_i32_0 = arith.constant 0 : i32
    return %arg0, %c0_i32 : i32, i32
  }
  func.func @transform_1(%arg0: i32) -> (i32, i32, i32) {
    %c0_i32 = arith.constant 0 : i32
    %c0_i32_0 = arith.constant 0 : i32
    %c0_i32_1 = arith.constant 0 : i32
    %c0_i32_2 = arith.constant 0 : i32
    return %c0_i32, %c0_i32_0, %c0_i32_1 : i32, i32, i32
  }
  func.func @transform_2(%arg0: i32) -> (i32, i32, i32) {
    %c0_i32 = arith.constant 0 : i32
    %c0_i32_0 = arith.constant 0 : i32
    %c0_i32_1 = arith.constant 0 : i32
    %c0_i32_2 = arith.constant 0 : i32
    return %c0_i32, %c0_i32_0, %c0_i32_1 : i32, i32, i32
  }
  func.func @transform_3(%arg0: i32) -> (i32, i32, i32) {
    %c0_i32 = arith.constant 0 : i32
    %c0_i32_0 = arith.constant 0 : i32
    %c0_i32_1 = arith.constant 0 : i32
    %c0_i32_2 = arith.constant 0 : i32
    return %c0_i32, %c0_i32_0, %c0_i32_1 : i32, i32, i32
  }
  func.func @transform_4(%arg0: i32) -> (i32, i32, i32) {
    %c0_i32 = arith.constant 0 : i32
    %c0_i32_0 = arith.constant 0 : i32
    %c0_i32_1 = arith.constant 0 : i32
    %c0_i32_2 = arith.constant 0 : i32
    return %c0_i32, %c0_i32_0, %c0_i32_1 : i32, i32, i32
  }
  func.func @transform_5(%arg0: i32) -> (i32, i32, i32) {
    %c0_i32 = arith.constant 0 : i32
    %c0_i32_0 = arith.constant 0 : i32
    %c0_i32_1 = arith.constant 0 : i32
    %c0_i32_2 = arith.constant 0 : i32
    return %c0_i32, %c0_i32_0, %c0_i32_1 : i32, i32, i32
  }
  func.func @transform_6(%arg0: i32) -> (i32, i32) {
    %c0_i32 = arith.constant 0 : i32
    %c0_i32_0 = arith.constant 0 : i32
    %c0_i32_1 = arith.constant 0 : i32
    return %c0_i32, %c0_i32_0 : i32, i32
  }
  func.func @transform_7(%arg0: i32) -> (i32, i32) {
    %c0_i32 = arith.constant 0 : i32
    %c0_i32_0 = arith.constant 0 : i32
    %c0_i32_1 = arith.constant 0 : i32
    return %c0_i32, %c0_i32_0 : i32, i32
  }
  func.func @transform_8(%arg0: i32) -> (i32, i32) {
    %c0_i32 = arith.constant 0 : i32
    %c0_i32_0 = arith.constant 0 : i32
    return %arg0, %c0_i32 : i32, i32
  }
}

</mosaic_0001>

<bundles_post_ra>
// kernel: _lambda_.1
= control target key start
LH: loop header
LB: loop body
LE: loop exit
PB: predicated region body
PF: predicated region fallthrough
CT: control target
= control target key end

     0   :  { %s11655_s27 = smov 0   ;;  %s16340_s0 = inlined_call_operand.vmem [shape: f32[256,64], index: 0, kind: input, shape index: {}]   ;;  %s16341_s1 = inlined_call_operand.vmem [shape: bf16[2,64,64], index: 1, kind: input, shape index: {}]   ;;  %s16342_s2 = inlined_call_operand.vmem [shape: f32[2,8,64], index: 2, kind: input, shape index: {}]   ;;  %s16343_s3 = inlined_call_operand.vmem [shape: bf16[2,64,2048], index: 3, kind: input, shape index: {}]   ;;  %s16344_s4 = inlined_call_operand.vmem [shape: f32[2,1,2048], index: 4, kind: input, shape index: {}]   ;;  %s16345_s5 = inlined_call_operand.vmem [shape: bf16[2,2048,64], index: 5, kind: input, shape index: {}]   ;;  %s16346_s6 = inlined_call_operand.vmem [shape: bf16[64,128], index: 6, kind: input, shape index: {}]   ;;  %s16347_s7 = inlined_call_operand.vmem [shape: f32[1,128], index: 7, kind: input, shape index: {}]   ;;  %s16348_s8 = inlined_call_operand.vmem [shape: f32[256,128], index: 8, kind: output, shape index: {}]  }
   0x1 LB: > { %s9145_s28 = sadd.s32 4294967295, %s11607_s27   ;;  %p9149_p0 = scmp.ge.s32.totalorder %s11607_s27, 1  ;;  %s11607_s27 = sphi %s11655_s27, %s18_s27  }
   0x2   : > { %p263_p1 = scmp.lt.s32.totalorder %s11607_s27, 3 }
   0x4   : > { %p264_p2 = pnand %p9149_p0, %p263_p1 }
   0x6   : > { %267 = sbr.rel (%p264_p2) target bundleno = 3354 (0xd1a), region = 52 }
   0xd   : > { %v11185_v0 = vld [vmem:[%s16341_s1] sm:$0xff]   ;;  %s9150_s9 = sshll.u32 %s9145_s28, 4  ;;  %v11186_v1 = vld [vmem:[%s16341_s1 + $0x8] sm:$0xff]   ;;  %v11187_v2 = vld [vmem:[%s16341_s1 + $0x10] sm:$0xff]   ;;  %vm371_vm0 = vcmask 523264   ;;  %v343_v28 = vlaneseq }
   0xe   : > { %p298_p3 = scmp.lt.s32.totalorder %s9150_s9, 31  ;;  %11096 = vmatprep.subr.bf16.mxu0 %v11185_v0  ;;  %11168 = vmatprep.subr.bf16.mxu1 %v11185_v0  ;;  %v11188_v5 = vld [vmem:[%s16341_s1 + $0x18] sm:$0xff]   ;;  %v11717_v31 = vld [vmem:[%s16342_s2] sm:$0xff] }
   0xf   : > { %11097 = vmatpush3.bf16.msra.mxu0 %v11185_v0  ;;  %11172 = vmatpush3.bf16.msra.mxu1 %v11185_v0  ;;  %v11709_v29 = vshrl.u32 %v343_v28, 7 }
  0x10   : > { %s16384_s9 = smov (!%p298_p3, %s9150_s9), 31  ;;  %11098 = vmatprep.subr.bf16.mxu0 %v11186_v1  ;;  %11169 = vmatprep.subr.bf16.mxu1 %v11186_v1 }
  0x11   : > { %s9151_s14 = sshll.u32 %s16384_s9, 3  ;;  %v11712_v30 = vsub.s32 0, %v11709_v29 }
  0x12   : > { %s11680_s17 = scalar_lea.vmem %s16340_s0, %s9151_s14  ;;  %s16319_s10 = scalar_lea.vmem %s16348_s8, %s9151_s14 }
  0x13   : > { %11099 = vmatpush3.bf16.msra.mxu0 %v11186_v1  ;;  %v310_v3 = vld [vmem:[%s11680_s17] sm:$0xff]  ;;  %v311_v4 = vld [vmem:[%s11680_s17 + $0x8] sm:$0xff]  ;;  %11173 = vmatpush3.bf16.msra.mxu1 %v11186_v1  ;;  %v312_v7 = vld [vmem:[%s11680_s17 + $0x10] sm:$0xff]  ;;  %v11721_v32 = vrot.slane %v11717_v31, %v11712_v30 }
  0x14   : > { %11100 = vmatprep.subr.bf16.mxu0 %v11187_v2  ;;  %v327_v6 = vpack.c.bf16 %v311_v4, %v310_v3  ;;  %11170 = vmatprep.subr.bf16.mxu1 %v11187_v2  ;;  %v313_v8 = vld [vmem:[%s11680_s17 + $0x18] sm:$0xff]  ;;  %v318_v9 = vld [vmem:[%s11680_s17 + $0x40] sm:$0xff]  ;;  %v315_v11 = vld [vmem:[%s11680_s17 + $0x28] sm:$0xff] }
  0x15   : > { %v314_v10 = vld [vmem:[%s11680_s17 + $0x20] sm:$0xff]  ;;  %v319_v12 = vld [vmem:[%s11680_s17 + $0x48] sm:$0xff]  ;;  %v320_v14 = vld [vmem:[%s11680_s17 + $0x50] sm:$0xff]  ;;  %v328_v18 = vpack.c.bf16 %v313_v8, %v312_v7 }
  0x16   : > { %11104 = vmatprep.mubr.msk.bf16.mxu0 %vm371_vm0, %v327_v6  ;;  %v331_v13 = vpack.c.bf16 %v319_v12, %v318_v9  ;;  %v321_v15 = vld [vmem:[%s11680_s17 + $0x58] sm:$0xff]  ;;  %v322_v16 = vld [vmem:[%s11680_s17 + $0x60] sm:$0xff]  ;;  %v323_v17 = vld [vmem:[%s11680_s17 + $0x68] sm:$0xff]  ;;  %v329_v20 = vpack.c.bf16 %v315_v11, %v314_v10 }
  0x17   : > { %11101 = vmatpush3.bf16.msra.mxu0 %v11187_v2  ;;  %11174 = vmatpush3.bf16.msra.mxu1 %v11187_v2  ;;  %v332_v19 = vpack.c.bf16 %v321_v15, %v320_v14  ;;  %v333_v21 = vpack.c.bf16 %v323_v17, %v322_v16  ;;  %v316_v22 = vld [vmem:[%s11680_s17 + $0x30] sm:$0xff]  ;;  %v317_v23 = vld [vmem:[%s11680_s17 + $0x38] sm:$0xff]  ;;  %v11582_v47 = vld [vmem:[%s11680_s17] sm:$0xff] }
  0x18   : > { %11102 = vmatprep.subr.bf16.mxu0 %v11188_v5  ;;  %11171 = vmatprep.subr.bf16.mxu1 %v11188_v5  ;;  %v324_v24 = vld [vmem:[%s11680_s17 + $0x70] sm:$0xff]  ;;  %v325_v25 = vld [vmem:[%s11680_s17 + $0x78] sm:$0xff]  ;;  %v330_v26 = vpack.c.bf16 %v317_v23, %v316_v22  ;;  %v11584_v53 = vld [vmem:[%s11680_s17 + $0x8] sm:$0xff] }
  0x19   : > { %11112 = vmatprep.mubr.msk.bf16.mxu1 %vm371_vm0, %v331_v13  ;;  %v334_v27 = vpack.c.bf16 %v325_v25, %v324_v24  ;;  %v11581_v43 = vld [vmem:[%s11680_s17 + $0x10] sm:$0xff]  ;;  %v11583_v50 = vld [vmem:[%s11680_s17 + $0x18] sm:$0xff]  ;;  %v11587_v11 = vld [vmem:[%s11680_s17 + $0x28] sm:$0xff] }
  0x1a   : > { %v11586_v8 = vld [vmem:[%s11680_s17 + $0x30] sm:$0xff]  ;;  %v11588_v14 = vld [vmem:[%s11680_s17 + $0x38] sm:$0xff]  ;;  %v11590_v23 = vld [vmem:[%s11680_s17 + $0x48] sm:$0xff] }
  0x1b   : > { %11103 = vmatpush3.bf16.msra.mxu0 %v11188_v5  ;;  %11175 = vmatpush3.bf16.msra.mxu1 %v11188_v5  ;;  %v11585_v5 = vld [vmem:[%s11680_s17 + $0x20] sm:$0xff] }
  0x1e   : > { %11105 = vmatmul.mubr.msk.bf16.vlgmr.msra.gmra.mrb[0].mxu0 %vm371_vm0, %v328_v18  ;;  %11113 = vmatmul.mubr.msk.bf16.vlgmr.msra.gmra.mrb[0].mxu1 %vm371_vm0, %v332_v19  ;;  %v11589_v19 = vld [vmem:[%s11680_s17 + $0x40] sm:$0xff] }
  0x1f   : > { %11108 = vmatprep.mubr.msk.bf16.mxu0 %vm371_vm0, %v329_v20  ;;  %11116 = vmatprep.mubr.msk.bf16.mxu1 %vm371_vm0, %v333_v21 }
  0x26   : > { %11109 = vmatmul.mubr.msk.bf16.gmra.mrb[4].mxu0 %vm371_vm0, %v330_v26  ;;  %11117 = vmatmul.mubr.msk.bf16.gmra.mrb[4].mxu1 %vm371_vm0, %v334_v27  ;;  %v11591_v27 = vld [vmem:[%s11680_s17 + $0x50] sm:$0xff] }
  0xf1   : > { %v11106_v33 = vpop.f32.mrb[0].mxu0  ;;  %v11114_v34 = vpop.f32.mrb[0].mxu1 }
  0xf2   : > { %v439_v35 = vadd.f32 %v11106_v33, %v11721_v32  ;;  %v430_v36 = vpop.f32.mrb[1].mxu0  ;;  %v462_v37 = vpop.f32.mrb[1].mxu1  ;;  %v471_v16 = vadd.f32 %v11114_v34, %v11721_v32 }
  0xf3   : > { %v431_v38 = vadd.f32 %v430_v36, %v11721_v32  ;;  %v11107_v39 = vpop.f32.mrb[2].mxu0  ;;  %v11115_v40 = vpop.f32.mrb[2].mxu1  ;;  %v463_v7 = vadd.f32 %v462_v37, %v11721_v32 }
  0xf4   : > { %v442_v41 = vadd.f32 %v11107_v39, %v11721_v32  ;;  %v433_v42 = vpop.f32.mrb[3].mxu0  ;;  %v11727_v44 = vadd.f32 %v11581_v43, %v439_v35  ;;  %v465_v45 = vpop.f32.mrb[3].mxu1  ;;  %v474_v21 = vadd.f32 %v11115_v40, %v11721_v32  ;;  %v11785_v28 = vadd.f32 %v11591_v27, %v471_v16  ;;  %v11592_v35 = vld [vmem:[%s11680_s17 + $0x58] sm:$0xff]  ;;  %v11593_v39 = vld [vmem:[%s11680_s17 + $0x60] sm:$0xff]  ;;  %v11594_v43 = vld [vmem:[%s11680_s17 + $0x68] sm:$0xff] }
  0xf5   : > { %v434_v46 = vadd.f32 %v433_v42, %v11721_v32  ;;  %v11731_v48 = vadd.f32 %v11582_v47, %v431_v38  ;;  %v466_v13 = vadd.f32 %v465_v45, %v11721_v32  ;;  %v11773_v20 = vadd.f32 %v11589_v19, %v463_v7  ;;  %v11595_v47 = vld [vmem:[%s11680_s17 + $0x70] sm:$0xff] }
  0xf6   : > { %v515_v49 = vsel %vm371_vm0, %v11727_v44, 0.0  ;;  %v11736_v51 = vadd.f32 %v11583_v50, %v442_v41  ;;  %v11791_v36 = vadd.f32 %v11592_v35, %v474_v21  ;;  %v539_v38 = vsel %vm371_vm0, %v11785_v28, 0.0 }
  0xf7   : > { %516 = vadd.xlane.f32.xlu1 %v515_v49  ;;  %v509_v52 = vsel %vm371_vm0, %v11731_v48, 0.0  ;;  %v11741_v54 = vadd.f32 %v11584_v53, %v434_v46  ;;  %v11779_v24 = vadd.f32 %v11590_v23, %v466_v13  ;;  %v533_v25 = vsel %vm371_vm0, %v11773_v20, 0.0 }
  0xf8   : > { %510 = vadd.xlane.f32.xlu0 %v509_v52  ;;  %v518_v59 = vsel %vm371_vm0, %v11736_v51, 0.0  ;;  %v542_v42 = vsel %vm371_vm0, %v11791_v36, 0.0  ;;  %v11596_v52 = vld [vmem:[%s11680_s17 + $0x78] sm:$0xff] }
  0xf9   : > { %v11110_v55 = vpop.f32.mrb[4].mxu0  ;;  %v11118_v56 = vpop.f32.mrb[4].mxu1  ;;  %v512_v63 = vsel %vm371_vm0, %v11741_v54, 0.0  ;;  %v536_v33 = vsel %vm371_vm0, %v11779_v24, 0.0 }
  0xfa   : > { %v455_v57 = vadd.f32 %v11110_v55, %v11721_v32  ;;  %v446_v58 = vpop.f32.mrb[5].mxu0  ;;  %v478_v60 = vpop.f32.mrb[5].mxu1  ;;  %v487_v37 = vadd.f32 %v11118_v56, %v11721_v32 }
  0xfb   : > { %v447_v61 = vadd.f32 %v446_v58, %v11721_v32  ;;  %519 = vadd.xlane.f32.xlu1 %v518_v59  ;;  %v11111_v62 = vpop.f32.mrb[6].mxu0  ;;  %v11119_v0 = vpop.f32.mrb[6].mxu1  ;;  %v479_v26 = vadd.f32 %v478_v60, %v11721_v32 }
  0xfc   : > { %v458_v1 = vadd.f32 %v11111_v62, %v11721_v32  ;;  %v449_v2 = vpop.f32.mrb[7].mxu0  ;;  %513 = vadd.xlane.f32.xlu0 %v512_v63  ;;  %v481_v3 = vpop.f32.mrb[7].mxu1  ;;  %v11756_v9 = vadd.f32 %v11586_v8, %v455_v57  ;;  %v490_v41 = vadd.f32 %v11119_v0, %v11721_v32  ;;  %v11808_v49 = vadd.f32 %v11595_v47, %v487_v37 }
  0xfd   : > { %v450_v4 = vadd.f32 %v449_v2, %v11721_v32  ;;  %v11752_v6 = vadd.f32 %v11585_v5, %v447_v61  ;;  %v482_v34 = vadd.f32 %v481_v3, %v11721_v32  ;;  %v11797_v40 = vadd.f32 %v11593_v39, %v479_v26 }
  0xfe   : > { %v11765_v15 = vadd.f32 %v11588_v14, %v458_v1  ;;  %v527_v18 = vsel %vm371_vm0, %v11756_v9, 0.0  ;;  %v11813_v53 = vadd.f32 %v11596_v52, %v490_v41  ;;  %v551_v32 = vsel %vm371_vm0, %v11808_v49, 0.0 }
  0xff   : > { %v521_v10 = vsel %vm371_vm0, %v11752_v6, 0.0  ;;  %v11761_v12 = vadd.f32 %v11587_v11, %v450_v4  ;;  %v11803_v45 = vadd.f32 %v11594_v43, %v482_v34  ;;  %v545_v46 = vsel %vm371_vm0, %v11797_v40, 0.0 }
 0x100   : > { %522 = vadd.xlane.f32.xlu0 %v521_v10  ;;  %v530_v22 = vsel %vm371_vm0, %v11765_v15, 0.0  ;;  %v554_v55 = vsel %vm371_vm0, %v11813_v53, 0.0 }
 0x101   : > { %v524_v17 = vsel %vm371_vm0, %v11761_v12, 0.0  ;;  %v548_v50 = vsel %vm371_vm0, %v11803_v45, 0.0 }
 0x102   : > { %525 = vadd.xlane.f32.xlu1 %v524_v17 }
 0x104   : > { %528 = vadd.xlane.f32.xlu0 %v527_v18 }
 0x106   : > { %531 = vadd.xlane.f32.xlu1 %v530_v22 }
 0x108   : > { %534 = vadd.xlane.f32.xlu0 %v533_v25 }
 0x10a   : > { %537 = vadd.xlane.f32.xlu1 %v536_v33 }
 0x10c   : > { %540 = vadd.xlane.f32.xlu0 %v539_v38 }
 0x10e   : > { %543 = vadd.xlane.f32.xlu1 %v542_v42 }
 0x110   : > { %546 = vadd.xlane.f32.xlu0 %v545_v46 }
 0x112   : > { %549 = vadd.xlane.f32.xlu1 %v548_v50 }
 0x114   : > { %552 = vadd.xlane.f32.xlu0 %v551_v32 }
 0x116   : > { %555 = vadd.xlane.f32.xlu1 %v554_v55 }
 0x184   : > { %v517_v56 = vpop.xlane.xlu1 %516 }
 0x185   : > { %v560_v57 = vmul.f32 0.015625, %v517_v56  ;;  %v511_v58 = vpop.xlane.xlu0 %510 }
 0x186   : > { %v558_v59 = vmul.f32 0.015625, %v511_v58 }
 0x187   : > { %v11820_v60 = vsub.f32 %v11727_v44, %v560_v57 }
 0x188   : > { %v11823_v61 = vsub.f32 %v11731_v48, %v558_v59  ;;  %v520_v62 = vpop.xlane.xlu1 %519 }
 0x189   : > { %v561_v63 = vmul.f32 0.015625, %v520_v62  ;;  %v514_v0 = vpop.xlane.xlu0 %513  ;;  %v592_v44 = vmul.f32 %v11820_v60, %v11820_v60 }
 0x18a   : > { %v559_v1 = vmul.f32 0.015625, %v514_v0  ;;  %v590_v2 = vmul.f32 %v11823_v61, %v11823_v61 }
 0x18b   : > { %v11828_v3 = vsub.f32 %v11736_v51, %v561_v63  ;;  %v612_v13 = vsel %vm371_vm0, %v592_v44, 0.0 }
 0x18c   : > { %v11831_v4 = vsub.f32 %v11741_v54, %v559_v1  ;;  %v606_v5 = vsel %vm371_vm0, %v590_v2, 0.0 }
 0x18d   : > { %607 = vadd.xlane.f32.xlu0 %v606_v5  ;;  %v523_v48 = vpop.xlane.xlu0 %522  ;;  %v593_v11 = vmul.f32 %v11828_v3, %v11828_v3 }
 0x18e   : > { %v562_v7 = vmul.f32 0.015625, %v523_v48  ;;  %v591_v8 = vmul.f32 %v11831_v4, %v11831_v4 }
 0x18f   : > { %v526_v10 = vpop.xlane.xlu1 %525  ;;  %v615_v22 = vsel %vm371_vm0, %v593_v11, 0.0 }
 0x190   : > { %v11841_v51 = vsub.f32 %v11752_v6, %v562_v7  ;;  %v563_v54 = vmul.f32 0.015625, %v526_v10  ;;  %v609_v14 = vsel %vm371_vm0, %v591_v8, 0.0 }
 0x191   : > { %613 = vadd.xlane.f32.xlu0 %v612_v13  ;;  %610 = vadd.xlane.f32.xlu1 %v609_v14  ;;  %v529_v16 = vpop.xlane.xlu0 %528  ;;  %v767_v13 = vld [vmem:[%s16343_s3 + $0x8] sm:$0xff] }
 0x192   : > { %v11846_v17 = vsub.f32 %v11761_v12, %v563_v54  ;;  %v564_v18 = vmul.f32 0.015625, %v529_v16  ;;  %v594_v19 = vmul.f32 %v11841_v51, %v11841_v51  ;;  %v774_v54 = vld [vmem:[%s16343_s3 + $0x40] sm:$0xff]  ;;  %v775_v14 = vld [vmem:[%s16343_s3 + $0x48] sm:$0xff] }
 0x193   : > { %v532_v21 = vpop.xlane.xlu1 %531 }
 0x194   : > { %v11852_v6 = vsub.f32 %v11756_v9, %v564_v18  ;;  %v565_v23 = vmul.f32 0.015625, %v532_v21  ;;  %v618_v25 = vsel %vm371_vm0, %v594_v19, 0.0  ;;  %v595_v26 = vmul.f32 %v11846_v17, %v11846_v17 }
 0x195   : > { %616 = vadd.xlane.f32.xlu1 %v615_v22  ;;  %619 = vadd.xlane.f32.xlu0 %v618_v25  ;;  %v535_v12 = vpop.xlane.xlu0 %534  ;;  %v9168_v21 = vcombine.low %v767_v13, %v775_v14  ;;  %v9169_v22 = vcombine.high %v767_v13, %v775_v14 }
 0x196   : > { %v11858_v27 = vsub.f32 %v11765_v15, %v565_v23  ;;  %v566_v33 = vmul.f32 0.015625, %v535_v12  ;;  %v596_v34 = vmul.f32 %v11852_v6, %v11852_v6  ;;  %v621_v9 = vsel %vm371_vm0, %v595_v26, 0.0  ;;  %v790_v12 = vld [vmem:[%s16343_s3 + $0xc0] sm:$0xff] }
 0x197   : > { %v538_v35 = vpop.xlane.xlu1 %537  ;;  %1371 = vmatprep.subr.bf16.mxu0 %v9169_v22 }
 0x198   : > { %v11864_v37 = vsub.f32 %v11773_v20, %v566_v33  ;;  %v567_v38 = vmul.f32 0.015625, %v538_v35  ;;  %v624_v39 = vsel %vm371_vm0, %v596_v34, 0.0  ;;  %v597_v41 = vmul.f32 %v11858_v27, %v11858_v27  ;;  %v783_v33 = vld [vmem:[%s16343_s3 + $0x88] sm:$0xff]  ;;  %1372 = vmatpush1.bf16.msra.mxu0 %v9168_v21 }
 0x199   : > { %622 = vadd.xlane.f32.xlu1 %v621_v9  ;;  %625 = vadd.xlane.f32.xlu0 %v624_v39  ;;  %v541_v15 = vpop.xlane.xlu0 %540  ;;  %v791_v35 = vld [vmem:[%s16343_s3 + $0xc8] sm:$0xff] }
 0x19a   : > { %v11870_v42 = vsub.f32 %v11779_v24, %v567_v38  ;;  %v568_v43 = vmul.f32 0.015625, %v541_v15  ;;  %v598_v46 = vmul.f32 %v11864_v37, %v11864_v37  ;;  %v627_v20 = vsel %vm371_vm0, %v597_v41, 0.0  ;;  %v798_v15 = vld [vmem:[%s16343_s3 + $0x100] sm:$0xff] }
 0x19b   : > { %v544_v47 = vpop.xlane.xlu1 %543  ;;  %v9185_v38 = vcombine.high %v783_v33, %v791_v35  ;;  %v9184_v39 = vcombine.low %v783_v33, %v791_v35 }
 0x19c   : > { %v11876_v50 = vsub.f32 %v11785_v28, %v568_v43  ;;  %v569_v52 = vmul.f32 0.015625, %v544_v47  ;;  %v630_v32 = vsel %vm371_vm0, %v598_v46, 0.0  ;;  %v599_v55 = vmul.f32 %v11870_v42, %v11870_v42  ;;  %v806_v43 = vld [vmem:[%s16343_s3 + $0x140] sm:$0xff]  ;;  %v799_v46 = vld [vmem:[%s16343_s3 + $0x108] sm:$0xff] }
 0x19d   : > { %628 = vadd.xlane.f32.xlu1 %v627_v20  ;;  %631 = vadd.xlane.f32.xlu0 %v630_v32  ;;  %v547_v24 = vpop.xlane.xlu0 %546  ;;  %v9199_v47 = vcombine.high %v798_v15, %v806_v43  ;;  %v807_v20 = vld [vmem:[%s16343_s3 + $0x148] sm:$0xff] }
 0x19e   : > { %v11882_v56 = vsub.f32 %v11791_v36, %v569_v52  ;;  %v570_v57 = vmul.f32 0.015625, %v547_v24  ;;  %v600_v58 = vmul.f32 %v11876_v50, %v11876_v50  ;;  %v633_v28 = vsel %vm371_vm0, %v599_v55, 0.0  ;;  %1373 = vmatprep.subr.bf16.mxu0 %v9185_v38  ;;  %v814_v24 = vld [vmem:[%s16343_s3 + $0x180] sm:$0xff] }
 0x19f   : > { %v550_v59 = vpop.xlane.xlu1 %549  ;;  %v9198_v52 = vcombine.low %v798_v15, %v806_v43  ;;  %v9201_v32 = vcombine.high %v799_v46, %v807_v20  ;;  %1374 = vmatpush1.bf16.msra.mxu0 %v9184_v39  ;;  %v9200_v55 = vcombine.low %v799_v46, %v807_v20  ;;  %v12001_v43 = vsub.s32 2, %v11709_v29 }
 0x1a0   : > { %v11888_v62 = vsub.f32 %v11797_v40, %v570_v57  ;;  %v571_v63 = vmul.f32 0.015625, %v550_v59  ;;  %v636_v0 = vsel %vm371_vm0, %v600_v58, 0.0  ;;  %v601_v1 = vmul.f32 %v11882_v56, %v11882_v56  ;;  %v822_v57 = vld [vmem:[%s16343_s3 + $0x1c0] sm:$0xff]  ;;  %v815_v58 = vld [vmem:[%s16343_s3 + $0x188] sm:$0xff] }
 0x1a1   : > { %634 = vadd.xlane.f32.xlu1 %v633_v28  ;;  %637 = vadd.xlane.f32.xlu0 %v636_v0  ;;  %v553_v36 = vpop.xlane.xlu0 %552  ;;  %v9215_v59 = vcombine.high %v814_v24, %v822_v57  ;;  %v823_v28 = vld [vmem:[%s16343_s3 + $0x1c8] sm:$0xff]  ;;  %16362 = vst [vmem:[#allocation2_spill] sm:$0xff] %v12001_v43 }
 0x1a2   : > { %v11894_v2 = vsub.f32 %v11803_v45, %v571_v63  ;;  %v572_v5 = vmul.f32 0.015625, %v553_v36  ;;  %v602_v44 = vmul.f32 %v11888_v62, %v11888_v62  ;;  %v639_v40 = vsel %vm371_vm0, %v601_v1, 0.0  ;;  %v766_v45 = vld [vmem:[%s16343_s3] sm:$0xff]  ;;  %1375 = vmatprep.subr.bf16.mxu0 %v9201_v32 }
 0x1a3   : > { %v556_v48 = vpop.xlane.xlu1 %555  ;;  %v9166_v19 = vcombine.low %v766_v45, %v774_v54  ;;  %v9214_v63 = vcombine.low %v814_v24, %v822_v57  ;;  %v9217_v0 = vcombine.high %v815_v58, %v823_v28  ;;  %1376 = vmatpush1.bf16.msra.mxu0 %v9200_v55  ;;  %v9216_v1 = vcombine.low %v815_v58, %v823_v28 }
 0x1a4   : > { %v11900_v7 = vsub.f32 %v11808_v49, %v572_v5  ;;  %v573_v8 = vmul.f32 0.015625, %v556_v48  ;;  %v642_v10 = vsel %vm371_vm0, %v602_v44, 0.0  ;;  %v603_v11 = vmul.f32 %v11894_v2, %v11894_v2  ;;  %v11968_v5 = vld [vmem:[%s16343_s3 + $0x10] sm:$0xff] }
 0x1a5   : > { %640 = vadd.xlane.f32.xlu1 %v639_v40  ;;  %643 = vadd.xlane.f32.xlu0 %v642_v10  ;;  %v9167_v49 = vcombine.high %v766_v45, %v774_v54  ;;  %v16349_v36 = vmov 0   ;;  %v11973_v44 = vld [vmem:[%s16343_s3 + $0x50] sm:$0xff]  ;;  %v11987_v10 = vld [vmem:[%s16343_s3 + $0x58] sm:$0xff]  ;;  %v12006_v24 = vrot.slane %v11717_v31, %v12001_v43 }
 0x1a6   : > { %v11918_v16 = vsub.f32 %v11813_v53, %v573_v8  ;;  %v604_v18 = vmul.f32 %v11900_v7, %v11900_v7  ;;  %v645_v23 = vsel %vm371_vm0, %v603_v11, 0.0  ;;  %v782_v53 = vld [vmem:[%s16343_s3 + $0x80] sm:$0xff]  ;;  %1377 = vmatprep.subr.bf16.mxu0 %v9217_v0  ;;  %1290 = vmatprep.mubr.bf16.mxu1 %v16349_v36  ;;  %v9170_v48 = vcombine.low %v11968_v5, %v11973_v44  ;;  %v11982_v8 = vld [vmem:[%s16343_s3 + $0x18] sm:$0xff] }
 0x1a7   : > { %1258 = vmatprep.subr.bf16.mxu1 %v9167_v49  ;;  %v9183_v34 = vcombine.high %v782_v53, %v790_v12  ;;  %v9182_v9 = vcombine.low %v782_v53, %v790_v12  ;;  %1403 = vmatprep.mubr.bf16.mxu0 %v16349_v36  ;;  %v9171_v40 = vcombine.high %v11968_v5, %v11973_v44 }
 0x1a8   : > { %v648_v25 = vsel %vm371_vm0, %v604_v18, 0.0  ;;  %v605_v26 = vmul.f32 %v11918_v16, %v11918_v16  ;;  %1259 = vmatpush1.bf16.msra.mxu1 %v9166_v19  ;;  %1378 = vmatpush1.bf16.msra.mxu0 %v9216_v1  ;;  %v9172_v11 = vcombine.low %v11982_v8, %v11987_v10  ;;  %v9173_v45 = vcombine.high %v11982_v8, %v11987_v10 }
 0x1a9   : > { %646 = vadd.xlane.f32.xlu1 %v645_v23  ;;  %649 = vadd.xlane.f32.xlu0 %v648_v25 }
 0x1aa   : > { %1260 = vmatprep.subr.bf16.mxu1 %v9183_v34  ;;  %v651_v41 = vsel %vm371_vm0, %v605_v26, 0.0  ;;  %1597 = vmatprep.subr.bf16.mxu0 %v9173_v45  ;;  %v11994_v34 = vsub.s32 1, %v11709_v29 }
 0x1ac   : > { %1261 = vmatpush1.bf16.msra.mxu1 %v9182_v9  ;;  %v11998_v15 = vrot.slane %v11717_v31, %v11994_v34 }
 0x1ad   : > { %652 = vadd.xlane.f32.xlu1 %v651_v41  ;;  %1262 = vmatprep.subr.bf16.mxu1 %v9199_v47 }
 0x1b0   : > { %1263 = vmatpush1.bf16.msra.mxu1 %v9198_v52 }
 0x1b1   : > { %1264 = vmatprep.subr.bf16.mxu1 %v9215_v59 }
 0x1b4   : > { %1265 = vmatpush1.bf16.msra.mxu1 %v9214_v63 }
 0x1b5   : > { %1484 = vmatprep.subr.bf16.mxu1 %v9171_v40  ;;  %v784_v40 = vld [vmem:[%s16343_s3 + $0x90] sm:$0xff] }
 0x21a   : > { %v608_v54 = vpop.xlane.xlu0 %607 }
 0x21b   : > { %v654_v13 = vmul.f32 0.015625, %v608_v54 }
 0x21d   : > { %v670_v49 = vadd.f32 1e-05, %v654_v13 }
 0x21e   : > { %v611_v14 = vpop.xlane.xlu1 %610  ;;  %v614_v18 = vpop.xlane.xlu0 %613 }
 0x21f   : > { %11453 = vrsqrt.f32 %v670_v49  ;;  %v655_v19 = vmul.f32 0.015625, %v611_v14  ;;  %v656_v21 = vmul.f32 0.015625, %v614_v18  ;;  %v792_v49 = vld [vmem:[%s16343_s3 + $0xd0] sm:$0xff]  ;;  %v785_v14 = vld [vmem:[%s16343_s3 + $0x98] sm:$0xff] }
 0x220   : > { %v793_v18 = vld [vmem:[%s16343_s3 + $0xd8] sm:$0xff] }
 0x221   : > { %v671_v22 = vadd.f32 1e-05, %v655_v19  ;;  %v672_v23 = vadd.f32 1e-05, %v656_v21  ;;  %v12039_v21 = vld [vmem:[%s16343_s3 + $0x110] sm:$0xff] }
 0x222   : > { %v617_v25 = vpop.xlane.xlu1 %616  ;;  %v620_v26 = vpop.xlane.xlu0 %619 }
 0x223   : > { %11455 = vrsqrt.f32 %v671_v22  ;;  %v657_v53 = vmul.f32 0.015625, %v617_v25  ;;  %v658_v33 = vmul.f32 0.015625, %v620_v26  ;;  %v12044_v22 = vld [vmem:[%s16343_s3 + $0x150] sm:$0xff]  ;;  %v9187_v26 = vcombine.high %v784_v40, %v792_v49 }
 0x224   : > { %11457 = vrsqrt.f32 %v672_v23 }
 0x225   : > { %v673_v12 = vadd.f32 1e-05, %v657_v53  ;;  %v674_v39 = vadd.f32 1e-05, %v658_v33  ;;  %v9189_v53 = vcombine.high %v785_v14, %v793_v18  ;;  %v809_v33 = vld [vmem:[%s16343_s3 + $0x158] sm:$0xff] }
 0x226   : > { %v623_v35 = vpop.xlane.xlu1 %622  ;;  %v626_v47 = vpop.xlane.xlu0 %625 }
 0x227   : > { %11459 = vrsqrt.f32 %v673_v12  ;;  %v659_v9 = vmul.f32 0.015625, %v623_v35  ;;  %v660_v55 = vmul.f32 0.015625, %v626_v47  ;;  %v801_v12 = vld [vmem:[%s16343_s3 + $0x118] sm:$0xff] }
 0x228   : > { %v9205_v5 = vcombine.high %v801_v12, %v809_v33 }
 0x229   : > { %v11454_v38 = vpop.eup %11453  ;;  %v675_v41 = vadd.f32 1e-05, %v659_v9  ;;  %v676_v1 = vadd.f32 1e-05, %v660_v55  ;;  %v825_v55 = vld [vmem:[%s16343_s3 + $0x1d8] sm:$0xff] }
 0x22a   : > { %v702_v46 = vmul.f32 %v11454_v38, %v11823_v61  ;;  %v629_v20 = vpop.xlane.xlu1 %628  ;;  %v632_v13 = vpop.xlane.xlu0 %631 }
 0x22b   : > { %11461 = vrsqrt.f32 %v675_v41  ;;  %v661_v52 = vmul.f32 0.015625, %v629_v20  ;;  %v662_v25 = vmul.f32 0.015625, %v632_v13  ;;  %v9188_v41 = vcombine.low %v785_v14, %v793_v18  ;;  %v12112_v13 = vld [vmem:[%s16343_s3 + $0x28] sm:$0xff] }
 0x22c   : > { %11463 = vrsqrt.f32 %v674_v39  ;;  %v722_v57 = vmul.f32 %v11998_v15, %v702_v46  ;;  %v9186_v39 = vcombine.low %v784_v40, %v792_v49  ;;  %v9203_v46 = vcombine.high %v12039_v21, %v12044_v22  ;;  %v12097_v40 = vld [vmem:[%s16343_s3 + $0x20] sm:$0xff]  ;;  %v12117_v49 = vld [vmem:[%s16343_s3 + $0x68] sm:$0xff] }
 0x22d   : > { %v11456_v32 = vpop.eup %11455  ;;  %v677_v28 = vadd.f32 1e-05, %v661_v52  ;;  %v678_v44 = vadd.f32 1e-05, %v662_v25 }
 0x22e   : > { %v703_v58 = vmul.f32 %v11456_v32, %v11831_v4  ;;  %v11458_v59 = vpop.eup %11457  ;;  %v635_v61 = vpop.xlane.xlu1 %634  ;;  %v12015_v45 = vadd.f32 %v12006_v24, %v722_v57  ;;  %v817_v32 = vld [vmem:[%s16343_s3 + $0x198] sm:$0xff] }
 0x22f   : > { %v704_v54 = vmul.f32 %v11458_v59, %v11820_v60  ;;  %11465 = vrsqrt.f32 %v677_v28  ;;  %v663_v19 = vmul.f32 0.015625, %v635_v61  ;;  %v9204_v28 = vcombine.low %v801_v12, %v809_v33 }
 0x230   : > { %v723_v63 = vmul.f32 %v11998_v15, %v703_v58  ;;  %11467 = vrsqrt.f32 %v676_v1  ;;  %v9221_v1 = vcombine.high %v817_v32, %v825_v55 }
 0x231   : > { %v11460_v0 = vpop.eup %11459  ;;  %v724_v35 = vmul.f32 %v11998_v15, %v704_v54  ;;  %v679_v38 = vadd.f32 1e-05, %v663_v19 }
 0x232   : > { %v12018_v31 = vadd.f32 %v12006_v24, %v723_v63  ;;  %v705_v4 = vmul.f32 %v11460_v0, %v11828_v3  ;;  %v641_v52 = vpop.xlane.xlu1 %640 }
 0x233   : > { %v12075_v8 = vadd.f32 %v12006_v24, %v724_v35  ;;  %11469 = vrsqrt.f32 %v679_v38  ;;  %v665_v57 = vmul.f32 0.015625, %v641_v52 }
 0x234   : > { %v12033_v60 = vpack.c.bf16 %v12018_v31, %v12015_v45  ;;  %v725_v3 = vmul.f32 %v11998_v15, %v705_v4  ;;  %11471 = vrsqrt.f32 %v678_v44  ;;  %v12107_v4 = vld [vmem:[%s16343_s3 + $0x60] sm:$0xff] }
 0x235   : > { %v11462_v23 = vpop.eup %11461  ;;  %v681_v18 = vadd.f32 1e-05, %v665_v57 }
 0x236   : > { %9230 = vmatmul.mubr.msk.bf16.vlgmr.msra.gmra.mrb[8].mxu1 %vm371_vm0, %v12033_v60  ;;  %9238 = vmatmul.mubr.msk.bf16.vlgmr.msra.gmra.mrb[8].mxu0 %vm371_vm0, %v12033_v60  ;;  %v11464_v9 = vpop.eup %11463  ;;  %v12066_v47 = vadd.f32 %v12006_v24, %v725_v3  ;;  %v707_v20 = vmul.f32 %v11462_v23, %v11846_v17  ;;  %v824_v17 = vld [vmem:[%s16343_s3 + $0x1d0] sm:$0xff]  ;;  %v9220_v23 = vcombine.low %v817_v32, %v825_v55 }
 0x237   : > { %1485 = vmatpush1.bf16.msra.mxu1 %v9170_v48  ;;  %1598 = vmatpush1.bf16.msra.mxu0 %v9172_v11  ;;  %v816_v48 = vld [vmem:[%s16343_s3 + $0x190] sm:$0xff]  ;;  %v706_v10 = vmul.f32 %v11464_v9, %v11841_v51  ;;  %v638_v11 = vpop.xlane.xlu0 %637  ;;  %v9202_v51 = vcombine.low %v12039_v21, %v12044_v22  ;;  %v647_v22 = vpop.xlane.xlu1 %646  ;;  %11473 = vrsqrt.f32 %v681_v18 }
 0x238   : > { %1300 = vmatprep.mubr.bf16.mxu1 %v16349_v36  ;;  %1413 = vmatprep.mubr.bf16.mxu0 %v16349_v36  ;;  %v12091_v58 = vpack.c.bf16 %v12066_v47, %v12075_v8  ;;  %v727_v59 = vmul.f32 %v11998_v15, %v707_v20  ;;  %v664_v61 = vmul.f32 0.015625, %v638_v11  ;;  %v9219_v0 = vcombine.high %v816_v48, %v824_v17 }
 0x239   : > { %1486 = vmatprep.subr.bf16.mxu1 %v9187_v26  ;;  %1599 = vmatprep.subr.bf16.mxu0 %v9189_v53  ;;  %v11466_v63 = vpop.eup %11465  ;;  %v726_v54 = vmul.f32 %v11998_v15, %v706_v10  ;;  %v9218_v19 = vcombine.low %v816_v48, %v824_v17  ;;  %v9175_v26 = vcombine.high %v12097_v40, %v12107_v4 }
 0x23a   : > { %v11468_v14 = vpop.eup %11467  ;;  %v12122_v3 = vadd.f32 %v12006_v24, %v727_v59  ;;  %v709_v21 = vmul.f32 %v11466_v63, %v11858_v27  ;;  %v680_v25 = vadd.f32 1e-05, %v664_v61  ;;  %v9177_v53 = vcombine.high %v12112_v13, %v12117_v49 }
 0x23b   : > { %1487 = vmatpush1.bf16.msra.mxu1 %v9186_v39  ;;  %1600 = vmatpush1.bf16.msra.mxu0 %v9188_v41  ;;  %v12130_v12 = vadd.f32 %v12006_v24, %v726_v54  ;;  %v708_v33 = vmul.f32 %v11468_v14, %v11852_v6  ;;  %v644_v35 = vpop.xlane.xlu0 %643  ;;  %v667_v27 = vmul.f32 0.015625, %v647_v22  ;;  %v653_v44 = vpop.xlane.xlu1 %652 }
 0x23c   : > { %1488 = vmatprep.subr.bf16.mxu1 %v9203_v46  ;;  %1601 = vmatprep.subr.bf16.mxu0 %v9205_v5  ;;  %v729_v38 = vmul.f32 %v11998_v15, %v709_v21  ;;  %11475 = vrsqrt.f32 %v680_v25  ;;  %v666_v41 = vmul.f32 0.015625, %v644_v35  ;;  %v669_v32 = vmul.f32 0.015625, %v653_v44  ;;  %v795_v44 = vld [vmem:[%s16343_s3 + $0xe8] sm:$0xff] }
 0x23d   : > { %v12135_v9 = vpack.c.bf16 %v12122_v3, %v12130_v12  ;;  %v11470_v39 = vpop.eup %11469  ;;  %v728_v46 = vmul.f32 %v11998_v15, %v708_v33  ;;  %v683_v20 = vadd.f32 1e-05, %v667_v27 }
 0x23e   : > { %9231 = vmatmul.mubr.msk.bf16.gmra.mrb[12].mxu1 %vm371_vm0, %v12091_v58  ;;  %9239 = vmatmul.mubr.msk.bf16.gmra.mrb[12].mxu0 %vm371_vm0, %v12091_v58  ;;  %v11472_v6 = vpop.eup %11471  ;;  %v12146_v52 = vadd.f32 %v12006_v24, %v729_v38  ;;  %v711_v5 = vmul.f32 %v11470_v39, %v11870_v42  ;;  %v682_v48 = vadd.f32 1e-05, %v666_v41 }
 0x23f   : > { %1310 = vmatprep.mubr.bf16.mxu1 %v16349_v36  ;;  %1423 = vmatprep.mubr.bf16.mxu0 %v16349_v36  ;;  %v12150_v10 = vadd.f32 %v12006_v24, %v728_v46  ;;  %v710_v11 = vmul.f32 %v11472_v6, %v11864_v37  ;;  %v650_v17 = vpop.xlane.xlu0 %649  ;;  %11477 = vrsqrt.f32 %v683_v20 }
 0x240   : > { %1489 = vmatpush1.bf16.msra.mxu1 %v9202_v51  ;;  %1602 = vmatpush1.bf16.msra.mxu0 %v9204_v28  ;;  %v731_v57 = vmul.f32 %v11998_v15, %v711_v5  ;;  %11479 = vrsqrt.f32 %v682_v48  ;;  %v668_v59 = vmul.f32 0.015625, %v650_v17  ;;  %v685_v28 = vadd.f32 1e-05, %v669_v32  ;;  %v787_v5 = vld [vmem:[%s16343_s3 + $0xa8] sm:$0xff]  ;;  %v802_v17 = vld [vmem:[%s16343_s3 + $0x120] sm:$0xff] }
 0x241   : > { %1490 = vmatprep.subr.bf16.mxu1 %v9219_v0  ;;  %1603 = vmatprep.subr.bf16.mxu0 %v9221_v1  ;;  %v12155_v55 = vpack.c.bf16 %v12146_v52, %v12150_v10  ;;  %v11474_v51 = vpop.eup %11473  ;;  %v730_v42 = vmul.f32 %v11998_v15, %v710_v11  ;;  %v9174_v48 = vcombine.low %v12097_v40, %v12107_v4  ;;  %v811_v40 = vld [vmem:[%s16343_s3 + $0x168] sm:$0xff] }
 0x242   : > { %v12166_v63 = vadd.f32 %v12006_v24, %v731_v57  ;;  %v713_v61 = vmul.f32 %v11474_v51, %v11882_v56  ;;  %v684_v0 = vadd.f32 1e-05, %v668_v59  ;;  %11481 = vrsqrt.f32 %v685_v28  ;;  %v810_v51 = vld [vmem:[%s16343_s3 + $0x160] sm:$0xff]  ;;  %v803_v59 = vld [vmem:[%s16343_s3 + $0x128] sm:$0xff] }
 0x243   : > { %v12170_v1 = vadd.f32 %v12006_v24, %v730_v42  ;;  %v9176_v11 = vcombine.low %v12112_v13, %v12117_v49  ;;  %v9193_v57 = vcombine.high %v787_v5, %v795_v44  ;;  %v9192_v13 = vcombine.low %v787_v5, %v795_v44  ;;  %v826_v28 = vld [vmem:[%s16343_s3 + $0x1e0] sm:$0xff]  ;;  %v804_v44 = vld [vmem:[%s16343_s3 + $0x130] sm:$0xff] }
 0x244   : > { %1491 = vmatpush1.bf16.msra.mxu1 %v9218_v19  ;;  %1604 = vmatpush1.bf16.msra.mxu0 %v9220_v23  ;;  %v733_v18 = vmul.f32 %v11998_v15, %v713_v61  ;;  %11483 = vrsqrt.f32 %v684_v0  ;;  %v9207_v49 = vcombine.high %v802_v17, %v810_v51  ;;  %v9209_v42 = vcombine.high %v803_v59, %v811_v40  ;;  %v819_v61 = vld [vmem:[%s16343_s3 + $0x1a8] sm:$0xff] }
 0x245   : > { %1710 = vmatprep.subr.bf16.mxu1 %v9175_v26  ;;  %1823 = vmatprep.subr.bf16.mxu0 %v9177_v53  ;;  %v12175_v14 = vpack.c.bf16 %v12166_v63, %v12170_v1  ;;  %v827_v0 = vld [vmem:[%s16343_s3 + $0x1e8] sm:$0xff] }
 0x246   : > { %9232 = vmatmul.mubr.msk.bf16.gmra.mrb[16].mxu1 %vm371_vm0, %v12135_v9  ;;  %9240 = vmatmul.mubr.msk.bf16.gmra.mrb[16].mxu0 %vm371_vm0, %v12135_v9  ;;  %v11476_v37 = vpop.eup %11475 }
 0x247   : > { %1320 = vmatprep.mubr.bf16.mxu1 %v16349_v36  ;;  %1433 = vmatprep.mubr.bf16.mxu0 %v16349_v36  ;;  %v712_v54 = vmul.f32 %v11476_v37, %v11876_v50  ;;  %v12186_v50 = vadd.f32 %v12006_v24, %v733_v18  ;;  %v818_v37 = vld [vmem:[%s16343_s3 + $0x1a0] sm:$0xff]  ;;  %v9208_v18 = vcombine.low %v803_v59, %v811_v40 }
 0x249   : > { %v11478_v19 = vpop.eup %11477  ;;  %v732_v21 = vmul.f32 %v11998_v15, %v712_v54  ;;  %v9206_v54 = vcombine.low %v802_v17, %v810_v51  ;;  %v812_v17 = vld [vmem:[%s16343_s3 + $0x170] sm:$0xff] }
 0x24a   : > { %v11480_v56 = vpop.eup %11479  ;;  %v715_v22 = vmul.f32 %v11478_v19, %v11894_v2  ;;  %v9223_v19 = vcombine.high %v818_v37, %v826_v28  ;;  %v9211_v40 = vcombine.high %v804_v44, %v812_v17 }
 0x24b   : > { %v12190_v23 = vadd.f32 %v12006_v24, %v732_v21  ;;  %v714_v25 = vmul.f32 %v11480_v56, %v11888_v62  ;;  %v9225_v21 = vcombine.high %v819_v61, %v827_v0  ;;  %v772_v56 = vld [vmem:[%s16343_s3 + $0x30] sm:$0xff] }
 0x24c   : > { %v735_v53 = vmul.f32 %v11998_v15, %v715_v22  ;;  %v11482_v33 = vpop.eup %11481  ;;  %v780_v22 = vld [vmem:[%s16343_s3 + $0x70] sm:$0xff] }
 0x24d   : > { %v12195_v26 = vpack.c.bf16 %v12186_v50, %v12190_v23  ;;  %v734_v35 = vmul.f32 %v11998_v15, %v714_v25  ;;  %v717_v27 = vmul.f32 %v11482_v33, %v11918_v16  ;;  %v773_v25 = vld [vmem:[%s16343_s3 + $0x38] sm:$0xff]  ;;  %v9222_v33 = vcombine.low %v818_v37, %v826_v28 }
 0x24e   : > { %9233 = vmatmul.mubr.msk.bf16.gmra.mrb[20].mxu1 %vm371_vm0, %v12155_v55  ;;  %9241 = vmatmul.mubr.msk.bf16.gmra.mrb[20].mxu0 %vm371_vm0, %v12155_v55  ;;  %v11484_v2 = vpop.eup %11483  ;;  %v12206_v62 = vadd.f32 %v12006_v24, %v735_v53  ;;  %v781_v53 = vld [vmem:[%s16343_s3 + $0x78] sm:$0xff]  ;;  %v9210_v28 = vcombine.low %v804_v44, %v812_v17  ;;  %v11207_v44 = vld [vmem:[%s16345_s5 + $0xe0] sm:$0xff]  }
 0x24f   : > { %1330 = vmatprep.mubr.bf16.mxu1 %v16349_v36  ;;  %1443 = vmatprep.mubr.bf16.mxu0 %v16349_v36  ;;  %v12210_v38 = vadd.f32 %v12006_v24, %v734_v35  ;;  %v716_v39 = vmul.f32 %v11484_v2, %v11900_v7  ;;  %v737_v46 = vmul.f32 %v11998_v15, %v717_v27  ;;  %v829_v37 = vld [vmem:[%s16343_s3 + $0x1f8] sm:$0xff]  ;;  %v11206_v17 = vld [vmem:[%s16345_s5 + $0x20] sm:$0xff]  }
 0x250   : > { %16363 = vst [vmem:[#allocation3_spill] sm:$0xff] %v12206_v62  ;;  %v9224_v35 = vcombine.low %v819_v61, %v827_v0  ;;  %v9179_v2 = vcombine.high %v772_v56, %v780_v22  ;;  %v9181_v27 = vcombine.high %v773_v25, %v781_v53  ;;  %v9180_v5 = vcombine.low %v773_v25, %v781_v53  ;;  %v11192_v25 = vld [vmem:[%s16345_s5 + $0x80] sm:$0xff]   ;;  %v11193_v53 = vld [vmem:[%s16345_s5 + $0x48] sm:$0xff]  }
 0x251   : > { %16364 = vst [vmem:[#allocation4_spill] sm:$0xff] %v12210_v38  ;;  %v12215_v41 = vpack.c.bf16 %v12206_v62, %v12210_v38  ;;  %v736_v6 = vmul.f32 %v11998_v15, %v716_v39  ;;  %v12226_v7 = vadd.f32 %v12006_v24, %v737_v46  ;;  %v786_v15 = vld [vmem:[%s16343_s3 + $0xa0] sm:$0xff]  ;;  %v788_v39 = vld [vmem:[%s16343_s3 + $0xb0] sm:$0xff]  ;;  %v12754_v62 = vsub.s32 5, %v11709_v29 }
 0x252   : > { %v796_v46 = vld [vmem:[%s16343_s3 + $0xf0] sm:$0xff] }
 0x253   : > { %16365 = vst [vmem:[#allocation5_spill] sm:$0xff] %v12226_v7  ;;  %v12229_v16 = vadd.f32 %v12006_v24, %v736_v6  ;;  %v794_v24 = vld [vmem:[%s16343_s3 + $0xe0] sm:$0xff]  ;;  %v789_v6 = vld [vmem:[%s16343_s3 + $0xb8] sm:$0xff]  ;;  %v9194_v51 = vcombine.low %v788_v39, %v796_v46 }
 0x254   : > { %v9191_v32 = vcombine.high %v786_v15, %v794_v24  ;;  %v9190_v4 = vcombine.low %v786_v15, %v794_v24  ;;  %v797_v15 = vld [vmem:[%s16343_s3 + $0xf8] sm:$0xff]  ;;  %v9178_v24 = vcombine.low %v772_v56, %v780_v22  ;;  %v11191_v56 = vld [vmem:[%s16345_s5 + $0xc0] sm:$0xff]  }
 0x255   : > { %16366 = vst [vmem:[#allocation6_spill] sm:$0xff] %v12229_v16  ;;  %v12233_v20 = vpack.c.bf16 %v12226_v7, %v12229_v16  ;;  %v9196_v59 = vcombine.low %v789_v6, %v797_v15  ;;  %v11190_v22 = vld [vmem:[%s16345_s5] sm:$0xff]   ;;  %v11226_v7 = vld [vmem:[%s16345_s5 + $0x108] sm:$0xff]  }
 0x256   : > { %9234 = vmatmul.mubr.msk.bf16.gmra.mrb[24].mxu1 %vm371_vm0, %v12175_v14  ;;  %9242 = vmatmul.mubr.msk.bf16.gmra.mrb[24].mxu0 %vm371_vm0, %v12175_v14 }
 0x257   : > { %1340 = vmatprep.mubr.bf16.mxu1 %v16349_v36  ;;  %1453 = vmatprep.mubr.bf16.mxu0 %v16349_v36 }
 0x25e   : > { %9235 = vmatmul.mubr.msk.bf16.gmra.mrb[28].mxu1 %vm371_vm0, %v12195_v26  ;;  %9243 = vmatmul.mubr.msk.bf16.gmra.mrb[28].mxu0 %vm371_vm0, %v12195_v26 }
 0x25f   : > { %1350 = vmatprep.mubr.bf16.mxu1 %v16349_v36  ;;  %1463 = vmatprep.mubr.bf16.mxu0 %v16349_v36 }
 0x266   : > { %9236 = vmatmul.mubr.msk.bf16.gmra.mrb[32].mxu1 %vm371_vm0, %v12215_v41  ;;  %9244 = vmatmul.mubr.msk.bf16.gmra.mrb[32].mxu0 %vm371_vm0, %v12215_v41 }
 0x267   : > { %1360 = vmatprep.mubr.bf16.mxu1 %v16349_v36  ;;  %1473 = vmatprep.mubr.bf16.mxu0 %v16349_v36 }
 0x26e   : > { %9237 = vmatmul.mubr.msk.bf16.gmra.mrb[36].mxu1 %vm371_vm0, %v12233_v20  ;;  %9245 = vmatmul.mubr.msk.bf16.gmra.mrb[36].mxu0 %vm371_vm0, %v12233_v20 }
 0x26f   : > { %1516 = vmatprep.mubr.bf16.mxu1 %v16349_v36  ;;  %1629 = vmatprep.mubr.bf16.mxu0 %v16349_v36 }
 0x276   : > { %9246 = vmatmul.mubr.msk.bf16.vlgmr.msra.gmra.mrb[40].mxu1 %vm371_vm0, %v12033_v60  ;;  %9254 = vmatmul.mubr.msk.bf16.vlgmr.msra.gmra.mrb[40].mxu0 %vm371_vm0, %v12033_v60 }
 0x277   : > { %1711 = vmatpush1.bf16.msra.mxu1 %v9174_v48  ;;  %1824 = vmatpush1.bf16.msra.mxu0 %v9176_v11  ;;  %v9195_v48 = vcombine.high %v788_v39, %v796_v46  ;;  %v9197_v11 = vcombine.high %v789_v6, %v797_v15  ;;  %v11198_v39 = vld [vmem:[%s16345_s5 + $0x10] sm:$0xff]   ;;  %v11201_v6 = vld [vmem:[%s16345_s5 + $0x58] sm:$0xff]  }
 0x278   : > { %1526 = vmatprep.mubr.bf16.mxu1 %v16349_v36  ;;  %1639 = vmatprep.mubr.bf16.mxu0 %v16349_v36  ;;  %v11200_v46 = vld [vmem:[%s16345_s5 + $0x90] sm:$0xff]   ;;  %v11203_v15 = vld [vmem:[%s16345_s5 + $0xd8] sm:$0xff]  }
 0x279   : > { %1712 = vmatprep.subr.bf16.mxu1 %v9191_v32  ;;  %1825 = vmatprep.subr.bf16.mxu0 %v9193_v57  ;;  %v805_v32 = vld [vmem:[%s16343_s3 + $0x138] sm:$0xff] }
 0x27a   : > { %v813_v57 = vld [vmem:[%s16343_s3 + $0x178] sm:$0xff] }
 0x27b   : > { %1713 = vmatpush1.bf16.msra.mxu1 %v9190_v4  ;;  %1826 = vmatpush1.bf16.msra.mxu0 %v9192_v13  ;;  %v9213_v4 = vcombine.high %v805_v32, %v813_v57  ;;  %v820_v13 = vld [vmem:[%s16343_s3 + $0x1b0] sm:$0xff]  ;;  %v9212_v61 = vcombine.low %v805_v32, %v813_v57  ;;  %v11208_v32 = vld [vmem:[%s16345_s5 + $0xa0] sm:$0xff]   ;;  %v11209_v57 = vld [vmem:[%s16345_s5 + $0x68] sm:$0xff]  }
 0x27c   : > { %1714 = vmatprep.subr.bf16.mxu1 %v9207_v49  ;;  %1827 = vmatprep.subr.bf16.mxu0 %v9209_v42  ;;  %v828_v49 = vld [vmem:[%s16343_s3 + $0x1f0] sm:$0xff]  ;;  %v821_v42 = vld [vmem:[%s16343_s3 + $0x1b8] sm:$0xff] }
 0x27d   : > { %v9227_v0 = vcombine.high %v820_v13, %v828_v49 }
 0x27e   : > { %9247 = vmatmul.mubr.msk.bf16.gmra.mrb[44].mxu1 %vm371_vm0, %v12091_v58  ;;  %9255 = vmatmul.mubr.msk.bf16.gmra.mrb[44].mxu0 %vm371_vm0, %v12091_v58 }
 0x27f   : > { %1536 = vmatprep.mubr.bf16.mxu1 %v16349_v36  ;;  %1649 = vmatprep.mubr.bf16.mxu0 %v16349_v36 }
 0x280   : > { %1715 = vmatpush1.bf16.msra.mxu1 %v9206_v54  ;;  %1828 = vmatpush1.bf16.msra.mxu0 %v9208_v18  ;;  %v9229_v54 = vcombine.high %v821_v42, %v829_v37  ;;  %v9226_v18 = vcombine.low %v820_v13, %v828_v49  ;;  %v11212_v49 = vld [vmem:[%s16345_s5 + $0xa8] sm:$0xff]  }
 0x281   : > { %1716 = vmatprep.subr.bf16.mxu1 %v9223_v19  ;;  %1829 = vmatprep.subr.bf16.mxu0 %v9225_v21  ;;  %v9228_v19 = vcombine.low %v821_v42, %v829_v37  ;;  %v11189_v21 = vld [vmem:[%s16345_s5 + $0x40] sm:$0xff]  }
 0x284   : > { %1717 = vmatpush1.bf16.msra.mxu1 %v9222_v33  ;;  %1830 = vmatpush1.bf16.msra.mxu0 %v9224_v35  ;;  %v11195_v33 = vld [vmem:[%s16345_s5 + $0xc8] sm:$0xff]  }
 0x285   : > { %1936 = vmatprep.subr.bf16.mxu1 %v9179_v2  ;;  %2049 = vmatprep.subr.bf16.mxu0 %v9181_v27  ;;  %v11194_v35 = vld [vmem:[%s16345_s5 + $0x8] sm:$0xff]   ;;  %v11197_v27 = vld [vmem:[%s16345_s5 + $0x50] sm:$0xff]  }
 0x286   : > { %9248 = vmatmul.mubr.msk.bf16.gmra.mrb[48].mxu1 %vm371_vm0, %v12135_v9  ;;  %9256 = vmatmul.mubr.msk.bf16.gmra.mrb[48].mxu0 %vm371_vm0, %v12135_v9  ;;  %v11196_v2 = vld [vmem:[%s16345_s5 + $0x88] sm:$0xff]  }
 0x287   : > { %1546 = vmatprep.mubr.bf16.mxu1 %v16349_v36  ;;  %1659 = vmatprep.mubr.bf16.mxu0 %v16349_v36 }
 0x28e   : > { %9249 = vmatmul.mubr.msk.bf16.gmra.mrb[52].mxu1 %vm371_vm0, %v12155_v55  ;;  %9257 = vmatmul.mubr.msk.bf16.gmra.mrb[52].mxu0 %vm371_vm0, %v12155_v55 }
 0x28f   : > { %1556 = vmatprep.mubr.bf16.mxu1 %v16349_v36  ;;  %1669 = vmatprep.mubr.bf16.mxu0 %v16349_v36 }
 0x296   : > { %9250 = vmatmul.mubr.msk.bf16.gmra.mrb[56].mxu1 %vm371_vm0, %v12175_v14  ;;  %9258 = vmatmul.mubr.msk.bf16.gmra.mrb[56].mxu0 %vm371_vm0, %v12175_v14 }
 0x297   : > { %1566 = vmatprep.mubr.bf16.mxu1 %v16349_v36  ;;  %1679 = vmatprep.mubr.bf16.mxu0 %v16349_v36 }
 0x29e   : > { %9251 = vmatmul.mubr.msk.bf16.gmra.mrb[60].mxu1 %vm371_vm0, %v12195_v26  ;;  %9259 = vmatmul.mubr.msk.bf16.gmra.mrb[60].mxu0 %vm371_vm0, %v12195_v26 }
 0x29f   : > { %1576 = vmatprep.mubr.bf16.mxu1 %v16349_v36  ;;  %1689 = vmatprep.mubr.bf16.mxu0 %v16349_v36 }
 0x2a6   : > { %9252 = vmatmul.mubr.msk.bf16.gmra.mrb[64].mxu1 %vm371_vm0, %v12215_v41  ;;  %9260 = vmatmul.mubr.msk.bf16.gmra.mrb[64].mxu0 %vm371_vm0, %v12215_v41 }
 0x2a7   : > { %1586 = vmatprep.mubr.bf16.mxu1 %v16349_v36  ;;  %1699 = vmatprep.mubr.bf16.mxu0 %v16349_v36 }
 0x2ae   : > { %9253 = vmatmul.mubr.msk.bf16.gmra.mrb[68].mxu1 %vm371_vm0, %v12233_v20  ;;  %9261 = vmatmul.mubr.msk.bf16.gmra.mrb[68].mxu0 %vm371_vm0, %v12233_v20 }
 0x2af   : > { %1742 = vmatprep.mubr.bf16.mxu1 %v16349_v36  ;;  %1855 = vmatprep.mubr.bf16.mxu0 %v16349_v36 }
 0x2b6   : > { %9262 = vmatmul.mubr.msk.bf16.vlgmr.msra.gmra.mrb[72].mxu1 %vm371_vm0, %v12033_v60  ;;  %9270 = vmatmul.mubr.msk.bf16.vlgmr.msra.gmra.mrb[72].mxu0 %vm371_vm0, %v12033_v60 }
 0x2b7   : > { %1937 = vmatpush1.bf16.msra.mxu1 %v9178_v24  ;;  %2050 = vmatpush1.bf16.msra.mxu0 %v9180_v5  ;;  %v11202_v24 = vld [vmem:[%s16345_s5 + $0x18] sm:$0xff]  }
 0x2b8   : > { %1752 = vmatprep.mubr.bf16.mxu1 %v16349_v36  ;;  %1865 = vmatprep.mubr.bf16.mxu0 %v16349_v36  ;;  %v11204_v5 = vld [vmem:[%s16345_s5 + $0x98] sm:$0xff]  }
 0x2b9   : > { %1938 = vmatprep.subr.bf16.mxu1 %v9195_v48  ;;  %2051 = vmatprep.subr.bf16.mxu0 %v9197_v11  ;;  %v12494_v48 = vld [vmem:[%s16344_s4] sm:$0xff]  ;;  %v12497_v11 = vsub.s32 3, %v11709_v29 }
 0x2bb   : > { %1939 = vmatpush1.bf16.msra.mxu1 %v9194_v51  ;;  %2052 = vmatpush1.bf16.msra.mxu0 %v9196_v59  ;;  %v11211_v51 = vld [vmem:[%s16345_s5 + $0xe8] sm:$0xff]   ;;  %v12517_v59 = vrot.slane %v12494_v48, %v11712_v30  ;;  %v12529_v13 = vrot.slane %v12494_v48, %v12497_v11 }
 0x2bc   : > { %1940 = vmatprep.subr.bf16.mxu1 %v9211_v40  ;;  %2053 = vmatprep.subr.bf16.mxu0 %v9213_v4  ;;  %v12521_v40 = vrot.slane %v12494_v48, %v12001_v43  ;;  %v12525_v4 = vrot.slane %v12494_v48, %v11994_v34 }
 0x2be   : > { %9263 = vmatmul.mubr.msk.bf16.gmra.mrb[76].mxu1 %vm371_vm0, %v12091_v58  ;;  %9271 = vmatmul.mubr.msk.bf16.gmra.mrb[76].mxu0 %vm371_vm0, %v12091_v58 }
 0x2bf   : > { %1762 = vmatprep.mubr.bf16.mxu1 %v16349_v36  ;;  %1875 = vmatprep.mubr.bf16.mxu0 %v16349_v36 }
 0x2c0   : > { %1941 = vmatpush1.bf16.msra.mxu1 %v9210_v28  ;;  %2054 = vmatpush1.bf16.msra.mxu0 %v9212_v61  ;;  %v11213_v28 = vld [vmem:[%s16345_s5 + $0x70] sm:$0xff]  }
 0x2c1   : > { %1942 = vmatprep.subr.bf16.mxu1 %v9227_v0  ;;  %2055 = vmatprep.subr.bf16.mxu0 %v9229_v54  ;;  %v11215_v61 = vld [vmem:[%s16345_s5 + $0xf0] sm:$0xff]  }
 0x2c4   : > { %1943 = vmatpush1.bf16.msra.mxu1 %v9226_v18  ;;  %2056 = vmatpush1.bf16.msra.mxu0 %v9228_v19 }
 0x2c5   : > { %10048 = vmatprep.subr.bf16.mxu1 %v11189_v21  ;;  %10112 = vmatprep.subr.bf16.mxu0 %v11191_v56 }
 0x2c6   : > { %9264 = vmatmul.mubr.msk.bf16.gmra.mrb[80].mxu1 %vm371_vm0, %v12135_v9  ;;  %9272 = vmatmul.mubr.msk.bf16.gmra.mrb[80].mxu0 %vm371_vm0, %v12135_v9 }
 0x2c7   : > { %1772 = vmatprep.mubr.bf16.mxu1 %v16349_v36  ;;  %1885 = vmatprep.mubr.bf16.mxu0 %v16349_v36 }
 0x2ce   : > { %9265 = vmatmul.mubr.msk.bf16.gmra.mrb[84].mxu1 %vm371_vm0, %v12155_v55  ;;  %9273 = vmatmul.mubr.msk.bf16.gmra.mrb[84].mxu0 %vm371_vm0, %v12155_v55 }
 0x2cf   : > { %1782 = vmatprep.mubr.bf16.mxu1 %v16349_v36  ;;  %1895 = vmatprep.mubr.bf16.mxu0 %v16349_v36 }
 0x2d6   : > { %9266 = vmatmul.mubr.msk.bf16.gmra.mrb[88].mxu1 %vm371_vm0, %v12175_v14  ;;  %9274 = vmatmul.mubr.msk.bf16.gmra.mrb[88].mxu0 %vm371_vm0, %v12175_v14 }
 0x2d7   : > { %1792 = vmatprep.mubr.bf16.mxu1 %v16349_v36  ;;  %1905 = vmatprep.mubr.bf16.mxu0 %v16349_v36 }
 0x2de   : > { %9267 = vmatmul.mubr.msk.bf16.gmra.mrb[92].mxu1 %vm371_vm0, %v12195_v26  ;;  %9275 = vmatmul.mubr.msk.bf16.gmra.mrb[92].mxu0 %vm371_vm0, %v12195_v26 }
 0x2df   : > { %1802 = vmatprep.mubr.bf16.mxu1 %v16349_v36  ;;  %1915 = vmatprep.mubr.bf16.mxu0 %v16349_v36 }
 0x2e6   : > { %9268 = vmatmul.mubr.msk.bf16.gmra.mrb[96].mxu1 %vm371_vm0, %v12215_v41  ;;  %9276 = vmatmul.mubr.msk.bf16.gmra.mrb[96].mxu0 %vm371_vm0, %v12215_v41 }
 0x2e7   : > { %1812 = vmatprep.mubr.bf16.mxu1 %v16349_v36  ;;  %1925 = vmatprep.mubr.bf16.mxu0 %v16349_v36 }
 0x2ee   : > { %9269 = vmatmul.mubr.msk.bf16.gmra.mrb[100].mxu1 %vm371_vm0, %v12233_v20  ;;  %9277 = vmatmul.mubr.msk.bf16.gmra.mrb[100].mxu0 %vm371_vm0, %v12233_v20 }
 0x2ef   : > { %1968 = vmatprep.mubr.bf16.mxu1 %v16349_v36  ;;  %2081 = vmatprep.mubr.bf16.mxu0 %v16349_v36 }
 0x2f6   : > { %9278 = vmatmul.mubr.msk.bf16.vlgmr.msra.gmra.mrb[104].mxu1 %vm371_vm0, %v12033_v60  ;;  %9286 = vmatmul.mubr.msk.bf16.vlgmr.msra.gmra.mrb[104].mxu0 %vm371_vm0, %v12033_v60  ;;  %v11199_v60 = vld [vmem:[%s16345_s5 + $0xd0] sm:$0xff]  }
 0x2f7   : > { %10049 = vmatpush3.bf16.msra.mxu1 %v11190_v22  ;;  %10113 = vmatpush3.bf16.msra.mxu0 %v11192_v25 }
 0x2f8   : > { %1978 = vmatprep.mubr.bf16.mxu1 %v16349_v36  ;;  %2091 = vmatprep.mubr.bf16.mxu0 %v16349_v36 }
 0x2f9   : > { %10050 = vmatprep.subr.bf16.mxu1 %v11193_v53  ;;  %10114 = vmatprep.subr.bf16.mxu0 %v11195_v33 }
 0x2fb   : > { %10051 = vmatpush3.bf16.msra.mxu1 %v11194_v35  ;;  %10115 = vmatpush3.bf16.msra.mxu0 %v11196_v2 }
 0x2fc   : > { %10052 = vmatprep.subr.bf16.mxu1 %v11197_v27  ;;  %10116 = vmatprep.subr.bf16.mxu0 %v11199_v60  ;;  %v11214_v27 = vld [vmem:[%s16345_s5 + $0x30] sm:$0xff]  }
 0x2fd   : > { %v11216_v60 = vld [vmem:[%s16345_s5 + $0xb0] sm:$0xff]  }
 0x2fe   : > { %9279 = vmatmul.mubr.msk.bf16.gmra.mrb[108].mxu1 %vm371_vm0, %v12091_v58  ;;  %9287 = vmatmul.mubr.msk.bf16.gmra.mrb[108].mxu0 %vm371_vm0, %v12091_v58  ;;  %v11205_v58 = vld [vmem:[%s16345_s5 + $0x60] sm:$0xff]  }
 0x2ff   : > { %1988 = vmatprep.mubr.bf16.mxu1 %v16349_v36  ;;  %2101 = vmatprep.mubr.bf16.mxu0 %v16349_v36 }
 0x300   : > { %10053 = vmatpush3.bf16.msra.mxu1 %v11198_v39  ;;  %10117 = vmatpush3.bf16.msra.mxu0 %v11200_v46 }
 0x301   : > { %10054 = vmatprep.subr.bf16.mxu1 %v11201_v6  ;;  %10118 = vmatprep.subr.bf16.mxu0 %v11203_v15  ;;  %v11217_v6 = vld [vmem:[%s16345_s5 + $0x78] sm:$0xff]  }
 0x302   : > { %v11219_v15 = vld [vmem:[%s16345_s5 + $0xf8] sm:$0xff]  }
 0x304   : > { %10055 = vmatpush3.bf16.msra.mxu1 %v11202_v24  ;;  %10119 = vmatpush3.bf16.msra.mxu0 %v11204_v5 }
 0x305   : > { %10056 = vmatprep.subr.bf16.mxu1 %v11205_v58  ;;  %10120 = vmatprep.subr.bf16.mxu0 %v11207_v44 }
 0x306   : > { %9280 = vmatmul.mubr.msk.bf16.gmra.mrb[112].mxu1 %vm371_vm0, %v12135_v9  ;;  %9288 = vmatmul.mubr.msk.bf16.gmra.mrb[112].mxu0 %vm371_vm0, %v12135_v9  ;;  %v11210_v9 = vld [vmem:[%s16345_s5 + $0x28] sm:$0xff]  }
 0x307   : > { %1998 = vmatprep.mubr.bf16.mxu1 %v16349_v36  ;;  %2111 = vmatprep.mubr.bf16.mxu0 %v16349_v36 }
 0x308   : > { %10057 = vmatpush3.bf16.msra.mxu1 %v11206_v17  ;;  %10121 = vmatpush3.bf16.msra.mxu0 %v11208_v32 }
 0x309   : > { %v1292_v42 = vpop.f32.mrb[8].mxu1  ;;  %v1405_v37 = vpop.f32.mrb[8].mxu0  ;;  %10058 = vmatprep.subr.bf16.mxu1 %v11209_v57  ;;  %10122 = vmatprep.subr.bf16.mxu0 %v11211_v51 }
 0x30a   : > { %v1293_v0 = vadd.f32 %v1292_v42, %v12517_v59  ;;  %v1406_v54 = vadd.f32 %v1405_v37, %v12521_v40  ;;  %v1294_v18 = vpop.f32.mrb[9].mxu1  ;;  %v1407_v19 = vpop.f32.mrb[9].mxu0  ;;  %v11218_v42 = vld [vmem:[%s16345_s5 + $0x38] sm:$0xff]  }
 0x30b   : > { %v1295_v21 = vadd.f32 %v1294_v18, %v12525_v4  ;;  %v1408_v56 = vadd.f32 %v1407_v19, %v12529_v13  ;;  %v1296_v22 = vpop.f32.mrb[10].mxu1  ;;  %v1409_v25 = vpop.f32.mrb[10].mxu0  ;;  %v11223_v18 = vld [vmem:[%s16345_s5 + $0x1c0] sm:$0xff]  }
 0x30c   : > { %v1297_v53 = vadd.f32 %v1296_v22, %v12517_v59  ;;  %v1410_v33 = vadd.f32 %v1409_v25, %v12521_v40  ;;  %v1298_v35 = vpop.f32.mrb[11].mxu1  ;;  %v1411_v2 = vpop.f32.mrb[11].mxu0  ;;  %10059 = vmatpush3.bf16.msra.mxu1 %v11210_v9  ;;  %10123 = vmatpush3.bf16.msra.mxu0 %v11212_v49  ;;  %v2162_v24 = vmax.f32 %v1293_v0, 0.0  ;;  %v2164_v5 = vmax.f32 %v1406_v54, 0.0  ;;  %v11221_v54 = vld [vmem:[%s16345_s5 + $0x140] sm:$0xff]  }
 0x30d   : > { %v1299_v39 = vadd.f32 %v1298_v35, %v12525_v4  ;;  %v1412_v46 = vadd.f32 %v1411_v2, %v12529_v13  ;;  %10060 = vmatprep.subr.bf16.mxu1 %v11213_v28  ;;  %10124 = vmatprep.subr.bf16.mxu0 %v11215_v61  ;;  %v2163_v17 = vmax.f32 %v1295_v21, 0.0  ;;  %v2165_v32 = vmax.f32 %v1408_v56, 0.0 }
 0x30e   : > { %v2178_v58 = vmax.f32 %v1297_v53, 0.0  ;;  %v2180_v44 = vmax.f32 %v1410_v33, 0.0  ;;  %9281 = vmatmul.mubr.msk.bf16.gmra.mrb[116].mxu1 %vm371_vm0, %v12155_v55  ;;  %9289 = vmatmul.mubr.msk.bf16.gmra.mrb[116].mxu0 %vm371_vm0, %v12155_v55  ;;  %v11220_v55 = vld [vmem:[%s16345_s5 + $0xb8] sm:$0xff]  }
 0x30f   : > { %v2179_v57 = vmax.f32 %v1299_v39, 0.0  ;;  %v2181_v51 = vmax.f32 %v1412_v46, 0.0  ;;  %2008 = vmatprep.mubr.bf16.mxu1 %v16349_v36  ;;  %2121 = vmatprep.mubr.bf16.mxu0 %v16349_v36 }
 0x310   : > { %v12571_v9 = vpack.c.bf16 %v2178_v58, %v2162_v24  ;;  %v12573_v49 = vpack.c.bf16 %v2180_v44, %v2164_v5  ;;  %10061 = vmatpush3.bf16.msra.mxu1 %v11214_v27  ;;  %10125 = vmatpush3.bf16.msra.mxu0 %v11216_v60 }
 0x311   : > { %v1302_v37 = vpop.f32.mrb[12].mxu1  ;;  %v1415_v28 = vpop.f32.mrb[12].mxu0  ;;  %10062 = vmatprep.subr.bf16.mxu1 %v11217_v6  ;;  %v12581_v61 = vpack.c.bf16 %v2179_v57, %v2163_v17  ;;  %10126 = vmatprep.subr.bf16.mxu0 %v11219_v15  ;;  %v12583_v0 = vpack.c.bf16 %v2181_v51, %v2165_v32 }
 0x312   : > { %v1303_v19 = vadd.f32 %v1302_v37, %v12517_v59  ;;  %v1416_v21 = vadd.f32 %v1415_v28, %v12521_v40  ;;  %v1304_v56 = vpop.f32.mrb[13].mxu1  ;;  %v1417_v22 = vpop.f32.mrb[13].mxu0 }
 0x313   : > { %v1305_v25 = vadd.f32 %v1304_v56, %v12525_v4  ;;  %v1418_v53 = vadd.f32 %v1417_v22, %v12529_v13  ;;  %v1306_v33 = vpop.f32.mrb[14].mxu1  ;;  %v1419_v35 = vpop.f32.mrb[14].mxu0 }
 0x314   : > { %v1307_v2 = vadd.f32 %v1306_v33, %v12517_v59  ;;  %v1420_v27 = vadd.f32 %v1419_v35, %v12521_v40  ;;  %v1308_v60 = vpop.f32.mrb[15].mxu1  ;;  %v1421_v39 = vpop.f32.mrb[15].mxu0  ;;  %10063 = vmatpush3.bf16.msra.mxu1 %v11218_v42  ;;  %10127 = vmatpush3.bf16.msra.mxu0 %v11220_v55  ;;  %v2194_v15 = vmax.f32 %v1303_v19, 0.0  ;;  %v2196_v24 = vmax.f32 %v1416_v21, 0.0 }
 0x315   : > { %v1309_v46 = vadd.f32 %v1308_v60, %v12525_v4  ;;  %v1422_v6 = vadd.f32 %v1421_v39, %v12529_v13  ;;  %10176 = vmatprep.subr.bf16.mxu1 %v11221_v54  ;;  %10240 = vmatprep.subr.bf16.mxu0 %v11223_v18  ;;  %v2195_v44 = vmax.f32 %v1305_v25, 0.0  ;;  %v2197_v17 = vmax.f32 %v1418_v53, 0.0 }
 0x316   : > { %v2210_v5 = vmax.f32 %v1307_v2, 0.0  ;;  %v2212_v58 = vmax.f32 %v1420_v27, 0.0  ;;  %9282 = vmatmul.mubr.msk.bf16.gmra.mrb[120].mxu1 %vm371_vm0, %v12175_v14  ;;  %9290 = vmatmul.mubr.msk.bf16.gmra.mrb[120].mxu0 %vm371_vm0, %v12175_v14 }
 0x317   : > { %v2211_v32 = vmax.f32 %v1309_v46, 0.0  ;;  %v2213_v57 = vmax.f32 %v1422_v6, 0.0  ;;  %2018 = vmatprep.mubr.bf16.mxu1 %v16349_v36  ;;  %2131 = vmatprep.mubr.bf16.mxu0 %v16349_v36 }
 0x318   : > { %v12605_v51 = vpack.c.bf16 %v2210_v5, %v2194_v15  ;;  %v12607_v42 = vpack.c.bf16 %v2212_v58, %v2196_v24 }
 0x319   : > { %v1312_v55 = vpop.f32.mrb[16].mxu1  ;;  %v1425_v37 = vpop.f32.mrb[16].mxu0  ;;  %v12609_v28 = vpack.c.bf16 %v2211_v32, %v2195_v44  ;;  %v12611_v54 = vpack.c.bf16 %v2213_v57, %v2197_v17 }
 0x31a   : > { %v1313_v14 = vadd.f32 %v1312_v55, %v12517_v59  ;;  %v1426_v18 = vadd.f32 %v1425_v37, %v12521_v40  ;;  %v1314_v19 = vpop.f32.mrb[17].mxu1  ;;  %v1427_v21 = vpop.f32.mrb[17].mxu0 }
 0x31b   : > { %v1315_v56 = vadd.f32 %v1314_v19, %v12525_v4  ;;  %v1428_v22 = vadd.f32 %v1427_v21, %v12529_v13  ;;  %v1316_v25 = vpop.f32.mrb[18].mxu1  ;;  %v1429_v53 = vpop.f32.mrb[18].mxu0 }
 0x31c   : > { %v1317_v33 = vadd.f32 %v1316_v25, %v12517_v59  ;;  %v1430_v35 = vadd.f32 %v1429_v53, %v12521_v40  ;;  %v1318_v2 = vpop.f32.mrb[19].mxu1  ;;  %v1431_v27 = vpop.f32.mrb[19].mxu0  ;;  %v2226_v46 = vmax.f32 %v1313_v14, 0.0  ;;  %v2228_v6 = vmax.f32 %v1426_v18, 0.0 }
 0x31d   : > { %v1319_v60 = vadd.f32 %v1318_v2, %v12525_v4  ;;  %v1432_v39 = vadd.f32 %v1431_v27, %v12529_v13  ;;  %v2227_v5 = vmax.f32 %v1315_v56, 0.0  ;;  %v2229_v58 = vmax.f32 %v1428_v22, 0.0 }
 0x31e   : > { %v2242_v15 = vmax.f32 %v1317_v33, 0.0  ;;  %v2244_v24 = vmax.f32 %v1430_v35, 0.0  ;;  %9283 = vmatmul.mubr.msk.bf16.gmra.mrb[124].mxu1 %vm371_vm0, %v12195_v26  ;;  %9291 = vmatmul.mubr.msk.bf16.gmra.mrb[124].mxu0 %vm371_vm0, %v12195_v26 }
 0x31f   : > { %v2243_v44 = vmax.f32 %v1319_v60, 0.0  ;;  %v2245_v17 = vmax.f32 %v1432_v39, 0.0  ;;  %2028 = vmatprep.mubr.bf16.mxu1 %v16349_v36  ;;  %2141 = vmatprep.mubr.bf16.mxu0 %v16349_v36 }
 0x320   : > { %v12627_v32 = vpack.c.bf16 %v2242_v15, %v2226_v46  ;;  %v12629_v57 = vpack.c.bf16 %v2244_v24, %v2228_v6 }
 0x321   : > { %v1322_v55 = vpop.f32.mrb[20].mxu1  ;;  %v1435_v37 = vpop.f32.mrb[20].mxu0  ;;  %v12631_v14 = vpack.c.bf16 %v2243_v44, %v2227_v5  ;;  %v12633_v18 = vpack.c.bf16 %v2245_v17, %v2229_v58 }
 0x322   : > { %v1323_v26 = vadd.f32 %v1322_v55, %v12517_v59  ;;  %v1436_v19 = vadd.f32 %v1435_v37, %v12521_v40  ;;  %v1324_v21 = vpop.f32.mrb[21].mxu1  ;;  %v1437_v56 = vpop.f32.mrb[21].mxu0 }
 0x323   : > { %v1325_v22 = vadd.f32 %v1324_v21, %v12525_v4  ;;  %v1438_v25 = vadd.f32 %v1437_v56, %v12529_v13  ;;  %v1326_v53 = vpop.f32.mrb[22].mxu1  ;;  %v1439_v33 = vpop.f32.mrb[22].mxu0 }
 0x324   : > { %v1327_v35 = vadd.f32 %v1326_v53, %v12517_v59  ;;  %v1440_v2 = vadd.f32 %v1439_v33, %v12521_v40  ;;  %v1328_v27 = vpop.f32.mrb[23].mxu1  ;;  %v1441_v60 = vpop.f32.mrb[23].mxu0  ;;  %v2258_v6 = vmax.f32 %v1323_v26, 0.0  ;;  %v2260_v15 = vmax.f32 %v1436_v19, 0.0 }
 0x325   : > { %v1329_v39 = vadd.f32 %v1328_v27, %v12525_v4  ;;  %v1442_v46 = vadd.f32 %v1441_v60, %v12529_v13  ;;  %v2259_v58 = vmax.f32 %v1325_v22, 0.0  ;;  %v2261_v44 = vmax.f32 %v1438_v25, 0.0 }
 0x326   : > { %v2274_v24 = vmax.f32 %v1327_v35, 0.0  ;;  %v2276_v5 = vmax.f32 %v1440_v2, 0.0  ;;  %9284 = vmatmul.mubr.msk.bf16.gmra.mrb[128].mxu1 %vm371_vm0, %v12215_v41  ;;  %9292 = vmatmul.mubr.msk.bf16.gmra.mrb[128].mxu0 %vm371_vm0, %v12215_v41 }
 0x327   : > { %v2275_v17 = vmax.f32 %v1329_v39, 0.0  ;;  %v2277_v55 = vmax.f32 %v1442_v46, 0.0  ;;  %2038 = vmatprep.mubr.bf16.mxu1 %v16349_v36  ;;  %2151 = vmatprep.mubr.bf16.mxu0 %v16349_v36 }
 0x328   : > { %v12649_v37 = vpack.c.bf16 %v2274_v24, %v2258_v6  ;;  %v12651_v26 = vpack.c.bf16 %v2276_v5, %v2260_v15 }
 0x329   : > { %v1332_v19 = vpop.f32.mrb[24].mxu1  ;;  %v1445_v21 = vpop.f32.mrb[24].mxu0  ;;  %v12653_v56 = vpack.c.bf16 %v2275_v17, %v2259_v58  ;;  %v12655_v53 = vpack.c.bf16 %v2277_v55, %v2261_v44 }
 0x32a   : > { %v1333_v41 = vadd.f32 %v1332_v19, %v12517_v59  ;;  %v1446_v22 = vadd.f32 %v1445_v21, %v12521_v40  ;;  %v1334_v25 = vpop.f32.mrb[25].mxu1  ;;  %v1447_v33 = vpop.f32.mrb[25].mxu0 }
 0x32b   : > { %v1335_v35 = vadd.f32 %v1334_v25, %v12525_v4  ;;  %v1448_v2 = vadd.f32 %v1447_v33, %v12529_v13  ;;  %v1336_v27 = vpop.f32.mrb[26].mxu1  ;;  %v1449_v60 = vpop.f32.mrb[26].mxu0 }
 0x32c   : > { %v1337_v39 = vadd.f32 %v1336_v27, %v12517_v59  ;;  %v1450_v46 = vadd.f32 %v1449_v60, %v12521_v40  ;;  %v1338_v6 = vpop.f32.mrb[27].mxu1  ;;  %v1451_v15 = vpop.f32.mrb[27].mxu0  ;;  %v2290_v58 = vmax.f32 %v1333_v41, 0.0  ;;  %v2292_v44 = vmax.f32 %v1446_v22, 0.0 }
 0x32d   : > { %v1339_v24 = vadd.f32 %v1338_v6, %v12525_v4  ;;  %v1452_v5 = vadd.f32 %v1451_v15, %v12529_v13  ;;  %v2291_v19 = vmax.f32 %v1335_v35, 0.0  ;;  %v2293_v21 = vmax.f32 %v1448_v2, 0.0 }
 0x32e   : > { %v2306_v17 = vmax.f32 %v1337_v39, 0.0  ;;  %v2308_v55 = vmax.f32 %v1450_v46, 0.0  ;;  %9285 = vmatmul.mubr.msk.bf16.gmra.mrb[132].mxu1 %vm371_vm0, %v12233_v20  ;;  %9293 = vmatmul.mubr.msk.bf16.gmra.mrb[132].mxu0 %vm371_vm0, %v12233_v20 }
 0x32f   : > { %v2307_v25 = vmax.f32 %v1339_v24, 0.0  ;;  %v2309_v33 = vmax.f32 %v1452_v5, 0.0  ;;  %3606 = vmatprep.mubr.bf16.mxu1 %v12581_v61  ;;  %3703 = vmatprep.mubr.bf16.mxu0 %v12583_v0  ;;  %v11222_v5 = vld [vmem:[%s16345_s5 + $0x100] sm:$0xff]  }
 0x330   : > { %v12671_v27 = vpack.c.bf16 %v2306_v17, %v2290_v58  ;;  %v12673_v41 = vpack.c.bf16 %v2308_v55, %v2292_v44 }
 0x331   : > { %v1342_v22 = vpop.f32.mrb[28].mxu1  ;;  %v1455_v60 = vpop.f32.mrb[28].mxu0  ;;  %v12675_v39 = vpack.c.bf16 %v2307_v25, %v2291_v19  ;;  %v12677_v46 = vpack.c.bf16 %v2309_v33, %v2293_v21  ;;  %v11224_v19 = vld [vmem:[%s16345_s5 + $0x180] sm:$0xff]   ;;  %v11225_v33 = vld [vmem:[%s16345_s5 + $0x148] sm:$0xff]  }
 0x332   : > { %v1343_v20 = vadd.f32 %v1342_v22, %v12517_v59  ;;  %v1456_v35 = vadd.f32 %v1455_v60, %v12521_v40  ;;  %v1344_v2 = vpop.f32.mrb[29].mxu1  ;;  %v1457_v6 = vpop.f32.mrb[29].mxu0  ;;  %v11227_v22 = vld [vmem:[%s16345_s5 + $0x1c8] sm:$0xff]  }
 0x333   : > { %v1345_v61 = vadd.f32 %v1344_v2, %v12525_v4  ;;  %v1458_v0 = vadd.f32 %v1457_v6, %v12529_v13  ;;  %v1346_v15 = vpop.f32.mrb[30].mxu1  ;;  %v1459_v24 = vpop.f32.mrb[30].mxu0 }
 0x334   : > { %v1347_v58 = vadd.f32 %v1346_v15, %v12517_v59  ;;  %v1460_v44 = vadd.f32 %v1459_v24, %v12521_v40  ;;  %v1348_v17 = vpop.f32.mrb[31].mxu1  ;;  %v1461_v55 = vpop.f32.mrb[31].mxu0  ;;  %v2322_v60 = vmax.f32 %v1343_v20, 0.0  ;;  %v2324_v2 = vmax.f32 %v1456_v35, 0.0 }
 0x335   : > { %v1349_v21 = vadd.f32 %v1348_v17, %v12525_v4  ;;  %v1462_v25 = vadd.f32 %v1461_v55, %v12529_v13  ;;  %v2323_v24 = vmax.f32 %v1345_v61, 0.0  ;;  %v2325_v17 = vmax.f32 %v1458_v0, 0.0 }
 0x336   : > { %v2338_v6 = vmax.f32 %v1347_v58, 0.0  ;;  %v2340_v15 = vmax.f32 %v1460_v44, 0.0  ;;  %3607 = vmatmul.mubr.bf16.vlgmr.msra.gmra.mrb[136].mxu1 %v12571_v9  ;;  %3704 = vmatmul.mubr.bf16.vlgmr.msra.gmra.mrb[136].mxu0 %v12573_v49  ;;  %v11228_v9 = vld [vmem:[%s16345_s5 + $0x188] sm:$0xff]   ;;  %v11229_v49 = vld [vmem:[%s16345_s5 + $0x150] sm:$0xff]  }
 0x337   : > { %v2339_v36 = vmax.f32 %v1349_v21, 0.0  ;;  %v2341_v55 = vmax.f32 %v1462_v25, 0.0  ;;  %10177 = vmatpush3.bf16.msra.mxu1 %v11222_v5  ;;  %3614 = vmatprep.mubr.bf16.mxu1 %v12609_v28 }
 0x338   : > { %3711 = vmatprep.mubr.bf16.mxu0 %v12611_v54  ;;  %10241 = vmatpush3.bf16.msra.mxu0 %v11224_v19  ;;  %v12712_v20 = vpack.c.bf16 %v2338_v6, %v2322_v60  ;;  %v12714_v35 = vpack.c.bf16 %v2340_v15, %v2324_v2  ;;  %v11231_v54 = vld [vmem:[%s16345_s5 + $0x1d0] sm:$0xff]  }
 0x339   : > { %v1352_v28 = vpop.f32.mrb[32].mxu1  ;;  %v1465_v61 = vpop.f32.mrb[32].mxu0  ;;  %10178 = vmatprep.subr.bf16.mxu1 %v11225_v33  ;;  %10242 = vmatprep.subr.bf16.mxu0 %v11227_v22  ;;  %v12719_v0 = vpack.c.bf16 %v2339_v36, %v2323_v24  ;;  %v12721_v5 = vpack.c.bf16 %v2341_v55, %v2325_v17  ;;  %v11230_v24 = vld [vmem:[%s16345_s5 + $0x110] sm:$0xff]  }
 0x33a   : > { %v1353_v58 = vadd.f32 %v1352_v28, %v12517_v59  ;;  %v1466_v44 = vadd.f32 %v1465_v61, %v12521_v40  ;;  %v1354_v19 = vpop.f32.mrb[33].mxu1  ;;  %v1467_v21 = vpop.f32.mrb[33].mxu0  ;;  %v11232_v17 = vld [vmem:[%s16345_s5 + $0x190] sm:$0xff]   ;;  %v12738_v28 = vsub.s32 4, %v11709_v29  ;;  %v12741_v61 = vsub.s32 6, %v11709_v29 }
 0x33b   : > { %v1355_v25 = vadd.f32 %v1354_v19, %v12525_v4  ;;  %v1468_v60 = vadd.f32 %v1467_v21, %v12529_v13  ;;  %v1356_v33 = vpop.f32.mrb[34].mxu1  ;;  %v1469_v22 = vpop.f32.mrb[34].mxu0  ;;  %10179 = vmatpush3.bf16.msra.mxu1 %v11226_v7 }
 0x33c   : > { %v1357_v2 = vadd.f32 %v1356_v33, %v12517_v59  ;;  %v1470_v36 = vadd.f32 %v1469_v22, %v12521_v40  ;;  %v1358_v6 = vpop.f32.mrb[35].mxu1  ;;  %v1471_v15 = vpop.f32.mrb[35].mxu0  ;;  %10243 = vmatpush3.bf16.msra.mxu0 %v11228_v9  ;;  %10180 = vmatprep.subr.bf16.mxu1 %v11229_v49  ;;  %v11233_v9 = vld [vmem:[%s16345_s5 + $0x158] sm:$0xff]   ;;  %v2354_v19 = vmax.f32 %v1353_v58, 0.0  ;;  %v2356_v21 = vmax.f32 %v1466_v44, 0.0 }
 0x33d   : > { %v1359_v55 = vadd.f32 %v1358_v6, %v12525_v4  ;;  %v1472_v7 = vadd.f32 %v1471_v15, %v12529_v13  ;;  %10244 = vmatprep.subr.bf16.mxu0 %v11231_v54  ;;  %v11235_v49 = vld [vmem:[%s16345_s5 + $0x1d8] sm:$0xff]   ;;  %v2355_v54 = vmax.f32 %v1355_v25, 0.0  ;;  %v2357_v6 = vmax.f32 %v1468_v60, 0.0  ;;  %v11237_v60 = vld [vmem:[%s16345_s5 + $0x160] sm:$0xff]  }
 0x33e   : > { %v2370_v33 = vmax.f32 %v1357_v2, 0.0  ;;  %v2372_v22 = vmax.f32 %v1470_v36, 0.0  ;;  %3615 = vmatmul.mubr.bf16.gmra.mrb[140].mxu1 %v12605_v51  ;;  %3712 = vmatmul.mubr.bf16.gmra.mrb[140].mxu0 %v12607_v42  ;;  %v11234_v58 = vld [vmem:[%s16345_s5 + $0x118] sm:$0xff]   ;;  %v11239_v2 = vld [vmem:[%s16345_s5 + $0x1e0] sm:$0xff]  }
 0x33f   : > { %v2371_v15 = vmax.f32 %v1359_v55, 0.0  ;;  %v2373_v16 = vmax.f32 %v1472_v7, 0.0  ;;  %3622 = vmatprep.mubr.bf16.mxu1 %v12631_v14  ;;  %3719 = vmatprep.mubr.bf16.mxu0 %v12633_v18  ;;  %v11236_v51 = vld [vmem:[%s16345_s5 + $0x198] sm:$0xff]   ;;  %v12767_v18 = vsub.s32 7, %v11709_v29 }
 0x340   : > { %10181 = vmatpush3.bf16.msra.mxu1 %v11230_v24  ;;  %10245 = vmatpush3.bf16.msra.mxu0 %v11232_v17  ;;  %v12762_v42 = vpack.c.bf16 %v2370_v33, %v2354_v19  ;;  %v12764_v44 = vpack.c.bf16 %v2372_v22, %v2356_v21  ;;  %v12785_v33 = vrot.slane %v12494_v48, %v12738_v28 }
 0x341   : > { %v1362_v14 = vpop.f32.mrb[36].mxu1  ;;  %v1475_v25 = vpop.f32.mrb[36].mxu0  ;;  %10182 = vmatprep.subr.bf16.mxu1 %v11233_v9  ;;  %10246 = vmatprep.subr.bf16.mxu0 %v11235_v49  ;;  %v12775_v36 = vpack.c.bf16 %v2371_v15, %v2355_v54  ;;  %v12777_v24 = vpack.c.bf16 %v2373_v16, %v2357_v6  ;;  %v12789_v16 = vrot.slane %v12494_v48, %v12741_v61 }
 0x342   : > { %v1363_v17 = vadd.f32 %v1362_v14, %v12517_v59  ;;  %v1476_v55 = vadd.f32 %v1475_v25, %v12521_v40  ;;  %v1364_v29 = vpop.f32.mrb[37].mxu1  ;;  %v1477_v7 = vpop.f32.mrb[37].mxu0  ;;  %v12795_v14 = vrot.slane %v12494_v48, %v12754_v62  ;;  %v11238_v25 = vld [vmem:[%s16345_s5 + $0x120] sm:$0xff]  }
 0x343   : > { %v1365_v9 = vadd.f32 %v1364_v29, %v12525_v4  ;;  %v1478_v49 = vadd.f32 %v1477_v7, %v12529_v13  ;;  %v1366_v19 = vpop.f32.mrb[38].mxu1  ;;  %v1479_v21 = vpop.f32.mrb[38].mxu0  ;;  %v11240_v29 = vld [vmem:[%s16345_s5 + $0x1a0] sm:$0xff]   ;;  %v12807_v7 = vrot.slane %v12494_v48, %v12767_v18 }
 0x344   : > { %v1367_v22 = vadd.f32 %v1366_v19, %v12517_v59  ;;  %v1480_v54 = vadd.f32 %v1479_v21, %v12521_v40  ;;  %v1368_v6 = vpop.f32.mrb[39].mxu1  ;;  %v1481_v15 = vpop.f32.mrb[39].mxu0  ;;  %10183 = vmatpush3.bf16.msra.mxu1 %v11234_v58  ;;  %10247 = vmatpush3.bf16.msra.mxu0 %v11236_v51  ;;  %v11241_v58 = vld [vmem:[%s16345_s5 + $0x168] sm:$0xff]   ;;  %v2386_v19 = vmax.f32 %v1363_v17, 0.0  ;;  %v2388_v21 = vmax.f32 %v1476_v55, 0.0 }
 0x345   : > { %v1369_v59 = vadd.f32 %v1368_v6, %v12525_v4  ;;  %v1482_v40 = vadd.f32 %v1481_v15, %v12529_v13  ;;  %10184 = vmatprep.subr.bf16.mxu1 %v11237_v60  ;;  %10248 = vmatprep.subr.bf16.mxu0 %v11239_v2  ;;  %v11243_v51 = vld [vmem:[%s16345_s5 + $0x1e8] sm:$0xff]   ;;  %v2387_v48 = vmax.f32 %v1365_v9, 0.0  ;;  %v2389_v13 = vmax.f32 %v1478_v49, 0.0 }
 0x346   : > { %v2402_v38 = vmax.f32 %v1367_v22, 0.0  ;;  %v2404_v4 = vmax.f32 %v1480_v54, 0.0  ;;  %3623 = vmatmul.mubr.bf16.gmra.mrb[144].mxu1 %v12627_v32  ;;  %3720 = vmatmul.mubr.bf16.gmra.mrb[144].mxu0 %v12629_v57  ;;  %v11242_v17 = vld [vmem:[%s16345_s5 + $0x128] sm:$0xff]   ;;  %v11247_v54 = vld [vmem:[%s16345_s5 + $0x1f0] sm:$0xff]  }
 0x347   : > { %v2403_v60 = vmax.f32 %v1369_v59, 0.0  ;;  %v2405_v2 = vmax.f32 %v1482_v40, 0.0  ;;  %3630 = vmatprep.mubr.bf16.mxu1 %v12653_v56  ;;  %3727 = vmatprep.mubr.bf16.mxu0 %v12655_v53  ;;  %v11244_v32 = vld [vmem:[%s16345_s5 + $0x1a8] sm:$0xff]   ;;  %v11245_v56 = vld [vmem:[%s16345_s5 + $0x170] sm:$0xff]  }
 0x348   : > { %10185 = vmatpush3.bf16.msra.mxu1 %v11238_v25  ;;  %10249 = vmatpush3.bf16.msra.mxu0 %v11240_v29  ;;  %v12825_v55 = vpack.c.bf16 %v2402_v38, %v2386_v19  ;;  %v12827_v57 = vpack.c.bf16 %v2404_v4, %v2388_v21 }
 0x349   : > { %v1518_v9 = vpop.f32.mrb[40].mxu1  ;;  %v1631_v49 = vpop.f32.mrb[40].mxu0  ;;  %10186 = vmatprep.subr.bf16.mxu1 %v11241_v58  ;;  %10250 = vmatprep.subr.bf16.mxu0 %v11243_v51  ;;  %v12832_v53 = vpack.c.bf16 %v2403_v60, %v2387_v48  ;;  %v12834_v22 = vpack.c.bf16 %v2405_v2, %v2389_v13  ;;  %v11246_v48 = vld [vmem:[%s16345_s5 + $0x130] sm:$0xff]  }
 0x34a   : > { %v1519_v38 = vadd.f32 %v1518_v9, %v12785_v33  ;;  %v1632_v6 = vadd.f32 %v1631_v49, %v12789_v16  ;;  %v1520_v15 = vpop.f32.mrb[41].mxu1  ;;  %v1633_v25 = vpop.f32.mrb[41].mxu0  ;;  %v11248_v13 = vld [vmem:[%s16345_s5 + $0x1b0] sm:$0xff]   ;;  %v11249_v9 = vld [vmem:[%s16345_s5 + $0x178] sm:$0xff]  }
 0x34b   : > { %v1521_v29 = vadd.f32 %v1520_v15, %v12795_v14  ;;  %v1634_v59 = vadd.f32 %v1633_v25, %v12807_v7  ;;  %v1522_v40 = vpop.f32.mrb[42].mxu1  ;;  %v1635_v58 = vpop.f32.mrb[42].mxu0 }
 0x34c   : > { %v1523_v51 = vadd.f32 %v1522_v40, %v12785_v33  ;;  %v1636_v19 = vadd.f32 %v1635_v58, %v12789_v16  ;;  %v1524_v21 = vpop.f32.mrb[43].mxu1  ;;  %v1637_v4 = vpop.f32.mrb[43].mxu0  ;;  %10187 = vmatpush3.bf16.msra.mxu1 %v11242_v17  ;;  %10251 = vmatpush3.bf16.msra.mxu0 %v11244_v32  ;;  %v11251_v17 = vld [vmem:[%s16345_s5 + $0x1f8] sm:$0xff]   ;;  %v2166_v32 = vmax.f32 %v1519_v38, 0.0  ;;  %v2168_v49 = vmax.f32 %v1632_v6, 0.0 }
 0x34d   : > { %v1525_v60 = vadd.f32 %v1524_v21, %v12795_v14  ;;  %v1638_v2 = vadd.f32 %v1637_v4, %v12807_v7  ;;  %10188 = vmatprep.subr.bf16.mxu1 %v11245_v56  ;;  %10252 = vmatprep.subr.bf16.mxu0 %v11247_v54  ;;  %v2167_v40 = vmax.f32 %v1521_v29, 0.0  ;;  %v2169_v58 = vmax.f32 %v1634_v59, 0.0  ;;  %v11253_v29 = vld [vmem:[%s16345_s5 + $0x240] sm:$0xff]  }
 0x34e   : > { %v2182_v15 = vmax.f32 %v1523_v51, 0.0  ;;  %v2184_v25 = vmax.f32 %v1636_v19, 0.0  ;;  %3631 = vmatmul.mubr.bf16.gmra.mrb[148].mxu1 %v12649_v37  ;;  %3728 = vmatmul.mubr.bf16.gmra.mrb[148].mxu0 %v12651_v26  ;;  %v11250_v37 = vld [vmem:[%s16345_s5 + $0x138] sm:$0xff]   ;;  %v11255_v59 = vld [vmem:[%s16345_s5 + $0x2c0] sm:$0xff]  }
 0x34f   : > { %v2183_v56 = vmax.f32 %v1525_v60, 0.0  ;;  %v2185_v54 = vmax.f32 %v1638_v2, 0.0  ;;  %3638 = vmatprep.mubr.bf16.mxu1 %v12675_v39  ;;  %3735 = vmatprep.mubr.bf16.mxu0 %v12677_v46  ;;  %v11252_v26 = vld [vmem:[%s16345_s5 + $0x1b8] sm:$0xff]  }
 0x350   : > { %v12863_v21 = vpack.c.bf16 %v2182_v15, %v2166_v32  ;;  %v12865_v4 = vpack.c.bf16 %v2184_v25, %v2168_v49  ;;  %10189 = vmatpush3.bf16.msra.mxu1 %v11246_v48  ;;  %10253 = vmatpush3.bf16.msra.mxu0 %v11248_v13 }
 0x351   : > { %v1528_v38 = vpop.f32.mrb[44].mxu1  ;;  %v1641_v6 = vpop.f32.mrb[44].mxu0  ;;  %10190 = vmatprep.subr.bf16.mxu1 %v11249_v9  ;;  %v12873_v39 = vpack.c.bf16 %v2183_v56, %v2167_v40  ;;  %10254 = vmatprep.subr.bf16.mxu0 %v11251_v17  ;;  %v12875_v46 = vpack.c.bf16 %v2185_v54, %v2169_v58 }
 0x352   : > { %v1529_v51 = vadd.f32 %v1528_v38, %v12785_v33  ;;  %v1642_v19 = vadd.f32 %v1641_v6, %v12789_v16  ;;  %v1530_v48 = vpop.f32.mrb[45].mxu1  ;;  %v1643_v13 = vpop.f32.mrb[45].mxu0 }
 0x353   : > { %v1531_v60 = vadd.f32 %v1530_v48, %v12795_v14  ;;  %v1644_v2 = vadd.f32 %v1643_v13, %v12807_v7  ;;  %v1532_v9 = vpop.f32.mrb[46].mxu1  ;;  %v1645_v17 = vpop.f32.mrb[46].mxu0 }
 0x354   : > { %v1533_v32 = vadd.f32 %v1532_v9, %v12785_v33  ;;  %v1646_v49 = vadd.f32 %v1645_v17, %v12789_v16  ;;  %v1534_v15 = vpop.f32.mrb[47].mxu1  ;;  %v1647_v25 = vpop.f32.mrb[47].mxu0  ;;  %10191 = vmatpush3.bf16.msra.mxu1 %v11250_v37  ;;  %10255 = vmatpush3.bf16.msra.mxu0 %v11252_v26  ;;  %v2198_v56 = vmax.f32 %v1529_v51, 0.0  ;;  %v2200_v54 = vmax.f32 %v1642_v19, 0.0 }
 0x355   : > { %v1535_v40 = vadd.f32 %v1534_v15, %v12795_v14  ;;  %v1648_v58 = vadd.f32 %v1647_v25, %v12807_v7  ;;  %10304 = vmatprep.subr.bf16.mxu1 %v11253_v29  ;;  %10368 = vmatprep.subr.bf16.mxu0 %v11255_v59  ;;  %v2199_v48 = vmax.f32 %v1531_v60, 0.0  ;;  %v2201_v13 = vmax.f32 %v1644_v2, 0.0 }
 0x356   : > { %v2214_v38 = vmax.f32 %v1533_v32, 0.0  ;;  %v2216_v6 = vmax.f32 %v1646_v49, 0.0  ;;  %3639 = vmatmul.mubr.bf16.gmra.mrb[152].mxu1 %v12671_v27  ;;  %3736 = vmatmul.mubr.bf16.gmra.mrb[152].mxu0 %v12673_v41 }
 0x357   : > { %v2215_v9 = vmax.f32 %v1535_v40, 0.0  ;;  %v2217_v17 = vmax.f32 %v1648_v58, 0.0  ;;  %3646 = vmatprep.mubr.bf16.mxu1 %v12719_v0  ;;  %3743 = vmatprep.mubr.bf16.mxu0 %v12721_v5 }
 0x358   : > { %v12895_v37 = vpack.c.bf16 %v2214_v38, %v2198_v56  ;;  %v12897_v26 = vpack.c.bf16 %v2216_v6, %v2200_v54 }
 0x359   : > { %v1538_v29 = vpop.f32.mrb[48].mxu1  ;;  %v1651_v59 = vpop.f32.mrb[48].mxu0  ;;  %v12899_v51 = vpack.c.bf16 %v2215_v9, %v2199_v48  ;;  %v12901_v19 = vpack.c.bf16 %v2217_v17, %v2201_v13 }
 0x35a   : > { %v1539_v27 = vadd.f32 %v1538_v29, %v12785_v33  ;;  %v1652_v41 = vadd.f32 %v1651_v59, %v12789_v16  ;;  %v1540_v60 = vpop.f32.mrb[49].mxu1  ;;  %v1653_v2 = vpop.f32.mrb[49].mxu0 }
 0x35b   : > { %v1541_v0 = vadd.f32 %v1540_v60, %v12795_v14  ;;  %v1654_v5 = vadd.f32 %v1653_v2, %v12807_v7  ;;  %v1542_v32 = vpop.f32.mrb[50].mxu1  ;;  %v1655_v49 = vpop.f32.mrb[50].mxu0 }
 0x35c   : > { %v1543_v15 = vadd.f32 %v1542_v32, %v12785_v33  ;;  %v1656_v25 = vadd.f32 %v1655_v49, %v12789_v16  ;;  %v1544_v40 = vpop.f32.mrb[51].mxu1  ;;  %v1657_v58 = vpop.f32.mrb[51].mxu0  ;;  %v2230_v38 = vmax.f32 %v1539_v27, 0.0  ;;  %v2232_v6 = vmax.f32 %v1652_v41, 0.0 }
 0x35d   : > { %v1545_v56 = vadd.f32 %v1544_v40, %v12795_v14  ;;  %v1658_v54 = vadd.f32 %v1657_v58, %v12807_v7  ;;  %v2231_v9 = vmax.f32 %v1541_v0, 0.0  ;;  %v2233_v17 = vmax.f32 %v1654_v5, 0.0 }
 0x35e   : > { %v2246_v48 = vmax.f32 %v1543_v15, 0.0  ;;  %v2248_v13 = vmax.f32 %v1656_v25, 0.0  ;;  %3647 = vmatmul.mubr.bf16.gmra.mrb[156].mxu1 %v12712_v20  ;;  %3744 = vmatmul.mubr.bf16.gmra.mrb[156].mxu0 %v12714_v35 }
 0x35f   : > { %v2247_v29 = vmax.f32 %v1545_v56, 0.0  ;;  %v2249_v59 = vmax.f32 %v1658_v54, 0.0  ;;  %3654 = vmatprep.mubr.bf16.mxu1 %v12775_v36  ;;  %3751 = vmatprep.mubr.bf16.mxu0 %v12777_v24 }
 0x360   : > { %v12915_v60 = vpack.c.bf16 %v2246_v48, %v2230_v38  ;;  %v12917_v2 = vpack.c.bf16 %v2248_v13, %v2232_v6 }
 0x361   : > { %v1548_v27 = vpop.f32.mrb[52].mxu1  ;;  %v1661_v41 = vpop.f32.mrb[52].mxu0  ;;  %v12919_v32 = vpack.c.bf16 %v2247_v29, %v2231_v9  ;;  %v12921_v49 = vpack.c.bf16 %v2249_v59, %v2233_v17 }
 0x362   : > { %v1549_v20 = vadd.f32 %v1548_v27, %v12785_v33  ;;  %v1662_v35 = vadd.f32 %v1661_v41, %v12789_v16  ;;  %v1550_v0 = vpop.f32.mrb[53].mxu1  ;;  %v1663_v5 = vpop.f32.mrb[53].mxu0 }
 0x363   : > { %v1551_v36 = vadd.f32 %v1550_v0, %v12795_v14  ;;  %v1664_v24 = vadd.f32 %v1663_v5, %v12807_v7  ;;  %v1552_v15 = vpop.f32.mrb[54].mxu1  ;;  %v1665_v25 = vpop.f32.mrb[54].mxu0 }
 0x364   : > { %v1553_v40 = vadd.f32 %v1552_v15, %v12785_v33  ;;  %v1666_v58 = vadd.f32 %v1665_v25, %v12789_v16  ;;  %v1554_v56 = vpop.f32.mrb[55].mxu1  ;;  %v1667_v54 = vpop.f32.mrb[55].mxu0  ;;  %v2262_v48 = vmax.f32 %v1549_v20, 0.0  ;;  %v2264_v13 = vmax.f32 %v1662_v35, 0.0 }
 0x365   : > { %v1555_v38 = vadd.f32 %v1554_v56, %v12795_v14  ;;  %v1668_v6 = vadd.f32 %v1667_v54, %v12807_v7  ;;  %v2263_v29 = vmax.f32 %v1551_v36, 0.0  ;;  %v2265_v59 = vmax.f32 %v1664_v24, 0.0 }
 0x366   : > { %v2278_v9 = vmax.f32 %v1553_v40, 0.0  ;;  %v2280_v17 = vmax.f32 %v1666_v58, 0.0  ;;  %3655 = vmatmul.mubr.bf16.gmra.mrb[160].mxu1 %v12762_v42  ;;  %3752 = vmatmul.mubr.bf16.gmra.mrb[160].mxu0 %v12764_v44 }
 0x367   : > { %v2279_v27 = vmax.f32 %v1555_v38, 0.0  ;;  %v2281_v41 = vmax.f32 %v1668_v6, 0.0  ;;  %3662 = vmatprep.mubr.bf16.mxu1 %v12832_v53  ;;  %3759 = vmatprep.mubr.bf16.mxu0 %v12834_v22 }
 0x368   : > { %v12935_v0 = vpack.c.bf16 %v2278_v9, %v2262_v48  ;;  %v12937_v5 = vpack.c.bf16 %v2280_v17, %v2264_v13 }
 0x369   : > { %v1558_v20 = vpop.f32.mrb[56].mxu1  ;;  %v1671_v35 = vpop.f32.mrb[56].mxu0  ;;  %v12939_v15 = vpack.c.bf16 %v2279_v27, %v2263_v29  ;;  %v12941_v25 = vpack.c.bf16 %v2281_v41, %v2265_v59 }
 0x36a   : > { %v1559_v42 = vadd.f32 %v1558_v20, %v12785_v33  ;;  %v1672_v44 = vadd.f32 %v1671_v35, %v12789_v16  ;;  %v1560_v36 = vpop.f32.mrb[57].mxu1  ;;  %v1673_v24 = vpop.f32.mrb[57].mxu0 }
 0x36b   : > { %v1561_v53 = vadd.f32 %v1560_v36, %v12795_v14  ;;  %v1674_v22 = vadd.f32 %v1673_v24, %v12807_v7  ;;  %v1562_v40 = vpop.f32.mrb[58].mxu1  ;;  %v1675_v58 = vpop.f32.mrb[58].mxu0 }
 0x36c   : > { %v1563_v56 = vadd.f32 %v1562_v40, %v12785_v33  ;;  %v1676_v54 = vadd.f32 %v1675_v58, %v12789_v16  ;;  %v1564_v38 = vpop.f32.mrb[59].mxu1  ;;  %v1677_v6 = vpop.f32.mrb[59].mxu0  ;;  %v2294_v9 = vmax.f32 %v1559_v42, 0.0  ;;  %v2296_v17 = vmax.f32 %v1672_v44, 0.0 }
 0x36d   : > { %v1565_v48 = vadd.f32 %v1564_v38, %v12795_v14  ;;  %v1678_v13 = vadd.f32 %v1677_v6, %v12807_v7  ;;  %v2295_v27 = vmax.f32 %v1561_v53, 0.0  ;;  %v2297_v41 = vmax.f32 %v1674_v22, 0.0  ;;  %v11254_v38 = vld [vmem:[%s16345_s5 + $0x200] sm:$0xff]  }
 0x36e   : > { %v2310_v29 = vmax.f32 %v1563_v56, 0.0  ;;  %v2312_v59 = vmax.f32 %v1676_v54, 0.0  ;;  %3663 = vmatmul.mubr.bf16.gmra.mrb[164].mxu1 %v12825_v55  ;;  %3760 = vmatmul.mubr.bf16.gmra.mrb[164].mxu0 %v12827_v57 }
 0x36f   : > { %v2311_v20 = vmax.f32 %v1565_v48, 0.0  ;;  %v2313_v35 = vmax.f32 %v1678_v13, 0.0  ;;  %3800 = vmatprep.mubr.bf16.mxu1 %v12873_v39  ;;  %3897 = vmatprep.mubr.bf16.mxu0 %v12875_v46 }
 0x370   : > { %v12955_v36 = vpack.c.bf16 %v2310_v29, %v2294_v9  ;;  %v12957_v24 = vpack.c.bf16 %v2312_v59, %v2296_v17  ;;  %v11256_v17 = vld [vmem:[%s16345_s5 + $0x280] sm:$0xff]  }
 0x371   : > { %v1568_v42 = vpop.f32.mrb[60].mxu1  ;;  %v1681_v44 = vpop.f32.mrb[60].mxu0  ;;  %v12959_v40 = vpack.c.bf16 %v2311_v20, %v2295_v27  ;;  %v12961_v58 = vpack.c.bf16 %v2313_v35, %v2297_v41  ;;  %v11257_v27 = vld [vmem:[%s16345_s5 + $0x248] sm:$0xff]  }
 0x372   : > { %v1569_v55 = vadd.f32 %v1568_v42, %v12785_v33  ;;  %v1682_v57 = vadd.f32 %v1681_v44, %v12789_v16  ;;  %v1570_v53 = vpop.f32.mrb[61].mxu1  ;;  %v1683_v22 = vpop.f32.mrb[61].mxu0  ;;  %v11259_v41 = vld [vmem:[%s16345_s5 + $0x2c8] sm:$0xff]  }
 0x373   : > { %v1571_v39 = vadd.f32 %v1570_v53, %v12795_v14  ;;  %v1684_v46 = vadd.f32 %v1683_v22, %v12807_v7  ;;  %v1572_v56 = vpop.f32.mrb[62].mxu1  ;;  %v1685_v54 = vpop.f32.mrb[62].mxu0 }
 0x374   : > { %v1573_v6 = vadd.f32 %v1572_v56, %v12785_v33  ;;  %v1686_v48 = vadd.f32 %v1685_v54, %v12789_v16  ;;  %v1574_v13 = vpop.f32.mrb[63].mxu1  ;;  %v1687_v9 = vpop.f32.mrb[63].mxu0  ;;  %v2326_v20 = vmax.f32 %v1569_v55, 0.0  ;;  %v2328_v35 = vmax.f32 %v1682_v57, 0.0 }
 0x375   : > { %v1575_v29 = vadd.f32 %v1574_v13, %v12795_v14  ;;  %v1688_v59 = vadd.f32 %v1687_v9, %v12807_v7  ;;  %v2327_v53 = vmax.f32 %v1571_v39, 0.0  ;;  %v2329_v22 = vmax.f32 %v1684_v46, 0.0  ;;  %v11258_v13 = vld [vmem:[%s16345_s5 + $0x208] sm:$0xff]  }
 0x376   : > { %v2342_v42 = vmax.f32 %v1573_v6, 0.0  ;;  %v2344_v44 = vmax.f32 %v1686_v48, 0.0  ;;  %3801 = vmatmul.mubr.bf16.vlgmr.msra.gmra.mrb[168].mxu1 %v12863_v21  ;;  %3898 = vmatmul.mubr.bf16.vlgmr.msra.gmra.mrb[168].mxu0 %v12865_v4  ;;  %v11260_v21 = vld [vmem:[%s16345_s5 + $0x288] sm:$0xff]   ;;  %v11261_v4 = vld [vmem:[%s16345_s5 + $0x250] sm:$0xff]  }
 0x377   : > { %v2343_v56 = vmax.f32 %v1575_v29, 0.0  ;;  %v2345_v54 = vmax.f32 %v1688_v59, 0.0  ;;  %10305 = vmatpush3.bf16.msra.mxu1 %v11254_v38  ;;  %3808 = vmatprep.mubr.bf16.mxu1 %v12899_v51 }
 0x378   : > { %3905 = vmatprep.mubr.bf16.mxu0 %v12901_v19  ;;  %10369 = vmatpush3.bf16.msra.mxu0 %v11256_v17  ;;  %v12996_v55 = vpack.c.bf16 %v2342_v42, %v2326_v20  ;;  %v12998_v57 = vpack.c.bf16 %v2344_v44, %v2328_v35  ;;  %v11263_v19 = vld [vmem:[%s16345_s5 + $0x2d0] sm:$0xff]  }
 0x379   : > { %v1578_v51 = vpop.f32.mrb[64].mxu1  ;;  %v1691_v39 = vpop.f32.mrb[64].mxu0  ;;  %10306 = vmatprep.subr.bf16.mxu1 %v11257_v27  ;;  %10370 = vmatprep.subr.bf16.mxu0 %v11259_v41  ;;  %v13003_v46 = vpack.c.bf16 %v2343_v56, %v2327_v53  ;;  %v13005_v38 = vpack.c.bf16 %v2345_v54, %v2329_v22  ;;  %v11262_v53 = vld [vmem:[%s16345_s5 + $0x210] sm:$0xff]  }
 0x37a   : > { %v1579_v6 = vadd.f32 %v1578_v51, %v12785_v33  ;;  %v1692_v48 = vadd.f32 %v1691_v39, %v12789_v16  ;;  %v1580_v9 = vpop.f32.mrb[65].mxu1  ;;  %v1693_v17 = vpop.f32.mrb[65].mxu0  ;;  %v11264_v22 = vld [vmem:[%s16345_s5 + $0x290] sm:$0xff]  }
 0x37b   : > { %v1581_v29 = vadd.f32 %v1580_v9, %v12795_v14  ;;  %v1694_v59 = vadd.f32 %v1693_v17, %v12807_v7  ;;  %v1582_v27 = vpop.f32.mrb[66].mxu1  ;;  %v1695_v41 = vpop.f32.mrb[66].mxu0  ;;  %10307 = vmatpush3.bf16.msra.mxu1 %v11258_v13  ;;  %v11265_v13 = vld [vmem:[%s16345_s5 + $0x258] sm:$0xff]  }
 0x37c   : > { %v1583_v20 = vadd.f32 %v1582_v27, %v12785_v33  ;;  %v1696_v35 = vadd.f32 %v1695_v41, %v12789_v16  ;;  %v1584_v42 = vpop.f32.mrb[67].mxu1  ;;  %v1697_v44 = vpop.f32.mrb[67].mxu0  ;;  %10371 = vmatpush3.bf16.msra.mxu0 %v11260_v21  ;;  %10308 = vmatprep.subr.bf16.mxu1 %v11261_v4  ;;  %v11267_v21 = vld [vmem:[%s16345_s5 + $0x2d8] sm:$0xff]   ;;  %v2358_v4 = vmax.f32 %v1579_v6, 0.0  ;;  %v2360_v51 = vmax.f32 %v1692_v48, 0.0  ;;  %v13034_v6 = vld [vmem:[%s16344_s4 + $0x8] sm:$0xff] }
 0x37d   : > { %v1585_v56 = vadd.f32 %v1584_v42, %v12795_v14  ;;  %v1698_v54 = vadd.f32 %v1697_v44, %v12807_v7  ;;  %10372 = vmatprep.subr.bf16.mxu0 %v11263_v19  ;;  %v2359_v17 = vmax.f32 %v1581_v29, 0.0  ;;  %v2361_v27 = vmax.f32 %v1694_v59, 0.0  ;;  %v11269_v59 = vld [vmem:[%s16345_s5 + $0x260] sm:$0xff]  }
 0x37e   : > { %v2374_v39 = vmax.f32 %v1583_v20, 0.0  ;;  %v2376_v9 = vmax.f32 %v1696_v35, 0.0  ;;  %3809 = vmatmul.mubr.bf16.gmra.mrb[172].mxu1 %v12895_v37  ;;  %3906 = vmatmul.mubr.bf16.gmra.mrb[172].mxu0 %v12897_v26  ;;  %v11266_v37 = vld [vmem:[%s16345_s5 + $0x218] sm:$0xff]   ;;  %v11271_v20 = vld [vmem:[%s16345_s5 + $0x2e0] sm:$0xff]  }
 0x37f   : > { %v2375_v41 = vmax.f32 %v1585_v56, 0.0  ;;  %v2377_v19 = vmax.f32 %v1698_v54, 0.0  ;;  %3816 = vmatprep.mubr.bf16.mxu1 %v12919_v32  ;;  %3913 = vmatprep.mubr.bf16.mxu0 %v12921_v49  ;;  %v11268_v26 = vld [vmem:[%s16345_s5 + $0x298] sm:$0xff]  }
 0x380   : > { %10309 = vmatpush3.bf16.msra.mxu1 %v11262_v53  ;;  %10373 = vmatpush3.bf16.msra.mxu0 %v11264_v22  ;;  %v13042_v48 = vpack.c.bf16 %v2374_v39, %v2358_v4  ;;  %v13044_v32 = vpack.c.bf16 %v2376_v9, %v2360_v51  ;;  %v13062_v51 = vrot.slane %v13034_v6, %v11712_v30 }
 0x381   : > { %v1588_v49 = vpop.f32.mrb[68].mxu1  ;;  %v1701_v29 = vpop.f32.mrb[68].mxu0  ;;  %10310 = vmatprep.subr.bf16.mxu1 %v11265_v13  ;;  %10374 = vmatprep.subr.bf16.mxu0 %v11267_v21  ;;  %v13052_v35 = vpack.c.bf16 %v2375_v41, %v2359_v17  ;;  %v13054_v42 = vpack.c.bf16 %v2377_v19, %v2361_v27  ;;  %v13066_v39 = vrot.slane %v13034_v6, %v12001_v43 }
 0x382   : > { %v1589_v44 = vadd.f32 %v1588_v49, %v12785_v33  ;;  %v1702_v53 = vadd.f32 %v1701_v29, %v12789_v16  ;;  %v1590_v22 = vpop.f32.mrb[69].mxu1  ;;  %v1703_v56 = vpop.f32.mrb[69].mxu0  ;;  %v13072_v19 = vrot.slane %v13034_v6, %v11994_v34  ;;  %v11270_v49 = vld [vmem:[%s16345_s5 + $0x220] sm:$0xff]  }
 0x383   : > { %v1591_v54 = vadd.f32 %v1590_v22, %v12795_v14  ;;  %v1704_v13 = vadd.f32 %v1703_v56, %v12807_v7  ;;  %v1592_v21 = vpop.f32.mrb[70].mxu1  ;;  %v1705_v4 = vpop.f32.mrb[70].mxu0  ;;  %v11272_v29 = vld [vmem:[%s16345_s5 + $0x2a0] sm:$0xff]   ;;  %v13084_v22 = vrot.slane %v13034_v6, %v12497_v11 }
 0x384   : > { %v1593_v9 = vadd.f32 %v1592_v21, %v12785_v33  ;;  %v1706_v17 = vadd.f32 %v1705_v4, %v12789_v16  ;;  %v1594_v27 = vpop.f32.mrb[71].mxu1  ;;  %v1707_v41 = vpop.f32.mrb[71].mxu0  ;;  %10311 = vmatpush3.bf16.msra.mxu1 %v11266_v37  ;;  %10375 = vmatpush3.bf16.msra.mxu0 %v11268_v26  ;;  %v11273_v37 = vld [vmem:[%s16345_s5 + $0x268] sm:$0xff]   ;;  %v2390_v56 = vmax.f32 %v1589_v44, 0.0  ;;  %v2392_v21 = vmax.f32 %v1702_v53, 0.0 }
 0x385   : > { %v1595_v33 = vadd.f32 %v1594_v27, %v12795_v14  ;;  %v1708_v16 = vadd.f32 %v1707_v41, %v12807_v7  ;;  %10312 = vmatprep.subr.bf16.mxu1 %v11269_v59  ;;  %10376 = vmatprep.subr.bf16.mxu0 %v11271_v20  ;;  %v11275_v26 = vld [vmem:[%s16345_s5 + $0x2e8] sm:$0xff]   ;;  %v2391_v7 = vmax.f32 %v1591_v54, 0.0  ;;  %v2393_v27 = vmax.f32 %v1704_v13, 0.0 }
 0x386   : > { %v2406_v4 = vmax.f32 %v1593_v9, 0.0  ;;  %v2408_v14 = vmax.f32 %v1706_v17, 0.0  ;;  %3817 = vmatmul.mubr.bf16.gmra.mrb[176].mxu1 %v12915_v60  ;;  %3914 = vmatmul.mubr.bf16.gmra.mrb[176].mxu0 %v12917_v2  ;;  %v11274_v44 = vld [vmem:[%s16345_s5 + $0x228] sm:$0xff]   ;;  %v11279_v17 = vld [vmem:[%s16345_s5 + $0x2f0] sm:$0xff]  }
 0x387   : > { %v2407_v59 = vmax.f32 %v1595_v33, 0.0  ;;  %v2409_v20 = vmax.f32 %v1708_v16, 0.0  ;;  %3824 = vmatprep.mubr.bf16.mxu1 %v12939_v15  ;;  %3921 = vmatprep.mubr.bf16.mxu0 %v12941_v25  ;;  %v11276_v60 = vld [vmem:[%s16345_s5 + $0x2a8] sm:$0xff]   ;;  %v11277_v15 = vld [vmem:[%s16345_s5 + $0x270] sm:$0xff]  }
 0x388   : > { %10313 = vmatpush3.bf16.msra.mxu1 %v11270_v49  ;;  %10377 = vmatpush3.bf16.msra.mxu0 %v11272_v29  ;;  %v13102_v53 = vpack.c.bf16 %v2406_v4, %v2390_v56  ;;  %v13104_v2 = vpack.c.bf16 %v2408_v14, %v2392_v21 }
 0x389   : > { %v1744_v54 = vpop.f32.mrb[72].mxu1  ;;  %v1857_v13 = vpop.f32.mrb[72].mxu0  ;;  %10314 = vmatprep.subr.bf16.mxu1 %v11273_v37  ;;  %10378 = vmatprep.subr.bf16.mxu0 %v11275_v26  ;;  %v13109_v25 = vpack.c.bf16 %v2407_v59, %v2391_v7  ;;  %v13111_v9 = vpack.c.bf16 %v2409_v20, %v2393_v27  ;;  %v11278_v27 = vld [vmem:[%s16345_s5 + $0x230] sm:$0xff]  }
 0x38a   : > { %v1745_v41 = vadd.f32 %v1744_v54, %v13062_v51  ;;  %v1858_v49 = vadd.f32 %v1857_v13, %v13066_v39  ;;  %v1746_v29 = vpop.f32.mrb[73].mxu1  ;;  %v1859_v33 = vpop.f32.mrb[73].mxu0  ;;  %v11280_v59 = vld [vmem:[%s16345_s5 + $0x2b0] sm:$0xff]   ;;  %v11281_v13 = vld [vmem:[%s16345_s5 + $0x278] sm:$0xff]  }
 0x38b   : > { %v1747_v16 = vadd.f32 %v1746_v29, %v13072_v19  ;;  %v1860_v37 = vadd.f32 %v1859_v33, %v13084_v22  ;;  %v1748_v26 = vpop.f32.mrb[74].mxu1  ;;  %v1861_v56 = vpop.f32.mrb[74].mxu0 }
 0x38c   : > { %v1749_v21 = vadd.f32 %v1748_v26, %v13062_v51  ;;  %v1862_v4 = vadd.f32 %v1861_v56, %v13066_v39  ;;  %v1750_v14 = vpop.f32.mrb[75].mxu1  ;;  %v1863_v7 = vpop.f32.mrb[75].mxu0  ;;  %10315 = vmatpush3.bf16.msra.mxu1 %v11274_v44  ;;  %10379 = vmatpush3.bf16.msra.mxu0 %v11276_v60  ;;  %v11283_v44 = vld [vmem:[%s16345_s5 + $0x2f8] sm:$0xff]   ;;  %v2170_v60 = vmax.f32 %v1745_v41, 0.0  ;;  %v2172_v29 = vmax.f32 %v1858_v49, 0.0 }
 0x38d   : > { %v1751_v20 = vadd.f32 %v1750_v14, %v13072_v19  ;;  %v1864_v54 = vadd.f32 %v1863_v7, %v13084_v22  ;;  %10316 = vmatprep.subr.bf16.mxu1 %v11277_v15  ;;  %10380 = vmatprep.subr.bf16.mxu0 %v11279_v17  ;;  %v2171_v56 = vmax.f32 %v1747_v16, 0.0  ;;  %v2173_v14 = vmax.f32 %v1860_v37, 0.0  ;;  %v11285_v16 = vld [vmem:[%s16345_s5 + $0x340] sm:$0xff]  }
 0x38e   : > { %v2186_v33 = vmax.f32 %v1749_v21, 0.0  ;;  %v2188_v26 = vmax.f32 %v1862_v4, 0.0  ;;  %3825 = vmatmul.mubr.bf16.gmra.mrb[180].mxu1 %v12935_v0  ;;  %3922 = vmatmul.mubr.bf16.gmra.mrb[180].mxu0 %v12937_v5  ;;  %v11282_v0 = vld [vmem:[%s16345_s5 + $0x238] sm:$0xff]   ;;  %v11287_v37 = vld [vmem:[%s16345_s5 + $0x3c0] sm:$0xff]  }
 0x38f   : > { %v2187_v15 = vmax.f32 %v1751_v20, 0.0  ;;  %v2189_v17 = vmax.f32 %v1864_v54, 0.0  ;;  %3832 = vmatprep.mubr.bf16.mxu1 %v12959_v40  ;;  %3929 = vmatprep.mubr.bf16.mxu0 %v12961_v58  ;;  %v11284_v5 = vld [vmem:[%s16345_s5 + $0x2b8] sm:$0xff]  }
 0x390   : > { %v13140_v7 = vpack.c.bf16 %v2186_v33, %v2170_v60  ;;  %v13142_v43 = vpack.c.bf16 %v2188_v26, %v2172_v29  ;;  %10317 = vmatpush3.bf16.msra.mxu1 %v11278_v27  ;;  %10381 = vmatpush3.bf16.msra.mxu0 %v11280_v59 }
 0x391   : > { %v1754_v41 = vpop.f32.mrb[76].mxu1  ;;  %v1867_v49 = vpop.f32.mrb[76].mxu0  ;;  %10318 = vmatprep.subr.bf16.mxu1 %v11281_v13  ;;  %v13150_v40 = vpack.c.bf16 %v2187_v15, %v2171_v56  ;;  %10382 = vmatprep.subr.bf16.mxu0 %v11283_v44  ;;  %v13152_v58 = vpack.c.bf16 %v2189_v17, %v2173_v14 }
 0x392   : > { %v1755_v21 = vadd.f32 %v1754_v41, %v13062_v51  ;;  %v1868_v4 = vadd.f32 %v1867_v49, %v13066_v39  ;;  %v1756_v27 = vpop.f32.mrb[77].mxu1  ;;  %v1869_v59 = vpop.f32.mrb[77].mxu0 }
 0x393   : > { %v1757_v20 = vadd.f32 %v1756_v27, %v13072_v19  ;;  %v1870_v54 = vadd.f32 %v1869_v59, %v13084_v22  ;;  %v1758_v13 = vpop.f32.mrb[78].mxu1  ;;  %v1871_v44 = vpop.f32.mrb[78].mxu0 }
 0x394   : > { %v1759_v60 = vadd.f32 %v1758_v13, %v13062_v51  ;;  %v1872_v29 = vadd.f32 %v1871_v44, %v13066_v39  ;;  %v1760_v33 = vpop.f32.mrb[79].mxu1  ;;  %v1873_v26 = vpop.f32.mrb[79].mxu0  ;;  %10319 = vmatpush3.bf16.msra.mxu1 %v11282_v0  ;;  %10383 = vmatpush3.bf16.msra.mxu0 %v11284_v5  ;;  %v2202_v15 = vmax.f32 %v1755_v21, 0.0  ;;  %v2204_v17 = vmax.f32 %v1868_v4, 0.0 }
 0x395   : > { %v1761_v56 = vadd.f32 %v1760_v33, %v13072_v19  ;;  %v1874_v14 = vadd.f32 %v1873_v26, %v13084_v22  ;;  %10432 = vmatprep.subr.bf16.mxu1 %v11285_v16  ;;  %10496 = vmatprep.subr.bf16.mxu0 %v11287_v37  ;;  %v2203_v27 = vmax.f32 %v1757_v20, 0.0  ;;  %v2205_v59 = vmax.f32 %v1870_v54, 0.0 }
 0x396   : > { %v2218_v41 = vmax.f32 %v1759_v60, 0.0  ;;  %v2220_v49 = vmax.f32 %v1872_v29, 0.0  ;;  %3833 = vmatmul.mubr.bf16.gmra.mrb[184].mxu1 %v12955_v36  ;;  %3930 = vmatmul.mubr.bf16.gmra.mrb[184].mxu0 %v12957_v24 }
 0x397   : > { %v2219_v13 = vmax.f32 %v1761_v56, 0.0  ;;  %v2221_v44 = vmax.f32 %v1874_v14, 0.0  ;;  %3840 = vmatprep.mubr.bf16.mxu1 %v13003_v46  ;;  %3937 = vmatprep.mubr.bf16.mxu0 %v13005_v38 }
 0x398   : > { %v13172_v0 = vpack.c.bf16 %v2218_v41, %v2202_v15  ;;  %v13174_v5 = vpack.c.bf16 %v2220_v49, %v2204_v17 }
 0x399   : > { %v1764_v16 = vpop.f32.mrb[80].mxu1  ;;  %v1877_v37 = vpop.f32.mrb[80].mxu0  ;;  %v13176_v21 = vpack.c.bf16 %v2219_v13, %v2203_v27  ;;  %v13178_v4 = vpack.c.bf16 %v2221_v44, %v2205_v59 }
 0x39a   : > { %v1765_v36 = vadd.f32 %v1764_v16, %v13062_v51  ;;  %v1878_v24 = vadd.f32 %v1877_v37, %v13066_v39  ;;  %v1766_v20 = vpop.f32.mrb[81].mxu1  ;;  %v1879_v54 = vpop.f32.mrb[81].mxu0 }
 0x39b   : > { %v1767_v46 = vadd.f32 %v1766_v20, %v13072_v19  ;;  %v1880_v38 = vadd.f32 %v1879_v54, %v13084_v22  ;;  %v1768_v60 = vpop.f32.mrb[82].mxu1  ;;  %v1881_v29 = vpop.f32.mrb[82].mxu0 }
 0x39c   : > { %v1769_v33 = vadd.f32 %v1768_v60, %v13062_v51  ;;  %v1882_v26 = vadd.f32 %v1881_v29, %v13066_v39  ;;  %v1770_v56 = vpop.f32.mrb[83].mxu1  ;;  %v1883_v14 = vpop.f32.mrb[83].mxu0  ;;  %v2234_v41 = vmax.f32 %v1765_v36, 0.0  ;;  %v2236_v49 = vmax.f32 %v1878_v24, 0.0 }
 0x39d   : > { %v1771_v15 = vadd.f32 %v1770_v56, %v13072_v19  ;;  %v1884_v17 = vadd.f32 %v1883_v14, %v13084_v22  ;;  %v2235_v13 = vmax.f32 %v1767_v46, 0.0  ;;  %v2237_v44 = vmax.f32 %v1880_v38, 0.0 }
 0x39e   : > { %v2250_v27 = vmax.f32 %v1769_v33, 0.0  ;;  %v2252_v59 = vmax.f32 %v1882_v26, 0.0  ;;  %3841 = vmatmul.mubr.bf16.gmra.mrb[188].mxu1 %v12996_v55  ;;  %3938 = vmatmul.mubr.bf16.gmra.mrb[188].mxu0 %v12998_v57 }
 0x39f   : > { %v2251_v16 = vmax.f32 %v1771_v15, 0.0  ;;  %v2253_v37 = vmax.f32 %v1884_v17, 0.0  ;;  %3848 = vmatprep.mubr.bf16.mxu1 %v13052_v35  ;;  %3945 = vmatprep.mubr.bf16.mxu0 %v13054_v42 }
 0x3a0   : > { %v13192_v20 = vpack.c.bf16 %v2250_v27, %v2234_v41  ;;  %v13194_v54 = vpack.c.bf16 %v2252_v59, %v2236_v49 }
 0x3a1   : > { %v1774_v36 = vpop.f32.mrb[84].mxu1  ;;  %v1887_v24 = vpop.f32.mrb[84].mxu0  ;;  %v13196_v60 = vpack.c.bf16 %v2251_v16, %v2235_v13  ;;  %v13198_v29 = vpack.c.bf16 %v2253_v37, %v2237_v44 }
 0x3a2   : > { %v1775_v55 = vadd.f32 %v1774_v36, %v13062_v51  ;;  %v1888_v57 = vadd.f32 %v1887_v24, %v13066_v39  ;;  %v1776_v46 = vpop.f32.mrb[85].mxu1  ;;  %v1889_v38 = vpop.f32.mrb[85].mxu0 }
 0x3a3   : > { %v1777_v35 = vadd.f32 %v1776_v46, %v13072_v19  ;;  %v1890_v42 = vadd.f32 %v1889_v38, %v13084_v22  ;;  %v1778_v33 = vpop.f32.mrb[86].mxu1  ;;  %v1891_v26 = vpop.f32.mrb[86].mxu0 }
 0x3a4   : > { %v1779_v56 = vadd.f32 %v1778_v33, %v13062_v51  ;;  %v1892_v14 = vadd.f32 %v1891_v26, %v13066_v39  ;;  %v1780_v15 = vpop.f32.mrb[87].mxu1  ;;  %v1893_v17 = vpop.f32.mrb[87].mxu0  ;;  %v2266_v27 = vmax.f32 %v1775_v55, 0.0  ;;  %v2268_v59 = vmax.f32 %v1888_v57, 0.0 }
 0x3a5   : > { %v1781_v41 = vadd.f32 %v1780_v15, %v13072_v19  ;;  %v1894_v49 = vadd.f32 %v1893_v17, %v13084_v22  ;;  %v2267_v16 = vmax.f32 %v1777_v35, 0.0  ;;  %v2269_v37 = vmax.f32 %v1890_v42, 0.0 }
 0x3a6   : > { %v2282_v13 = vmax.f32 %v1779_v56, 0.0  ;;  %v2284_v44 = vmax.f32 %v1892_v14, 0.0  ;;  %3849 = vmatmul.mubr.bf16.gmra.mrb[192].mxu1 %v13042_v48  ;;  %3946 = vmatmul.mubr.bf16.gmra.mrb[192].mxu0 %v13044_v32 }
 0x3a7   : > { %v2283_v36 = vmax.f32 %v1781_v41, 0.0  ;;  %v2285_v24 = vmax.f32 %v1894_v49, 0.0  ;;  %3856 = vmatprep.mubr.bf16.mxu1 %v13109_v25  ;;  %3953 = vmatprep.mubr.bf16.mxu0 %v13111_v9 }
 0x3a8   : > { %v13212_v46 = vpack.c.bf16 %v2282_v13, %v2266_v27  ;;  %v13214_v38 = vpack.c.bf16 %v2284_v44, %v2268_v59 }
 0x3a9   : > { %v1784_v55 = vpop.f32.mrb[88].mxu1  ;;  %v1897_v57 = vpop.f32.mrb[88].mxu0  ;;  %v13216_v33 = vpack.c.bf16 %v2283_v36, %v2267_v16  ;;  %v13218_v26 = vpack.c.bf16 %v2285_v24, %v2269_v37 }
 0x3aa   : > { %v1785_v48 = vadd.f32 %v1784_v55, %v13062_v51  ;;  %v1898_v32 = vadd.f32 %v1897_v57, %v13066_v39  ;;  %v1786_v35 = vpop.f32.mrb[89].mxu1  ;;  %v1899_v42 = vpop.f32.mrb[89].mxu0 }
 0x3ab   : > { %v1787_v25 = vadd.f32 %v1786_v35, %v13072_v19  ;;  %v1900_v9 = vadd.f32 %v1899_v42, %v13084_v22  ;;  %v1788_v56 = vpop.f32.mrb[90].mxu1  ;;  %v1901_v14 = vpop.f32.mrb[90].mxu0 }
 0x3ac   : > { %v1789_v15 = vadd.f32 %v1788_v56, %v13062_v51  ;;  %v1902_v17 = vadd.f32 %v1901_v14, %v13066_v39  ;;  %v1790_v41 = vpop.f32.mrb[91].mxu1  ;;  %v1903_v49 = vpop.f32.mrb[91].mxu0  ;;  %v2298_v13 = vmax.f32 %v1785_v48, 0.0  ;;  %v2300_v44 = vmax.f32 %v1898_v32, 0.0 }
 0x3ad   : > { %v1791_v27 = vadd.f32 %v1790_v41, %v13072_v19  ;;  %v1904_v59 = vadd.f32 %v1903_v49, %v13084_v22  ;;  %v2299_v36 = vmax.f32 %v1787_v25, 0.0  ;;  %v2301_v24 = vmax.f32 %v1900_v9, 0.0  ;;  %v11286_v41 = vld [vmem:[%s16345_s5 + $0x300] sm:$0xff]  }
 0x3ae   : > { %v2314_v16 = vmax.f32 %v1789_v15, 0.0  ;;  %v2316_v37 = vmax.f32 %v1902_v17, 0.0  ;;  %3857 = vmatmul.mubr.bf16.gmra.mrb[196].mxu1 %v13102_v53  ;;  %3954 = vmatmul.mubr.bf16.gmra.mrb[196].mxu0 %v13104_v2 }
 0x3af   : > { %v2315_v55 = vmax.f32 %v1791_v27, 0.0  ;;  %v2317_v57 = vmax.f32 %v1904_v59, 0.0  ;;  %3994 = vmatprep.mubr.bf16.mxu1 %v13150_v40  ;;  %4091 = vmatprep.mubr.bf16.mxu0 %v13152_v58 }
 0x3b0   : > { %v13232_v35 = vpack.c.bf16 %v2314_v16, %v2298_v13  ;;  %v13234_v42 = vpack.c.bf16 %v2316_v37, %v2300_v44  ;;  %v11288_v44 = vld [vmem:[%s16345_s5 + $0x380] sm:$0xff]  }
 0x3b1   : > { %v1794_v48 = vpop.f32.mrb[92].mxu1  ;;  %v1907_v32 = vpop.f32.mrb[92].mxu0  ;;  %v13236_v56 = vpack.c.bf16 %v2315_v55, %v2299_v36  ;;  %v13238_v14 = vpack.c.bf16 %v2317_v57, %v2301_v24  ;;  %v11289_v36 = vld [vmem:[%s16345_s5 + $0x348] sm:$0xff]  }
 0x3b2   : > { %v1795_v53 = vadd.f32 %v1794_v48, %v13062_v51  ;;  %v1908_v2 = vadd.f32 %v1907_v32, %v13066_v39  ;;  %v1796_v25 = vpop.f32.mrb[93].mxu1  ;;  %v1909_v9 = vpop.f32.mrb[93].mxu0  ;;  %v11291_v24 = vld [vmem:[%s16345_s5 + $0x3c8] sm:$0xff]  }
 0x3b3   : > { %v1797_v40 = vadd.f32 %v1796_v25, %v13072_v19  ;;  %v1910_v58 = vadd.f32 %v1909_v9, %v13084_v22  ;;  %v1798_v15 = vpop.f32.mrb[94].mxu1  ;;  %v1911_v17 = vpop.f32.mrb[94].mxu0 }
 0x3b4   : > { %v1799_v49 = vadd.f32 %v1798_v15, %v13062_v51  ;;  %v1912_v27 = vadd.f32 %v1911_v17, %v13066_v39  ;;  %v1800_v59 = vpop.f32.mrb[95].mxu1  ;;  %v1913_v13 = vpop.f32.mrb[95].mxu0  ;;  %v2330_v55 = vmax.f32 %v1795_v53, 0.0  ;;  %v2332_v57 = vmax.f32 %v1908_v2, 0.0 }
 0x3b5   : > { %v1801_v16 = vadd.f32 %v1800_v59, %v13072_v19  ;;  %v1914_v37 = vadd.f32 %v1913_v13, %v13084_v22  ;;  %v2331_v25 = vmax.f32 %v1797_v40, 0.0  ;;  %v2333_v9 = vmax.f32 %v1910_v58, 0.0  ;;  %v11290_v59 = vld [vmem:[%s16345_s5 + $0x308] sm:$0xff]  }
 0x3b6   : > { %v2346_v48 = vmax.f32 %v1799_v49, 0.0  ;;  %v2348_v32 = vmax.f32 %v1912_v27, 0.0  ;;  %3995 = vmatmul.mubr.bf16.vlgmr.msra.gmra.mrb[200].mxu1 %v13140_v7  ;;  %4092 = vmatmul.mubr.bf16.vlgmr.msra.gmra.mrb[200].mxu0 %v13142_v43  ;;  %v11292_v7 = vld [vmem:[%s16345_s5 + $0x388] sm:$0xff]   ;;  %v11293_v43 = vld [vmem:[%s16345_s5 + $0x350] sm:$0xff]  }
 0x3b7   : > { %v2347_v15 = vmax.f32 %v1801_v16, 0.0  ;;  %v2349_v17 = vmax.f32 %v1914_v37, 0.0  ;;  %10433 = vmatpush3.bf16.msra.mxu1 %v11286_v41  ;;  %4002 = vmatprep.mubr.bf16.mxu1 %v13176_v21 }
 0x3b8   : > { %4099 = vmatprep.mubr.bf16.mxu0 %v13178_v4  ;;  %10497 = vmatpush3.bf16.msra.mxu0 %v11288_v44  ;;  %v13273_v53 = vpack.c.bf16 %v2346_v48, %v2330_v55  ;;  %v13275_v2 = vpack.c.bf16 %v2348_v32, %v2332_v57  ;;  %v11295_v4 = vld [vmem:[%s16345_s5 + $0x3d0] sm:$0xff]  }
 0x3b9   : > { %v1804_v21 = vpop.f32.mrb[96].mxu1  ;;  %v1917_v40 = vpop.f32.mrb[96].mxu0  ;;  %10434 = vmatprep.subr.bf16.mxu1 %v11289_v36  ;;  %10498 = vmatprep.subr.bf16.mxu0 %v11291_v24  ;;  %v13280_v58 = vpack.c.bf16 %v2347_v15, %v2331_v25  ;;  %v13282_v41 = vpack.c.bf16 %v2349_v17, %v2333_v9  ;;  %v11294_v25 = vld [vmem:[%s16345_s5 + $0x310] sm:$0xff]  }
 0x3ba   : > { %v1805_v49 = vadd.f32 %v1804_v21, %v13062_v51  ;;  %v1918_v27 = vadd.f32 %v1917_v40, %v13066_v39  ;;  %v1806_v13 = vpop.f32.mrb[97].mxu1  ;;  %v1919_v44 = vpop.f32.mrb[97].mxu0  ;;  %v11296_v9 = vld [vmem:[%s16345_s5 + $0x390] sm:$0xff]  }
 0x3bb   : > { %v1807_v16 = vadd.f32 %v1806_v13, %v13072_v19  ;;  %v1920_v37 = vadd.f32 %v1919_v44, %v13084_v22  ;;  %v1808_v36 = vpop.f32.mrb[98].mxu1  ;;  %v1921_v24 = vpop.f32.mrb[98].mxu0  ;;  %10435 = vmatpush3.bf16.msra.mxu1 %v11290_v59  ;;  %v11297_v59 = vld [vmem:[%s16345_s5 + $0x358] sm:$0xff]  }
 0x3bc   : > { %v1809_v55 = vadd.f32 %v1808_v36, %v13062_v51  ;;  %v1922_v57 = vadd.f32 %v1921_v24, %v13066_v39  ;;  %v1810_v48 = vpop.f32.mrb[99].mxu1  ;;  %v1923_v32 = vpop.f32.mrb[99].mxu0  ;;  %10499 = vmatpush3.bf16.msra.mxu0 %v11292_v7  ;;  %10436 = vmatprep.subr.bf16.mxu1 %v11293_v43  ;;  %v11299_v7 = vld [vmem:[%s16345_s5 + $0x3d8] sm:$0xff]   ;;  %v2362_v43 = vmax.f32 %v1805_v49, 0.0  ;;  %v2364_v21 = vmax.f32 %v1918_v27, 0.0 }
 0x3bd   : > { %v1811_v15 = vadd.f32 %v1810_v48, %v13072_v19  ;;  %v1924_v17 = vadd.f32 %v1923_v32, %v13084_v22  ;;  %10500 = vmatprep.subr.bf16.mxu0 %v11295_v4  ;;  %v2363_v44 = vmax.f32 %v1807_v16, 0.0  ;;  %v2365_v36 = vmax.f32 %v1920_v37, 0.0  ;;  %v11298_v49 = vld [vmem:[%s16345_s5 + $0x318] sm:$0xff]  }
 0x3be   : > { %v2378_v40 = vmax.f32 %v1809_v55, 0.0  ;;  %v2380_v13 = vmax.f32 %v1922_v57, 0.0  ;;  %4003 = vmatmul.mubr.bf16.gmra.mrb[204].mxu1 %v13172_v0  ;;  %4100 = vmatmul.mubr.bf16.gmra.mrb[204].mxu0 %v13174_v5  ;;  %v11300_v0 = vld [vmem:[%s16345_s5 + $0x398] sm:$0xff]  }
 0x3bf   : > { %v2379_v24 = vmax.f32 %v1811_v15, 0.0  ;;  %v2381_v4 = vmax.f32 %v1924_v17, 0.0  ;;  %4010 = vmatprep.mubr.bf16.mxu1 %v13196_v60  ;;  %4107 = vmatprep.mubr.bf16.mxu0 %v13198_v29  ;;  %v11301_v60 = vld [vmem:[%s16345_s5 + $0x360] sm:$0xff]  }
 0x3c0   : > { %10437 = vmatpush3.bf16.msra.mxu1 %v11294_v25  ;;  %10501 = vmatpush3.bf16.msra.mxu0 %v11296_v9  ;;  %v13314_v27 = vpack.c.bf16 %v2378_v40, %v2362_v43  ;;  %v13316_v5 = vpack.c.bf16 %v2380_v13, %v2364_v21  ;;  %v11303_v29 = vld [vmem:[%s16345_s5 + $0x3e0] sm:$0xff]   ;;  %v13334_v43 = vrot.slane %v13034_v6, %v12738_v28 }
 0x3c1   : > { %v1814_v16 = vpop.f32.mrb[100].mxu1  ;;  %v1927_v37 = vpop.f32.mrb[100].mxu0  ;;  %10438 = vmatprep.subr.bf16.mxu1 %v11297_v59  ;;  %10502 = vmatprep.subr.bf16.mxu0 %v11299_v7  ;;  %v13324_v55 = vpack.c.bf16 %v2379_v24, %v2363_v44  ;;  %v13326_v57 = vpack.c.bf16 %v2381_v4, %v2365_v36  ;;  %v13338_v21 = vrot.slane %v13034_v6, %v12741_v61  ;;  %v11302_v4 = vld [vmem:[%s16345_s5 + $0x320] sm:$0xff]  }
 0x3c2   : > { %v1815_v48 = vadd.f32 %v1814_v16, %v13062_v51  ;;  %v1928_v32 = vadd.f32 %v1927_v37, %v13066_v39  ;;  %v1816_v25 = vpop.f32.mrb[101].mxu1  ;;  %v1929_v9 = vpop.f32.mrb[101].mxu0  ;;  %v13344_v24 = vrot.slane %v13034_v6, %v12754_v62  ;;  %v11304_v16 = vld [vmem:[%s16345_s5 + $0x3a0] sm:$0xff]   ;;  %v13356_v37 = vrot.slane %v13034_v6, %v12767_v18 }
 0x3c3   : > { %v1817_v15 = vadd.f32 %v1816_v25, %v13072_v19  ;;  %v1930_v17 = vadd.f32 %v1929_v9, %v13084_v22  ;;  %v1818_v59 = vpop.f32.mrb[102].mxu1  ;;  %v1931_v7 = vpop.f32.mrb[102].mxu0 }
 0x3c4   : > { %v1819_v40 = vadd.f32 %v1818_v59, %v13062_v51  ;;  %v1932_v13 = vadd.f32 %v1931_v7, %v13066_v39  ;;  %v1820_v44 = vpop.f32.mrb[103].mxu1  ;;  %v1933_v36 = vpop.f32.mrb[103].mxu0  ;;  %10439 = vmatpush3.bf16.msra.mxu1 %v11298_v49  ;;  %10503 = vmatpush3.bf16.msra.mxu0 %v11300_v0  ;;  %v11305_v49 = vld [vmem:[%s16345_s5 + $0x368] sm:$0xff]   ;;  %v2394_v25 = vmax.f32 %v1815_v48, 0.0  ;;  %v2396_v9 = vmax.f32 %v1928_v32, 0.0 }
 0x3c5   : > { %v1821_v51 = vadd.f32 %v1820_v44, %v13072_v19  ;;  %v1934_v39 = vadd.f32 %v1933_v36, %v13084_v22  ;;  %10440 = vmatprep.subr.bf16.mxu1 %v11301_v60  ;;  %10504 = vmatprep.subr.bf16.mxu0 %v11303_v29  ;;  %v11307_v0 = vld [vmem:[%s16345_s5 + $0x3e8] sm:$0xff]   ;;  %v2395_v6 = vmax.f32 %v1817_v15, 0.0  ;;  %v2397_v22 = vmax.f32 %v1930_v17, 0.0 }
 0x3c6   : > { %v2410_v59 = vmax.f32 %v1819_v40, 0.0  ;;  %v2412_v19 = vmax.f32 %v1932_v13, 0.0  ;;  %4011 = vmatmul.mubr.bf16.gmra.mrb[208].mxu1 %v13192_v20  ;;  %4108 = vmatmul.mubr.bf16.gmra.mrb[208].mxu0 %v13194_v54  ;;  %v11306_v48 = vld [vmem:[%s16345_s5 + $0x328] sm:$0xff]   ;;  %v11311_v40 = vld [vmem:[%s16345_s5 + $0x3f0] sm:$0xff]  }
 0x3c7   : > { %v2411_v60 = vmax.f32 %v1821_v51, 0.0  ;;  %v2413_v29 = vmax.f32 %v1934_v39, 0.0  ;;  %4018 = vmatprep.mubr.bf16.mxu1 %v13216_v33  ;;  %4115 = vmatprep.mubr.bf16.mxu0 %v13218_v26  ;;  %v11308_v20 = vld [vmem:[%s16345_s5 + $0x3a8] sm:$0xff]   ;;  %v11309_v33 = vld [vmem:[%s16345_s5 + $0x370] sm:$0xff]  }
 0x3c8   : > { %10441 = vmatpush3.bf16.msra.mxu1 %v11302_v4  ;;  %10505 = vmatpush3.bf16.msra.mxu0 %v11304_v16  ;;  %v13374_v32 = vpack.c.bf16 %v2410_v59, %v2394_v25  ;;  %v13376_v54 = vpack.c.bf16 %v2412_v19, %v2396_v9  ;;  %v11310_v19 = vld [vmem:[%s16345_s5 + $0x330] sm:$0xff]  }
 0x3c9   : > { %v1970_v15 = vpop.f32.mrb[104].mxu1  ;;  %v2083_v17 = vpop.f32.mrb[104].mxu0  ;;  %10442 = vmatprep.subr.bf16.mxu1 %v11305_v49  ;;  %10506 = vmatprep.subr.bf16.mxu0 %v11307_v0  ;;  %v13381_v26 = vpack.c.bf16 %v2411_v60, %v2395_v6  ;;  %v13383_v7 = vpack.c.bf16 %v2413_v29, %v2397_v22  ;;  %v11312_v6 = vld [vmem:[%s16345_s5 + $0x3b0] sm:$0xff]   ;;  %v11313_v29 = vld [vmem:[%s16345_s5 + $0x378] sm:$0xff]  }
 0x3ca   : > { %v1971_v13 = vadd.f32 %v1970_v15, %v13334_v43  ;;  %v2084_v44 = vadd.f32 %v2083_v17, %v13338_v21  ;;  %v1972_v36 = vpop.f32.mrb[105].mxu1  ;;  %v2085_v4 = vpop.f32.mrb[105].mxu0 }
 0x3cb   : > { %v1973_v16 = vadd.f32 %v1972_v36, %v13344_v24  ;;  %v2086_v51 = vadd.f32 %v2085_v4, %v13356_v37  ;;  %v1974_v39 = vpop.f32.mrb[106].mxu1  ;;  %v2087_v49 = vpop.f32.mrb[106].mxu0 }
 0x3cc   : > { %v1975_v0 = vadd.f32 %v1974_v39, %v13334_v43  ;;  %v2088_v25 = vadd.f32 %v2087_v49, %v13338_v21  ;;  %v1976_v9 = vpop.f32.mrb[107].mxu1  ;;  %v2089_v59 = vpop.f32.mrb[107].mxu0  ;;  %10443 = vmatpush3.bf16.msra.mxu1 %v11306_v48  ;;  %10507 = vmatpush3.bf16.msra.mxu0 %v11308_v20  ;;  %v11315_v48 = vld [vmem:[%s16345_s5 + $0x3f8] sm:$0xff]   ;;  %v2174_v20 = vmax.f32 %v1971_v13, 0.0  ;;  %v2176_v15 = vmax.f32 %v2084_v44, 0.0 }
 0x3cd   : > { %v1977_v22 = vadd.f32 %v1976_v9, %v13344_v24  ;;  %v2090_v60 = vadd.f32 %v2089_v59, %v13356_v37  ;;  %10444 = vmatprep.subr.bf16.mxu1 %v11309_v33  ;;  %10508 = vmatprep.subr.bf16.mxu0 %v11311_v40  ;;  %v2175_v4 = vmax.f32 %v1973_v16, 0.0  ;;  %v2177_v39 = vmax.f32 %v2086_v51, 0.0 }
 0x3ce   : > { %v2190_v17 = vmax.f32 %v1975_v0, 0.0  ;;  %v2192_v36 = vmax.f32 %v2088_v25, 0.0  ;;  %4019 = vmatmul.mubr.bf16.gmra.mrb[212].mxu1 %v13212_v46  ;;  %4116 = vmatmul.mubr.bf16.gmra.mrb[212].mxu0 %v13214_v38  ;;  %v11314_v46 = vld [vmem:[%s16345_s5 + $0x338] sm:$0xff]  }
 0x3cf   : > { %v2191_v33 = vmax.f32 %v1977_v22, 0.0  ;;  %v2193_v40 = vmax.f32 %v2090_v60, 0.0  ;;  %4026 = vmatprep.mubr.bf16.mxu1 %v13236_v56  ;;  %4123 = vmatprep.mubr.bf16.mxu0 %v13238_v14  ;;  %v11316_v38 = vld [vmem:[%s16345_s5 + $0x3b8] sm:$0xff]  }
 0x3d0   : > { %v13412_v49 = vpack.c.bf16 %v2190_v17, %v2174_v20  ;;  %v13414_v9 = vpack.c.bf16 %v2192_v36, %v2176_v15  ;;  %10445 = vmatpush3.bf16.msra.mxu1 %v11310_v19  ;;  %10509 = vmatpush3.bf16.msra.mxu0 %v11312_v6 }
 0x3d1   : > { %v1980_v13 = vpop.f32.mrb[108].mxu1  ;;  %v2093_v44 = vpop.f32.mrb[108].mxu0  ;;  %10446 = vmatprep.subr.bf16.mxu1 %v11313_v29  ;;  %v13422_v56 = vpack.c.bf16 %v2191_v33, %v2175_v4  ;;  %10510 = vmatprep.subr.bf16.mxu0 %v11315_v48  ;;  %v13424_v14 = vpack.c.bf16 %v2193_v40, %v2177_v39 }
 0x3d2   : > { %v1981_v16 = vadd.f32 %v1980_v13, %v13334_v43  ;;  %v2094_v51 = vadd.f32 %v2093_v44, %v13338_v21  ;;  %v1982_v0 = vpop.f32.mrb[109].mxu1  ;;  %v2095_v25 = vpop.f32.mrb[109].mxu0 }
 0x3d3   : > { %v1983_v59 = vadd.f32 %v1982_v0, %v13344_v24  ;;  %v2096_v19 = vadd.f32 %v2095_v25, %v13356_v37  ;;  %v1984_v6 = vpop.f32.mrb[110].mxu1  ;;  %v2097_v22 = vpop.f32.mrb[110].mxu0 }
 0x3d4   : > { %v1985_v60 = vadd.f32 %v1984_v6, %v13334_v43  ;;  %v2098_v29 = vadd.f32 %v2097_v22, %v13338_v21  ;;  %v1986_v20 = vpop.f32.mrb[111].mxu1  ;;  %v2099_v48 = vpop.f32.mrb[111].mxu0  ;;  %10447 = vmatpush3.bf16.msra.mxu1 %v11314_v46  ;;  %10511 = vmatpush3.bf16.msra.mxu0 %v11316_v38  ;;  %v2206_v36 = vmax.f32 %v1981_v16, 0.0  ;;  %v2208_v4 = vmax.f32 %v2094_v51, 0.0 }
 0x3d5   : > { %v1987_v15 = vadd.f32 %v1986_v20, %v13344_v24  ;;  %v2100_v17 = vadd.f32 %v2099_v48, %v13356_v37  ;;  %v2207_v40 = vmax.f32 %v1983_v59, 0.0  ;;  %v2209_v13 = vmax.f32 %v2096_v19, 0.0 }
 0x3d6   : > { %v2222_v39 = vmax.f32 %v1985_v60, 0.0  ;;  %v2224_v33 = vmax.f32 %v2098_v29, 0.0  ;;  %4027 = vmatmul.mubr.bf16.gmra.mrb[216].mxu1 %v13232_v35  ;;  %4124 = vmatmul.mubr.bf16.gmra.mrb[216].mxu0 %v13234_v42 }
 0x3d7   : > { %v2223_v44 = vmax.f32 %v1987_v15, 0.0  ;;  %v2225_v0 = vmax.f32 %v2100_v17, 0.0  ;;  %4034 = vmatprep.mubr.bf16.mxu1 %v13280_v58  ;;  %4131 = vmatprep.mubr.bf16.mxu0 %v13282_v41 }
 0x3d8   : > { %v13438_v46 = vpack.c.bf16 %v2222_v39, %v2206_v36  ;;  %v13440_v38 = vpack.c.bf16 %v2224_v33, %v2208_v4 }
 0x3d9   : > { %v1990_v16 = vpop.f32.mrb[112].mxu1  ;;  %v2103_v51 = vpop.f32.mrb[112].mxu0  ;;  %v13442_v25 = vpack.c.bf16 %v2223_v44, %v2207_v40  ;;  %v13444_v6 = vpack.c.bf16 %v2225_v0, %v2209_v13 }
 0x3da   : > { %v1991_v35 = vadd.f32 %v1990_v16, %v13334_v43  ;;  %v2104_v42 = vadd.f32 %v2103_v51, %v13338_v21  ;;  %v1992_v59 = vpop.f32.mrb[113].mxu1  ;;  %v2105_v19 = vpop.f32.mrb[113].mxu0 }
 0x3db   : > { %v1993_v58 = vadd.f32 %v1992_v59, %v13344_v24  ;;  %v2106_v41 = vadd.f32 %v2105_v19, %v13356_v37  ;;  %v1994_v22 = vpop.f32.mrb[114].mxu1  ;;  %v2107_v60 = vpop.f32.mrb[114].mxu0 }
 0x3dc   : > { %v1995_v29 = vadd.f32 %v1994_v22, %v13334_v43  ;;  %v2108_v20 = vadd.f32 %v2107_v60, %v13338_v21  ;;  %v1996_v48 = vpop.f32.mrb[115].mxu1  ;;  %v2109_v15 = vpop.f32.mrb[115].mxu0  ;;  %v2238_v4 = vmax.f32 %v1991_v35, 0.0  ;;  %v2240_v39 = vmax.f32 %v2104_v42, 0.0 }
 0x3dd   : > { %v1997_v17 = vadd.f32 %v1996_v48, %v13344_v24  ;;  %v2110_v36 = vadd.f32 %v2109_v15, %v13356_v37  ;;  %v2239_v13 = vmax.f32 %v1993_v58, 0.0  ;;  %v2241_v44 = vmax.f32 %v2106_v41, 0.0 }
 0x3de   : > { %v2254_v33 = vmax.f32 %v1995_v29, 0.0  ;;  %v2256_v40 = vmax.f32 %v2108_v20, 0.0  ;;  %4035 = vmatmul.mubr.bf16.gmra.mrb[220].mxu1 %v13273_v53  ;;  %4132 = vmatmul.mubr.bf16.gmra.mrb[220].mxu0 %v13275_v2 }
 0x3df   : > { %v2255_v0 = vmax.f32 %v1997_v17, 0.0  ;;  %v2257_v16 = vmax.f32 %v2110_v36, 0.0  ;;  %4042 = vmatprep.mubr.bf16.mxu1 %v13324_v55  ;;  %4139 = vmatprep.mubr.bf16.mxu0 %v13326_v57 }
 0x3e0   : > { %v13458_v51 = vpack.c.bf16 %v2254_v33, %v2238_v4  ;;  %v13460_v59 = vpack.c.bf16 %v2256_v40, %v2240_v39 }
 0x3e1   : > { %v2000_v35 = vpop.f32.mrb[116].mxu1  ;;  %v2113_v42 = vpop.f32.mrb[116].mxu0  ;;  %v13462_v19 = vpack.c.bf16 %v2255_v0, %v2239_v13  ;;  %v13464_v22 = vpack.c.bf16 %v2257_v16, %v2241_v44 }
 0x3e2   : > { %v2001_v53 = vadd.f32 %v2000_v35, %v13334_v43  ;;  %v2114_v2 = vadd.f32 %v2113_v42, %v13338_v21  ;;  %v2002_v58 = vpop.f32.mrb[117].mxu1  ;;  %v2115_v41 = vpop.f32.mrb[117].mxu0 }
 0x3e3   : > { %v2003_v55 = vadd.f32 %v2002_v58, %v13344_v24  ;;  %v2116_v57 = vadd.f32 %v2115_v41, %v13356_v37  ;;  %v2004_v60 = vpop.f32.mrb[118].mxu1  ;;  %v2117_v29 = vpop.f32.mrb[118].mxu0 }
 0x3e4   : > { %v2005_v20 = vadd.f32 %v2004_v60, %v13334_v43  ;;  %v2118_v48 = vadd.f32 %v2117_v29, %v13338_v21  ;;  %v2006_v15 = vpop.f32.mrb[119].mxu1  ;;  %v2119_v17 = vpop.f32.mrb[119].mxu0  ;;  %v2270_v39 = vmax.f32 %v2001_v53, 0.0  ;;  %v2272_v33 = vmax.f32 %v2114_v2, 0.0 }
 0x3e5   : > { %v2007_v36 = vadd.f32 %v2006_v15, %v13344_v24  ;;  %v2120_v4 = vadd.f32 %v2119_v17, %v13356_v37  ;;  %v2271_v44 = vmax.f32 %v2003_v55, 0.0  ;;  %v2273_v0 = vmax.f32 %v2116_v57, 0.0 }
 0x3e6   : > { %v2286_v40 = vmax.f32 %v2005_v20, 0.0  ;;  %v2288_v13 = vmax.f32 %v2118_v48, 0.0  ;;  %4043 = vmatmul.mubr.bf16.gmra.mrb[224].mxu1 %v13314_v27  ;;  %4140 = vmatmul.mubr.bf16.gmra.mrb[224].mxu0 %v13316_v5 }
 0x3e7   : > { %v2287_v16 = vmax.f32 %v2007_v36, 0.0  ;;  %v2289_v35 = vmax.f32 %v2120_v4, 0.0  ;;  %4050 = vmatprep.mubr.bf16.mxu1 %v13381_v26  ;;  %4147 = vmatprep.mubr.bf16.mxu0 %v13383_v7 }
 0x3e8   : > { %v13478_v42 = vpack.c.bf16 %v2286_v40, %v2270_v39  ;;  %v13480_v58 = vpack.c.bf16 %v2288_v13, %v2272_v33 }
 0x3e9   : > { %v2010_v53 = vpop.f32.mrb[120].mxu1  ;;  %v2123_v2 = vpop.f32.mrb[120].mxu0  ;;  %v13482_v41 = vpack.c.bf16 %v2287_v16, %v2271_v44  ;;  %v13484_v60 = vpack.c.bf16 %v2289_v35, %v2273_v0 }
 0x3ea   : > { %v2011_v27 = vadd.f32 %v2010_v53, %v13334_v43  ;;  %v2124_v5 = vadd.f32 %v2123_v2, %v13338_v21  ;;  %v2012_v55 = vpop.f32.mrb[121].mxu1  ;;  %v2125_v57 = vpop.f32.mrb[121].mxu0 }
 0x3eb   : > { %v2013_v26 = vadd.f32 %v2012_v55, %v13344_v24  ;;  %v2126_v7 = vadd.f32 %v2125_v57, %v13356_v37  ;;  %v2014_v29 = vpop.f32.mrb[122].mxu1  ;;  %v2127_v20 = vpop.f32.mrb[122].mxu0 }
 0x3ec   : > { %v2015_v48 = vadd.f32 %v2014_v29, %v13334_v43  ;;  %v2128_v15 = vadd.f32 %v2127_v20, %v13338_v21  ;;  %v2016_v17 = vpop.f32.mrb[123].mxu1  ;;  %v2129_v36 = vpop.f32.mrb[123].mxu0  ;;  %v2302_v33 = vmax.f32 %v2011_v27, 0.0  ;;  %v2304_v40 = vmax.f32 %v2124_v5, 0.0 }
 0x3ed   : > { %v2017_v4 = vadd.f32 %v2016_v17, %v13344_v24  ;;  %v2130_v39 = vadd.f32 %v2129_v36, %v13356_v37  ;;  %v2303_v0 = vmax.f32 %v2013_v26, 0.0  ;;  %v2305_v16 = vmax.f32 %v2126_v7, 0.0 }
 0x3ee   : > { %v2318_v13 = vmax.f32 %v2015_v48, 0.0  ;;  %v2320_v44 = vmax.f32 %v2128_v15, 0.0  ;;  %4051 = vmatmul.mubr.bf16.gmra.mrb[228].mxu1 %v13374_v32  ;;  %4148 = vmatmul.mubr.bf16.gmra.mrb[228].mxu0 %v13376_v54 }
 0x3ef   : > { %v2319_v35 = vmax.f32 %v2017_v4, 0.0  ;;  %v2321_v53 = vmax.f32 %v2130_v39, 0.0  ;;  %4188 = vmatprep.mubr.bf16.mxu1 %v13422_v56  ;;  %4285 = vmatprep.mubr.bf16.mxu0 %v13424_v14 }
 0x3f0   : > { %v13498_v2 = vpack.c.bf16 %v2318_v13, %v2302_v33  ;;  %v13500_v55 = vpack.c.bf16 %v2320_v44, %v2304_v40 }
 0x3f1   : > { %v2020_v27 = vpop.f32.mrb[124].mxu1  ;;  %v2133_v5 = vpop.f32.mrb[124].mxu0  ;;  %v13502_v57 = vpack.c.bf16 %v2319_v35, %v2303_v0  ;;  %v13504_v29 = vpack.c.bf16 %v2321_v53, %v2305_v16 }
 0x3f2   : > { %v2021_v32 = vadd.f32 %v2020_v27, %v13334_v43  ;;  %v2134_v54 = vadd.f32 %v2133_v5, %v13338_v21  ;;  %v2022_v26 = vpop.f32.mrb[125].mxu1  ;;  %v2135_v7 = vpop.f32.mrb[125].mxu0 }
 0x3f3   : > { %v2023_v56 = vadd.f32 %v2022_v26, %v13344_v24  ;;  %v2136_v14 = vadd.f32 %v2135_v7, %v13356_v37  ;;  %v2024_v20 = vpop.f32.mrb[126].mxu1  ;;  %v2137_v48 = vpop.f32.mrb[126].mxu0 }
 0x3f4   : > { %v2025_v15 = vadd.f32 %v2024_v20, %v13334_v43  ;;  %v2138_v17 = vadd.f32 %v2137_v48, %v13338_v21  ;;  %v2026_v36 = vpop.f32.mrb[127].mxu1  ;;  %v2139_v4 = vpop.f32.mrb[127].mxu0  ;;  %v2334_v40 = vmax.f32 %v2021_v32, 0.0  ;;  %v2336_v13 = vmax.f32 %v2134_v54, 0.0 }
 0x3f5   : > { %v2027_v39 = vadd.f32 %v2026_v36, %v13344_v24  ;;  %v2140_v33 = vadd.f32 %v2139_v4, %v13356_v37  ;;  %v2335_v16 = vmax.f32 %v2023_v56, 0.0  ;;  %v2337_v35 = vmax.f32 %v2136_v14, 0.0 }
 0x3f6   : > { %v2350_v44 = vmax.f32 %v2025_v15, 0.0  ;;  %v2352_v0 = vmax.f32 %v2138_v17, 0.0  ;;  %4189 = vmatmul.mubr.bf16.vlgmr.msra.gmra.mrb[232].mxu1 %v13412_v49  ;;  %4286 = vmatmul.mubr.bf16.vlgmr.msra.gmra.mrb[232].mxu0 %v13414_v9 }
 0x3f7   : > { %v2351_v53 = vmax.f32 %v2027_v39, 0.0  ;;  %v2353_v27 = vmax.f32 %v2140_v33, 0.0  ;;  %4196 = vmatprep.mubr.bf16.mxu1 %v13442_v25  ;;  %4293 = vmatprep.mubr.bf16.mxu0 %v13444_v6 }
 0x3f8   : > { %v13518_v5 = vpack.c.bf16 %v2350_v44, %v2334_v40  ;;  %v13520_v26 = vpack.c.bf16 %v2352_v0, %v2336_v13 }
 0x3f9   : > { %v2030_v32 = vpop.f32.mrb[128].mxu1  ;;  %v2143_v54 = vpop.f32.mrb[128].mxu0  ;;  %v13522_v7 = vpack.c.bf16 %v2351_v53, %v2335_v16  ;;  %v13524_v20 = vpack.c.bf16 %v2353_v27, %v2337_v35 }
 0x3fa   : > { %v2031_v49 = vadd.f32 %v2030_v32, %v13334_v43  ;;  %v2144_v9 = vadd.f32 %v2143_v54, %v13338_v21  ;;  %v2032_v56 = vpop.f32.mrb[129].mxu1  ;;  %v2145_v14 = vpop.f32.mrb[129].mxu0 }
 0x3fb   : > { %v2033_v25 = vadd.f32 %v2032_v56, %v13344_v24  ;;  %v2146_v6 = vadd.f32 %v2145_v14, %v13356_v37  ;;  %v2034_v48 = vpop.f32.mrb[130].mxu1  ;;  %v2147_v15 = vpop.f32.mrb[130].mxu0 }
 0x3fc   : > { %v2035_v17 = vadd.f32 %v2034_v48, %v13334_v43  ;;  %v2148_v36 = vadd.f32 %v2147_v15, %v13338_v21  ;;  %v2036_v4 = vpop.f32.mrb[131].mxu1  ;;  %v2149_v39 = vpop.f32.mrb[131].mxu0  ;;  %v2366_v13 = vmax.f32 %v2031_v49, 0.0  ;;  %v2368_v44 = vmax.f32 %v2144_v9, 0.0 }
 0x3fd   : > { %v2037_v33 = vadd.f32 %v2036_v4, %v13344_v24  ;;  %v2150_v40 = vadd.f32 %v2149_v39, %v13356_v37  ;;  %v2367_v35 = vmax.f32 %v2033_v25, 0.0  ;;  %v2369_v53 = vmax.f32 %v2146_v6, 0.0 }
 0x3fe   : > { %v2382_v0 = vmax.f32 %v2035_v17, 0.0  ;;  %v2384_v16 = vmax.f32 %v2148_v36, 0.0  ;;  %4197 = vmatmul.mubr.bf16.gmra.mrb[236].mxu1 %v13438_v46  ;;  %4294 = vmatmul.mubr.bf16.gmra.mrb[236].mxu0 %v13440_v38 }
 0x3ff   : > { %v2383_v27 = vmax.f32 %v2037_v33, 0.0  ;;  %v2385_v32 = vmax.f32 %v2150_v40, 0.0  ;;  %4204 = vmatprep.mubr.bf16.mxu1 %v13462_v19  ;;  %4301 = vmatprep.mubr.bf16.mxu0 %v13464_v22 }
 0x400   : > { %v13538_v54 = vpack.c.bf16 %v2382_v0, %v2366_v13  ;;  %v13540_v56 = vpack.c.bf16 %v2384_v16, %v2368_v44 }
 0x401   : > { %v2040_v49 = vpop.f32.mrb[132].mxu1  ;;  %v2153_v9 = vpop.f32.mrb[132].mxu0  ;;  %v13542_v14 = vpack.c.bf16 %v2383_v27, %v2367_v35  ;;  %v13544_v48 = vpack.c.bf16 %v2385_v32, %v2369_v53 }
 0x402   : > { %v2041_v46 = vadd.f32 %v2040_v49, %v13334_v43  ;;  %v2154_v38 = vadd.f32 %v2153_v9, %v13338_v21  ;;  %v2042_v25 = vpop.f32.mrb[133].mxu1  ;;  %v2155_v6 = vpop.f32.mrb[133].mxu0 }
 0x403   : > { %v2043_v19 = vadd.f32 %v2042_v25, %v13344_v24  ;;  %v2156_v22 = vadd.f32 %v2155_v6, %v13356_v37  ;;  %v2044_v15 = vpop.f32.mrb[134].mxu1  ;;  %v2157_v17 = vpop.f32.mrb[134].mxu0 }
 0x404   : > { %v2045_v36 = vadd.f32 %v2044_v15, %v13334_v43  ;;  %v2158_v4 = vadd.f32 %v2157_v17, %v13338_v21  ;;  %v2046_v39 = vpop.f32.mrb[135].mxu1  ;;  %v2159_v33 = vpop.f32.mrb[135].mxu0  ;;  %v2398_v44 = vmax.f32 %v2041_v46, 0.0  ;;  %v2400_v0 = vmax.f32 %v2154_v38, 0.0 }
 0x405   : > { %v2047_v40 = vadd.f32 %v2046_v39, %v13344_v24  ;;  %v2160_v13 = vadd.f32 %v2159_v33, %v13356_v37  ;;  %v2399_v53 = vmax.f32 %v2043_v19, 0.0  ;;  %v2401_v27 = vmax.f32 %v2156_v22, 0.0 }
 0x406   : > { %v2414_v16 = vmax.f32 %v2045_v36, 0.0  ;;  %v2416_v35 = vmax.f32 %v2158_v4, 0.0  ;;  %4205 = vmatmul.mubr.bf16.gmra.mrb[240].mxu1 %v13458_v51  ;;  %4302 = vmatmul.mubr.bf16.gmra.mrb[240].mxu0 %v13460_v59  ;;  %v11597_v51 = vld [vmem:[%s16342_s2] sm:$0xff] }
 0x407   : > { %v2415_v32 = vmax.f32 %v2047_v40, 0.0  ;;  %v2417_v43 = vmax.f32 %v2160_v13, 0.0  ;;  %4212 = vmatprep.mubr.bf16.mxu1 %v13482_v41  ;;  %4309 = vmatprep.mubr.bf16.mxu0 %v13484_v60  ;;  %v13566_v59 = vrot.slane %v11597_v51, %v12497_v11 }
 0x408   : > { %v13558_v21 = vpack.c.bf16 %v2414_v16, %v2398_v44  ;;  %v13560_v24 = vpack.c.bf16 %v2416_v35, %v2400_v0 }
 0x409   : > { %v10064_v37 = vpop.f32.mrb[136].mxu1  ;;  %v10128_v49 = vpop.f32.mrb[136].mxu0  ;;  %v13568_v9 = vpack.c.bf16 %v2415_v32, %v2399_v53  ;;  %v13570_v46 = vpack.c.bf16 %v2417_v43, %v2401_v27 }
 0x40a   : > { %v10065_v41 = vpop.f32.mrb[137].mxu1  ;;  %v10129_v38 = vpop.f32.mrb[137].mxu0 }
 0x40b   : > { %v10066_v60 = vadd.f32 %v10065_v41, %v10064_v37  ;;  %v10130_v25 = vadd.f32 %v10129_v38, %v10128_v49  ;;  %v10067_v6 = vpop.f32.mrb[138].mxu1  ;;  %v10131_v19 = vpop.f32.mrb[138].mxu0 }
 0x40c   : > { %v10068_v22 = vpop.f32.mrb[139].mxu1  ;;  %v10132_v15 = vpop.f32.mrb[139].mxu0 }
 0x40d   : > { %v3609_v17 = vadd.f32 %v10066_v60, %v13566_v59  ;;  %v10069_v36 = vadd.f32 %v10068_v22, %v10067_v6  ;;  %v10133_v4 = vadd.f32 %v10132_v15, %v10131_v19 }
 0x40e   : > { %4213 = vmatmul.mubr.bf16.gmra.mrb[244].mxu1 %v13478_v42  ;;  %4310 = vmatmul.mubr.bf16.gmra.mrb[244].mxu0 %v13480_v58 }
 0x40f   : > { %v13575_v39 = vadd.f32 %v10130_v25, %v3609_v17  ;;  %v3612_v33 = vadd.f32 %v10069_v36, %v13566_v59  ;;  %4220 = vmatprep.mubr.bf16.mxu1 %v13502_v57  ;;  %4317 = vmatprep.mubr.bf16.mxu0 %v13504_v29 }
 0x411   : > { %v13580_v40 = vadd.f32 %v10133_v4, %v3612_v33  ;;  %v10070_v13 = vpop.f32.mrb[140].mxu1  ;;  %v10134_v44 = vpop.f32.mrb[140].mxu0 }
 0x412   : > { %v10071_v0 = vpop.f32.mrb[141].mxu1  ;;  %v10135_v16 = vpop.f32.mrb[141].mxu0 }
 0x413   : > { %v10072_v35 = vadd.f32 %v10071_v0, %v10070_v13  ;;  %v10136_v53 = vadd.f32 %v10135_v16, %v10134_v44  ;;  %v10073_v27 = vpop.f32.mrb[142].mxu1  ;;  %v10137_v42 = vpop.f32.mrb[142].mxu0 }
 0x414   : > { %v10074_v32 = vpop.f32.mrb[143].mxu1  ;;  %v10138_v58 = vpop.f32.mrb[143].mxu0 }
 0x415   : > { %v3617_v43 = vadd.f32 %v10072_v35, %v13566_v59  ;;  %v10075_v37 = vadd.f32 %v10074_v32, %v10073_v27  ;;  %v10139_v49 = vadd.f32 %v10138_v58, %v10137_v42 }
 0x416   : > { %4221 = vmatmul.mubr.bf16.gmra.mrb[248].mxu1 %v13498_v2  ;;  %4318 = vmatmul.mubr.bf16.gmra.mrb[248].mxu0 %v13500_v55 }
 0x417   : > { %v13585_v57 = vadd.f32 %v10136_v53, %v3617_v43  ;;  %v3620_v29 = vadd.f32 %v10075_v37, %v13566_v59  ;;  %4228 = vmatprep.mubr.bf16.mxu1 %v13522_v7  ;;  %4325 = vmatprep.mubr.bf16.mxu0 %v13524_v20 }
 0x419   : > { %v13590_v51 = vadd.f32 %v10139_v49, %v3620_v29  ;;  %v10076_v41 = vpop.f32.mrb[144].mxu1  ;;  %v10140_v38 = vpop.f32.mrb[144].mxu0 }
 0x41a   : > { %v10077_v60 = vpop.f32.mrb[145].mxu1  ;;  %v10141_v25 = vpop.f32.mrb[145].mxu0 }
 0x41b   : > { %v10078_v6 = vadd.f32 %v10077_v60, %v10076_v41  ;;  %v10142_v19 = vadd.f32 %v10141_v25, %v10140_v38  ;;  %v10079_v22 = vpop.f32.mrb[146].mxu1  ;;  %v10143_v2 = vpop.f32.mrb[146].mxu0 }
 0x41c   : > { %v10080_v15 = vpop.f32.mrb[147].mxu1  ;;  %v10144_v55 = vpop.f32.mrb[147].mxu0 }
 0x41d   : > { %v3625_v17 = vadd.f32 %v10078_v6, %v13566_v59  ;;  %v10081_v36 = vadd.f32 %v10080_v15, %v10079_v22  ;;  %v10145_v4 = vadd.f32 %v10144_v55, %v10143_v2  ;;  %v16367_v55 = vmov 0  }
 0x41e   : > { %4229 = vmatmul.mubr.bf16.gmra.mrb[252].mxu1 %v13518_v5  ;;  %4326 = vmatmul.mubr.bf16.gmra.mrb[252].mxu0 %v13520_v26 }
 0x41f   : > { %v13595_v7 = vadd.f32 %v10142_v19, %v3625_v17  ;;  %v3628_v20 = vadd.f32 %v10081_v36, %v13566_v59  ;;  %4236 = vmatprep.mubr.bf16.mxu1 %v13542_v14  ;;  %4333 = vmatprep.mubr.bf16.mxu0 %v13544_v48 }
 0x421   : > { %v13600_v33 = vadd.f32 %v10145_v4, %v3628_v20  ;;  %v10082_v13 = vpop.f32.mrb[148].mxu1  ;;  %v10146_v44 = vpop.f32.mrb[148].mxu0 }
 0x422   : > { %v10083_v0 = vpop.f32.mrb[149].mxu1  ;;  %v10147_v16 = vpop.f32.mrb[149].mxu0 }
 0x423   : > { %v10084_v35 = vadd.f32 %v10083_v0, %v10082_v13  ;;  %v10148_v53 = vadd.f32 %v10147_v16, %v10146_v44  ;;  %v10085_v27 = vpop.f32.mrb[150].mxu1  ;;  %v10149_v5 = vpop.f32.mrb[150].mxu0 }
 0x424   : > { %v10086_v42 = vpop.f32.mrb[151].mxu1  ;;  %v10150_v26 = vpop.f32.mrb[151].mxu0 }
 0x425   : > { %v3633_v32 = vadd.f32 %v10084_v35, %v13566_v59  ;;  %v10087_v58 = vadd.f32 %v10086_v42, %v10085_v27  ;;  %v10151_v43 = vadd.f32 %v10150_v26, %v10149_v5 }
 0x426   : > { %4237 = vmatmul.mubr.bf16.gmra.mrb[0].mxu1 %v13538_v54  ;;  %4334 = vmatmul.mubr.bf16.gmra.mrb[0].mxu0 %v13540_v56 }
 0x427   : > { %v13605_v14 = vadd.f32 %v10148_v53, %v3633_v32  ;;  %v3636_v48 = vadd.f32 %v10087_v58, %v13566_v59  ;;  %4244 = vmatprep.mubr.bf16.mxu1 %v13568_v9  ;;  %4341 = vmatprep.mubr.bf16.mxu0 %v13570_v46 }
 0x429   : > { %v13610_v37 = vadd.f32 %v10151_v43, %v3636_v48  ;;  %v10088_v49 = vpop.f32.mrb[152].mxu1  ;;  %v10152_v29 = vpop.f32.mrb[152].mxu0 }
 0x42a   : > { %v10089_v41 = vpop.f32.mrb[153].mxu1  ;;  %v10153_v38 = vpop.f32.mrb[153].mxu0 }
 0x42b   : > { %v10090_v60 = vadd.f32 %v10089_v41, %v10088_v49  ;;  %v10154_v25 = vadd.f32 %v10153_v38, %v10152_v29  ;;  %v10091_v6 = vpop.f32.mrb[154].mxu1  ;;  %v10155_v54 = vpop.f32.mrb[154].mxu0 }
 0x42c   : > { %v10092_v19 = vpop.f32.mrb[155].mxu1  ;;  %v10156_v56 = vpop.f32.mrb[155].mxu0 }
 0x42d   : > { %v3641_v22 = vadd.f32 %v10090_v60, %v13566_v59  ;;  %v10093_v2 = vadd.f32 %v10092_v19, %v10091_v6  ;;  %v10157_v15 = vadd.f32 %v10156_v56, %v10155_v54 }
 0x42e   : > { %4245 = vmatmul.mubr.bf16.gmra.mrb[4].mxu1 %v13558_v21  ;;  %4342 = vmatmul.mubr.bf16.gmra.mrb[4].mxu0 %v13560_v24 }
 0x42f   : > { %v13615_v9 = vadd.f32 %v10154_v25, %v3641_v22  ;;  %v3644_v46 = vadd.f32 %v10093_v2, %v13566_v59  ;;  %5580 = vmatprep.mubr.bf16.mxu0 %v16367_v55 }
 0x431   : > { %v13619_v17 = vadd.f32 %v10157_v15, %v3644_v46  ;;  %v10094_v36 = vpop.f32.mrb[156].mxu1  ;;  %v10158_v4 = vpop.f32.mrb[156].mxu0 }
 0x432   : > { %v10095_v20 = vpop.f32.mrb[157].mxu1  ;;  %v10159_v13 = vpop.f32.mrb[157].mxu0 }
 0x433   : > { %v10096_v44 = vadd.f32 %v10095_v20, %v10094_v36  ;;  %v10160_v0 = vadd.f32 %v10159_v13, %v10158_v4  ;;  %v10097_v16 = vpop.f32.mrb[158].mxu1  ;;  %v10161_v35 = vpop.f32.mrb[158].mxu0 }
 0x434   : > { %v10098_v53 = vpop.f32.mrb[159].mxu1  ;;  %v10162_v21 = vpop.f32.mrb[159].mxu0 }
 0x435   : > { %v3649_v24 = vadd.f32 %v10096_v44, %v13566_v59  ;;  %v10099_v27 = vadd.f32 %v10098_v53, %v10097_v16  ;;  %v10163_v5 = vadd.f32 %v10162_v21, %v10161_v35 }
 0x437   : > { %v13622_v42 = vadd.f32 %v10160_v0, %v3649_v24  ;;  %v3652_v26 = vadd.f32 %v10099_v27, %v13566_v59 }
 0x439   : > { %v13625_v32 = vadd.f32 %v10163_v5, %v3652_v26  ;;  %v10100_v58 = vpop.f32.mrb[160].mxu1  ;;  %v10164_v43 = vpop.f32.mrb[160].mxu0 }
 0x43a   : > { %v10101_v48 = vpop.f32.mrb[161].mxu1  ;;  %v10165_v49 = vpop.f32.mrb[161].mxu0 }
 0x43b   : > { %v10102_v29 = vadd.f32 %v10101_v48, %v10100_v58  ;;  %v10166_v41 = vadd.f32 %v10165_v49, %v10164_v43  ;;  %v10103_v38 = vpop.f32.mrb[162].mxu1  ;;  %v10167_v60 = vpop.f32.mrb[162].mxu0 }
 0x43c   : > { %v10104_v25 = vpop.f32.mrb[163].mxu1  ;;  %v10168_v6 = vpop.f32.mrb[163].mxu0 }
 0x43d   : > { %v3657_v54 = vadd.f32 %v10102_v29, %v13566_v59  ;;  %v10105_v19 = vadd.f32 %v10104_v25, %v10103_v38  ;;  %v10169_v56 = vadd.f32 %v10168_v6, %v10167_v60 }
 0x43f   : > { %v13628_v22 = vadd.f32 %v10166_v41, %v3657_v54  ;;  %v3660_v2 = vadd.f32 %v10105_v19, %v13566_v59 }
 0x441   : > { %v13631_v15 = vadd.f32 %v10169_v56, %v3660_v2  ;;  %v10106_v46 = vpop.f32.mrb[164].mxu1  ;;  %v10170_v36 = vpop.f32.mrb[164].mxu0 }
 0x442   : > { %v10107_v4 = vpop.f32.mrb[165].mxu1  ;;  %v10171_v20 = vpop.f32.mrb[165].mxu0 }
 0x443   : > { %v10108_v13 = vadd.f32 %v10107_v4, %v10106_v46  ;;  %v10172_v44 = vadd.f32 %v10171_v20, %v10170_v36  ;;  %v10109_v0 = vpop.f32.mrb[166].mxu1  ;;  %v10173_v16 = vpop.f32.mrb[166].mxu0 }
 0x444   : > { %v10110_v35 = vpop.f32.mrb[167].mxu1  ;;  %v10174_v53 = vpop.f32.mrb[167].mxu0 }
 0x445   : > { %v3665_v21 = vadd.f32 %v10108_v13, %v13566_v59  ;;  %v10111_v24 = vadd.f32 %v10110_v35, %v10109_v0  ;;  %v10175_v27 = vadd.f32 %v10174_v53, %v10173_v16 }
 0x447   : > { %v13634_v5 = vadd.f32 %v10172_v44, %v3665_v21  ;;  %v3668_v26 = vadd.f32 %v10111_v24, %v13566_v59 }
 0x449   : > { %v13637_v58 = vadd.f32 %v10175_v27, %v3668_v26  ;;  %v10192_v43 = vpop.f32.mrb[168].mxu1  ;;  %v10256_v48 = vpop.f32.mrb[168].mxu0 }
 0x44a   : > { %v10193_v49 = vpop.f32.mrb[169].mxu1  ;;  %v10257_v29 = vpop.f32.mrb[169].mxu0 }
 0x44b   : > { %v10194_v41 = vadd.f32 %v10193_v49, %v10192_v43  ;;  %v10258_v38 = vadd.f32 %v10257_v29, %v10256_v48  ;;  %v10195_v60 = vpop.f32.mrb[170].mxu1  ;;  %v10259_v25 = vpop.f32.mrb[170].mxu0 }
 0x44c   : > { %v10196_v6 = vpop.f32.mrb[171].mxu1  ;;  %v10260_v54 = vpop.f32.mrb[171].mxu0 }
 0x44d   : > { %v3803_v19 = vadd.f32 %v10194_v41, %v13575_v39  ;;  %v10197_v56 = vadd.f32 %v10196_v6, %v10195_v60  ;;  %v10261_v2 = vadd.f32 %v10260_v54, %v10259_v25 }
 0x44f   : > { %v13640_v46 = vadd.f32 %v10258_v38, %v3803_v19  ;;  %v3806_v59 = vadd.f32 %v10197_v56, %v13580_v40 }
 0x451   : > { %v13643_v36 = vadd.f32 %v10261_v2, %v3806_v59  ;;  %v10198_v4 = vpop.f32.mrb[172].mxu1  ;;  %v10262_v20 = vpop.f32.mrb[172].mxu0 }
 0x452   : > { %v10199_v13 = vpop.f32.mrb[173].mxu1  ;;  %v10263_v44 = vpop.f32.mrb[173].mxu0 }
 0x453   : > { %v10200_v0 = vadd.f32 %v10199_v13, %v10198_v4  ;;  %v10264_v16 = vadd.f32 %v10263_v44, %v10262_v20  ;;  %v10201_v35 = vpop.f32.mrb[174].mxu1  ;;  %v10265_v53 = vpop.f32.mrb[174].mxu0 }
 0x454   : > { %v10202_v21 = vpop.f32.mrb[175].mxu1  ;;  %v10266_v24 = vpop.f32.mrb[175].mxu0 }
 0x455   : > { %v3811_v39 = vadd.f32 %v10200_v0, %v13585_v57  ;;  %v10203_v27 = vadd.f32 %v10202_v21, %v10201_v35  ;;  %v10267_v26 = vadd.f32 %v10266_v24, %v10265_v53 }
 0x457   : > { %v13646_v43 = vadd.f32 %v10264_v16, %v3811_v39  ;;  %v3814_v40 = vadd.f32 %v10203_v27, %v13590_v51 }
 0x459   : > { %v13649_v48 = vadd.f32 %v10267_v26, %v3814_v40  ;;  %v10204_v49 = vpop.f32.mrb[176].mxu1  ;;  %v10268_v29 = vpop.f32.mrb[176].mxu0 }
 0x45a   : > { %v10205_v41 = vpop.f32.mrb[177].mxu1  ;;  %v10269_v38 = vpop.f32.mrb[177].mxu0 }
 0x45b   : > { %v10206_v60 = vadd.f32 %v10205_v41, %v10204_v49  ;;  %v10270_v25 = vadd.f32 %v10269_v38, %v10268_v29  ;;  %v10207_v6 = vpop.f32.mrb[178].mxu1  ;;  %v10271_v54 = vpop.f32.mrb[178].mxu0 }
 0x45c   : > { %v10208_v19 = vpop.f32.mrb[179].mxu1  ;;  %v10272_v56 = vpop.f32.mrb[179].mxu0 }
 0x45d   : > { %v3819_v57 = vadd.f32 %v10206_v60, %v13595_v7  ;;  %v10209_v2 = vadd.f32 %v10208_v19, %v10207_v6  ;;  %v10273_v59 = vadd.f32 %v10272_v56, %v10271_v54 }
 0x45f   : > { %v13652_v4 = vadd.f32 %v10270_v25, %v3819_v57  ;;  %v3822_v51 = vadd.f32 %v10209_v2, %v13600_v33 }
 0x461   : > { %v13655_v20 = vadd.f32 %v10273_v59, %v3822_v51  ;;  %v10210_v13 = vpop.f32.mrb[180].mxu1  ;;  %v10274_v44 = vpop.f32.mrb[180].mxu0 }
 0x462   : > { %v10211_v0 = vpop.f32.mrb[181].mxu1  ;;  %v10275_v16 = vpop.f32.mrb[181].mxu0 }
 0x463   : > { %v10212_v35 = vadd.f32 %v10211_v0, %v10210_v13  ;;  %v10276_v53 = vadd.f32 %v10275_v16, %v10274_v44  ;;  %v10213_v21 = vpop.f32.mrb[182].mxu1  ;;  %v10277_v24 = vpop.f32.mrb[182].mxu0 }
 0x464   : > { %v10214_v39 = vpop.f32.mrb[183].mxu1  ;;  %v10278_v27 = vpop.f32.mrb[183].mxu0 }
 0x465   : > { %v3827_v7 = vadd.f32 %v10212_v35, %v13605_v14  ;;  %v10215_v26 = vadd.f32 %v10214_v39, %v10213_v21  ;;  %v10279_v40 = vadd.f32 %v10278_v27, %v10277_v24 }
 0x467   : > { %v13658_v49 = vadd.f32 %v10276_v53, %v3827_v7  ;;  %v3830_v33 = vadd.f32 %v10215_v26, %v13610_v37 }
 0x469   : > { %v13661_v29 = vadd.f32 %v10279_v40, %v3830_v33  ;;  %v10216_v41 = vpop.f32.mrb[184].mxu1  ;;  %v10280_v38 = vpop.f32.mrb[184].mxu0 }
 0x46a   : > { %v10217_v60 = vpop.f32.mrb[185].mxu1  ;;  %v10281_v25 = vpop.f32.mrb[185].mxu0 }
 0x46b   : > { %v10218_v6 = vadd.f32 %v10217_v60, %v10216_v41  ;;  %v10282_v54 = vadd.f32 %v10281_v25, %v10280_v38  ;;  %v10219_v19 = vpop.f32.mrb[186].mxu1  ;;  %v10283_v56 = vpop.f32.mrb[186].mxu0 }
 0x46c   : > { %v10220_v57 = vpop.f32.mrb[187].mxu1  ;;  %v10284_v2 = vpop.f32.mrb[187].mxu0 }
 0x46d   : > { %v3835_v14 = vadd.f32 %v10218_v6, %v13615_v9  ;;  %v10221_v59 = vadd.f32 %v10220_v57, %v10219_v19  ;;  %v10285_v51 = vadd.f32 %v10284_v2, %v10283_v56 }
 0x46f   : > { %v13664_v13 = vadd.f32 %v10282_v54, %v3835_v14  ;;  %v3838_v37 = vadd.f32 %v10221_v59, %v13619_v17 }
 0x471   : > { %v13667_v44 = vadd.f32 %v10285_v51, %v3838_v37  ;;  %v10222_v0 = vpop.f32.mrb[188].mxu1  ;;  %v10286_v16 = vpop.f32.mrb[188].mxu0 }
 0x472   : > { %v10223_v35 = vpop.f32.mrb[189].mxu1  ;;  %v10287_v53 = vpop.f32.mrb[189].mxu0 }
 0x473   : > { %v10224_v21 = vadd.f32 %v10223_v35, %v10222_v0  ;;  %v10288_v24 = vadd.f32 %v10287_v53, %v10286_v16  ;;  %v10225_v39 = vpop.f32.mrb[190].mxu1  ;;  %v10289_v27 = vpop.f32.mrb[190].mxu0 }
 0x474   : > { %v10226_v7 = vpop.f32.mrb[191].mxu1  ;;  %v10290_v26 = vpop.f32.mrb[191].mxu0 }
 0x475   : > { %v3843_v9 = vadd.f32 %v10224_v21, %v13622_v42  ;;  %v10227_v40 = vadd.f32 %v10226_v7, %v10225_v39  ;;  %v10291_v33 = vadd.f32 %v10290_v26, %v10289_v27 }
 0x477   : > { %v13670_v41 = vadd.f32 %v10288_v24, %v3843_v9  ;;  %v3846_v17 = vadd.f32 %v10227_v40, %v13625_v32 }
 0x479   : > { %v13673_v38 = vadd.f32 %v10291_v33, %v3846_v17  ;;  %v10228_v60 = vpop.f32.mrb[192].mxu1  ;;  %v10292_v25 = vpop.f32.mrb[192].mxu0 }
 0x47a   : > { %v10229_v6 = vpop.f32.mrb[193].mxu1  ;;  %v10293_v54 = vpop.f32.mrb[193].mxu0 }
 0x47b   : > { %v10230_v19 = vadd.f32 %v10229_v6, %v10228_v60  ;;  %v10294_v56 = vadd.f32 %v10293_v54, %v10292_v25  ;;  %v10231_v57 = vpop.f32.mrb[194].mxu1  ;;  %v10295_v2 = vpop.f32.mrb[194].mxu0 }
 0x47c   : > { %v10232_v14 = vpop.f32.mrb[195].mxu1  ;;  %v10296_v59 = vpop.f32.mrb[195].mxu0 }
 0x47d   : > { %v3851_v42 = vadd.f32 %v10230_v19, %v13628_v22  ;;  %v10233_v51 = vadd.f32 %v10232_v14, %v10231_v57  ;;  %v10297_v37 = vadd.f32 %v10296_v59, %v10295_v2 }
 0x47f   : > { %v13676_v0 = vadd.f32 %v10294_v56, %v3851_v42  ;;  %v3854_v32 = vadd.f32 %v10233_v51, %v13631_v15 }
 0x481   : > { %v13679_v16 = vadd.f32 %v10297_v37, %v3854_v32  ;;  %v10234_v35 = vpop.f32.mrb[196].mxu1  ;;  %v10298_v53 = vpop.f32.mrb[196].mxu0 }
 0x482   : > { %v10235_v21 = vpop.f32.mrb[197].mxu1  ;;  %v10299_v24 = vpop.f32.mrb[197].mxu0 }
 0x483   : > { %v10236_v39 = vadd.f32 %v10235_v21, %v10234_v35  ;;  %v10300_v27 = vadd.f32 %v10299_v24, %v10298_v53  ;;  %v10237_v7 = vpop.f32.mrb[198].mxu1  ;;  %v10301_v26 = vpop.f32.mrb[198].mxu0 }
 0x484   : > { %v10238_v9 = vpop.f32.mrb[199].mxu1  ;;  %v10302_v40 = vpop.f32.mrb[199].mxu0 }
 0x485   : > { %v3859_v22 = vadd.f32 %v10236_v39, %v13634_v5  ;;  %v10239_v33 = vadd.f32 %v10238_v9, %v10237_v7  ;;  %v10303_v17 = vadd.f32 %v10302_v40, %v10301_v26 }
 0x487   : > { %v13682_v60 = vadd.f32 %v10300_v27, %v3859_v22  ;;  %v3862_v15 = vadd.f32 %v10239_v33, %v13637_v58 }
 0x489   : > { %v13685_v25 = vadd.f32 %v10303_v17, %v3862_v15  ;;  %v10320_v6 = vpop.f32.mrb[200].mxu1  ;;  %v10384_v54 = vpop.f32.mrb[200].mxu0 }
 0x48a   : > { %v10321_v19 = vpop.f32.mrb[201].mxu1  ;;  %v10385_v56 = vpop.f32.mrb[201].mxu0 }
 0x48b   : > { %v10322_v57 = vadd.f32 %v10321_v19, %v10320_v6  ;;  %v10386_v2 = vadd.f32 %v10385_v56, %v10384_v54  ;;  %v10323_v14 = vpop.f32.mrb[202].mxu1  ;;  %v10387_v59 = vpop.f32.mrb[202].mxu0 }
 0x48c   : > { %v10324_v42 = vpop.f32.mrb[203].mxu1  ;;  %v10388_v51 = vpop.f32.mrb[203].mxu0 }
 0x48d   : > { %v3997_v5 = vadd.f32 %v10322_v57, %v13640_v46  ;;  %v10325_v37 = vadd.f32 %v10324_v42, %v10323_v14  ;;  %v10389_v32 = vadd.f32 %v10388_v51, %v10387_v59 }
 0x48f   : > { %v13688_v35 = vadd.f32 %v10386_v2, %v3997_v5  ;;  %v4000_v58 = vadd.f32 %v10325_v37, %v13643_v36 }
 0x491   : > { %v13691_v53 = vadd.f32 %v10389_v32, %v4000_v58  ;;  %v10326_v21 = vpop.f32.mrb[204].mxu1  ;;  %v10390_v24 = vpop.f32.mrb[204].mxu0 }
 0x492   : > { %v10327_v39 = vpop.f32.mrb[205].mxu1  ;;  %v10391_v27 = vpop.f32.mrb[205].mxu0 }
 0x493   : > { %v10328_v7 = vadd.f32 %v10327_v39, %v10326_v21  ;;  %v10392_v26 = vadd.f32 %v10391_v27, %v10390_v24  ;;  %v10329_v9 = vpop.f32.mrb[206].mxu1  ;;  %v10393_v40 = vpop.f32.mrb[206].mxu0 }
 0x494   : > { %v10330_v22 = vpop.f32.mrb[207].mxu1  ;;  %v10394_v33 = vpop.f32.mrb[207].mxu0 }
 0x495   : > { %v4005_v46 = vadd.f32 %v10328_v7, %v13646_v43  ;;  %v10331_v17 = vadd.f32 %v10330_v22, %v10329_v9  ;;  %v10395_v15 = vadd.f32 %v10394_v33, %v10393_v40 }
 0x497   : > { %v13694_v6 = vadd.f32 %v10392_v26, %v4005_v46  ;;  %v4008_v36 = vadd.f32 %v10331_v17, %v13649_v48 }
 0x499   : > { %v13697_v54 = vadd.f32 %v10395_v15, %v4008_v36  ;;  %v10332_v19 = vpop.f32.mrb[208].mxu1  ;;  %v10396_v56 = vpop.f32.mrb[208].mxu0 }
 0x49a   : > { %v10333_v57 = vpop.f32.mrb[209].mxu1  ;;  %v10397_v2 = vpop.f32.mrb[209].mxu0 }
 0x49b   : > { %v10334_v14 = vadd.f32 %v10333_v57, %v10332_v19  ;;  %v10398_v59 = vadd.f32 %v10397_v2, %v10396_v56  ;;  %v10335_v42 = vpop.f32.mrb[210].mxu1  ;;  %v10399_v51 = vpop.f32.mrb[210].mxu0 }
 0x49c   : > { %v10336_v5 = vpop.f32.mrb[211].mxu1  ;;  %v10400_v37 = vpop.f32.mrb[211].mxu0 }
 0x49d   : > { %v4013_v43 = vadd.f32 %v10334_v14, %v13652_v4  ;;  %v10337_v32 = vadd.f32 %v10336_v5, %v10335_v42  ;;  %v10401_v58 = vadd.f32 %v10400_v37, %v10399_v51 }
 0x49f   : > { %v13700_v21 = vadd.f32 %v10398_v59, %v4013_v43  ;;  %v4016_v48 = vadd.f32 %v10337_v32, %v13655_v20 }
 0x4a1   : > { %v13703_v24 = vadd.f32 %v10401_v58, %v4016_v48  ;;  %v10338_v39 = vpop.f32.mrb[212].mxu1  ;;  %v10402_v27 = vpop.f32.mrb[212].mxu0 }
 0x4a2   : > { %v10339_v7 = vpop.f32.mrb[213].mxu1  ;;  %v10403_v26 = vpop.f32.mrb[213].mxu0 }
 0x4a3   : > { %v10340_v9 = vadd.f32 %v10339_v7, %v10338_v39  ;;  %v10404_v40 = vadd.f32 %v10403_v26, %v10402_v27  ;;  %v10341_v22 = vpop.f32.mrb[214].mxu1  ;;  %v10405_v33 = vpop.f32.mrb[214].mxu0 }
 0x4a4   : > { %v10342_v46 = vpop.f32.mrb[215].mxu1  ;;  %v10406_v17 = vpop.f32.mrb[215].mxu0 }
 0x4a5   : > { %v4021_v4 = vadd.f32 %v10340_v9, %v13658_v49  ;;  %v10343_v15 = vadd.f32 %v10342_v46, %v10341_v22  ;;  %v10407_v36 = vadd.f32 %v10406_v17, %v10405_v33 }
 0x4a7   : > { %v13706_v19 = vadd.f32 %v10404_v40, %v4021_v4  ;;  %v4024_v20 = vadd.f32 %v10343_v15, %v13661_v29 }
 0x4a9   : > { %v13709_v56 = vadd.f32 %v10407_v36, %v4024_v20  ;;  %v10344_v57 = vpop.f32.mrb[216].mxu1  ;;  %v10408_v2 = vpop.f32.mrb[216].mxu0 }
 0x4aa   : > { %v10345_v14 = vpop.f32.mrb[217].mxu1  ;;  %v10409_v59 = vpop.f32.mrb[217].mxu0 }
 0x4ab   : > { %v10346_v42 = vadd.f32 %v10345_v14, %v10344_v57  ;;  %v10410_v51 = vadd.f32 %v10409_v59, %v10408_v2  ;;  %v10347_v5 = vpop.f32.mrb[218].mxu1  ;;  %v10411_v37 = vpop.f32.mrb[218].mxu0 }
 0x4ac   : > { %v10348_v43 = vpop.f32.mrb[219].mxu1  ;;  %v10412_v32 = vpop.f32.mrb[219].mxu0 }
 0x4ad   : > { %v4029_v49 = vadd.f32 %v10346_v42, %v13664_v13  ;;  %v10349_v58 = vadd.f32 %v10348_v43, %v10347_v5  ;;  %v10413_v48 = vadd.f32 %v10412_v32, %v10411_v37 }
 0x4af   : > { %v13712_v39 = vadd.f32 %v10410_v51, %v4029_v49  ;;  %v4032_v29 = vadd.f32 %v10349_v58, %v13667_v44 }
 0x4b1   : > { %v13715_v27 = vadd.f32 %v10413_v48, %v4032_v29  ;;  %v10350_v7 = vpop.f32.mrb[220].mxu1  ;;  %v10414_v26 = vpop.f32.mrb[220].mxu0 }
 0x4b2   : > { %v10351_v9 = vpop.f32.mrb[221].mxu1  ;;  %v10415_v40 = vpop.f32.mrb[221].mxu0 }
 0x4b3   : > { %v10352_v22 = vadd.f32 %v10351_v9, %v10350_v7  ;;  %v10416_v33 = vadd.f32 %v10415_v40, %v10414_v26  ;;  %v10353_v46 = vpop.f32.mrb[222].mxu1  ;;  %v10417_v17 = vpop.f32.mrb[222].mxu0 }
 0x4b4   : > { %v10354_v4 = vpop.f32.mrb[223].mxu1  ;;  %v10418_v15 = vpop.f32.mrb[223].mxu0 }
 0x4b5   : > { %v4037_v13 = vadd.f32 %v10352_v22, %v13670_v41  ;;  %v10355_v36 = vadd.f32 %v10354_v4, %v10353_v46  ;;  %v10419_v20 = vadd.f32 %v10418_v15, %v10417_v17 }
 0x4b7   : > { %v13718_v57 = vadd.f32 %v10416_v33, %v4037_v13  ;;  %v4040_v44 = vadd.f32 %v10355_v36, %v13673_v38 }
 0x4b9   : > { %v13721_v2 = vadd.f32 %v10419_v20, %v4040_v44  ;;  %v10356_v14 = vpop.f32.mrb[224].mxu1  ;;  %v10420_v59 = vpop.f32.mrb[224].mxu0 }
 0x4ba   : > { %v10357_v42 = vpop.f32.mrb[225].mxu1  ;;  %v10421_v51 = vpop.f32.mrb[225].mxu0 }
 0x4bb   : > { %v10358_v5 = vadd.f32 %v10357_v42, %v10356_v14  ;;  %v10422_v37 = vadd.f32 %v10421_v51, %v10420_v59  ;;  %v10359_v43 = vpop.f32.mrb[226].mxu1  ;;  %v10423_v32 = vpop.f32.mrb[226].mxu0 }
 0x4bc   : > { %v10360_v49 = vpop.f32.mrb[227].mxu1  ;;  %v10424_v58 = vpop.f32.mrb[227].mxu0 }
 0x4bd   : > { %v4045_v41 = vadd.f32 %v10358_v5, %v13676_v0  ;;  %v10361_v48 = vadd.f32 %v10360_v49, %v10359_v43  ;;  %v10425_v29 = vadd.f32 %v10424_v58, %v10423_v32 }
 0x4bf   : > { %v13724_v7 = vadd.f32 %v10422_v37, %v4045_v41  ;;  %v4048_v38 = vadd.f32 %v10361_v48, %v13679_v16 }
 0x4c1   : > { %v13727_v26 = vadd.f32 %v10425_v29, %v4048_v38  ;;  %v10362_v9 = vpop.f32.mrb[228].mxu1  ;;  %v10426_v40 = vpop.f32.mrb[228].mxu0 }
 0x4c2   : > { %v10363_v22 = vpop.f32.mrb[229].mxu1  ;;  %v10427_v33 = vpop.f32.mrb[229].mxu0 }
 0x4c3   : > { %v10364_v46 = vadd.f32 %v10363_v22, %v10362_v9  ;;  %v10428_v17 = vadd.f32 %v10427_v33, %v10426_v40  ;;  %v10365_v4 = vpop.f32.mrb[230].mxu1  ;;  %v10429_v15 = vpop.f32.mrb[230].mxu0 }
 0x4c4   : > { %v10366_v13 = vpop.f32.mrb[231].mxu1  ;;  %v10430_v36 = vpop.f32.mrb[231].mxu0 }
 0x4c5   : > { %v4053_v0 = vadd.f32 %v10364_v46, %v13682_v60  ;;  %v10367_v20 = vadd.f32 %v10366_v13, %v10365_v4  ;;  %v10431_v44 = vadd.f32 %v10430_v36, %v10429_v15 }
 0x4c7   : > { %v13730_v14 = vadd.f32 %v10428_v17, %v4053_v0  ;;  %v4056_v16 = vadd.f32 %v10367_v20, %v13685_v25 }
 0x4c9   : > { %v13733_v59 = vadd.f32 %v10431_v44, %v4056_v16  ;;  %v10448_v42 = vpop.f32.mrb[232].mxu1  ;;  %v10512_v51 = vpop.f32.mrb[232].mxu0 }
 0x4ca   : > { %v10449_v5 = vpop.f32.mrb[233].mxu1  ;;  %v10513_v37 = vpop.f32.mrb[233].mxu0 }
 0x4cb   : > { %v10450_v43 = vadd.f32 %v10449_v5, %v10448_v42  ;;  %v10514_v32 = vadd.f32 %v10513_v37, %v10512_v51  ;;  %v10451_v49 = vpop.f32.mrb[234].mxu1  ;;  %v10515_v58 = vpop.f32.mrb[234].mxu0 }
 0x4cc   : > { %v10452_v41 = vpop.f32.mrb[235].mxu1  ;;  %v10516_v48 = vpop.f32.mrb[235].mxu0 }
 0x4cd   : > { %v4191_v60 = vadd.f32 %v10450_v43, %v13688_v35  ;;  %v10453_v29 = vadd.f32 %v10452_v41, %v10451_v49  ;;  %v10517_v38 = vadd.f32 %v10516_v48, %v10515_v58 }
 0x4cf   : > { %v4194_v9 = vadd.f32 %v10453_v29, %v13691_v53  ;;  %v4288_v40 = vadd.f32 %v10514_v32, %v4191_v60 }
 0x4d1   : > { %v10454_v25 = vpop.f32.mrb[236].mxu1  ;;  %v10518_v22 = vpop.f32.mrb[236].mxu0  ;;  %v13738_v33 = vadd.f32 %v4288_v40, %v12015_v45  ;;  %v4291_v46 = vadd.f32 %v10517_v38, %v4194_v9 }
 0x4d2   : > { %v10455_v17 = vpop.f32.mrb[237].mxu1  ;;  %v10519_v4 = vpop.f32.mrb[237].mxu0 }
 0x4d3   : > { %v10456_v15 = vadd.f32 %v10455_v17, %v10454_v25  ;;  %v10520_v13 = vadd.f32 %v10519_v4, %v10518_v22  ;;  %v10457_v36 = vpop.f32.mrb[238].mxu1  ;;  %v10521_v0 = vpop.f32.mrb[238].mxu0  ;;  %v4366_v35 = vsel %vm371_vm0, %v13738_v33, 0.0  ;;  %v13743_v20 = vadd.f32 %v4291_v46, %v12018_v31 }
 0x4d4   : > { %v10458_v53 = vpop.f32.mrb[239].mxu1  ;;  %v10522_v44 = vpop.f32.mrb[239].mxu0  ;;  %4367 = vadd.xlane.f32.xlu0 %v4366_v35 }
 0x4d5   : > { %v4199_v16 = vadd.f32 %v10456_v15, %v13694_v6  ;;  %v10459_v45 = vadd.f32 %v10458_v53, %v10457_v36  ;;  %v10523_v42 = vadd.f32 %v10522_v44, %v10521_v0  ;;  %v4369_v51 = vsel %vm371_vm0, %v13743_v20, 0.0 }
 0x4d6   : > { %4370 = vadd.xlane.f32.xlu1 %v4369_v51 }
 0x4d7   : > { %v4202_v5 = vadd.f32 %v10459_v45, %v13697_v54  ;;  %v4296_v37 = vadd.f32 %v10520_v13, %v4199_v16 }
 0x4d9   : > { %v10460_v43 = vpop.f32.mrb[240].mxu1  ;;  %v10524_v32 = vpop.f32.mrb[240].mxu0  ;;  %v13750_v49 = vadd.f32 %v4296_v37, %v12075_v8  ;;  %v4299_v31 = vadd.f32 %v10523_v42, %v4202_v5 }
 0x4da   : > { %v10461_v58 = vpop.f32.mrb[241].mxu1  ;;  %v10525_v41 = vpop.f32.mrb[241].mxu0 }
 0x4db   : > { %v10462_v48 = vadd.f32 %v10461_v58, %v10460_v43  ;;  %v10526_v60 = vadd.f32 %v10525_v41, %v10524_v32  ;;  %v10463_v6 = vpop.f32.mrb[242].mxu1  ;;  %v10527_v29 = vpop.f32.mrb[242].mxu0  ;;  %v4372_v38 = vsel %vm371_vm0, %v13750_v49, 0.0  ;;  %v13755_v9 = vadd.f32 %v4299_v31, %v12066_v47 }
 0x4dc   : > { %v10464_v54 = vpop.f32.mrb[243].mxu1  ;;  %v10528_v40 = vpop.f32.mrb[243].mxu0  ;;  %4373 = vadd.xlane.f32.xlu0 %v4372_v38 }
 0x4dd   : > { %v4207_v25 = vadd.f32 %v10462_v48, %v13700_v21  ;;  %v10465_v8 = vadd.f32 %v10464_v54, %v10463_v6  ;;  %v10529_v22 = vadd.f32 %v10528_v40, %v10527_v29  ;;  %v4375_v46 = vsel %vm371_vm0, %v13755_v9, 0.0 }
 0x4de   : > { %4376 = vadd.xlane.f32.xlu1 %v4375_v46 }
 0x4df   : > { %v4210_v17 = vadd.f32 %v10465_v8, %v13703_v24  ;;  %v4304_v4 = vadd.f32 %v10526_v60, %v4207_v25 }
 0x4e1   : > { %v10466_v15 = vpop.f32.mrb[244].mxu1  ;;  %v10530_v13 = vpop.f32.mrb[244].mxu0  ;;  %v13762_v36 = vadd.f32 %v4304_v4, %v12130_v12  ;;  %v4307_v47 = vadd.f32 %v10529_v22, %v4210_v17 }
 0x4e2   : > { %v10467_v0 = vpop.f32.mrb[245].mxu1  ;;  %v10531_v35 = vpop.f32.mrb[245].mxu0 }
 0x4e3   : > { %v10468_v53 = vadd.f32 %v10467_v0, %v10466_v15  ;;  %v10532_v44 = vadd.f32 %v10531_v35, %v10530_v13  ;;  %v10469_v21 = vpop.f32.mrb[246].mxu1  ;;  %v10533_v16 = vpop.f32.mrb[246].mxu0  ;;  %v4378_v45 = vsel %vm371_vm0, %v13762_v36, 0.0  ;;  %v13767_v42 = vadd.f32 %v4307_v47, %v12122_v3 }
 0x4e4   : > { %v10470_v24 = vpop.f32.mrb[247].mxu1  ;;  %v10534_v51 = vpop.f32.mrb[247].mxu0  ;;  %4379 = vadd.xlane.f32.xlu0 %v4378_v45 }
 0x4e5   : > { %v4215_v5 = vadd.f32 %v10468_v53, %v13706_v19  ;;  %v10471_v12 = vadd.f32 %v10470_v24, %v10469_v21  ;;  %v10535_v37 = vadd.f32 %v10534_v51, %v10533_v16  ;;  %v4381_v43 = vsel %vm371_vm0, %v13767_v42, 0.0 }
 0x4e6   : > { %4382 = vadd.xlane.f32.xlu1 %v4381_v43 }
 0x4e7   : > { %v4218_v32 = vadd.f32 %v10471_v12, %v13709_v56  ;;  %v4312_v31 = vadd.f32 %v10532_v44, %v4215_v5 }
 0x4e9   : > { %v10472_v58 = vpop.f32.mrb[248].mxu1  ;;  %v10536_v41 = vpop.f32.mrb[248].mxu0  ;;  %v13774_v48 = vadd.f32 %v4312_v31, %v12150_v10  ;;  %v4315_v3 = vadd.f32 %v10535_v37, %v4218_v32 }
 0x4ea   : > { %v10473_v60 = vpop.f32.mrb[249].mxu1  ;;  %v10537_v6 = vpop.f32.mrb[249].mxu0 }
 0x4eb   : > { %v10474_v29 = vadd.f32 %v10473_v60, %v10472_v58  ;;  %v10538_v38 = vadd.f32 %v10537_v6, %v10536_v41  ;;  %v10475_v19 = vpop.f32.mrb[250].mxu1  ;;  %v10539_v54 = vpop.f32.mrb[250].mxu0  ;;  %v4384_v40 = vsel %vm371_vm0, %v13774_v48, 0.0  ;;  %v13779_v25 = vadd.f32 %v4315_v3, %v12146_v52 }
 0x4ec   : > { %v10476_v56 = vpop.f32.mrb[251].mxu1  ;;  %v10540_v8 = vpop.f32.mrb[251].mxu0  ;;  %4385 = vadd.xlane.f32.xlu0 %v4384_v40 }
 0x4ed   : > { %v4223_v22 = vadd.f32 %v10474_v29, %v13712_v39  ;;  %v10477_v10 = vadd.f32 %v10476_v56, %v10475_v19  ;;  %v10541_v46 = vadd.f32 %v10540_v8, %v10539_v54  ;;  %v4387_v17 = vsel %vm371_vm0, %v13779_v25, 0.0 }
 0x4ee   : > { %4388 = vadd.xlane.f32.xlu1 %v4387_v17 }
 0x4ef   : > { %v4226_v4 = vadd.f32 %v10477_v10, %v13715_v27  ;;  %v4320_v15 = vadd.f32 %v10538_v38, %v4223_v22 }
 0x4f1   : > { %v10478_v13 = vpop.f32.mrb[252].mxu1  ;;  %v10542_v47 = vpop.f32.mrb[252].mxu0  ;;  %v13786_v0 = vadd.f32 %v4320_v15, %v12170_v1  ;;  %v4323_v52 = vadd.f32 %v10541_v46, %v4226_v4  ;;  %v16368_v15 = vld [vmem:[#allocation4_spill] sm:$0xff] }
 0x4f2   : > { %v10479_v35 = vpop.f32.mrb[253].mxu1  ;;  %v10543_v53 = vpop.f32.mrb[253].mxu0 }
 0x4f3   : > { %v10480_v44 = vadd.f32 %v10479_v35, %v10478_v13  ;;  %v10544_v21 = vadd.f32 %v10543_v53, %v10542_v47  ;;  %v10481_v39 = vpop.f32.mrb[254].mxu1  ;;  %v10545_v16 = vpop.f32.mrb[254].mxu0  ;;  %v4390_v45 = vsel %vm371_vm0, %v13786_v0, 0.0  ;;  %v13791_v24 = vadd.f32 %v4323_v52, %v12166_v63 }
 0x4f4   : > { %v10482_v27 = vpop.f32.mrb[255].mxu1  ;;  %v10546_v51 = vpop.f32.mrb[255].mxu0  ;;  %4391 = vadd.xlane.f32.xlu0 %v4390_v45 }
 0x4f5   : > { %v4231_v5 = vadd.f32 %v10480_v44, %v13718_v57  ;;  %v10483_v1 = vadd.f32 %v10482_v27, %v10481_v39  ;;  %v10547_v12 = vadd.f32 %v10546_v51, %v10545_v16  ;;  %v4393_v37 = vsel %vm371_vm0, %v13791_v24, 0.0  ;;  %v16369_v39 = vld [vmem:[#allocation3_spill] sm:$0xff] }
 0x4f6   : > { %4394 = vadd.xlane.f32.xlu1 %v4393_v37 }
 0x4f7   : > { %v4234_v43 = vadd.f32 %v10483_v1, %v13721_v2  ;;  %v4328_v32 = vadd.f32 %v10544_v21, %v4231_v5 }
 0x4f9   : > { %v10484_v31 = vpop.f32.mrb[0].mxu1  ;;  %v10548_v58 = vpop.f32.mrb[0].mxu0  ;;  %v13798_v41 = vadd.f32 %v4328_v32, %v12190_v23  ;;  %v4331_v63 = vadd.f32 %v10547_v12, %v4234_v43  ;;  %v16370_v43 = vld [vmem:[#allocation6_spill] sm:$0xff] }
 0x4fa   : > { %v10485_v3 = vpop.f32.mrb[1].mxu1  ;;  %v10549_v60 = vpop.f32.mrb[1].mxu0 }
 0x4fb   : > { %v10486_v6 = vadd.f32 %v10485_v3, %v10484_v31  ;;  %v10550_v29 = vadd.f32 %v10549_v60, %v10548_v58  ;;  %v10487_v57 = vpop.f32.mrb[2].mxu1  ;;  %v10551_v38 = vpop.f32.mrb[2].mxu0  ;;  %v4396_v19 = vsel %vm371_vm0, %v13798_v41, 0.0  ;;  %v13803_v54 = vadd.f32 %v4331_v63, %v12186_v50  ;;  %v16371_v63 = vld [vmem:[#allocation5_spill] sm:$0xff]  ;;  %v11318_v60 = vld [vmem:[%s16341_s1 + $0x28] sm:$0xff]  }
 0x4fc   : > { %v10488_v2 = vpop.f32.mrb[3].mxu1  ;;  %v10552_v40 = vpop.f32.mrb[3].mxu0  ;;  %4397 = vadd.xlane.f32.xlu0 %v4396_v19 }
 0x4fd   : > { %v4239_v56 = vadd.f32 %v10486_v6, %v13724_v7  ;;  %v10489_v23 = vadd.f32 %v10488_v2, %v10487_v57  ;;  %v10553_v8 = vadd.f32 %v10552_v40, %v10551_v38  ;;  %v4399_v22 = vsel %vm371_vm0, %v13803_v54, 0.0 }
 0x4fe   : > { %4400 = vadd.xlane.f32.xlu1 %v4399_v22 }
 0x4ff   : > { %v4242_v10 = vadd.f32 %v10489_v23, %v13727_v26  ;;  %v4336_v46 = vadd.f32 %v10550_v29, %v4239_v56 }
 0x501   : > { %v10490_v17 = vpop.f32.mrb[4].mxu1  ;;  %v10554_v4 = vpop.f32.mrb[4].mxu0  ;;  %v13810_v13 = vadd.f32 %v4336_v46, %v16368_v15  ;;  %v4339_v50 = vadd.f32 %v10553_v8, %v4242_v10 }
 0x502   : > { %v10491_v47 = vpop.f32.mrb[5].mxu1  ;;  %v10555_v52 = vpop.f32.mrb[5].mxu0 }
 0x503   : > { %v10492_v35 = vadd.f32 %v10491_v47, %v10490_v17  ;;  %v10556_v53 = vadd.f32 %v10555_v52, %v10554_v4  ;;  %v10493_v7 = vpop.f32.mrb[6].mxu1  ;;  %v10557_v44 = vpop.f32.mrb[6].mxu0  ;;  %v4402_v21 = vsel %vm371_vm0, %v13810_v13, 0.0  ;;  %v13815_v16 = vadd.f32 %v4339_v50, %v16369_v39 }
 0x504   : > { %v10494_v26 = vpop.f32.mrb[7].mxu1  ;;  %v10558_v45 = vpop.f32.mrb[7].mxu0  ;;  %4403 = vadd.xlane.f32.xlu0 %v4402_v21 }
 0x505   : > { %v4247_v27 = vadd.f32 %v10492_v35, %v13730_v14  ;;  %v10495_v51 = vadd.f32 %v10494_v26, %v10493_v7  ;;  %v10559_v5 = vadd.f32 %v10558_v45, %v10557_v44  ;;  %v4405_v1 = vsel %vm371_vm0, %v13815_v16, 0.0 }
 0x506   : > { %4406 = vadd.xlane.f32.xlu1 %v4405_v1 }
 0x507   : > { %v4250_v12 = vadd.f32 %v10495_v51, %v13733_v59  ;;  %v4344_v37 = vadd.f32 %v10556_v53, %v4247_v27  ;;  %v11317_v59 = vld [vmem:[%s16341_s1 + $0x20] sm:$0xff]  }
 0x508   : > { %11120 = vmatprep.subr.bf16.mxu1 %v11317_v59 }
 0x509   : > { %v13822_v32 = vadd.f32 %v4344_v37, %v16370_v43  ;;  %v4347_v31 = vadd.f32 %v10559_v5, %v4250_v12  ;;  %11121 = vmatpush3.bf16.msra.mxu1 %v11317_v59 }
 0x50a   : > { %11122 = vmatprep.subr.bf16.mxu1 %v11318_v60 }
 0x50b   : > { %v4408_v58 = vsel %vm371_vm0, %v13822_v32, 0.0  ;;  %v13827_v3 = vadd.f32 %v4347_v31, %v16371_v63 }
 0x50c   : > { %4409 = vadd.xlane.f32.xlu0 %v4408_v58 }
 0x50d   : > { %v4411_v14 = vsel %vm371_vm0, %v13827_v3, 0.0  ;;  %11123 = vmatpush3.bf16.msra.mxu1 %v11318_v60  ;;  %v11319_v60 = vld [vmem:[%s16341_s1 + $0x30] sm:$0xff]  }
 0x50e   : > { %4412 = vadd.xlane.f32.xlu1 %v4411_v14  ;;  %11124 = vmatprep.subr.bf16.mxu1 %v11319_v60 }
 0x511   : > { %11125 = vmatpush3.bf16.msra.mxu1 %v11319_v60 }
 0x561   : > { %v4368_v6 = vpop.xlane.xlu0 %4367 }
 0x562   : > { %v4414_v29 = vmul.f32 0.015625, %v4368_v6 }
 0x563   : > { %v4371_v57 = vpop.xlane.xlu1 %4370 }
 0x564   : > { %v13838_v38 = vsub.f32 %v13738_v33, %v4414_v29  ;;  %v4415_v19 = vmul.f32 0.015625, %v4371_v57 }
 0x566   : > { %v13841_v2 = vsub.f32 %v13743_v20, %v4415_v19  ;;  %v4446_v40 = vmul.f32 %v13838_v38, %v13838_v38 }
 0x568   : > { %v4462_v56 = vsel %vm371_vm0, %v4446_v40, 0.0  ;;  %v4447_v23 = vmul.f32 %v13841_v2, %v13841_v2 }
 0x569   : > { %v4374_v8 = vpop.xlane.xlu0 %4373  ;;  %4463 = vadd.xlane.f32.xlu0 %v4462_v56 }
 0x56a   : > { %v4416_v22 = vmul.f32 0.015625, %v4374_v8  ;;  %v4465_v10 = vsel %vm371_vm0, %v4447_v23, 0.0 }
 0x56b   : > { %v4377_v46 = vpop.xlane.xlu1 %4376  ;;  %4466 = vadd.xlane.f32.xlu1 %v4465_v10 }
 0x56c   : > { %v13850_v33 = vsub.f32 %v13750_v49, %v4416_v22  ;;  %v4417_v20 = vmul.f32 0.015625, %v4377_v46 }
 0x56e   : > { %v13853_v17 = vsub.f32 %v13755_v9, %v4417_v20  ;;  %v4448_v4 = vmul.f32 %v13850_v33, %v13850_v33 }
 0x570   : > { %v4468_v15 = vsel %vm371_vm0, %v4448_v4, 0.0  ;;  %v4449_v50 = vmul.f32 %v13853_v17, %v13853_v17 }
 0x571   : > { %v4380_v47 = vpop.xlane.xlu0 %4379  ;;  %4469 = vadd.xlane.f32.xlu0 %v4468_v15 }
 0x572   : > { %v4418_v52 = vmul.f32 0.015625, %v4380_v47  ;;  %v4471_v35 = vsel %vm371_vm0, %v4449_v50, 0.0 }
 0x573   : > { %v4383_v53 = vpop.xlane.xlu1 %4382  ;;  %4472 = vadd.xlane.f32.xlu1 %v4471_v35 }
 0x574   : > { %v13862_v49 = vsub.f32 %v13762_v36, %v4418_v52  ;;  %v4419_v9 = vmul.f32 0.015625, %v4383_v53 }
 0x576   : > { %v13865_v7 = vsub.f32 %v13767_v42, %v4419_v9  ;;  %v4450_v44 = vmul.f32 %v13862_v49, %v13862_v49 }
 0x578   : > { %v4474_v21 = vsel %vm371_vm0, %v4450_v44, 0.0  ;;  %v4451_v39 = vmul.f32 %v13865_v7, %v13865_v7 }
 0x579   : > { %v4386_v26 = vpop.xlane.xlu0 %4385  ;;  %4475 = vadd.xlane.f32.xlu0 %v4474_v21 }
 0x57a   : > { %v4420_v45 = vmul.f32 0.015625, %v4386_v26  ;;  %v4477_v27 = vsel %vm371_vm0, %v4451_v39, 0.0 }
 0x57b   : > { %v4389_v51 = vpop.xlane.xlu1 %4388  ;;  %4478 = vadd.xlane.f32.xlu1 %v4477_v27 }
 0x57c   : > { %v13874_v36 = vsub.f32 %v13774_v48, %v4420_v45  ;;  %v4421_v42 = vmul.f32 0.015625, %v4389_v51 }
 0x57e   : > { %v13877_v5 = vsub.f32 %v13779_v25, %v4421_v42  ;;  %v4452_v1 = vmul.f32 %v13874_v36, %v13874_v36 }
 0x580   : > { %v4480_v12 = vsel %vm371_vm0, %v4452_v1, 0.0  ;;  %v4453_v37 = vmul.f32 %v13877_v5, %v13877_v5 }
 0x581   : > { %v4392_v43 = vpop.xlane.xlu0 %4391  ;;  %4481 = vadd.xlane.f32.xlu0 %v4480_v12 }
 0x582   : > { %v4422_v31 = vmul.f32 0.015625, %v4392_v43  ;;  %v4483_v58 = vsel %vm371_vm0, %v4453_v37, 0.0 }
 0x583   : > { %v4395_v63 = vpop.xlane.xlu1 %4394  ;;  %4484 = vadd.xlane.f32.xlu1 %v4483_v58 }
 0x584   : > { %v13886_v48 = vsub.f32 %v13786_v0, %v4422_v31  ;;  %v4423_v25 = vmul.f32 0.015625, %v4395_v63 }
 0x586   : > { %v13889_v14 = vsub.f32 %v13791_v24, %v4423_v25  ;;  %v4454_v59 = vmul.f32 %v13886_v48, %v13886_v48 }
 0x588   : > { %v4486_v6 = vsel %vm371_vm0, %v4454_v59, 0.0  ;;  %v4455_v29 = vmul.f32 %v13889_v14, %v13889_v14 }
 0x589   : > { %v4398_v57 = vpop.xlane.xlu0 %4397  ;;  %4487 = vadd.xlane.f32.xlu0 %v4486_v6  ;;  %v11598_v6 = vld [vmem:[%s16342_s2] sm:$0xff] }
 0x58a   : > { %v4424_v0 = vmul.f32 0.015625, %v4398_v57  ;;  %v4489_v24 = vsel %vm371_vm0, %v4455_v29, 0.0  ;;  %v13943_v29 = vrot.slane %v11598_v6, %v12738_v28 }
 0x58b   : > { %v4401_v19 = vpop.xlane.xlu1 %4400  ;;  %4490 = vadd.xlane.f32.xlu1 %v4489_v24 }
 0x58c   : > { %v13901_v40 = vsub.f32 %v13798_v41, %v4424_v0  ;;  %v4425_v56 = vmul.f32 0.015625, %v4401_v19  ;;  %v11320_v41 = vld [vmem:[%s16341_s1 + $0x38] sm:$0xff]  }
 0x58d   : > { %11126 = vmatprep.subr.bf16.mxu1 %v11320_v41 }
 0x58e   : > { %v13904_v23 = vsub.f32 %v13803_v54, %v4425_v56  ;;  %v4456_v8 = vmul.f32 %v13901_v40, %v13901_v40  ;;  %11127 = vmatpush3.bf16.msra.mxu1 %v11320_v41 }
 0x590   : > { %v4492_v22 = vsel %vm371_vm0, %v4456_v8, 0.0  ;;  %v4457_v10 = vmul.f32 %v13904_v23, %v13904_v23 }
 0x591   : > { %v4404_v46 = vpop.xlane.xlu0 %4403  ;;  %4493 = vadd.xlane.f32.xlu0 %v4492_v22  ;;  %v13948_v22 = vrot.slane %v11598_v6, %v12754_v62 }
 0x592   : > { %v4426_v20 = vmul.f32 0.015625, %v4404_v46  ;;  %v4495_v4 = vsel %vm371_vm0, %v4457_v10, 0.0 }
 0x593   : > { %v4407_v15 = vpop.xlane.xlu1 %4406  ;;  %4496 = vadd.xlane.f32.xlu1 %v4495_v4 }
 0x594   : > { %v13916_v54 = vsub.f32 %v13810_v13, %v4426_v20  ;;  %v4427_v50 = vmul.f32 0.015625, %v4407_v15 }
 0x596   : > { %v13919_v47 = vsub.f32 %v13815_v16, %v4427_v50  ;;  %v4458_v52 = vmul.f32 %v13916_v54, %v13916_v54 }
 0x598   : > { %v4498_v35 = vsel %vm371_vm0, %v4458_v52, 0.0  ;;  %v4459_v53 = vmul.f32 %v13919_v47, %v13919_v47 }
 0x599   : > { %4499 = vadd.xlane.f32.xlu0 %v4498_v35  ;;  %v4410_v9 = vpop.xlane.xlu0 %4409 }
 0x59a   : > { %v4428_v44 = vmul.f32 0.015625, %v4410_v9  ;;  %v4501_v13 = vsel %vm371_vm0, %v4459_v53, 0.0 }
 0x59b   : > { %4502 = vadd.xlane.f32.xlu1 %v4501_v13  ;;  %v4413_v21 = vpop.xlane.xlu1 %4412 }
 0x59c   : > { %v13928_v39 = vsub.f32 %v13822_v32, %v4428_v44  ;;  %v4429_v16 = vmul.f32 0.015625, %v4413_v21 }
 0x59e   : > { %v13931_v26 = vsub.f32 %v13827_v3, %v4429_v16  ;;  %v4460_v45 = vmul.f32 %v13928_v39, %v13928_v39 }
 0x5a0   : > { %v4504_v27 = vsel %vm371_vm0, %v4460_v45, 0.0  ;;  %v4461_v51 = vmul.f32 %v13931_v26, %v13931_v26 }
 0x5a1   : > { %4505 = vadd.xlane.f32.xlu0 %v4504_v27 }
 0x5a2   : > { %v4507_v42 = vsel %vm371_vm0, %v4461_v51, 0.0 }
 0x5a3   : > { %4508 = vadd.xlane.f32.xlu1 %v4507_v42 }
 0x5f6   : > { %v4464_v1 = vpop.xlane.xlu0 %4463 }
 0x5f7   : > { %v4510_v12 = vmul.f32 0.015625, %v4464_v1 }
 0x5f8   : > { %v4467_v32 = vpop.xlane.xlu1 %4466 }
 0x5f9   : > { %v4526_v37 = vadd.f32 1e-05, %v4510_v12  ;;  %v4511_v43 = vmul.f32 0.015625, %v4467_v32 }
 0x5fb   : > { %11485 = vrsqrt.f32 %v4526_v37  ;;  %v4527_v3 = vadd.f32 1e-05, %v4511_v43 }
 0x5fd   : > { %11487 = vrsqrt.f32 %v4527_v3 }
 0x5fe   : > { %v4470_v31 = vpop.xlane.xlu0 %4469 }
 0x5ff   : > { %v4512_v58 = vmul.f32 0.015625, %v4470_v31 }
 0x600   : > { %v4473_v63 = vpop.xlane.xlu1 %4472 }
 0x601   : > { %v4528_v25 = vadd.f32 1e-05, %v4512_v58  ;;  %v4513_v59 = vmul.f32 0.015625, %v4473_v63 }
 0x603   : > { %11489 = vrsqrt.f32 %v4528_v25  ;;  %v4529_v60 = vadd.f32 1e-05, %v4513_v59 }
 0x605   : > { %v11486_v57 = vpop.eup %11485  ;;  %11491 = vrsqrt.f32 %v4529_v60 }
 0x606   : > { %v4558_v0 = vmul.f32 %v11486_v57, %v13838_v38  ;;  %v4476_v24 = vpop.xlane.xlu0 %4475 }
 0x607   : > { %v11488_v19 = vpop.eup %11487  ;;  %v4514_v56 = vmul.f32 0.015625, %v4476_v24 }
 0x608   : > { %v4559_v8 = vmul.f32 %v11488_v19, %v13841_v2  ;;  %v4479_v10 = vpop.xlane.xlu1 %4478  ;;  %v4578_v46 = vmul.f32 %v13943_v29, %v4558_v0 }
 0x609   : > { %v4530_v20 = vadd.f32 1e-05, %v4514_v56  ;;  %v4515_v4 = vmul.f32 0.015625, %v4479_v10 }
 0x60a   : > { %v4579_v15 = vmul.f32 %v13943_v29, %v4559_v8  ;;  %v13953_v50 = vadd.f32 %v13948_v22, %v4578_v46 }
 0x60b   : > { %11493 = vrsqrt.f32 %v4530_v20  ;;  %v4531_v41 = vadd.f32 1e-05, %v4515_v4 }
 0x60c   : > { %v13956_v38 = vadd.f32 %v13948_v22, %v4579_v15 }
 0x60d   : > { %v11490_v52 = vpop.eup %11489  ;;  %11495 = vrsqrt.f32 %v4531_v41 }
 0x60e   : > { %v4560_v2 = vmul.f32 %v11490_v52, %v13850_v33  ;;  %v4482_v35 = vpop.xlane.xlu0 %4481  ;;  %v4616_v53 = vpack.c.bf16 %v13956_v38, %v13953_v50 }
 0x60f   : > { %v11492_v9 = vpop.eup %11491  ;;  %v4516_v44 = vmul.f32 0.015625, %v4482_v35 }
 0x610   : > { %v4580_v13 = vmul.f32 %v13943_v29, %v4560_v2  ;;  %v4561_v21 = vmul.f32 %v11492_v9, %v13853_v17  ;;  %v4485_v16 = vpop.xlane.xlu1 %4484  ;;  %11128 = vmatprep.mubr.msk.bf16.mxu1 %vm371_vm0, %v4616_v53 }
 0x611   : > { %v4532_v45 = vadd.f32 1e-05, %v4516_v44  ;;  %v4517_v27 = vmul.f32 0.015625, %v4485_v16 }
 0x612   : > { %v4581_v51 = vmul.f32 %v13943_v29, %v4561_v21  ;;  %v13966_v33 = vadd.f32 %v13948_v22, %v4580_v13 }
 0x613   : > { %11497 = vrsqrt.f32 %v4532_v45  ;;  %v4533_v42 = vadd.f32 1e-05, %v4517_v27 }
 0x614   : > { %v13969_v1 = vadd.f32 %v13948_v22, %v4581_v51 }
 0x615   : > { %v11494_v12 = vpop.eup %11493  ;;  %11499 = vrsqrt.f32 %v4533_v42 }
 0x616   : > { %v4617_v17 = vpack.c.bf16 %v13969_v1, %v13966_v33  ;;  %v4562_v32 = vmul.f32 %v11494_v12, %v13862_v49  ;;  %v4488_v37 = vpop.xlane.xlu0 %4487 }
 0x617   : > { %v11496_v43 = vpop.eup %11495  ;;  %v4518_v3 = vmul.f32 0.015625, %v4488_v37 }
 0x618   : > { %v4563_v31 = vmul.f32 %v11496_v43, %v13865_v7  ;;  %v4491_v58 = vpop.xlane.xlu1 %4490  ;;  %11129 = vmatmul.mubr.msk.bf16.vlgmr.msra.gmra.mrb[8].mxu1 %vm371_vm0, %v4617_v17  ;;  %v4582_v63 = vmul.f32 %v13943_v29, %v4562_v32 }
 0x619   : > { %v4534_v25 = vadd.f32 1e-05, %v4518_v3  ;;  %v4519_v59 = vmul.f32 0.015625, %v4491_v58 }
 0x61a   : > { %v4583_v60 = vmul.f32 %v13943_v29, %v4563_v31  ;;  %v13979_v57 = vadd.f32 %v13948_v22, %v4582_v63 }
 0x61b   : > { %11501 = vrsqrt.f32 %v4534_v25  ;;  %v4535_v6 = vadd.f32 1e-05, %v4519_v59 }
 0x61c   : > { %v13982_v49 = vadd.f32 %v13948_v22, %v4583_v60 }
 0x61d   : > { %v11498_v0 = vpop.eup %11497  ;;  %11503 = vrsqrt.f32 %v4535_v6 }
 0x61e   : > { %v4564_v7 = vmul.f32 %v11498_v0, %v13874_v36  ;;  %v4494_v24 = vpop.xlane.xlu0 %4493  ;;  %v4618_v19 = vpack.c.bf16 %v13982_v49, %v13979_v57 }
 0x61f   : > { %v11500_v56 = vpop.eup %11499  ;;  %v4520_v8 = vmul.f32 0.015625, %v4494_v24 }
 0x620   : > { %v4584_v10 = vmul.f32 %v13943_v29, %v4564_v7  ;;  %v4565_v46 = vmul.f32 %v11500_v56, %v13877_v5  ;;  %v4497_v20 = vpop.xlane.xlu1 %4496  ;;  %11132 = vmatprep.mubr.msk.bf16.mxu1 %vm371_vm0, %v4618_v19 }
 0x621   : > { %v4536_v4 = vadd.f32 1e-05, %v4520_v8  ;;  %v4521_v15 = vmul.f32 0.015625, %v4497_v20 }
 0x622   : > { %v4585_v41 = vmul.f32 %v13943_v29, %v4565_v46  ;;  %v13992_v36 = vadd.f32 %v13948_v22, %v4584_v10 }
 0x623   : > { %11505 = vrsqrt.f32 %v4536_v4  ;;  %v4537_v52 = vadd.f32 1e-05, %v4521_v15 }
 0x624   : > { %v13995_v2 = vadd.f32 %v13948_v22, %v4585_v41 }
 0x625   : > { %v11502_v35 = vpop.eup %11501  ;;  %11507 = vrsqrt.f32 %v4537_v52 }
 0x626   : > { %v4619_v5 = vpack.c.bf16 %v13995_v2, %v13992_v36  ;;  %v4566_v53 = vmul.f32 %v11502_v35, %v13886_v48  ;;  %v4500_v9 = vpop.xlane.xlu0 %4499 }
 0x627   : > { %v11504_v44 = vpop.eup %11503  ;;  %v4522_v13 = vmul.f32 0.015625, %v4500_v9 }
 0x628   : > { %v4567_v21 = vmul.f32 %v11504_v44, %v13889_v14  ;;  %v4503_v16 = vpop.xlane.xlu1 %4502  ;;  %11133 = vmatmul.mubr.msk.bf16.gmra.mrb[12].mxu1 %vm371_vm0, %v4619_v5  ;;  %v4586_v45 = vmul.f32 %v13943_v29, %v4566_v53 }
 0x629   : > { %v4538_v27 = vadd.f32 1e-05, %v4522_v13  ;;  %v4523_v51 = vmul.f32 0.015625, %v4503_v16 }
 0x62a   : > { %v4587_v42 = vmul.f32 %v13943_v29, %v4567_v21  ;;  %v14005_v17 = vadd.f32 %v13948_v22, %v4586_v45 }
 0x62b   : > { %11509 = vrsqrt.f32 %v4538_v27  ;;  %v4539_v12 = vadd.f32 1e-05, %v4523_v51 }
 0x62c   : > { %v14008_v48 = vadd.f32 %v13948_v22, %v4587_v42 }
 0x62d   : > { %v11506_v32 = vpop.eup %11505  ;;  %11511 = vrsqrt.f32 %v4539_v12 }
 0x62e   : > { %v4568_v14 = vmul.f32 %v11506_v32, %v13901_v40  ;;  %v4506_v37 = vpop.xlane.xlu0 %4505  ;;  %v4620_v43 = vpack.c.bf16 %v14008_v48, %v14005_v17 }
 0x62f   : > { %v11508_v3 = vpop.eup %11507  ;;  %v4524_v31 = vmul.f32 0.015625, %v4506_v37 }
 0x630   : > { %v4588_v58 = vmul.f32 %v13943_v29, %v4568_v14  ;;  %v4569_v63 = vmul.f32 %v11508_v3, %v13904_v23  ;;  %v4509_v25 = vpop.xlane.xlu1 %4508  ;;  %11136 = vmatprep.mubr.msk.bf16.mxu1 %vm371_vm0, %v4620_v43 }
 0x631   : > { %v4540_v59 = vadd.f32 1e-05, %v4524_v31  ;;  %v4525_v60 = vmul.f32 0.015625, %v4509_v25 }
 0x632   : > { %v4589_v6 = vmul.f32 %v13943_v29, %v4569_v63  ;;  %v14018_v40 = vadd.f32 %v13948_v22, %v4588_v58 }
 0x633   : > { %11513 = vrsqrt.f32 %v4540_v59  ;;  %v4541_v0 = vadd.f32 1e-05, %v4525_v60 }
 0x634   : > { %v14021_v7 = vadd.f32 %v13948_v22, %v4589_v6 }
 0x635   : > { %v11510_v24 = vpop.eup %11509  ;;  %11515 = vrsqrt.f32 %v4541_v0 }
 0x636   : > { %v4621_v23 = vpack.c.bf16 %v14021_v7, %v14018_v40  ;;  %v4570_v19 = vmul.f32 %v11510_v24, %v13916_v54 }
 0x637   : > { %v11512_v56 = vpop.eup %11511 }
 0x638   : > { %v4571_v8 = vmul.f32 %v11512_v56, %v13919_v47  ;;  %11137 = vmatmul.mubr.msk.bf16.gmra.mrb[16].mxu1 %vm371_vm0, %v4621_v23  ;;  %v4590_v10 = vmul.f32 %v13943_v29, %v4570_v19 }
 0x63a   : > { %v4591_v46 = vmul.f32 %v13943_v29, %v4571_v8  ;;  %v14031_v20 = vadd.f32 %v13948_v22, %v4590_v10 }
 0x63c   : > { %v14034_v4 = vadd.f32 %v13948_v22, %v4591_v46 }
 0x63d   : > { %v11514_v15 = vpop.eup %11513 }
 0x63e   : > { %v4572_v41 = vmul.f32 %v11514_v15, %v13928_v39  ;;  %v4622_v54 = vpack.c.bf16 %v14034_v4, %v14031_v20 }
 0x63f   : > { %v11516_v52 = vpop.eup %11515 }
 0x640   : > { %v4592_v47 = vmul.f32 %v13943_v29, %v4572_v41  ;;  %v4573_v35 = vmul.f32 %v11516_v52, %v13931_v26  ;;  %11140 = vmatprep.mubr.msk.bf16.mxu1 %vm371_vm0, %v4622_v54  ;;  %v14056_v26 = vld [vmem:[%s16342_s2 + $0x8] sm:$0xff] }
 0x642   : > { %v4593_v5 = vmul.f32 %v13943_v29, %v4573_v35  ;;  %v14044_v53 = vadd.f32 %v13948_v22, %v4592_v47  ;;  %v14060_v29 = vrot.slane %v14056_v26, %v11712_v30 }
 0x644   : > { %v14047_v9 = vadd.f32 %v13948_v22, %v4593_v5 }
 0x646   : > { %v4623_v39 = vpack.c.bf16 %v14047_v9, %v14044_v53 }
 0x648   : > { %11141 = vmatmul.mubr.msk.bf16.gmra.mrb[20].mxu1 %vm371_vm0, %v4623_v39 }
 0x649   : > { %5693 = vmatprep.mubr.bf16.mxu1 %v16367_v55 }
 0x6eb   : > { %v11130_v44 = vpop.f32.mrb[8].mxu1 }
 0x6ec   : > { %v4719_v13 = vpop.f32.mrb[9].mxu1  ;;  %v4728_v22 = vadd.f32 %v11130_v44, %v14060_v29 }
 0x6ed   : > { %v4720_v21 = vadd.f32 %v4719_v13, %v14060_v29  ;;  %v11131_v16 = vpop.f32.mrb[10].mxu1 }
 0x6ee   : > { %v4722_v45 = vpop.f32.mrb[11].mxu1  ;;  %v4731_v27 = vadd.f32 %v11131_v16, %v14060_v29  ;;  %v14075_v14 = vadd.f32 %v4728_v22, %v13966_v33 }
 0x6ef   : > { %v4723_v51 = vadd.f32 %v4722_v45, %v14060_v29  ;;  %v14067_v42 = vadd.f32 %v4720_v21, %v13953_v50 }
 0x6f0   : > { %v14080_v43 = vadd.f32 %v4731_v27, %v13969_v1  ;;  %v4804_v50 = vsel %vm371_vm0, %v14075_v14, 0.0 }
 0x6f1   : > { %v4798_v12 = vsel %vm371_vm0, %v14067_v42, 0.0  ;;  %v14072_v32 = vadd.f32 %v4723_v51, %v13956_v38 }
 0x6f2   : > { %4799 = vadd.xlane.f32.xlu0 %v4798_v12  ;;  %v4807_v3 = vsel %vm371_vm0, %v14080_v43, 0.0 }
 0x6f3   : > { %v4801_v37 = vsel %vm371_vm0, %v14072_v32, 0.0 }
 0x6f4   : > { %4802 = vadd.xlane.f32.xlu1 %v4801_v37 }
 0x6f6   : > { %4805 = vadd.xlane.f32.xlu0 %v4804_v50 }
 0x6f8   : > { %4808 = vadd.xlane.f32.xlu1 %v4807_v3 }
 0x6fb   : > { %v11134_v38 = vpop.f32.mrb[12].mxu1 }
 0x6fc   : > { %v4735_v31 = vpop.f32.mrb[13].mxu1  ;;  %v4744_v33 = vadd.f32 %v11134_v38, %v14060_v29 }
 0x6fd   : > { %v4736_v58 = vadd.f32 %v4735_v31, %v14060_v29  ;;  %v11135_v63 = vpop.f32.mrb[14].mxu1 }
 0x6fe   : > { %v4738_v25 = vpop.f32.mrb[15].mxu1  ;;  %v4747_v1 = vadd.f32 %v11135_v63, %v14060_v29  ;;  %v14099_v24 = vadd.f32 %v4744_v33, %v13992_v36  ;;  %v9467_v33 = vld [vmem:[%s16343_s3 + $0x2c0] sm:$0xff] }
 0x6ff   : > { %v4739_v59 = vadd.f32 %v4738_v25, %v14060_v29  ;;  %v14091_v60 = vadd.f32 %v4736_v58, %v13979_v57  ;;  %v9475_v58 = vld [vmem:[%s16343_s3 + $0x300] sm:$0xff] }
 0x700   : > { %v14104_v19 = vadd.f32 %v4747_v1, %v13995_v2  ;;  %v4816_v57 = vsel %vm371_vm0, %v14099_v24, 0.0  ;;  %v9483_v25 = vld [vmem:[%s16343_s3 + $0x340] sm:$0xff]  ;;  %v9444_v1 = vld [vmem:[%s16343_s3 + $0x208] sm:$0xff] }
 0x701   : > { %v4810_v6 = vsel %vm371_vm0, %v14091_v60, 0.0  ;;  %v14096_v0 = vadd.f32 %v4739_v59, %v13982_v49  ;;  %v9452_v59 = vld [vmem:[%s16343_s3 + $0x248] sm:$0xff] }
 0x702   : > { %4811 = vadd.xlane.f32.xlu0 %v4810_v6  ;;  %v4819_v56 = vsel %vm371_vm0, %v14104_v19, 0.0  ;;  %v9511_v6 = vcombine.low %v9444_v1, %v9452_v59 }
 0x703   : > { %v4813_v23 = vsel %vm371_vm0, %v14096_v0, 0.0 }
 0x704   : > { %4814 = vadd.xlane.f32.xlu1 %v4813_v23  ;;  %v9512_v23 = vcombine.high %v9444_v1, %v9452_v59 }
 0x706   : > { %4817 = vadd.xlane.f32.xlu0 %v4816_v57  ;;  %5661 = vmatprep.subr.bf16.mxu1 %v9512_v23  ;;  %v9468_v23 = vld [vmem:[%s16343_s3 + $0x2c8] sm:$0xff] }
 0x707   : > { %5662 = vmatpush1.bf16.msra.mxu1 %v9511_v6 }
 0x708   : > { %4820 = vadd.xlane.f32.xlu1 %v4819_v56  ;;  %v9542_v56 = vcombine.high %v9475_v58, %v9483_v25 }
 0x70b   : > { %v11138_v49 = vpop.f32.mrb[16].mxu1 }
 0x70c   : > { %v4751_v8 = vpop.f32.mrb[17].mxu1  ;;  %v4760_v36 = vadd.f32 %v11138_v49, %v14060_v29  ;;  %v9541_v49 = vcombine.low %v9475_v58, %v9483_v25 }
 0x70d   : > { %v4752_v10 = vadd.f32 %v4751_v8, %v14060_v29  ;;  %v11139_v46 = vpop.f32.mrb[18].mxu1 }
 0x70e   : > { %v4754_v15 = vpop.f32.mrb[19].mxu1  ;;  %v4763_v2 = vadd.f32 %v11139_v46, %v14060_v29  ;;  %v14123_v35 = vadd.f32 %v4760_v36, %v14018_v40 }
 0x70f   : > { %v4755_v41 = vadd.f32 %v4754_v15, %v14060_v29  ;;  %v14115_v54 = vadd.f32 %v4752_v10, %v14005_v17 }
 0x710   : > { %v14128_v39 = vadd.f32 %v4763_v2, %v14021_v7  ;;  %v4828_v17 = vsel %vm371_vm0, %v14123_v35, 0.0 }
 0x711   : > { %v4822_v52 = vsel %vm371_vm0, %v14115_v54, 0.0  ;;  %v14120_v47 = vadd.f32 %v4755_v41, %v14008_v48 }
 0x712   : > { %4823 = vadd.xlane.f32.xlu0 %v4822_v52  ;;  %v4831_v44 = vsel %vm371_vm0, %v14128_v39, 0.0 }
 0x713   : > { %v4825_v5 = vsel %vm371_vm0, %v14120_v47, 0.0 }
 0x714   : > { %4826 = vadd.xlane.f32.xlu1 %v4825_v5 }
 0x716   : > { %4829 = vadd.xlane.f32.xlu0 %v4828_v17 }
 0x718   : > { %4832 = vadd.xlane.f32.xlu1 %v4831_v44 }
 0x71b   : > { %v11142_v48 = vpop.f32.mrb[20].mxu1 }
 0x71c   : > { %v4767_v13 = vpop.f32.mrb[21].mxu1  ;;  %v4776_v40 = vadd.f32 %v11142_v48, %v14060_v29 }
 0x71d   : > { %v4768_v22 = vadd.f32 %v4767_v13, %v14060_v29  ;;  %v11143_v21 = vpop.f32.mrb[22].mxu1 }
 0x71e   : > { %v4770_v16 = vpop.f32.mrb[23].mxu1  ;;  %v4779_v7 = vadd.f32 %v11143_v21, %v14060_v29  ;;  %v14147_v37 = vadd.f32 %v4776_v40, %v14044_v53  ;;  %v9451_v53 = vld [vmem:[%s16343_s3 + $0x240] sm:$0xff] }
 0x71f   : > { %v4771_v45 = vadd.f32 %v4770_v16, %v14060_v29  ;;  %v14139_v27 = vadd.f32 %v4768_v22, %v14031_v20 }
 0x720   : > { %v14152_v3 = vadd.f32 %v4779_v7, %v14047_v9  ;;  %v4840_v20 = vsel %vm371_vm0, %v14147_v37, 0.0  ;;  %v9459_v9 = vld [vmem:[%s16343_s3 + $0x280] sm:$0xff] }
 0x721   : > { %v4834_v51 = vsel %vm371_vm0, %v14139_v27, 0.0  ;;  %v14144_v12 = vadd.f32 %v4771_v45, %v14034_v4  ;;  %v9443_v4 = vld [vmem:[%s16343_s3 + $0x200] sm:$0xff]  ;;  %v9526_v63 = vcombine.high %v9459_v9, %v9467_v33  ;;  %v9525_v57 = vcombine.low %v9459_v9, %v9467_v33 }
 0x722   : > { %4835 = vadd.xlane.f32.xlu0 %v4834_v51  ;;  %v4843_v29 = vsel %vm371_vm0, %v14152_v3, 0.0  ;;  %v9509_v38 = vcombine.low %v9443_v4, %v9451_v53  ;;  %v9510_v31 = vcombine.high %v9443_v4, %v9451_v53 }
 0x723   : > { %v4837_v50 = vsel %vm371_vm0, %v14144_v12, 0.0 }
 0x724   : > { %4838 = vadd.xlane.f32.xlu1 %v4837_v50  ;;  %5548 = vmatprep.subr.bf16.mxu0 %v9510_v31 }
 0x725   : > { %5549 = vmatpush1.bf16.msra.mxu0 %v9509_v38 }
 0x726   : > { %4841 = vadd.xlane.f32.xlu0 %v4840_v20  ;;  %5550 = vmatprep.subr.bf16.mxu0 %v9526_v63 }
 0x728   : > { %4844 = vadd.xlane.f32.xlu1 %v4843_v29 }
 0x729   : > { %5551 = vmatpush1.bf16.msra.mxu0 %v9525_v57 }
 0x72a   : > { %5552 = vmatprep.subr.bf16.mxu0 %v9542_v56 }
 0x72d   : > { %5553 = vmatpush1.bf16.msra.mxu0 %v9541_v49 }
 0x77f   : > { %v4800_v8 = vpop.xlane.xlu0 %4799 }
 0x780   : > { %v4846_v36 = vmul.f32 0.015625, %v4800_v8 }
 0x781   : > { %v4803_v10 = vpop.xlane.xlu1 %4802 }
 0x782   : > { %v14183_v46 = vsub.f32 %v14067_v42, %v4846_v36  ;;  %v4847_v15 = vmul.f32 0.015625, %v4803_v10 }
 0x783   : > { %v4806_v2 = vpop.xlane.xlu0 %4805 }
 0x784   : > { %v14186_v41 = vsub.f32 %v14072_v32, %v4847_v15  ;;  %v4848_v52 = vmul.f32 0.015625, %v4806_v2  ;;  %v4878_v5 = vmul.f32 %v14183_v46, %v14183_v46 }
 0x785   : > { %v4809_v17 = vpop.xlane.xlu1 %4808 }
 0x786   : > { %v14191_v44 = vsub.f32 %v14075_v14, %v4848_v52  ;;  %v4849_v48 = vmul.f32 0.015625, %v4809_v17  ;;  %v4894_v13 = vsel %vm371_vm0, %v4878_v5, 0.0  ;;  %v4879_v42 = vmul.f32 %v14186_v41, %v14186_v41  ;;  %v9476_v5 = vld [vmem:[%s16343_s3 + $0x308] sm:$0xff] }
 0x787   : > { %4895 = vadd.xlane.f32.xlu0 %v4894_v13 }
 0x788   : > { %v14197_v40 = vsub.f32 %v14080_v43, %v4849_v48  ;;  %v4897_v32 = vsel %vm371_vm0, %v4879_v42, 0.0  ;;  %v4880_v22 = vmul.f32 %v14191_v44, %v14191_v44 }
 0x789   : > { %4898 = vadd.xlane.f32.xlu1 %v4897_v32 }
 0x78a   : > { %v4900_v21 = vsel %vm371_vm0, %v4880_v22, 0.0  ;;  %v4881_v14 = vmul.f32 %v14197_v40, %v14197_v40 }
 0x78b   : > { %4901 = vadd.xlane.f32.xlu0 %v4900_v21 }
 0x78c   : > { %v4903_v16 = vsel %vm371_vm0, %v4881_v14, 0.0 }
 0x78d   : > { %4904 = vadd.xlane.f32.xlu1 %v4903_v16 }
 0x78f   : > { %v4812_v7 = vpop.xlane.xlu0 %4811 }
 0x790   : > { %v4850_v45 = vmul.f32 0.015625, %v4812_v7  ;;  %v9499_v7 = vld [vmem:[%s16343_s3 + $0x3c0] sm:$0xff] }
 0x791   : > { %v4815_v51 = vpop.xlane.xlu1 %4814 }
 0x792   : > { %v14207_v43 = vsub.f32 %v14091_v60, %v4850_v45  ;;  %v4851_v50 = vmul.f32 0.015625, %v4815_v51  ;;  %v9492_v45 = vld [vmem:[%s16343_s3 + $0x388] sm:$0xff] }
 0x793   : > { %v4818_v20 = vpop.xlane.xlu0 %4817  ;;  %v9500_v51 = vld [vmem:[%s16343_s3 + $0x3c8] sm:$0xff] }
 0x794   : > { %v14210_v29 = vsub.f32 %v14096_v0, %v4851_v50  ;;  %v4852_v4 = vmul.f32 0.015625, %v4818_v20  ;;  %v4882_v53 = vmul.f32 %v14207_v43, %v14207_v43 }
 0x795   : > { %v4821_v9 = vpop.xlane.xlu1 %4820 }
 0x796   : > { %v14215_v38 = vsub.f32 %v14099_v24, %v4852_v4  ;;  %v4853_v31 = vmul.f32 0.015625, %v4821_v9  ;;  %v4906_v33 = vsel %vm371_vm0, %v4882_v53, 0.0  ;;  %v4883_v60 = vmul.f32 %v14210_v29, %v14210_v29 }
 0x797   : > { %4907 = vadd.xlane.f32.xlu0 %v4906_v33  ;;  %v9559_v53 = vcombine.low %v9492_v45, %v9500_v51  ;;  %v9560_v9 = vcombine.high %v9492_v45, %v9500_v51 }
 0x798   : > { %v14221_v58 = vsub.f32 %v14104_v19, %v4853_v31  ;;  %v4909_v0 = vsel %vm371_vm0, %v4883_v60, 0.0  ;;  %v4884_v63 = vmul.f32 %v14215_v38, %v14215_v38  ;;  %v9460_v19 = vld [vmem:[%s16343_s3 + $0x288] sm:$0xff] }
 0x799   : > { %4910 = vadd.xlane.f32.xlu1 %v4909_v0  ;;  %v9528_v56 = vcombine.high %v9460_v19, %v9468_v23  ;;  %v9527_v36 = vcombine.low %v9460_v19, %v9468_v23 }
 0x79a   : > { %v4912_v25 = vsel %vm371_vm0, %v4884_v63, 0.0  ;;  %v4885_v24 = vmul.f32 %v14221_v58, %v14221_v58 }
 0x79b   : > { %4913 = vadd.xlane.f32.xlu0 %v4912_v25  ;;  %5663 = vmatprep.subr.bf16.mxu1 %v9528_v56 }
 0x79c   : > { %v4915_v1 = vsel %vm371_vm0, %v4885_v24, 0.0  ;;  %5664 = vmatpush1.bf16.msra.mxu1 %v9527_v36 }
 0x79d   : > { %4916 = vadd.xlane.f32.xlu1 %v4915_v1 }
 0x79f   : > { %v4824_v59 = vpop.xlane.xlu0 %4823 }
 0x7a0   : > { %v4854_v6 = vmul.f32 0.015625, %v4824_v59 }
 0x7a1   : > { %v4827_v57 = vpop.xlane.xlu1 %4826 }
 0x7a2   : > { %v14237_v49 = vsub.f32 %v14115_v54, %v4854_v6  ;;  %v4855_v8 = vmul.f32 0.015625, %v4827_v57  ;;  %v9484_v54 = vld [vmem:[%s16343_s3 + $0x348] sm:$0xff] }
 0x7a3   : > { %v4830_v10 = vpop.xlane.xlu0 %4829  ;;  %v9544_v48 = vcombine.high %v9476_v5, %v9484_v54  ;;  %v9543_v22 = vcombine.low %v9476_v5, %v9484_v54  ;;  %v14315_v5 = vld [vmem:[%s16343_s3 + $0x218] sm:$0xff] }
 0x7a4   : > { %v14240_v15 = vsub.f32 %v14120_v47, %v4855_v8  ;;  %v4856_v2 = vmul.f32 0.015625, %v4830_v10  ;;  %v4886_v52 = vmul.f32 %v14237_v49, %v14237_v49 }
 0x7a5   : > { %v4833_v17 = vpop.xlane.xlu1 %4832  ;;  %5665 = vmatprep.subr.bf16.mxu1 %v9544_v48  ;;  %v14324_v48 = vld [vmem:[%s16343_s3 + $0x258] sm:$0xff] }
 0x7a6   : > { %v14251_v13 = vsub.f32 %v14123_v35, %v4856_v2  ;;  %v4857_v47 = vmul.f32 0.015625, %v4833_v17  ;;  %v4918_v42 = vsel %vm371_vm0, %v4886_v52, 0.0  ;;  %v4887_v32 = vmul.f32 %v14240_v15, %v14240_v15  ;;  %v9491_v35 = vld [vmem:[%s16343_s3 + $0x380] sm:$0xff]  ;;  %5666 = vmatpush1.bf16.msra.mxu1 %v9543_v22  ;;  %v14310_v52 = vld [vmem:[%s16343_s3 + $0x250] sm:$0xff] }
 0x7a7   : > { %4919 = vadd.xlane.f32.xlu0 %v4918_v42  ;;  %v9557_v4 = vcombine.low %v9491_v35, %v9499_v7  ;;  %5667 = vmatprep.subr.bf16.mxu1 %v9560_v9  ;;  %v9516_v42 = vcombine.high %v14315_v5, %v14324_v48 }
 0x7a8   : > { %v14257_v21 = vsub.f32 %v14128_v39, %v4857_v47  ;;  %v4921_v14 = vsel %vm371_vm0, %v4887_v32, 0.0  ;;  %v4888_v16 = vmul.f32 %v14251_v13, %v14251_v13  ;;  %v9558_v39 = vcombine.high %v9491_v35, %v9499_v7 }
 0x7a9   : > { %4922 = vadd.xlane.f32.xlu1 %v4921_v14  ;;  %v9515_v47 = vcombine.low %v14315_v5, %v14324_v48  ;;  %v9501_v5 = vld [vmem:[%s16343_s3 + $0x3d0] sm:$0xff]  ;;  %v9502_v48 = vld [vmem:[%s16343_s3 + $0x3d8] sm:$0xff] }
 0x7aa   : > { %v4924_v50 = vsel %vm371_vm0, %v4888_v16, 0.0  ;;  %v4889_v20 = vmul.f32 %v14257_v21, %v14257_v21  ;;  %5554 = vmatprep.subr.bf16.mxu0 %v9558_v39  ;;  %5668 = vmatpush1.bf16.msra.mxu1 %v9559_v53  ;;  %v14332_v53 = vrot.slane %v14056_v26, %v11994_v34 }
 0x7ab   : > { %4925 = vadd.xlane.f32.xlu0 %v4924_v50  ;;  %5555 = vmatpush1.bf16.msra.mxu0 %v9557_v4 }
 0x7ac   : > { %v4927_v31 = vsel %vm371_vm0, %v4889_v20, 0.0  ;;  %5887 = vmatprep.subr.bf16.mxu1 %v9516_v42 }
 0x7ad   : > { %4928 = vadd.xlane.f32.xlu1 %v4927_v31 }
 0x7af   : > { %v4836_v33 = vpop.xlane.xlu0 %4835 }
 0x7b0   : > { %v4858_v60 = vmul.f32 0.015625, %v4836_v33 }
 0x7b1   : > { %v4839_v0 = vpop.xlane.xlu1 %4838 }
 0x7b2   : > { %v14279_v63 = vsub.f32 %v14139_v27, %v4858_v60  ;;  %v4859_v25 = vmul.f32 0.015625, %v4839_v0 }
 0x7b3   : > { %v4842_v24 = vpop.xlane.xlu0 %4841 }
 0x7b4   : > { %v14282_v1 = vsub.f32 %v14144_v12, %v4859_v25  ;;  %v4860_v59 = vmul.f32 0.015625, %v4842_v24  ;;  %v4890_v6 = vmul.f32 %v14279_v63, %v14279_v63  ;;  %v16372_v25 = vld [vmem:[#allocation2_spill] sm:$0xff] }
 0x7b5   : > { %v4845_v19 = vpop.xlane.xlu1 %4844  ;;  %v14337_v24 = vrot.slane %v14056_v26, %v16372_v25  ;;  %v9461_v26 = vld [vmem:[%s16343_s3 + $0x290] sm:$0xff] }
 0x7b6   : > { %v14287_v23 = vsub.f32 %v14147_v37, %v4860_v59  ;;  %v4861_v57 = vmul.f32 0.015625, %v4845_v19  ;;  %v4930_v56 = vsel %vm371_vm0, %v4890_v6, 0.0  ;;  %v4891_v27 = vmul.f32 %v14282_v1, %v14282_v1 }
 0x7b7   : > { %4931 = vadd.xlane.f32.xlu0 %v4930_v56 }
 0x7b8   : > { %v14293_v8 = vsub.f32 %v14152_v3, %v4861_v57  ;;  %v4933_v12 = vsel %vm371_vm0, %v4891_v27, 0.0  ;;  %v4892_v36 = vmul.f32 %v14287_v23, %v14287_v23  ;;  %v14305_v3 = vld [vmem:[%s16343_s3 + $0x210] sm:$0xff] }
 0x7b9   : > { %4934 = vadd.xlane.f32.xlu1 %v4933_v12  ;;  %v9513_v54 = vcombine.low %v14305_v3, %v14310_v52  ;;  %v9514_v17 = vcombine.high %v14305_v3, %v14310_v52  ;;  %v9493_v3 = vld [vmem:[%s16343_s3 + $0x390] sm:$0xff] }
 0x7ba   : > { %v4936_v10 = vsel %vm371_vm0, %v4892_v36, 0.0  ;;  %v4893_v37 = vmul.f32 %v14293_v8, %v14293_v8 }
 0x7bb   : > { %4937 = vadd.xlane.f32.xlu0 %v4936_v10  ;;  %5774 = vmatprep.subr.bf16.mxu0 %v9514_v17 }
 0x7bc   : > { %v4939_v2 = vsel %vm371_vm0, %v4893_v37, 0.0 }
 0x7bd   : > { %4940 = vadd.xlane.f32.xlu1 %v4939_v2 }
 0x814   : > { %v4896_v32 = vpop.xlane.xlu0 %4895 }
 0x815   : > { %v4942_v22 = vmul.f32 0.015625, %v4896_v32 }
 0x816   : > { %v4899_v14 = vpop.xlane.xlu1 %4898 }
 0x817   : > { %v4958_v16 = vadd.f32 1e-05, %v4942_v22  ;;  %v4943_v35 = vmul.f32 0.015625, %v4899_v14  ;;  %v9469_v22 = vld [vmem:[%s16343_s3 + $0x2d0] sm:$0xff]  ;;  %v9462_v14 = vld [vmem:[%s16343_s3 + $0x298] sm:$0xff] }
 0x818   : > { %v4902_v7 = vpop.xlane.xlu0 %4901 }
 0x819   : > { %11517 = vrsqrt.f32 %v4958_v16  ;;  %v4959_v45 = vadd.f32 1e-05, %v4943_v35  ;;  %v4944_v39 = vmul.f32 0.015625, %v4902_v7  ;;  %v9470_v16 = vld [vmem:[%s16343_s3 + $0x2d8] sm:$0xff] }
 0x81a   : > { %v4905_v51 = vpop.xlane.xlu1 %4904 }
 0x81b   : > { %11519 = vrsqrt.f32 %v4959_v45  ;;  %v4960_v50 = vadd.f32 1e-05, %v4944_v39  ;;  %v4945_v20 = vmul.f32 0.015625, %v4905_v51  ;;  %v9477_v45 = vld [vmem:[%s16343_s3 + $0x310] sm:$0xff]  ;;  %v9530_v51 = vcombine.high %v9461_v26, %v9469_v22 }
 0x81d   : > { %11521 = vrsqrt.f32 %v4960_v50  ;;  %v4961_v4 = vadd.f32 1e-05, %v4945_v20  ;;  %v9532_v50 = vcombine.high %v9462_v14, %v9470_v16  ;;  %v9485_v20 = vld [vmem:[%s16343_s3 + $0x350] sm:$0xff] }
 0x81f   : > { %11523 = vrsqrt.f32 %v4961_v4  ;;  %v9478_v4 = vld [vmem:[%s16343_s3 + $0x318] sm:$0xff] }
 0x823   : > { %v11518_v9 = vpop.eup %11517 }
 0x824   : > { %v4990_v31 = vmul.f32 %v11518_v9, %v14183_v46  ;;  %v4908_v33 = vpop.xlane.xlu0 %4907  ;;  %v9486_v9 = vld [vmem:[%s16343_s3 + $0x358] sm:$0xff] }
 0x825   : > { %v11520_v60 = vpop.eup %11519  ;;  %v4946_v0 = vmul.f32 0.015625, %v4908_v33  ;;  %v9529_v33 = vcombine.low %v9461_v26, %v9469_v22  ;;  %v14418_v26 = vld [vmem:[%s16343_s3 + $0x220] sm:$0xff]  ;;  %v14434_v22 = vld [vmem:[%s16343_s3 + $0x228] sm:$0xff] }
 0x826   : > { %v5010_v59 = vmul.f32 %v14332_v53, %v4990_v31  ;;  %v4991_v6 = vmul.f32 %v11520_v60, %v14186_v41  ;;  %v4911_v19 = vpop.xlane.xlu1 %4910  ;;  %v9531_v60 = vcombine.low %v9462_v14, %v9470_v16  ;;  %v14439_v14 = vld [vmem:[%s16343_s3 + $0x268] sm:$0xff] }
 0x827   : > { %v11522_v57 = vpop.eup %11521  ;;  %v4962_v56 = vadd.f32 1e-05, %v4946_v0  ;;  %v4947_v27 = vmul.f32 0.015625, %v4911_v19  ;;  %v9545_v19 = vcombine.low %v9477_v45, %v9485_v20 }
 0x828   : > { %v5011_v12 = vmul.f32 %v14332_v53, %v4991_v6  ;;  %v4914_v36 = vpop.xlane.xlu0 %4913  ;;  %v14346_v2 = vadd.f32 %v14337_v24, %v5010_v59  ;;  %v4992_v17 = vmul.f32 %v11522_v57, %v14191_v44  ;;  %v9546_v59 = vcombine.high %v9477_v45, %v9485_v20 }
 0x829   : > { %v11524_v10 = vpop.eup %11523  ;;  %11525 = vrsqrt.f32 %v4962_v56  ;;  %v4963_v46 = vadd.f32 1e-05, %v4947_v27  ;;  %v4948_v37 = vmul.f32 0.015625, %v4914_v36  ;;  %v9548_v6 = vcombine.high %v9478_v4, %v9486_v9 }
 0x82a   : > { %v14349_v41 = vadd.f32 %v14337_v24, %v5011_v12  ;;  %v4993_v42 = vmul.f32 %v11524_v10, %v14197_v40  ;;  %v4917_v32 = vpop.xlane.xlu1 %4916  ;;  %v5012_v31 = vmul.f32 %v14332_v53, %v4992_v17  ;;  %v9547_v12 = vcombine.low %v9478_v4, %v9486_v9  ;;  %v14423_v17 = vld [vmem:[%s16343_s3 + $0x260] sm:$0xff] }
 0x82b   : > { %11527 = vrsqrt.f32 %v4963_v46  ;;  %v4964_v35 = vadd.f32 1e-05, %v4948_v37  ;;  %v4949_v7 = vmul.f32 0.015625, %v4917_v32  ;;  %v9562_v46 = vcombine.high %v9493_v3, %v9501_v5 }
 0x82c   : > { %v14364_v44 = vpack.c.bf16 %v14349_v41, %v14346_v2  ;;  %v5013_v40 = vmul.f32 %v14332_v53, %v4993_v42  ;;  %v14399_v52 = vadd.f32 %v14337_v24, %v5012_v31  ;;  %v9520_v9 = vcombine.high %v14434_v22, %v14439_v14 }
 0x82d   : > { %11529 = vrsqrt.f32 %v4964_v35  ;;  %v4965_v39 = vadd.f32 1e-05, %v4949_v7  ;;  %v9561_v7 = vcombine.low %v9493_v3, %v9501_v5 }
 0x82e   : > { %9573 = vmatmul.mubr.msk.bf16.vlgmr.msra.gmra.mrb[8].mxu0 %vm371_vm0, %v14364_v44  ;;  %9581 = vmatmul.mubr.msk.bf16.vlgmr.msra.gmra.mrb[24].mxu1 %vm371_vm0, %v14364_v44  ;;  %v14391_v0 = vadd.f32 %v14337_v24, %v5013_v40 }
 0x82f   : > { %11531 = vrsqrt.f32 %v4965_v39  ;;  %5775 = vmatpush1.bf16.msra.mxu0 %v9513_v54  ;;  %5888 = vmatpush1.bf16.msra.mxu1 %v9515_v47  ;;  %v9494_v54 = vld [vmem:[%s16343_s3 + $0x398] sm:$0xff] }
 0x830   : > { %5590 = vmatprep.mubr.bf16.mxu0 %v16367_v55  ;;  %5703 = vmatprep.mubr.bf16.mxu1 %v16367_v55  ;;  %v14412_v57 = vpack.c.bf16 %v14391_v0, %v14399_v52  ;;  %v9564_v37 = vcombine.high %v9494_v54, %v9502_v48  ;;  %v9563_v39 = vcombine.low %v9494_v54, %v9502_v48 }
 0x831   : > { %5776 = vmatprep.subr.bf16.mxu0 %v9530_v51  ;;  %5889 = vmatprep.subr.bf16.mxu1 %v9532_v50  ;;  %v9518_v51 = vcombine.high %v14418_v26, %v14423_v17 }
 0x833   : > { %v11526_v47 = vpop.eup %11525  ;;  %5777 = vmatpush1.bf16.msra.mxu0 %v9529_v33  ;;  %5890 = vmatpush1.bf16.msra.mxu1 %v9531_v60 }
 0x834   : > { %v4994_v56 = vmul.f32 %v11526_v47, %v14207_v43  ;;  %v4920_v27 = vpop.xlane.xlu0 %4919  ;;  %5778 = vmatprep.subr.bf16.mxu0 %v9546_v59  ;;  %5891 = vmatprep.subr.bf16.mxu1 %v9548_v6 }
 0x835   : > { %v11528_v36 = vpop.eup %11527  ;;  %v4950_v10 = vmul.f32 0.015625, %v4920_v27 }
 0x836   : > { %v5014_v43 = vmul.f32 %v14332_v53, %v4994_v56  ;;  %v4995_v42 = vmul.f32 %v11528_v36, %v14210_v29  ;;  %v4923_v32 = vpop.xlane.xlu1 %4922  ;;  %9574 = vmatmul.mubr.msk.bf16.gmra.mrb[12].mxu0 %vm371_vm0, %v14412_v57  ;;  %9582 = vmatmul.mubr.msk.bf16.gmra.mrb[28].mxu1 %vm371_vm0, %v14412_v57 }
 0x837   : > { %v11530_v16 = vpop.eup %11529  ;;  %v4966_v35 = vadd.f32 1e-05, %v4950_v10  ;;  %v4951_v29 = vmul.f32 0.015625, %v4923_v32  ;;  %5600 = vmatprep.mubr.bf16.mxu0 %v16367_v55  ;;  %5713 = vmatprep.mubr.bf16.mxu1 %v16367_v55 }
 0x838   : > { %v5015_v40 = vmul.f32 %v14332_v53, %v4995_v42  ;;  %v4926_v45 = vpop.xlane.xlu0 %4925  ;;  %5779 = vmatpush1.bf16.msra.mxu0 %v9545_v19  ;;  %5892 = vmatpush1.bf16.msra.mxu1 %v9547_v12  ;;  %v14449_v31 = vadd.f32 %v14337_v24, %v5014_v43  ;;  %v4996_v60 = vmul.f32 %v11530_v16, %v14215_v38 }
 0x839   : > { %v11532_v50 = vpop.eup %11531  ;;  %11533 = vrsqrt.f32 %v4966_v35  ;;  %v4967_v20 = vadd.f32 1e-05, %v4951_v29  ;;  %v4952_v4 = vmul.f32 0.015625, %v4926_v45  ;;  %5780 = vmatprep.subr.bf16.mxu0 %v9562_v46  ;;  %5893 = vmatprep.subr.bf16.mxu1 %v9564_v37 }
 0x83a   : > { %v14452_v33 = vadd.f32 %v14337_v24, %v5015_v40  ;;  %v4997_v59 = vmul.f32 %v11532_v50, %v14221_v58  ;;  %v4929_v6 = vpop.xlane.xlu1 %4928  ;;  %v5016_v38 = vmul.f32 %v14332_v53, %v4996_v60 }
 0x83b   : > { %11535 = vrsqrt.f32 %v4967_v20  ;;  %v4968_v3 = vadd.f32 1e-05, %v4952_v4  ;;  %v4953_v5 = vmul.f32 0.015625, %v4929_v6 }
 0x83c   : > { %v14458_v54 = vpack.c.bf16 %v14452_v33, %v14449_v31  ;;  %v5017_v48 = vmul.f32 %v14332_v53, %v4997_v59  ;;  %5781 = vmatpush1.bf16.msra.mxu0 %v9561_v7  ;;  %5894 = vmatpush1.bf16.msra.mxu1 %v9563_v39  ;;  %v14472_v19 = vadd.f32 %v14337_v24, %v5016_v38 }
 0x83d   : > { %11537 = vrsqrt.f32 %v4968_v3  ;;  %v4969_v47 = vadd.f32 1e-05, %v4953_v5  ;;  %6000 = vmatprep.subr.bf16.mxu0 %v9518_v51  ;;  %6113 = vmatprep.subr.bf16.mxu1 %v9520_v9 }
 0x83e   : > { %9575 = vmatmul.mubr.msk.bf16.gmra.mrb[16].mxu0 %vm371_vm0, %v14458_v54  ;;  %9583 = vmatmul.mubr.msk.bf16.gmra.mrb[32].mxu1 %vm371_vm0, %v14458_v54  ;;  %v14469_v58 = vadd.f32 %v14337_v24, %v5017_v48 }
 0x83f   : > { %11539 = vrsqrt.f32 %v4969_v47  ;;  %5610 = vmatprep.mubr.bf16.mxu0 %v16367_v55  ;;  %5723 = vmatprep.mubr.bf16.mxu1 %v16367_v55 }
 0x840   : > { %v14476_v27 = vpack.c.bf16 %v14469_v58, %v14472_v19 }
 0x843   : > { %v11534_v56 = vpop.eup %11533 }
 0x844   : > { %v4998_v12 = vmul.f32 %v11534_v56, %v14237_v49  ;;  %v4932_v36 = vpop.xlane.xlu0 %4931 }
 0x845   : > { %v11536_v10 = vpop.eup %11535  ;;  %v4954_v46 = vmul.f32 0.015625, %v4932_v36 }
 0x846   : > { %v5018_v37 = vmul.f32 %v14332_v53, %v4998_v12  ;;  %v4999_v43 = vmul.f32 %v11536_v10, %v14240_v15  ;;  %v4935_v42 = vpop.xlane.xlu1 %4934  ;;  %9576 = vmatmul.mubr.msk.bf16.gmra.mrb[20].mxu0 %vm371_vm0, %v14476_v27  ;;  %9584 = vmatmul.mubr.msk.bf16.gmra.mrb[36].mxu1 %vm371_vm0, %v14476_v27 }
 0x847   : > { %v11538_v32 = vpop.eup %11537  ;;  %v4970_v16 = vadd.f32 1e-05, %v4954_v46  ;;  %v4955_v35 = vmul.f32 0.015625, %v4935_v42  ;;  %5620 = vmatprep.mubr.bf16.mxu0 %v16367_v55  ;;  %5733 = vmatprep.mubr.bf16.mxu1 %v16367_v55 }
 0x848   : > { %v5019_v49 = vmul.f32 %v14332_v53, %v4999_v43  ;;  %v4938_v29 = vpop.xlane.xlu0 %4937  ;;  %v14489_v45 = vadd.f32 %v14337_v24, %v5018_v37  ;;  %v5000_v51 = vmul.f32 %v11538_v32, %v14251_v13 }
 0x849   : > { %v11540_v7 = vpop.eup %11539  ;;  %11541 = vrsqrt.f32 %v4970_v16  ;;  %v4971_v15 = vadd.f32 1e-05, %v4955_v35  ;;  %v4956_v40 = vmul.f32 0.015625, %v4938_v29  ;;  %v9472_v29 = vld [vmem:[%s16343_s3 + $0x2e8] sm:$0xff] }
 0x84a   : > { %v14492_v39 = vadd.f32 %v14337_v24, %v5019_v49  ;;  %v5001_v50 = vmul.f32 %v11540_v7, %v14257_v21  ;;  %v4941_v20 = vpop.xlane.xlu1 %4940  ;;  %v5020_v3 = vmul.f32 %v14332_v53, %v5000_v51  ;;  %v9464_v49 = vld [vmem:[%s16343_s3 + $0x2a8] sm:$0xff]  ;;  %v9517_v7 = vcombine.low %v14418_v26, %v14423_v17 }
 0x84b   : > { %11543 = vrsqrt.f32 %v4971_v15  ;;  %v4972_v4 = vadd.f32 1e-05, %v4956_v40  ;;  %v4957_v9 = vmul.f32 0.015625, %v4941_v20  ;;  %v9519_v15 = vcombine.low %v14434_v22, %v14439_v14  ;;  %v9479_v40 = vld [vmem:[%s16343_s3 + $0x320] sm:$0xff]  ;;  %v9488_v26 = vld [vmem:[%s16343_s3 + $0x368] sm:$0xff] }
 0x84c   : > { %v14498_v60 = vpack.c.bf16 %v14492_v39, %v14489_v45  ;;  %v5021_v59 = vmul.f32 %v14332_v53, %v5001_v50  ;;  %v14512_v21 = vadd.f32 %v14337_v24, %v5020_v3  ;;  %v9536_v50 = vcombine.high %v9464_v49, %v9472_v29  ;;  %v9487_v20 = vld [vmem:[%s16343_s3 + $0x360] sm:$0xff]  ;;  %v9496_v3 = vld [vmem:[%s16343_s3 + $0x3a8] sm:$0xff] }
 0x84d   : > { %11545 = vrsqrt.f32 %v4972_v4  ;;  %v4973_v6 = vadd.f32 1e-05, %v4957_v9  ;;  %v9480_v4 = vld [vmem:[%s16343_s3 + $0x328] sm:$0xff]  ;;  %v9535_v22 = vcombine.low %v9464_v49, %v9472_v29  ;;  %v9550_v14 = vcombine.high %v9479_v40, %v9487_v20  ;;  %v9473_v49 = vld [vmem:[%s16343_s3 + $0x2f0] sm:$0xff]  ;;  %v9466_v29 = vld [vmem:[%s16343_s3 + $0x2b8] sm:$0xff] }
 0x84e   : > { %9577 = vmatmul.mubr.msk.bf16.gmra.mrb[24].mxu0 %vm371_vm0, %v14498_v60  ;;  %9585 = vmatmul.mubr.msk.bf16.gmra.mrb[40].mxu1 %vm371_vm0, %v14498_v60  ;;  %v14509_v13 = vadd.f32 %v14337_v24, %v5021_v59  ;;  %v9552_v9 = vcombine.high %v9480_v4, %v9488_v26  ;;  %v9495_v59 = vld [vmem:[%s16343_s3 + $0x3a0] sm:$0xff] }
 0x84f   : > { %11547 = vrsqrt.f32 %v4973_v6  ;;  %5630 = vmatprep.mubr.bf16.mxu0 %v16367_v55  ;;  %5743 = vmatprep.mubr.bf16.mxu1 %v16367_v55  ;;  %v9503_v6 = vld [vmem:[%s16343_s3 + $0x3e0] sm:$0xff] }
 0x850   : > { %16373 = vst [vmem:[#allocation4_spill] sm:$0xff] %v14509_v13  ;;  %v14516_v48 = vpack.c.bf16 %v14509_v13, %v14512_v21 }
 0x853   : > { %v11542_v5 = vpop.eup %11541 }
 0x854   : > { %v5002_v47 = vmul.f32 %v11542_v5, %v14279_v63  ;;  %v9504_v5 = vld [vmem:[%s16343_s3 + $0x3e8] sm:$0xff] }
 0x855   : > { %v11544_v38 = vpop.eup %11543 }
 0x856   : > { %v5022_v56 = vmul.f32 %v14332_v53, %v5002_v47  ;;  %v5003_v12 = vmul.f32 %v11544_v38, %v14282_v1  ;;  %9578 = vmatmul.mubr.msk.bf16.gmra.mrb[28].mxu0 %vm371_vm0, %v14516_v48  ;;  %9586 = vmatmul.mubr.msk.bf16.gmra.mrb[44].mxu1 %vm371_vm0, %v14516_v48  ;;  %v9549_v47 = vcombine.low %v9479_v40, %v9487_v20 }
 0x857   : > { %v11546_v36 = vpop.eup %11545  ;;  %5640 = vmatprep.mubr.bf16.mxu0 %v16367_v55  ;;  %5753 = vmatprep.mubr.bf16.mxu1 %v16367_v55  ;;  %v9551_v38 = vcombine.low %v9480_v4, %v9488_v26  ;;  %v9489_v4 = vld [vmem:[%s16343_s3 + $0x370] sm:$0xff]  ;;  %v9482_v26 = vld [vmem:[%s16343_s3 + $0x338] sm:$0xff] }
 0x858   : > { %v5023_v10 = vmul.f32 %v14332_v53, %v5003_v12  ;;  %v14529_v63 = vadd.f32 %v14337_v24, %v5022_v56  ;;  %v5004_v1 = vmul.f32 %v11546_v36, %v14287_v23  ;;  %v9566_v56 = vcombine.high %v9495_v59, %v9503_v6  ;;  %v9449_v36 = vld [vmem:[%s16343_s3 + $0x230] sm:$0xff] }
 0x859   : > { %v11548_v46 = vpop.eup %11547  ;;  %v9568_v12 = vcombine.high %v9496_v3, %v9504_v5 }
 0x85a   : > { %16374 = vst [vmem:[#allocation3_spill] sm:$0xff] %v14529_v63  ;;  %v14532_v37 = vadd.f32 %v14337_v24, %v5023_v10  ;;  %v5005_v43 = vmul.f32 %v11548_v46, %v14293_v8  ;;  %v5024_v16 = vmul.f32 %v14332_v53, %v5004_v1  ;;  %v9457_v10 = vld [vmem:[%s16343_s3 + $0x270] sm:$0xff]  ;;  %v9450_v46 = vld [vmem:[%s16343_s3 + $0x238] sm:$0xff] }
 0x85b   : > { %v9458_v1 = vld [vmem:[%s16343_s3 + $0x278] sm:$0xff] }
 0x85c   : > { %16375 = vst [vmem:[#allocation6_spill] sm:$0xff] %v14532_v37  ;;  %v14538_v42 = vpack.c.bf16 %v14532_v37, %v14529_v63  ;;  %v5025_v32 = vmul.f32 %v14332_v53, %v5005_v43  ;;  %v14552_v8 = vadd.f32 %v14337_v24, %v5024_v16  ;;  %v9463_v53 = vld [vmem:[%s16343_s3 + $0x2a0] sm:$0xff]  ;;  %v9565_v43 = vcombine.low %v9495_v59, %v9503_v6  ;;  %v9497_v6 = vld [vmem:[%s16343_s3 + $0x3b0] sm:$0xff]  ;;  %v11358_v63 = vld [vmem:[%s16345_s5 + $0x508] sm:$0xff]  }
 0x85d   : > { %v9522_v16 = vcombine.high %v9449_v36, %v9457_v10  ;;  %v9523_v40 = vcombine.low %v9450_v46, %v9458_v1 }
 0x85e   : > { %9579 = vmatmul.mubr.msk.bf16.gmra.mrb[32].mxu0 %vm371_vm0, %v14538_v42  ;;  %9587 = vmatmul.mubr.msk.bf16.gmra.mrb[48].mxu1 %vm371_vm0, %v14538_v42  ;;  %v14549_v23 = vadd.f32 %v14337_v24, %v5025_v32  ;;  %16377 = vst [vmem:[#allocation2_spill] sm:$0xff] %v14552_v8  ;;  %v9471_v24 = vld [vmem:[%s16343_s3 + $0x2e0] sm:$0xff]  ;;  %v9567_v32 = vcombine.low %v9496_v3, %v9504_v5  ;;  %v9505_v3 = vld [vmem:[%s16343_s3 + $0x3f0] sm:$0xff]  ;;  %v9498_v5 = vld [vmem:[%s16343_s3 + $0x3b8] sm:$0xff] }
 0x85f   : > { %5650 = vmatprep.mubr.bf16.mxu0 %v16367_v55  ;;  %5763 = vmatprep.mubr.bf16.mxu1 %v16367_v55  ;;  %v9534_v51 = vcombine.high %v9463_v53, %v9471_v24  ;;  %v9533_v17 = vcombine.low %v9463_v53, %v9471_v24  ;;  %v9524_v53 = vcombine.high %v9450_v46, %v9458_v1  ;;  %v9465_v24 = vld [vmem:[%s16343_s3 + $0x2b0] sm:$0xff]  ;;  %v11321_v1 = vld [vmem:[%s16345_s5 + $0x440] sm:$0xff]  }
 0x860   : > { %16376 = vst [vmem:[#allocation5_spill] sm:$0xff] %v14549_v23  ;;  %v14556_v35 = vpack.c.bf16 %v14549_v23, %v14552_v8 }
 0x866   : > { %9580 = vmatmul.mubr.msk.bf16.gmra.mrb[36].mxu0 %vm371_vm0, %v14556_v35  ;;  %9588 = vmatmul.mubr.msk.bf16.gmra.mrb[52].mxu1 %vm371_vm0, %v14556_v35 }
 0x867   : > { %5806 = vmatprep.mubr.bf16.mxu0 %v16367_v55  ;;  %5919 = vmatprep.mubr.bf16.mxu1 %v16367_v55 }
 0x86e   : > { %9589 = vmatmul.mubr.msk.bf16.vlgmr.msra.gmra.mrb[40].mxu0 %vm371_vm0, %v14364_v44  ;;  %9597 = vmatmul.mubr.msk.bf16.vlgmr.msra.gmra.mrb[56].mxu1 %vm371_vm0, %v14364_v44 }
 0x86f   : > { %6001 = vmatpush1.bf16.msra.mxu0 %v9517_v7  ;;  %6114 = vmatpush1.bf16.msra.mxu1 %v9519_v15  ;;  %v9474_v7 = vld [vmem:[%s16343_s3 + $0x2f8] sm:$0xff]  ;;  %v9521_v15 = vcombine.low %v9449_v36, %v9457_v10  ;;  %v9569_v10 = vcombine.low %v9497_v6, %v9505_v3 }
 0x870   : > { %5816 = vmatprep.mubr.bf16.mxu0 %v16367_v55  ;;  %5929 = vmatprep.mubr.bf16.mxu1 %v16367_v55  ;;  %v9540_v20 = vcombine.high %v9466_v29, %v9474_v7 }
 0x871   : > { %6002 = vmatprep.subr.bf16.mxu0 %v9534_v51  ;;  %6115 = vmatprep.subr.bf16.mxu1 %v9536_v50  ;;  %v9481_v51 = vld [vmem:[%s16343_s3 + $0x330] sm:$0xff]  ;;  %v9538_v50 = vcombine.high %v9465_v24, %v9473_v49 }
 0x873   : > { %6003 = vmatpush1.bf16.msra.mxu0 %v9533_v17  ;;  %6116 = vmatpush1.bf16.msra.mxu1 %v9535_v22  ;;  %v9490_v17 = vld [vmem:[%s16343_s3 + $0x378] sm:$0xff]  ;;  %v9537_v22 = vcombine.low %v9465_v24, %v9473_v49  ;;  %v11327_v24 = vld [vmem:[%s16345_s5 + $0x4c8] sm:$0xff]  }
 0x874   : > { %6004 = vmatprep.subr.bf16.mxu0 %v9550_v14  ;;  %6117 = vmatprep.subr.bf16.mxu1 %v9552_v9  ;;  %v9539_v14 = vcombine.low %v9466_v29, %v9474_v7  ;;  %v9554_v9 = vcombine.high %v9481_v51, %v9489_v4  ;;  %v9556_v59 = vcombine.high %v9482_v26, %v9490_v17  ;;  %v11326_v49 = vld [vmem:[%s16345_s5 + $0x408] sm:$0xff]   ;;  %v11329_v7 = vld [vmem:[%s16345_s5 + $0x450] sm:$0xff]  }
 0x875   : > { %v11328_v29 = vld [vmem:[%s16345_s5 + $0x488] sm:$0xff]  }
 0x876   : > { %9590 = vmatmul.mubr.msk.bf16.gmra.mrb[44].mxu0 %vm371_vm0, %v14412_v57  ;;  %9598 = vmatmul.mubr.msk.bf16.gmra.mrb[60].mxu1 %vm371_vm0, %v14412_v57 }
 0x877   : > { %5826 = vmatprep.mubr.bf16.mxu0 %v16367_v55  ;;  %5939 = vmatprep.mubr.bf16.mxu1 %v16367_v55 }
 0x878   : > { %6005 = vmatpush1.bf16.msra.mxu0 %v9549_v47  ;;  %6118 = vmatpush1.bf16.msra.mxu1 %v9551_v38  ;;  %v9506_v47 = vld [vmem:[%s16343_s3 + $0x3f8] sm:$0xff]  ;;  %v9553_v38 = vcombine.low %v9481_v51, %v9489_v4 }
 0x879   : > { %6006 = vmatprep.subr.bf16.mxu0 %v9566_v56  ;;  %6119 = vmatprep.subr.bf16.mxu1 %v9568_v12  ;;  %v9555_v56 = vcombine.low %v9482_v26, %v9490_v17  ;;  %v9570_v12 = vcombine.high %v9497_v6, %v9505_v3  ;;  %v9572_v36 = vcombine.high %v9498_v5, %v9506_v47  ;;  %v11333_v51 = vld [vmem:[%s16345_s5 + $0x458] sm:$0xff]   ;;  %v11339_v26 = vld [vmem:[%s16345_s5 + $0x4e0] sm:$0xff]   ;;  %v14817_v17 = vld [vmem:[%s16344_s4 + $0x10] sm:$0xff] }
 0x87a   : > { %v9571_v46 = vcombine.low %v9498_v5, %v9506_v47  ;;  %v11336_v4 = vld [vmem:[%s16345_s5 + $0x498] sm:$0xff]   ;;  %v14837_v6 = vrot.slane %v14817_v17, %v11712_v30  ;;  %v14841_v3 = vrot.slane %v14817_v17, %v16372_v25  ;;  %v14845_v5 = vrot.slane %v14817_v17, %v11994_v34 }
 0x87b   : > { %v14849_v47 = vrot.slane %v14817_v17, %v12497_v11 }
 0x87c   : > { %6007 = vmatpush1.bf16.msra.mxu0 %v9565_v43  ;;  %6120 = vmatpush1.bf16.msra.mxu1 %v9567_v32  ;;  %v11323_v43 = vld [vmem:[%s16345_s5 + $0x4c0] sm:$0xff]  }
 0x87d   : > { %6226 = vmatprep.subr.bf16.mxu0 %v9522_v16  ;;  %6339 = vmatprep.subr.bf16.mxu1 %v9524_v53  ;;  %v11322_v32 = vld [vmem:[%s16345_s5 + $0x400] sm:$0xff]   ;;  %v11325_v53 = vld [vmem:[%s16345_s5 + $0x448] sm:$0xff]  }
 0x87e   : > { %9591 = vmatmul.mubr.msk.bf16.gmra.mrb[48].mxu0 %vm371_vm0, %v14458_v54  ;;  %9599 = vmatmul.mubr.msk.bf16.gmra.mrb[64].mxu1 %vm371_vm0, %v14458_v54  ;;  %v11324_v16 = vld [vmem:[%s16345_s5 + $0x480] sm:$0xff]  }
 0x87f   : > { %5836 = vmatprep.mubr.bf16.mxu0 %v16367_v55  ;;  %5949 = vmatprep.mubr.bf16.mxu1 %v16367_v55 }
 0x886   : > { %9592 = vmatmul.mubr.msk.bf16.gmra.mrb[52].mxu0 %vm371_vm0, %v14476_v27  ;;  %9600 = vmatmul.mubr.msk.bf16.gmra.mrb[68].mxu1 %vm371_vm0, %v14476_v27 }
 0x887   : > { %5846 = vmatprep.mubr.bf16.mxu0 %v16367_v55  ;;  %5959 = vmatprep.mubr.bf16.mxu1 %v16367_v55 }
 0x88e   : > { %9593 = vmatmul.mubr.msk.bf16.gmra.mrb[56].mxu0 %vm371_vm0, %v14498_v60  ;;  %9601 = vmatmul.mubr.msk.bf16.gmra.mrb[72].mxu1 %vm371_vm0, %v14498_v60 }
 0x88f   : > { %5856 = vmatprep.mubr.bf16.mxu0 %v16367_v55  ;;  %5969 = vmatprep.mubr.bf16.mxu1 %v16367_v55 }
 0x896   : > { %9594 = vmatmul.mubr.msk.bf16.gmra.mrb[60].mxu0 %vm371_vm0, %v14516_v48  ;;  %9602 = vmatmul.mubr.msk.bf16.gmra.mrb[76].mxu1 %vm371_vm0, %v14516_v48 }
 0x897   : > { %5866 = vmatprep.mubr.bf16.mxu0 %v16367_v55  ;;  %5979 = vmatprep.mubr.bf16.mxu1 %v16367_v55 }
 0x89e   : > { %9595 = vmatmul.mubr.msk.bf16.gmra.mrb[64].mxu0 %vm371_vm0, %v14538_v42  ;;  %9603 = vmatmul.mubr.msk.bf16.gmra.mrb[80].mxu1 %vm371_vm0, %v14538_v42 }
 0x89f   : > { %5876 = vmatprep.mubr.bf16.mxu0 %v16367_v55  ;;  %5989 = vmatprep.mubr.bf16.mxu1 %v16367_v55 }
 0x8a6   : > { %9596 = vmatmul.mubr.msk.bf16.gmra.mrb[68].mxu0 %vm371_vm0, %v14556_v35  ;;  %9604 = vmatmul.mubr.msk.bf16.gmra.mrb[84].mxu1 %vm371_vm0, %v14556_v35 }
 0x8a7   : > { %6032 = vmatprep.mubr.bf16.mxu0 %v16367_v55  ;;  %6145 = vmatprep.mubr.bf16.mxu1 %v16367_v55 }
 0x8ae   : > { %9605 = vmatmul.mubr.msk.bf16.vlgmr.msra.gmra.mrb[72].mxu0 %vm371_vm0, %v14364_v44  ;;  %9613 = vmatmul.mubr.msk.bf16.vlgmr.msra.gmra.mrb[88].mxu1 %vm371_vm0, %v14364_v44 }
 0x8af   : > { %6227 = vmatpush1.bf16.msra.mxu0 %v9521_v15  ;;  %6340 = vmatpush1.bf16.msra.mxu1 %v9523_v40  ;;  %v11330_v15 = vld [vmem:[%s16345_s5 + $0x410] sm:$0xff]  }
 0x8b0   : > { %6042 = vmatprep.mubr.bf16.mxu0 %v16367_v55  ;;  %6155 = vmatprep.mubr.bf16.mxu1 %v16367_v55  ;;  %v11332_v40 = vld [vmem:[%s16345_s5 + $0x490] sm:$0xff]  }
 0x8b1   : > { %6228 = vmatprep.subr.bf16.mxu0 %v9538_v50  ;;  %6341 = vmatprep.subr.bf16.mxu1 %v9540_v20  ;;  %v11335_v50 = vld [vmem:[%s16345_s5 + $0x4d8] sm:$0xff]  }
 0x8b2   : > { %v11334_v20 = vld [vmem:[%s16345_s5 + $0x418] sm:$0xff]  }
 0x8b3   : > { %6229 = vmatpush1.bf16.msra.mxu0 %v9537_v22  ;;  %6342 = vmatpush1.bf16.msra.mxu1 %v9539_v14  ;;  %v11338_v22 = vld [vmem:[%s16345_s5 + $0x420] sm:$0xff]  }
 0x8b4   : > { %6230 = vmatprep.subr.bf16.mxu0 %v9554_v9  ;;  %6343 = vmatprep.subr.bf16.mxu1 %v9556_v59  ;;  %v11340_v14 = vld [vmem:[%s16345_s5 + $0x4a0] sm:$0xff]   ;;  %v11341_v9 = vld [vmem:[%s16345_s5 + $0x468] sm:$0xff]  }
 0x8b5   : > { %v11343_v59 = vld [vmem:[%s16345_s5 + $0x4e8] sm:$0xff]  }
 0x8b6   : > { %9606 = vmatmul.mubr.msk.bf16.gmra.mrb[76].mxu0 %vm371_vm0, %v14412_v57  ;;  %9614 = vmatmul.mubr.msk.bf16.gmra.mrb[92].mxu1 %vm371_vm0, %v14412_v57 }
 0x8b7   : > { %6052 = vmatprep.mubr.bf16.mxu0 %v16367_v55  ;;  %6165 = vmatprep.mubr.bf16.mxu1 %v16367_v55 }
 0x8b8   : > { %6231 = vmatpush1.bf16.msra.mxu0 %v9553_v38  ;;  %6344 = vmatpush1.bf16.msra.mxu1 %v9555_v56  ;;  %v11344_v38 = vld [vmem:[%s16345_s5 + $0x4a8] sm:$0xff]  }
 0x8b9   : > { %6232 = vmatprep.subr.bf16.mxu0 %v9570_v12  ;;  %6345 = vmatprep.subr.bf16.mxu1 %v9572_v36  ;;  %v11345_v36 = vld [vmem:[%s16345_s5 + $0x470] sm:$0xff]  }
 0x8bc   : > { %6233 = vmatpush1.bf16.msra.mxu0 %v9569_v10  ;;  %6346 = vmatpush1.bf16.msra.mxu1 %v9571_v46  ;;  %v11347_v10 = vld [vmem:[%s16345_s5 + $0x4f0] sm:$0xff]  }
 0x8bd   : > { %10572 = vmatprep.subr.bf16.mxu0 %v11321_v1  ;;  %10636 = vmatprep.subr.bf16.mxu1 %v11323_v43 }
 0x8be   : > { %9607 = vmatmul.mubr.msk.bf16.gmra.mrb[80].mxu0 %vm371_vm0, %v14458_v54  ;;  %9615 = vmatmul.mubr.msk.bf16.gmra.mrb[96].mxu1 %vm371_vm0, %v14458_v54 }
 0x8bf   : > { %6062 = vmatprep.mubr.bf16.mxu0 %v16367_v55  ;;  %6175 = vmatprep.mubr.bf16.mxu1 %v16367_v55 }
 0x8c6   : > { %9608 = vmatmul.mubr.msk.bf16.gmra.mrb[84].mxu0 %vm371_vm0, %v14476_v27  ;;  %9616 = vmatmul.mubr.msk.bf16.gmra.mrb[100].mxu1 %vm371_vm0, %v14476_v27 }
 0x8c7   : > { %6072 = vmatprep.mubr.bf16.mxu0 %v16367_v55  ;;  %6185 = vmatprep.mubr.bf16.mxu1 %v16367_v55 }
 0x8ce   : > { %9609 = vmatmul.mubr.msk.bf16.gmra.mrb[88].mxu0 %vm371_vm0, %v14498_v60  ;;  %9617 = vmatmul.mubr.msk.bf16.gmra.mrb[104].mxu1 %vm371_vm0, %v14498_v60 }
 0x8cf   : > { %6082 = vmatprep.mubr.bf16.mxu0 %v16367_v55  ;;  %6195 = vmatprep.mubr.bf16.mxu1 %v16367_v55 }
 0x8d6   : > { %9610 = vmatmul.mubr.msk.bf16.gmra.mrb[92].mxu0 %vm371_vm0, %v14516_v48  ;;  %9618 = vmatmul.mubr.msk.bf16.gmra.mrb[108].mxu1 %vm371_vm0, %v14516_v48 }
 0x8d7   : > { %6092 = vmatprep.mubr.bf16.mxu0 %v16367_v55  ;;  %6205 = vmatprep.mubr.bf16.mxu1 %v16367_v55 }
 0x8de   : > { %9611 = vmatmul.mubr.msk.bf16.gmra.mrb[96].mxu0 %vm371_vm0, %v14538_v42  ;;  %9619 = vmatmul.mubr.msk.bf16.gmra.mrb[112].mxu1 %vm371_vm0, %v14538_v42 }
 0x8df   : > { %6102 = vmatprep.mubr.bf16.mxu0 %v16367_v55  ;;  %6215 = vmatprep.mubr.bf16.mxu1 %v16367_v55 }
 0x8e6   : > { %9612 = vmatmul.mubr.msk.bf16.gmra.mrb[100].mxu0 %vm371_vm0, %v14556_v35  ;;  %9620 = vmatmul.mubr.msk.bf16.gmra.mrb[116].mxu1 %vm371_vm0, %v14556_v35 }
 0x8e7   : > { %6258 = vmatprep.mubr.bf16.mxu0 %v16367_v55  ;;  %6371 = vmatprep.mubr.bf16.mxu1 %v16367_v55 }
 0x8ee   : > { %9621 = vmatmul.mubr.msk.bf16.vlgmr.msra.gmra.mrb[104].mxu0 %vm371_vm0, %v14364_v44  ;;  %9629 = vmatmul.mubr.msk.bf16.vlgmr.msra.gmra.mrb[120].mxu1 %vm371_vm0, %v14364_v44  ;;  %v11331_v44 = vld [vmem:[%s16345_s5 + $0x4d0] sm:$0xff]  }
 0x8ef   : > { %10573 = vmatpush3.bf16.msra.mxu0 %v11322_v32  ;;  %10637 = vmatpush3.bf16.msra.mxu1 %v11324_v16 }
 0x8f0   : > { %6268 = vmatprep.mubr.bf16.mxu0 %v16367_v55  ;;  %6381 = vmatprep.mubr.bf16.mxu1 %v16367_v55 }
 0x8f1   : > { %10574 = vmatprep.subr.bf16.mxu0 %v11325_v53  ;;  %10638 = vmatprep.subr.bf16.mxu1 %v11327_v24 }
 0x8f3   : > { %10575 = vmatpush3.bf16.msra.mxu0 %v11326_v49  ;;  %10639 = vmatpush3.bf16.msra.mxu1 %v11328_v29 }
 0x8f4   : > { %10576 = vmatprep.subr.bf16.mxu0 %v11329_v7  ;;  %10640 = vmatprep.subr.bf16.mxu1 %v11331_v44 }
 0x8f6   : > { %9622 = vmatmul.mubr.msk.bf16.gmra.mrb[108].mxu0 %vm371_vm0, %v14412_v57  ;;  %9630 = vmatmul.mubr.msk.bf16.gmra.mrb[124].mxu1 %vm371_vm0, %v14412_v57  ;;  %v11337_v57 = vld [vmem:[%s16345_s5 + $0x460] sm:$0xff]  }
 0x8f7   : > { %6278 = vmatprep.mubr.bf16.mxu0 %v16367_v55  ;;  %6391 = vmatprep.mubr.bf16.mxu1 %v16367_v55 }
 0x8f8   : > { %10577 = vmatpush3.bf16.msra.mxu0 %v11330_v15  ;;  %10641 = vmatpush3.bf16.msra.mxu1 %v11332_v40  ;;  %v11346_v40 = vld [vmem:[%s16345_s5 + $0x430] sm:$0xff]  }
 0x8f9   : > { %10578 = vmatprep.subr.bf16.mxu0 %v11333_v51  ;;  %10642 = vmatprep.subr.bf16.mxu1 %v11335_v50  ;;  %v11348_v51 = vld [vmem:[%s16345_s5 + $0x4b0] sm:$0xff]  }
 0x8fc   : > { %10579 = vmatpush3.bf16.msra.mxu0 %v11334_v20  ;;  %10643 = vmatpush3.bf16.msra.mxu1 %v11336_v4  ;;  %v11349_v4 = vld [vmem:[%s16345_s5 + $0x478] sm:$0xff]  }
 0x8fd   : > { %10580 = vmatprep.subr.bf16.mxu0 %v11337_v57  ;;  %10644 = vmatprep.subr.bf16.mxu1 %v11339_v26  ;;  %v11351_v57 = vld [vmem:[%s16345_s5 + $0x4f8] sm:$0xff]  }
 0x8fe   : > { %9623 = vmatmul.mubr.msk.bf16.gmra.mrb[112].mxu0 %vm371_vm0, %v14458_v54  ;;  %9631 = vmatmul.mubr.msk.bf16.gmra.mrb[128].mxu1 %vm371_vm0, %v14458_v54  ;;  %v11342_v54 = vld [vmem:[%s16345_s5 + $0x428] sm:$0xff]  }
 0x8ff   : > { %6288 = vmatprep.mubr.bf16.mxu0 %v16367_v55  ;;  %6401 = vmatprep.mubr.bf16.mxu1 %v16367_v55 }
 0x900   : > { %10581 = vmatpush3.bf16.msra.mxu0 %v11338_v22  ;;  %10645 = vmatpush3.bf16.msra.mxu1 %v11340_v14 }
 0x901   : > { %v5582_v56 = vpop.f32.mrb[8].mxu0  ;;  %v5695_v12 = vpop.f32.mrb[24].mxu1  ;;  %10582 = vmatprep.subr.bf16.mxu0 %v11341_v9  ;;  %10646 = vmatprep.subr.bf16.mxu1 %v11343_v59 }
 0x902   : > { %v5583_v46 = vadd.f32 %v5582_v56, %v14837_v6  ;;  %v5696_v1 = vadd.f32 %v5695_v12, %v14841_v3  ;;  %v5584_v43 = vpop.f32.mrb[9].mxu0  ;;  %v5697_v32 = vpop.f32.mrb[25].mxu1 }
 0x903   : > { %v5585_v16 = vadd.f32 %v5584_v43, %v14845_v5  ;;  %v5698_v53 = vadd.f32 %v5697_v32, %v14849_v47  ;;  %v5586_v24 = vpop.f32.mrb[10].mxu0  ;;  %v5699_v49 = vpop.f32.mrb[26].mxu1 }
 0x904   : > { %v5587_v29 = vadd.f32 %v5586_v24, %v14837_v6  ;;  %v5700_v7 = vadd.f32 %v5699_v49, %v14841_v3  ;;  %v5588_v44 = vpop.f32.mrb[11].mxu0  ;;  %v5701_v15 = vpop.f32.mrb[27].mxu1  ;;  %10583 = vmatpush3.bf16.msra.mxu0 %v11342_v54  ;;  %10647 = vmatpush3.bf16.msra.mxu1 %v11344_v38  ;;  %v6452_v26 = vmax.f32 %v5583_v46, 0.0  ;;  %v6454_v22 = vmax.f32 %v5696_v1, 0.0 }
 0x905   : > { %v5589_v50 = vadd.f32 %v5588_v44, %v14845_v5  ;;  %v5702_v20 = vadd.f32 %v5701_v15, %v14849_v47  ;;  %10584 = vmatprep.subr.bf16.mxu0 %v11345_v36  ;;  %10648 = vmatprep.subr.bf16.mxu1 %v11347_v10  ;;  %v6453_v59 = vmax.f32 %v5585_v16, 0.0  ;;  %v6455_v54 = vmax.f32 %v5698_v53, 0.0  ;;  %v11350_v10 = vld [vmem:[%s16345_s5 + $0x438] sm:$0xff]   ;;  %v11353_v16 = vld [vmem:[%s16345_s5 + $0x540] sm:$0xff]  }
 0x906   : > { %v6468_v14 = vmax.f32 %v5587_v29, 0.0  ;;  %v6470_v9 = vmax.f32 %v5700_v7, 0.0  ;;  %9624 = vmatmul.mubr.msk.bf16.gmra.mrb[116].mxu0 %vm371_vm0, %v14476_v27  ;;  %9632 = vmatmul.mubr.msk.bf16.gmra.mrb[132].mxu1 %vm371_vm0, %v14476_v27  ;;  %v11352_v27 = vld [vmem:[%s16345_s5 + $0x4b8] sm:$0xff]   ;;  %v11355_v53 = vld [vmem:[%s16345_s5 + $0x5c0] sm:$0xff]  }
 0x907   : > { %v6469_v38 = vmax.f32 %v5589_v50, 0.0  ;;  %v6471_v56 = vmax.f32 %v5702_v20, 0.0  ;;  %6298 = vmatprep.mubr.bf16.mxu0 %v16367_v55  ;;  %6411 = vmatprep.mubr.bf16.mxu1 %v16367_v55 }
 0x908   : > { %v14891_v12 = vpack.c.bf16 %v6468_v14, %v6452_v26  ;;  %v14893_v36 = vpack.c.bf16 %v6470_v9, %v6454_v22  ;;  %10585 = vmatpush3.bf16.msra.mxu0 %v11346_v40  ;;  %10649 = vmatpush3.bf16.msra.mxu1 %v11348_v51 }
 0x909   : > { %v14901_v46 = vpack.c.bf16 %v6471_v56, %v6455_v54  ;;  %v5592_v1 = vpop.f32.mrb[12].mxu0  ;;  %v5705_v43 = vpop.f32.mrb[28].mxu1  ;;  %10586 = vmatprep.subr.bf16.mxu0 %v11349_v4  ;;  %v14903_v32 = vpack.c.bf16 %v6469_v38, %v6453_v59  ;;  %10650 = vmatprep.subr.bf16.mxu1 %v11351_v57 }
 0x90a   : > { %v5593_v24 = vadd.f32 %v5592_v1, %v14837_v6  ;;  %v5706_v49 = vadd.f32 %v5705_v43, %v14841_v3  ;;  %v5594_v29 = vpop.f32.mrb[13].mxu0  ;;  %v5707_v7 = vpop.f32.mrb[29].mxu1 }
 0x90b   : > { %v5595_v44 = vadd.f32 %v5594_v29, %v14845_v5  ;;  %v5708_v15 = vadd.f32 %v5707_v7, %v14849_v47  ;;  %v5596_v40 = vpop.f32.mrb[14].mxu0  ;;  %v5709_v51 = vpop.f32.mrb[30].mxu1 }
 0x90c   : > { %v5597_v50 = vadd.f32 %v5596_v40, %v14837_v6  ;;  %v5710_v20 = vadd.f32 %v5709_v51, %v14841_v3  ;;  %v5598_v4 = vpop.f32.mrb[15].mxu0  ;;  %v5711_v57 = vpop.f32.mrb[31].mxu1  ;;  %10587 = vmatpush3.bf16.msra.mxu0 %v11350_v10  ;;  %10651 = vmatpush3.bf16.msra.mxu1 %v11352_v27  ;;  %v6484_v14 = vmax.f32 %v5593_v24, 0.0  ;;  %v6486_v9 = vmax.f32 %v5706_v49, 0.0 }
 0x90d   : > { %v5599_v26 = vadd.f32 %v5598_v4, %v14845_v5  ;;  %v5712_v22 = vadd.f32 %v5711_v57, %v14849_v47  ;;  %10700 = vmatprep.subr.bf16.mxu0 %v11353_v16  ;;  %10764 = vmatprep.subr.bf16.mxu1 %v11355_v53  ;;  %v6485_v38 = vmax.f32 %v5595_v44, 0.0  ;;  %v6487_v56 = vmax.f32 %v5708_v15, 0.0 }
 0x90e   : > { %v6500_v59 = vmax.f32 %v5597_v50, 0.0  ;;  %v6502_v54 = vmax.f32 %v5710_v20, 0.0  ;;  %9625 = vmatmul.mubr.msk.bf16.gmra.mrb[120].mxu0 %vm371_vm0, %v14498_v60  ;;  %9633 = vmatmul.mubr.msk.bf16.gmra.mrb[136].mxu1 %vm371_vm0, %v14498_v60 }
 0x90f   : > { %v6501_v10 = vmax.f32 %v5599_v26, 0.0  ;;  %v6503_v27 = vmax.f32 %v5712_v22, 0.0  ;;  %6308 = vmatprep.mubr.bf16.mxu0 %v16367_v55  ;;  %6421 = vmatprep.mubr.bf16.mxu1 %v16367_v55 }
 0x910   : > { %v14925_v1 = vpack.c.bf16 %v6500_v59, %v6484_v14  ;;  %v14927_v43 = vpack.c.bf16 %v6502_v54, %v6486_v9 }
 0x911   : > { %v14929_v16 = vpack.c.bf16 %v6503_v27, %v6487_v56  ;;  %v5602_v53 = vpop.f32.mrb[16].mxu0  ;;  %v5715_v24 = vpop.f32.mrb[32].mxu1  ;;  %v14931_v49 = vpack.c.bf16 %v6501_v10, %v6485_v38 }
 0x912   : > { %v5603_v60 = vadd.f32 %v5602_v53, %v14837_v6  ;;  %v5716_v29 = vadd.f32 %v5715_v24, %v14841_v3  ;;  %v5604_v7 = vpop.f32.mrb[17].mxu0  ;;  %v5717_v44 = vpop.f32.mrb[33].mxu1 }
 0x913   : > { %v5605_v15 = vadd.f32 %v5604_v7, %v14845_v5  ;;  %v5718_v40 = vadd.f32 %v5717_v44, %v14849_v47  ;;  %v5606_v51 = vpop.f32.mrb[18].mxu0  ;;  %v5719_v50 = vpop.f32.mrb[34].mxu1 }
 0x914   : > { %v5607_v20 = vadd.f32 %v5606_v51, %v14837_v6  ;;  %v5720_v4 = vadd.f32 %v5719_v50, %v14841_v3  ;;  %v5608_v57 = vpop.f32.mrb[19].mxu0  ;;  %v5721_v26 = vpop.f32.mrb[35].mxu1  ;;  %v6516_v9 = vmax.f32 %v5603_v60, 0.0  ;;  %v6518_v59 = vmax.f32 %v5716_v29, 0.0 }
 0x915   : > { %v5609_v22 = vadd.f32 %v5608_v57, %v14845_v5  ;;  %v5722_v14 = vadd.f32 %v5721_v26, %v14849_v47  ;;  %v6517_v56 = vmax.f32 %v5605_v15, 0.0  ;;  %v6519_v10 = vmax.f32 %v5718_v40, 0.0 }
 0x916   : > { %v6532_v54 = vmax.f32 %v5607_v20, 0.0  ;;  %v6534_v38 = vmax.f32 %v5720_v4, 0.0  ;;  %9626 = vmatmul.mubr.msk.bf16.gmra.mrb[124].mxu0 %vm371_vm0, %v14516_v48  ;;  %9634 = vmatmul.mubr.msk.bf16.gmra.mrb[140].mxu1 %vm371_vm0, %v14516_v48 }
 0x917   : > { %v6533_v27 = vmax.f32 %v5609_v22, 0.0  ;;  %v6535_v53 = vmax.f32 %v5722_v14, 0.0  ;;  %6318 = vmatprep.mubr.bf16.mxu0 %v16367_v55  ;;  %6431 = vmatprep.mubr.bf16.mxu1 %v16367_v55 }
 0x918   : > { %v14947_v24 = vpack.c.bf16 %v6532_v54, %v6516_v9  ;;  %v14949_v60 = vpack.c.bf16 %v6534_v38, %v6518_v59 }
 0x919   : > { %v14951_v29 = vpack.c.bf16 %v6535_v53, %v6519_v10  ;;  %v5612_v7 = vpop.f32.mrb[20].mxu0  ;;  %v5725_v44 = vpop.f32.mrb[36].mxu1  ;;  %v14953_v51 = vpack.c.bf16 %v6533_v27, %v6517_v56 }
 0x91a   : > { %v5613_v48 = vadd.f32 %v5612_v7, %v14837_v6  ;;  %v5726_v15 = vadd.f32 %v5725_v44, %v14841_v3  ;;  %v5614_v40 = vpop.f32.mrb[21].mxu0  ;;  %v5727_v50 = vpop.f32.mrb[37].mxu1 }
 0x91b   : > { %v5615_v20 = vadd.f32 %v5614_v40, %v14845_v5  ;;  %v5728_v4 = vadd.f32 %v5727_v50, %v14849_v47  ;;  %v5616_v57 = vpop.f32.mrb[22].mxu0  ;;  %v5729_v26 = vpop.f32.mrb[38].mxu1 }
 0x91c   : > { %v5617_v22 = vadd.f32 %v5616_v57, %v14837_v6  ;;  %v5730_v14 = vadd.f32 %v5729_v26, %v14841_v3  ;;  %v5618_v9 = vpop.f32.mrb[23].mxu0  ;;  %v5731_v59 = vpop.f32.mrb[39].mxu1  ;;  %v6548_v56 = vmax.f32 %v5613_v48, 0.0  ;;  %v6550_v10 = vmax.f32 %v5726_v15, 0.0 }
 0x91d   : > { %v5619_v54 = vadd.f32 %v5618_v9, %v14845_v5  ;;  %v5732_v38 = vadd.f32 %v5731_v59, %v14849_v47  ;;  %v6549_v7 = vmax.f32 %v5615_v20, 0.0  ;;  %v6551_v44 = vmax.f32 %v5728_v4, 0.0 }
 0x91e   : > { %v6564_v27 = vmax.f32 %v5617_v22, 0.0  ;;  %v6566_v53 = vmax.f32 %v5730_v14, 0.0  ;;  %9627 = vmatmul.mubr.msk.bf16.gmra.mrb[128].mxu0 %vm371_vm0, %v14538_v42  ;;  %9635 = vmatmul.mubr.msk.bf16.gmra.mrb[144].mxu1 %vm371_vm0, %v14538_v42 }
 0x91f   : > { %v6565_v40 = vmax.f32 %v5619_v54, 0.0  ;;  %v6567_v50 = vmax.f32 %v5732_v38, 0.0  ;;  %6328 = vmatprep.mubr.bf16.mxu0 %v16367_v55  ;;  %6441 = vmatprep.mubr.bf16.mxu1 %v16367_v55 }
 0x920   : > { %v14969_v57 = vpack.c.bf16 %v6564_v27, %v6548_v56  ;;  %v14971_v48 = vpack.c.bf16 %v6566_v53, %v6550_v10 }
 0x921   : > { %v14973_v15 = vpack.c.bf16 %v6567_v50, %v6551_v44  ;;  %v5622_v26 = vpop.f32.mrb[24].mxu0  ;;  %v5735_v22 = vpop.f32.mrb[40].mxu1  ;;  %v14975_v14 = vpack.c.bf16 %v6565_v40, %v6549_v7 }
 0x922   : > { %v5623_v42 = vadd.f32 %v5622_v26, %v14837_v6  ;;  %v5736_v20 = vadd.f32 %v5735_v22, %v14841_v3  ;;  %v5624_v4 = vpop.f32.mrb[25].mxu0  ;;  %v5737_v9 = vpop.f32.mrb[41].mxu1 }
 0x923   : > { %v5625_v59 = vadd.f32 %v5624_v4, %v14845_v5  ;;  %v5738_v55 = vadd.f32 %v5737_v9, %v14849_v47  ;;  %v5626_v54 = vpop.f32.mrb[26].mxu0  ;;  %v5739_v38 = vpop.f32.mrb[42].mxu1 }
 0x924   : > { %v5627_v56 = vadd.f32 %v5626_v54, %v14837_v6  ;;  %v5740_v10 = vadd.f32 %v5739_v38, %v14841_v3  ;;  %v5628_v27 = vpop.f32.mrb[27].mxu0  ;;  %v5741_v53 = vpop.f32.mrb[43].mxu1  ;;  %v6580_v40 = vmax.f32 %v5623_v42, 0.0  ;;  %v6582_v50 = vmax.f32 %v5736_v20, 0.0 }
 0x925   : > { %v5629_v7 = vadd.f32 %v5628_v27, %v14845_v5  ;;  %v5742_v44 = vadd.f32 %v5741_v53, %v14849_v47  ;;  %v6581_v4 = vmax.f32 %v5625_v59, 0.0  ;;  %v6583_v9 = vmax.f32 %v5738_v55, 0.0 }
 0x926   : > { %v6596_v26 = vmax.f32 %v5627_v56, 0.0  ;;  %v6598_v22 = vmax.f32 %v5740_v10, 0.0  ;;  %9628 = vmatmul.mubr.msk.bf16.gmra.mrb[132].mxu0 %vm371_vm0, %v14556_v35  ;;  %9636 = vmatmul.mubr.msk.bf16.gmra.mrb[148].mxu1 %vm371_vm0, %v14556_v35 }
 0x927   : > { %v6597_v54 = vmax.f32 %v5629_v7, 0.0  ;;  %v6599_v38 = vmax.f32 %v5742_v44, 0.0  ;;  %7897 = vmatprep.mubr.bf16.mxu0 %v14903_v32  ;;  %7994 = vmatprep.mubr.bf16.mxu1 %v14901_v46 }
 0x928   : > { %v14991_v27 = vpack.c.bf16 %v6596_v26, %v6580_v40  ;;  %v14993_v42 = vpack.c.bf16 %v6598_v22, %v6582_v50  ;;  %v11354_v50 = vld [vmem:[%s16345_s5 + $0x500] sm:$0xff]  }
 0x929   : > { %v14995_v20 = vpack.c.bf16 %v6597_v54, %v6581_v4  ;;  %v14997_v56 = vpack.c.bf16 %v6599_v38, %v6583_v9  ;;  %v5632_v10 = vpop.f32.mrb[28].mxu0  ;;  %v5745_v53 = vpop.f32.mrb[44].mxu1  ;;  %v11356_v54 = vld [vmem:[%s16345_s5 + $0x580] sm:$0xff]  }
 0x92a   : > { %v5633_v35 = vadd.f32 %v5632_v10, %v14837_v6  ;;  %v5746_v59 = vadd.f32 %v5745_v53, %v14841_v3  ;;  %v5634_v55 = vpop.f32.mrb[29].mxu0  ;;  %v5747_v7 = vpop.f32.mrb[45].mxu1  ;;  %v11357_v53 = vld [vmem:[%s16345_s5 + $0x548] sm:$0xff]  }
 0x92b   : > { %v5635_v32 = vadd.f32 %v5634_v55, %v14845_v5  ;;  %v5748_v46 = vadd.f32 %v5747_v7, %v14849_v47  ;;  %v5636_v44 = vpop.f32.mrb[30].mxu0  ;;  %v5749_v40 = vpop.f32.mrb[46].mxu1  ;;  %v11359_v55 = vld [vmem:[%s16345_s5 + $0x5c8] sm:$0xff]  }
 0x92c   : > { %v5637_v26 = vadd.f32 %v5636_v44, %v14837_v6  ;;  %v5750_v22 = vadd.f32 %v5749_v40, %v14841_v3  ;;  %v5638_v4 = vpop.f32.mrb[31].mxu0  ;;  %v5751_v9 = vpop.f32.mrb[47].mxu1  ;;  %v6612_v7 = vmax.f32 %v5633_v35, 0.0  ;;  %v6614_v44 = vmax.f32 %v5746_v59, 0.0 }
 0x92d   : > { %v5639_v38 = vadd.f32 %v5638_v4, %v14845_v5  ;;  %v5752_v10 = vadd.f32 %v5751_v9, %v14849_v47  ;;  %v6613_v8 = vmax.f32 %v5635_v32, 0.0  ;;  %v6615_v4 = vmax.f32 %v5748_v46, 0.0 }
 0x92e   : > { %v6628_v40 = vmax.f32 %v5637_v26, 0.0  ;;  %v6630_v23 = vmax.f32 %v5750_v22, 0.0  ;;  %7898 = vmatmul.mubr.bf16.vlgmr.msra.gmra.mrb[136].mxu0 %v14891_v12  ;;  %7995 = vmatmul.mubr.bf16.vlgmr.msra.gmra.mrb[152].mxu1 %v14893_v36  ;;  %v11360_v12 = vld [vmem:[%s16345_s5 + $0x588] sm:$0xff]   ;;  %v11361_v36 = vld [vmem:[%s16345_s5 + $0x550] sm:$0xff]  }
 0x92f   : > { %v6629_v37 = vmax.f32 %v5639_v38, 0.0  ;;  %v6631_v9 = vmax.f32 %v5752_v10, 0.0  ;;  %10701 = vmatpush3.bf16.msra.mxu0 %v11354_v50  ;;  %7905 = vmatprep.mubr.bf16.mxu0 %v14931_v49 }
 0x930   : > { %v15025_v13 = vpack.c.bf16 %v6628_v40, %v6612_v7  ;;  %v15027_v35 = vpack.c.bf16 %v6630_v23, %v6614_v44  ;;  %8002 = vmatprep.mubr.bf16.mxu1 %v14929_v16  ;;  %10765 = vmatpush3.bf16.msra.mxu1 %v11356_v54  ;;  %v11363_v23 = vld [vmem:[%s16345_s5 + $0x5d0] sm:$0xff]  }
 0x931   : > { %v15036_v49 = vpack.c.bf16 %v6629_v37, %v6613_v8  ;;  %v15038_v59 = vpack.c.bf16 %v6631_v9, %v6615_v4  ;;  %v5642_v32 = vpop.f32.mrb[32].mxu0  ;;  %v5755_v46 = vpop.f32.mrb[48].mxu1  ;;  %10702 = vmatprep.subr.bf16.mxu0 %v11357_v53  ;;  %10766 = vmatprep.subr.bf16.mxu1 %v11359_v55  ;;  %v11362_v44 = vld [vmem:[%s16345_s5 + $0x510] sm:$0xff]   ;;  %v11365_v9 = vld [vmem:[%s16345_s5 + $0x558] sm:$0xff]  }
 0x932   : > { %v5643_v16 = vadd.f32 %v5642_v32, %v14837_v6  ;;  %v5756_v50 = vadd.f32 %v5755_v46, %v14841_v3  ;;  %v5644_v26 = vpop.f32.mrb[33].mxu0  ;;  %v5757_v22 = vpop.f32.mrb[49].mxu1  ;;  %v11364_v40 = vld [vmem:[%s16345_s5 + $0x590] sm:$0xff]  }
 0x933   : > { %v5645_v54 = vadd.f32 %v5644_v26, %v14845_v5  ;;  %v5758_v37 = vadd.f32 %v5757_v22, %v14849_v47  ;;  %v5646_v8 = vpop.f32.mrb[34].mxu0  ;;  %v5759_v38 = vpop.f32.mrb[50].mxu1  ;;  %10703 = vmatpush3.bf16.msra.mxu0 %v11358_v63 }
 0x934   : > { %v5647_v10 = vadd.f32 %v5646_v8, %v14837_v6  ;;  %v5760_v53 = vadd.f32 %v5759_v38, %v14841_v3  ;;  %v5648_v55 = vpop.f32.mrb[35].mxu0  ;;  %v5761_v7 = vpop.f32.mrb[51].mxu1  ;;  %10767 = vmatpush3.bf16.msra.mxu1 %v11360_v12  ;;  %10704 = vmatprep.subr.bf16.mxu0 %v11361_v36  ;;  %v11367_v12 = vld [vmem:[%s16345_s5 + $0x5d8] sm:$0xff]   ;;  %v6644_v36 = vmax.f32 %v5643_v16, 0.0  ;;  %v6646_v32 = vmax.f32 %v5756_v50, 0.0 }
 0x935   : > { %v5649_v4 = vadd.f32 %v5648_v55, %v14845_v5  ;;  %v5762_v63 = vadd.f32 %v5761_v7, %v14849_v47  ;;  %10768 = vmatprep.subr.bf16.mxu1 %v11363_v23  ;;  %v6645_v22 = vmax.f32 %v5645_v54, 0.0  ;;  %v6647_v8 = vmax.f32 %v5758_v37, 0.0  ;;  %v11369_v54 = vld [vmem:[%s16345_s5 + $0x560] sm:$0xff]  }
 0x936   : > { %v6660_v46 = vmax.f32 %v5647_v10, 0.0  ;;  %v6662_v26 = vmax.f32 %v5760_v53, 0.0  ;;  %7906 = vmatmul.mubr.bf16.gmra.mrb[140].mxu0 %v14925_v1  ;;  %8003 = vmatmul.mubr.bf16.gmra.mrb[156].mxu1 %v14927_v43  ;;  %v11366_v1 = vld [vmem:[%s16345_s5 + $0x518] sm:$0xff]   ;;  %v11371_v37 = vld [vmem:[%s16345_s5 + $0x5e0] sm:$0xff]  }
 0x937   : > { %v6661_v38 = vmax.f32 %v5649_v4, 0.0  ;;  %v6663_v23 = vmax.f32 %v5762_v63, 0.0  ;;  %7913 = vmatprep.mubr.bf16.mxu0 %v14953_v51  ;;  %8010 = vmatprep.mubr.bf16.mxu1 %v14951_v29  ;;  %v11368_v43 = vld [vmem:[%s16345_s5 + $0x598] sm:$0xff]  }
 0x938   : > { %v15067_v55 = vpack.c.bf16 %v6660_v46, %v6644_v36  ;;  %v15069_v7 = vpack.c.bf16 %v6662_v26, %v6646_v32  ;;  %10705 = vmatpush3.bf16.msra.mxu0 %v11362_v44  ;;  %10769 = vmatpush3.bf16.msra.mxu1 %v11364_v40  ;;  %v15093_v36 = vrot.slane %v14817_v17, %v12738_v28 }
 0x939   : > { %v15077_v16 = vpack.c.bf16 %v6661_v38, %v6645_v22  ;;  %v15079_v50 = vpack.c.bf16 %v6663_v23, %v6647_v8  ;;  %v5652_v51 = vpop.f32.mrb[36].mxu0  ;;  %v5765_v29 = vpop.f32.mrb[52].mxu1  ;;  %10706 = vmatprep.subr.bf16.mxu0 %v11365_v9  ;;  %10770 = vmatprep.subr.bf16.mxu1 %v11367_v12  ;;  %v15097_v32 = vrot.slane %v14817_v17, %v12741_v61  ;;  %v11370_v23 = vld [vmem:[%s16345_s5 + $0x520] sm:$0xff]  }
 0x93a   : > { %v5653_v10 = vadd.f32 %v5652_v51, %v14837_v6  ;;  %v5766_v53 = vadd.f32 %v5765_v29, %v14841_v3  ;;  %v5654_v44 = vpop.f32.mrb[37].mxu0  ;;  %v5767_v40 = vpop.f32.mrb[53].mxu1  ;;  %v15103_v38 = vrot.slane %v14817_v17, %v12754_v62  ;;  %v11372_v51 = vld [vmem:[%s16345_s5 + $0x5a0] sm:$0xff]   ;;  %v15115_v29 = vrot.slane %v14817_v17, %v12767_v18 }
 0x93b   : > { %v5655_v4 = vadd.f32 %v5654_v44, %v14845_v5  ;;  %v5768_v63 = vadd.f32 %v5767_v40, %v14849_v47  ;;  %v5656_v9 = vpop.f32.mrb[38].mxu0  ;;  %v5769_v12 = vpop.f32.mrb[54].mxu1 }
 0x93c   : > { %v5657_v46 = vadd.f32 %v5656_v9, %v14837_v6  ;;  %v5770_v26 = vadd.f32 %v5769_v12, %v14841_v3  ;;  %v5658_v22 = vpop.f32.mrb[39].mxu0  ;;  %v5771_v8 = vpop.f32.mrb[55].mxu1  ;;  %10707 = vmatpush3.bf16.msra.mxu0 %v11366_v1  ;;  %10771 = vmatpush3.bf16.msra.mxu1 %v11368_v43  ;;  %v11373_v1 = vld [vmem:[%s16345_s5 + $0x568] sm:$0xff]   ;;  %v6676_v44 = vmax.f32 %v5653_v10, 0.0  ;;  %v6678_v40 = vmax.f32 %v5766_v53, 0.0 }
 0x93d   : > { %v5659_v6 = vadd.f32 %v5658_v22, %v14845_v5  ;;  %v5772_v3 = vadd.f32 %v5771_v8, %v14849_v47  ;;  %10708 = vmatprep.subr.bf16.mxu0 %v11369_v54  ;;  %10772 = vmatprep.subr.bf16.mxu1 %v11371_v37  ;;  %v11375_v43 = vld [vmem:[%s16345_s5 + $0x5e8] sm:$0xff]   ;;  %v6677_v17 = vmax.f32 %v5655_v4, 0.0  ;;  %v6679_v47 = vmax.f32 %v5768_v63, 0.0  ;;  %v11377_v4 = vld [vmem:[%s16345_s5 + $0x570] sm:$0xff]  }
 0x93e   : > { %v6692_v9 = vmax.f32 %v5657_v46, 0.0  ;;  %v6694_v5 = vmax.f32 %v5770_v26, 0.0  ;;  %7914 = vmatmul.mubr.bf16.gmra.mrb[144].mxu0 %v14947_v24  ;;  %8011 = vmatmul.mubr.bf16.gmra.mrb[160].mxu1 %v14949_v60  ;;  %v11374_v24 = vld [vmem:[%s16345_s5 + $0x528] sm:$0xff]   ;;  %v11379_v63 = vld [vmem:[%s16345_s5 + $0x5f0] sm:$0xff]  }
 0x93f   : > { %v6693_v54 = vmax.f32 %v5659_v6, 0.0  ;;  %v6695_v37 = vmax.f32 %v5772_v3, 0.0  ;;  %7921 = vmatprep.mubr.bf16.mxu0 %v14975_v14  ;;  %8018 = vmatprep.mubr.bf16.mxu1 %v14973_v15  ;;  %v11376_v60 = vld [vmem:[%s16345_s5 + $0x5a8] sm:$0xff]  }
 0x940   : > { %v15127_v12 = vpack.c.bf16 %v6692_v9, %v6676_v44  ;;  %v15129_v22 = vpack.c.bf16 %v6694_v5, %v6678_v40  ;;  %10709 = vmatpush3.bf16.msra.mxu0 %v11370_v23  ;;  %10773 = vmatpush3.bf16.msra.mxu1 %v11372_v51  ;;  %v11378_v5 = vld [vmem:[%s16345_s5 + $0x530] sm:$0xff]  }
 0x941   : > { %v15137_v10 = vpack.c.bf16 %v6693_v54, %v6677_v17  ;;  %v15139_v53 = vpack.c.bf16 %v6695_v37, %v6679_v47  ;;  %v5808_v14 = vpop.f32.mrb[40].mxu0  ;;  %v5921_v15 = vpop.f32.mrb[56].mxu1  ;;  %10710 = vmatprep.subr.bf16.mxu0 %v11373_v1  ;;  %10774 = vmatprep.subr.bf16.mxu1 %v11375_v43  ;;  %v11380_v17 = vld [vmem:[%s16345_s5 + $0x5b0] sm:$0xff]   ;;  %v11381_v37 = vld [vmem:[%s16345_s5 + $0x578] sm:$0xff]  }
 0x942   : > { %v5809_v46 = vadd.f32 %v5808_v14, %v15093_v36  ;;  %v5922_v26 = vadd.f32 %v5921_v15, %v15097_v32  ;;  %v5810_v8 = vpop.f32.mrb[41].mxu0  ;;  %v5923_v23 = vpop.f32.mrb[57].mxu1 }
 0x943   : > { %v5811_v51 = vadd.f32 %v5810_v8, %v15103_v38  ;;  %v5924_v6 = vadd.f32 %v5923_v23, %v15115_v29  ;;  %v5812_v3 = vpop.f32.mrb[42].mxu0  ;;  %v5925_v1 = vpop.f32.mrb[58].mxu1 }
 0x944   : > { %v5813_v43 = vadd.f32 %v5812_v3, %v15093_v36  ;;  %v5926_v44 = vadd.f32 %v5925_v1, %v15097_v32  ;;  %v5814_v40 = vpop.f32.mrb[43].mxu0  ;;  %v5927_v9 = vpop.f32.mrb[59].mxu1  ;;  %10711 = vmatpush3.bf16.msra.mxu0 %v11374_v24  ;;  %10775 = vmatpush3.bf16.msra.mxu1 %v11376_v60  ;;  %v11383_v24 = vld [vmem:[%s16345_s5 + $0x5f8] sm:$0xff]   ;;  %v6456_v60 = vmax.f32 %v5809_v46, 0.0  ;;  %v6458_v14 = vmax.f32 %v5922_v26, 0.0 }
 0x945   : > { %v5815_v47 = vadd.f32 %v5814_v40, %v15103_v38  ;;  %v5928_v54 = vadd.f32 %v5927_v9, %v15115_v29  ;;  %10712 = vmatprep.subr.bf16.mxu0 %v11377_v4  ;;  %10776 = vmatprep.subr.bf16.mxu1 %v11379_v63  ;;  %v6457_v23 = vmax.f32 %v5811_v51, 0.0  ;;  %v6459_v3 = vmax.f32 %v5924_v6, 0.0  ;;  %v11385_v51 = vld [vmem:[%s16345_s5 + $0x640] sm:$0xff]  }
 0x946   : > { %v6472_v15 = vmax.f32 %v5813_v43, 0.0  ;;  %v6474_v8 = vmax.f32 %v5926_v44, 0.0  ;;  %7922 = vmatmul.mubr.bf16.gmra.mrb[148].mxu0 %v14969_v57  ;;  %8019 = vmatmul.mubr.bf16.gmra.mrb[164].mxu1 %v14971_v48  ;;  %v11382_v57 = vld [vmem:[%s16345_s5 + $0x538] sm:$0xff]   ;;  %v11387_v6 = vld [vmem:[%s16345_s5 + $0x6c0] sm:$0xff]  }
 0x947   : > { %v6473_v4 = vmax.f32 %v5815_v47, 0.0  ;;  %v6475_v63 = vmax.f32 %v5928_v54, 0.0  ;;  %7929 = vmatprep.mubr.bf16.mxu0 %v14995_v20  ;;  %8026 = vmatprep.mubr.bf16.mxu1 %v14997_v56  ;;  %v11384_v48 = vld [vmem:[%s16345_s5 + $0x5b8] sm:$0xff]  }
 0x948   : > { %v15171_v1 = vpack.c.bf16 %v6472_v15, %v6456_v60  ;;  %v15173_v40 = vpack.c.bf16 %v6474_v8, %v6458_v14  ;;  %10713 = vmatpush3.bf16.msra.mxu0 %v11378_v5  ;;  %10777 = vmatpush3.bf16.msra.mxu1 %v11380_v17 }
 0x949   : > { %v15181_v46 = vpack.c.bf16 %v6473_v4, %v6457_v23  ;;  %v15183_v26 = vpack.c.bf16 %v6475_v63, %v6459_v3  ;;  %v5818_v20 = vpop.f32.mrb[44].mxu0  ;;  %v5931_v56 = vpop.f32.mrb[60].mxu1  ;;  %10714 = vmatprep.subr.bf16.mxu0 %v11381_v37  ;;  %10778 = vmatprep.subr.bf16.mxu1 %v11383_v24 }
 0x94a   : > { %v5819_v43 = vadd.f32 %v5818_v20, %v15093_v36  ;;  %v5932_v44 = vadd.f32 %v5931_v56, %v15097_v32  ;;  %v5820_v9 = vpop.f32.mrb[45].mxu0  ;;  %v5933_v5 = vpop.f32.mrb[61].mxu1 }
 0x94b   : > { %v5821_v17 = vadd.f32 %v5820_v9, %v15103_v38  ;;  %v5934_v47 = vadd.f32 %v5933_v5, %v15115_v29  ;;  %v5822_v54 = vpop.f32.mrb[46].mxu0  ;;  %v5935_v37 = vpop.f32.mrb[62].mxu1 }
 0x94c   : > { %v5823_v24 = vadd.f32 %v5822_v54, %v15093_v36  ;;  %v5936_v60 = vadd.f32 %v5935_v37, %v15097_v32  ;;  %v5824_v14 = vpop.f32.mrb[47].mxu0  ;;  %v5937_v15 = vpop.f32.mrb[63].mxu1  ;;  %10715 = vmatpush3.bf16.msra.mxu0 %v11382_v57  ;;  %10779 = vmatpush3.bf16.msra.mxu1 %v11384_v48  ;;  %v6488_v3 = vmax.f32 %v5819_v43, 0.0  ;;  %v6490_v4 = vmax.f32 %v5932_v44, 0.0 }
 0x94d   : > { %v5825_v8 = vadd.f32 %v5824_v14, %v15103_v38  ;;  %v5938_v23 = vadd.f32 %v5937_v15, %v15115_v29  ;;  %10828 = vmatprep.subr.bf16.mxu0 %v11385_v51  ;;  %10892 = vmatprep.subr.bf16.mxu1 %v11387_v6  ;;  %v6489_v56 = vmax.f32 %v5821_v17, 0.0  ;;  %v6491_v9 = vmax.f32 %v5934_v47, 0.0 }
 0x94e   : > { %v6504_v63 = vmax.f32 %v5823_v24, 0.0  ;;  %v6506_v20 = vmax.f32 %v5936_v60, 0.0  ;;  %7930 = vmatmul.mubr.bf16.gmra.mrb[152].mxu0 %v14991_v27  ;;  %8027 = vmatmul.mubr.bf16.gmra.mrb[168].mxu1 %v14993_v42 }
 0x94f   : > { %v6505_v5 = vmax.f32 %v5825_v8, 0.0  ;;  %v6507_v54 = vmax.f32 %v5938_v23, 0.0  ;;  %7937 = vmatprep.mubr.bf16.mxu0 %v15036_v49  ;;  %8034 = vmatprep.mubr.bf16.mxu1 %v15038_v59 }
 0x950   : > { %v15203_v57 = vpack.c.bf16 %v6504_v63, %v6488_v3  ;;  %v15205_v48 = vpack.c.bf16 %v6506_v20, %v6490_v4 }
 0x951   : > { %v15207_v51 = vpack.c.bf16 %v6505_v5, %v6489_v56  ;;  %v15209_v6 = vpack.c.bf16 %v6507_v54, %v6491_v9  ;;  %v5828_v43 = vpop.f32.mrb[48].mxu0  ;;  %v5941_v27 = vpop.f32.mrb[64].mxu1 }
 0x952   : > { %v5829_v42 = vadd.f32 %v5828_v43, %v15093_v36  ;;  %v5942_v44 = vadd.f32 %v5941_v27, %v15097_v32  ;;  %v5830_v17 = vpop.f32.mrb[49].mxu0  ;;  %v5943_v47 = vpop.f32.mrb[65].mxu1 }
 0x953   : > { %v5831_v49 = vadd.f32 %v5830_v17, %v15103_v38  ;;  %v5944_v59 = vadd.f32 %v5943_v47, %v15115_v29  ;;  %v5832_v37 = vpop.f32.mrb[50].mxu0  ;;  %v5945_v24 = vpop.f32.mrb[66].mxu1 }
 0x954   : > { %v5833_v60 = vadd.f32 %v5832_v37, %v15093_v36  ;;  %v5946_v14 = vadd.f32 %v5945_v24, %v15097_v32  ;;  %v5834_v15 = vpop.f32.mrb[51].mxu0  ;;  %v5947_v8 = vpop.f32.mrb[67].mxu1  ;;  %v6520_v4 = vmax.f32 %v5829_v42, 0.0  ;;  %v6522_v63 = vmax.f32 %v5942_v44, 0.0 }
 0x955   : > { %v5835_v23 = vadd.f32 %v5834_v15, %v15103_v38  ;;  %v5948_v3 = vadd.f32 %v5947_v8, %v15115_v29  ;;  %v6521_v9 = vmax.f32 %v5831_v49, 0.0  ;;  %v6523_v5 = vmax.f32 %v5944_v59, 0.0 }
 0x956   : > { %v6536_v20 = vmax.f32 %v5833_v60, 0.0  ;;  %v6538_v56 = vmax.f32 %v5946_v14, 0.0  ;;  %7938 = vmatmul.mubr.bf16.gmra.mrb[156].mxu0 %v15025_v13  ;;  %8035 = vmatmul.mubr.bf16.gmra.mrb[172].mxu1 %v15027_v35 }
 0x957   : > { %v6537_v54 = vmax.f32 %v5835_v23, 0.0  ;;  %v6539_v43 = vmax.f32 %v5948_v3, 0.0  ;;  %7945 = vmatprep.mubr.bf16.mxu0 %v15077_v16  ;;  %8042 = vmatprep.mubr.bf16.mxu1 %v15079_v50 }
 0x958   : > { %v15223_v27 = vpack.c.bf16 %v6536_v20, %v6520_v4  ;;  %v15225_v17 = vpack.c.bf16 %v6538_v56, %v6522_v63 }
 0x959   : > { %v15227_v42 = vpack.c.bf16 %v6537_v54, %v6521_v9  ;;  %v15229_v44 = vpack.c.bf16 %v6539_v43, %v6523_v5  ;;  %v5838_v47 = vpop.f32.mrb[52].mxu0  ;;  %v5951_v13 = vpop.f32.mrb[68].mxu1 }
 0x95a   : > { %v5839_v35 = vadd.f32 %v5838_v47, %v15093_v36  ;;  %v5952_v49 = vadd.f32 %v5951_v13, %v15097_v32  ;;  %v5840_v59 = vpop.f32.mrb[53].mxu0  ;;  %v5953_v37 = vpop.f32.mrb[69].mxu1 }
 0x95b   : > { %v5841_v16 = vadd.f32 %v5840_v59, %v15103_v38  ;;  %v5954_v50 = vadd.f32 %v5953_v37, %v15115_v29  ;;  %v5842_v24 = vpop.f32.mrb[54].mxu0  ;;  %v5955_v60 = vpop.f32.mrb[70].mxu1 }
 0x95c   : > { %v5843_v14 = vadd.f32 %v5842_v24, %v15093_v36  ;;  %v5956_v15 = vadd.f32 %v5955_v60, %v15097_v32  ;;  %v5844_v8 = vpop.f32.mrb[55].mxu0  ;;  %v5957_v23 = vpop.f32.mrb[71].mxu1  ;;  %v6552_v63 = vmax.f32 %v5839_v35, 0.0  ;;  %v6554_v20 = vmax.f32 %v5952_v49, 0.0 }
 0x95d   : > { %v5845_v3 = vadd.f32 %v5844_v8, %v15103_v38  ;;  %v5958_v4 = vadd.f32 %v5957_v23, %v15115_v29  ;;  %v6553_v5 = vmax.f32 %v5841_v16, 0.0  ;;  %v6555_v54 = vmax.f32 %v5954_v50, 0.0 }
 0x95e   : > { %v6568_v56 = vmax.f32 %v5843_v14, 0.0  ;;  %v6570_v9 = vmax.f32 %v5956_v15, 0.0  ;;  %7946 = vmatmul.mubr.bf16.gmra.mrb[160].mxu0 %v15067_v55  ;;  %8043 = vmatmul.mubr.bf16.gmra.mrb[176].mxu1 %v15069_v7 }
 0x95f   : > { %v6569_v43 = vmax.f32 %v5845_v3, 0.0  ;;  %v6571_v47 = vmax.f32 %v5958_v4, 0.0  ;;  %7953 = vmatprep.mubr.bf16.mxu0 %v15137_v10  ;;  %8050 = vmatprep.mubr.bf16.mxu1 %v15139_v53 }
 0x960   : > { %v15243_v13 = vpack.c.bf16 %v6568_v56, %v6552_v63  ;;  %v15245_v59 = vpack.c.bf16 %v6570_v9, %v6554_v20 }
 0x961   : > { %v15247_v35 = vpack.c.bf16 %v6569_v43, %v6553_v5  ;;  %v15249_v49 = vpack.c.bf16 %v6571_v47, %v6555_v54  ;;  %v5848_v37 = vpop.f32.mrb[56].mxu0  ;;  %v5961_v55 = vpop.f32.mrb[72].mxu1 }
 0x962   : > { %v5849_v7 = vadd.f32 %v5848_v37, %v15093_v36  ;;  %v5962_v16 = vadd.f32 %v5961_v55, %v15097_v32  ;;  %v5850_v50 = vpop.f32.mrb[57].mxu0  ;;  %v5963_v24 = vpop.f32.mrb[73].mxu1 }
 0x963   : > { %v5851_v10 = vadd.f32 %v5850_v50, %v15103_v38  ;;  %v5964_v53 = vadd.f32 %v5963_v24, %v15115_v29  ;;  %v5852_v60 = vpop.f32.mrb[58].mxu0  ;;  %v5965_v14 = vpop.f32.mrb[74].mxu1 }
 0x964   : > { %v5853_v15 = vadd.f32 %v5852_v60, %v15093_v36  ;;  %v5966_v8 = vadd.f32 %v5965_v14, %v15097_v32  ;;  %v5854_v23 = vpop.f32.mrb[59].mxu0  ;;  %v5967_v3 = vpop.f32.mrb[75].mxu1  ;;  %v6584_v20 = vmax.f32 %v5849_v7, 0.0  ;;  %v6586_v56 = vmax.f32 %v5962_v16, 0.0 }
 0x965   : > { %v5855_v4 = vadd.f32 %v5854_v23, %v15103_v38  ;;  %v5968_v63 = vadd.f32 %v5967_v3, %v15115_v29  ;;  %v6585_v54 = vmax.f32 %v5851_v10, 0.0  ;;  %v6587_v43 = vmax.f32 %v5964_v53, 0.0 }
 0x966   : > { %v6600_v9 = vmax.f32 %v5853_v15, 0.0  ;;  %v6602_v5 = vmax.f32 %v5966_v8, 0.0  ;;  %7954 = vmatmul.mubr.bf16.gmra.mrb[164].mxu0 %v15127_v12  ;;  %8051 = vmatmul.mubr.bf16.gmra.mrb[180].mxu1 %v15129_v22  ;;  %v11386_v8 = vld [vmem:[%s16345_s5 + $0x600] sm:$0xff]  }
 0x967   : > { %v6601_v47 = vmax.f32 %v5855_v4, 0.0  ;;  %v6603_v37 = vmax.f32 %v5968_v63, 0.0  ;;  %8091 = vmatprep.mubr.bf16.mxu0 %v15181_v46  ;;  %8188 = vmatprep.mubr.bf16.mxu1 %v15183_v26 }
 0x968   : > { %v15263_v55 = vpack.c.bf16 %v6600_v9, %v6584_v20  ;;  %v15265_v50 = vpack.c.bf16 %v6602_v5, %v6586_v56  ;;  %v11388_v20 = vld [vmem:[%s16345_s5 + $0x680] sm:$0xff]   ;;  %v11389_v5 = vld [vmem:[%s16345_s5 + $0x648] sm:$0xff]  }
 0x969   : > { %v15267_v7 = vpack.c.bf16 %v6601_v47, %v6585_v54  ;;  %v15269_v16 = vpack.c.bf16 %v6603_v37, %v6587_v43  ;;  %v5858_v24 = vpop.f32.mrb[60].mxu0  ;;  %v5971_v12 = vpop.f32.mrb[76].mxu1  ;;  %v11391_v54 = vld [vmem:[%s16345_s5 + $0x6c8] sm:$0xff]  }
 0x96a   : > { %v5859_v22 = vadd.f32 %v5858_v24, %v15093_v36  ;;  %v5972_v10 = vadd.f32 %v5971_v12, %v15097_v32  ;;  %v5860_v53 = vpop.f32.mrb[61].mxu0  ;;  %v5973_v60 = vpop.f32.mrb[77].mxu1 }
 0x96b   : > { %v5861_v46 = vadd.f32 %v5860_v53, %v15103_v38  ;;  %v5974_v26 = vadd.f32 %v5973_v60, %v15115_v29  ;;  %v5862_v14 = vpop.f32.mrb[62].mxu0  ;;  %v5975_v15 = vpop.f32.mrb[78].mxu1 }
 0x96c   : > { %v5863_v23 = vadd.f32 %v5862_v14, %v15093_v36  ;;  %v5976_v3 = vadd.f32 %v5975_v15, %v15097_v32  ;;  %v5864_v4 = vpop.f32.mrb[63].mxu0  ;;  %v5977_v63 = vpop.f32.mrb[79].mxu1  ;;  %v6616_v43 = vmax.f32 %v5859_v22, 0.0  ;;  %v6618_v47 = vmax.f32 %v5972_v10, 0.0  ;;  %v11390_v15 = vld [vmem:[%s16345_s5 + $0x608] sm:$0xff]  }
 0x96d   : > { %v5865_v56 = vadd.f32 %v5864_v4, %v15103_v38  ;;  %v5978_v9 = vadd.f32 %v5977_v63, %v15115_v29  ;;  %v6617_v12 = vmax.f32 %v5861_v46, 0.0  ;;  %v6619_v53 = vmax.f32 %v5974_v26, 0.0 }
 0x96e   : > { %v6632_v37 = vmax.f32 %v5863_v23, 0.0  ;;  %v6634_v24 = vmax.f32 %v5976_v3, 0.0  ;;  %8092 = vmatmul.mubr.bf16.vlgmr.msra.gmra.mrb[168].mxu0 %v15171_v1  ;;  %8189 = vmatmul.mubr.bf16.vlgmr.msra.gmra.mrb[184].mxu1 %v15173_v40  ;;  %v11392_v1 = vld [vmem:[%s16345_s5 + $0x688] sm:$0xff]   ;;  %v11393_v40 = vld [vmem:[%s16345_s5 + $0x650] sm:$0xff]  }
 0x96f   : > { %v6633_v60 = vmax.f32 %v5865_v56, 0.0  ;;  %v6635_v14 = vmax.f32 %v5978_v9, 0.0  ;;  %10829 = vmatpush3.bf16.msra.mxu0 %v11386_v8  ;;  %8099 = vmatprep.mubr.bf16.mxu0 %v15207_v51 }
 0x970   : > { %v15297_v4 = vpack.c.bf16 %v6632_v37, %v6616_v43  ;;  %v15299_v22 = vpack.c.bf16 %v6634_v24, %v6618_v47  ;;  %8196 = vmatprep.mubr.bf16.mxu1 %v15209_v6  ;;  %10893 = vmatpush3.bf16.msra.mxu1 %v11388_v20  ;;  %v11395_v6 = vld [vmem:[%s16345_s5 + $0x6d0] sm:$0xff]  }
 0x971   : > { %v15308_v51 = vpack.c.bf16 %v6633_v60, %v6617_v12  ;;  %v15310_v10 = vpack.c.bf16 %v6635_v14, %v6619_v53  ;;  %v5868_v46 = vpop.f32.mrb[64].mxu0  ;;  %v5981_v26 = vpop.f32.mrb[80].mxu1  ;;  %10830 = vmatprep.subr.bf16.mxu0 %v11389_v5  ;;  %10894 = vmatprep.subr.bf16.mxu1 %v11391_v54  ;;  %v11394_v24 = vld [vmem:[%s16345_s5 + $0x610] sm:$0xff]   ;;  %v11397_v14 = vld [vmem:[%s16345_s5 + $0x658] sm:$0xff]  }
 0x972   : > { %v5869_v8 = vadd.f32 %v5868_v46, %v15093_v36  ;;  %v5982_v23 = vadd.f32 %v5981_v26, %v15097_v32  ;;  %v5870_v3 = vpop.f32.mrb[65].mxu0  ;;  %v5983_v63 = vpop.f32.mrb[81].mxu1  ;;  %v11396_v12 = vld [vmem:[%s16345_s5 + $0x690] sm:$0xff]  }
 0x973   : > { %v5871_v20 = vadd.f32 %v5870_v3, %v15103_v38  ;;  %v5984_v56 = vadd.f32 %v5983_v63, %v15115_v29  ;;  %v5872_v9 = vpop.f32.mrb[66].mxu0  ;;  %v5985_v43 = vpop.f32.mrb[82].mxu1  ;;  %10831 = vmatpush3.bf16.msra.mxu0 %v11390_v15  ;;  %v11399_v15 = vld [vmem:[%s16345_s5 + $0x6d8] sm:$0xff]  }
 0x974   : > { %v5873_v5 = vadd.f32 %v5872_v9, %v15093_v36  ;;  %v5986_v54 = vadd.f32 %v5985_v43, %v15097_v32  ;;  %v5874_v47 = vpop.f32.mrb[67].mxu0  ;;  %v5987_v37 = vpop.f32.mrb[83].mxu1  ;;  %10895 = vmatpush3.bf16.msra.mxu1 %v11392_v1  ;;  %10832 = vmatprep.subr.bf16.mxu0 %v11393_v40  ;;  %v6648_v1 = vmax.f32 %v5869_v8, 0.0  ;;  %v6650_v40 = vmax.f32 %v5982_v23, 0.0 }
 0x975   : > { %v5875_v53 = vadd.f32 %v5874_v47, %v15103_v38  ;;  %v5988_v60 = vadd.f32 %v5987_v37, %v15115_v29  ;;  %10896 = vmatprep.subr.bf16.mxu1 %v11395_v6  ;;  %v6649_v3 = vmax.f32 %v5871_v20, 0.0  ;;  %v6651_v63 = vmax.f32 %v5984_v56, 0.0  ;;  %v11401_v56 = vld [vmem:[%s16345_s5 + $0x660] sm:$0xff]  }
 0x976   : > { %v6664_v46 = vmax.f32 %v5873_v5, 0.0  ;;  %v6666_v26 = vmax.f32 %v5986_v54, 0.0  ;;  %8100 = vmatmul.mubr.bf16.gmra.mrb[172].mxu0 %v15203_v57  ;;  %8197 = vmatmul.mubr.bf16.gmra.mrb[188].mxu1 %v15205_v48  ;;  %v15346_v57 = vld [vmem:[%s16344_s4 + $0x18] sm:$0xff]  ;;  %v11403_v5 = vld [vmem:[%s16345_s5 + $0x6e0] sm:$0xff]  }
 0x977   : > { %v6665_v9 = vmax.f32 %v5875_v53, 0.0  ;;  %v6667_v6 = vmax.f32 %v5988_v60, 0.0  ;;  %8107 = vmatprep.mubr.bf16.mxu0 %v15227_v42  ;;  %8204 = vmatprep.mubr.bf16.mxu1 %v15229_v44  ;;  %v11398_v48 = vld [vmem:[%s16345_s5 + $0x618] sm:$0xff]  }
 0x978   : > { %v15339_v43 = vpack.c.bf16 %v6664_v46, %v6648_v1  ;;  %v15341_v47 = vpack.c.bf16 %v6666_v26, %v6650_v40  ;;  %10833 = vmatpush3.bf16.msra.mxu0 %v11394_v24  ;;  %10897 = vmatpush3.bf16.msra.mxu1 %v11396_v12  ;;  %v11400_v42 = vld [vmem:[%s16345_s5 + $0x698] sm:$0xff]   ;;  %v15370_v1 = vrot.slane %v15346_v57, %v11712_v30  ;;  %v11402_v30 = vld [vmem:[%s16345_s5 + $0x620] sm:$0xff]  }
 0x979   : > { %v15354_v44 = vpack.c.bf16 %v6665_v9, %v6649_v3  ;;  %v15356_v8 = vpack.c.bf16 %v6667_v6, %v6651_v63  ;;  %v5878_v23 = vpop.f32.mrb[68].mxu0  ;;  %v5991_v20 = vpop.f32.mrb[84].mxu1  ;;  %10834 = vmatprep.subr.bf16.mxu0 %v11397_v14  ;;  %10898 = vmatprep.subr.bf16.mxu1 %v11399_v15  ;;  %v15374_v40 = vrot.slane %v15346_v57, %v16372_v25  ;;  %v11404_v25 = vld [vmem:[%s16345_s5 + $0x6a0] sm:$0xff]  }
 0x97a   : > { %v5879_v54 = vadd.f32 %v5878_v23, %v15093_v36  ;;  %v5992_v37 = vadd.f32 %v5991_v20, %v15097_v32  ;;  %v5880_v24 = vpop.f32.mrb[69].mxu0  ;;  %v5993_v12 = vpop.f32.mrb[85].mxu1  ;;  %v15380_v9 = vrot.slane %v15346_v57, %v11994_v34  ;;  %v15392_v6 = vrot.slane %v15346_v57, %v12497_v11  ;;  %v11405_v34 = vld [vmem:[%s16345_s5 + $0x668] sm:$0xff]  }
 0x97b   : > { %v5881_v53 = vadd.f32 %v5880_v24, %v15103_v38  ;;  %v5994_v60 = vadd.f32 %v5993_v12, %v15115_v29  ;;  %v5882_v14 = vpop.f32.mrb[70].mxu0  ;;  %v5995_v15 = vpop.f32.mrb[86].mxu1 }
 0x97c   : > { %v5883_v46 = vadd.f32 %v5882_v14, %v15093_v36  ;;  %v5996_v26 = vadd.f32 %v5995_v15, %v15097_v32  ;;  %v5884_v3 = vpop.f32.mrb[71].mxu0  ;;  %v5997_v63 = vpop.f32.mrb[87].mxu1  ;;  %10835 = vmatpush3.bf16.msra.mxu0 %v11398_v48  ;;  %10899 = vmatpush3.bf16.msra.mxu1 %v11400_v42  ;;  %v11407_v48 = vld [vmem:[%s16345_s5 + $0x6e8] sm:$0xff]   ;;  %v6680_v42 = vmax.f32 %v5879_v54, 0.0  ;;  %v6682_v23 = vmax.f32 %v5992_v37, 0.0 }
 0x97d   : > { %v5885_v36 = vadd.f32 %v5884_v3, %v15103_v38  ;;  %v5998_v32 = vadd.f32 %v5997_v63, %v15115_v29  ;;  %10836 = vmatprep.subr.bf16.mxu0 %v11401_v56  ;;  %10900 = vmatprep.subr.bf16.mxu1 %v11403_v5  ;;  %v6681_v29 = vmax.f32 %v5881_v53, 0.0  ;;  %v6683_v24 = vmax.f32 %v5994_v60, 0.0  ;;  %v11409_v53 = vld [vmem:[%s16345_s5 + $0x670] sm:$0xff]  }
 0x97e   : > { %v6696_v20 = vmax.f32 %v5883_v46, 0.0  ;;  %v6698_v38 = vmax.f32 %v5996_v26, 0.0  ;;  %8108 = vmatmul.mubr.bf16.gmra.mrb[176].mxu0 %v15223_v27  ;;  %8205 = vmatmul.mubr.bf16.gmra.mrb[192].mxu1 %v15225_v17  ;;  %v11406_v27 = vld [vmem:[%s16345_s5 + $0x628] sm:$0xff]   ;;  %v11411_v60 = vld [vmem:[%s16345_s5 + $0x6f0] sm:$0xff]  }
 0x97f   : > { %v6697_v56 = vmax.f32 %v5885_v36, 0.0  ;;  %v6699_v5 = vmax.f32 %v5998_v32, 0.0  ;;  %8115 = vmatprep.mubr.bf16.mxu0 %v15247_v35  ;;  %8212 = vmatprep.mubr.bf16.mxu1 %v15249_v49  ;;  %v11408_v17 = vld [vmem:[%s16345_s5 + $0x6a8] sm:$0xff]  }
 0x980   : > { %v15404_v12 = vpack.c.bf16 %v6696_v20, %v6680_v42  ;;  %v15406_v14 = vpack.c.bf16 %v6698_v38, %v6682_v23  ;;  %10837 = vmatpush3.bf16.msra.mxu0 %v11402_v30  ;;  %10901 = vmatpush3.bf16.msra.mxu1 %v11404_v25  ;;  %v11410_v23 = vld [vmem:[%s16345_s5 + $0x630] sm:$0xff]  }
 0x981   : > { %v15414_v54 = vpack.c.bf16 %v6697_v56, %v6681_v29  ;;  %v15416_v37 = vpack.c.bf16 %v6699_v5, %v6683_v24  ;;  %v6034_v35 = vpop.f32.mrb[72].mxu0  ;;  %v6147_v49 = vpop.f32.mrb[88].mxu1  ;;  %10838 = vmatprep.subr.bf16.mxu0 %v11405_v34  ;;  %10902 = vmatprep.subr.bf16.mxu1 %v11407_v48  ;;  %v11412_v20 = vld [vmem:[%s16345_s5 + $0x6b0] sm:$0xff]   ;;  %v11413_v24 = vld [vmem:[%s16345_s5 + $0x678] sm:$0xff]  }
 0x982   : > { %v6035_v15 = vadd.f32 %v6034_v35, %v15370_v1  ;;  %v6148_v46 = vadd.f32 %v6147_v49, %v15374_v40  ;;  %v6036_v26 = vpop.f32.mrb[73].mxu0  ;;  %v6149_v3 = vpop.f32.mrb[89].mxu1  ;;  %v11415_v56 = vld [vmem:[%s16345_s5 + $0x6f8] sm:$0xff]  }
 0x983   : > { %v6037_v63 = vadd.f32 %v6036_v26, %v15380_v9  ;;  %v6150_v30 = vadd.f32 %v6149_v3, %v15392_v6  ;;  %v6038_v25 = vpop.f32.mrb[74].mxu0  ;;  %v6151_v36 = vpop.f32.mrb[90].mxu1 }
 0x984   : > { %v6039_v32 = vadd.f32 %v6038_v25, %v15370_v1  ;;  %v6152_v34 = vadd.f32 %v6151_v36, %v15374_v40  ;;  %v6040_v48 = vpop.f32.mrb[75].mxu0  ;;  %v6153_v42 = vpop.f32.mrb[91].mxu1  ;;  %10839 = vmatpush3.bf16.msra.mxu0 %v11406_v27  ;;  %10903 = vmatpush3.bf16.msra.mxu1 %v11408_v17  ;;  %v6460_v5 = vmax.f32 %v6035_v15, 0.0  ;;  %v6462_v27 = vmax.f32 %v6148_v46, 0.0 }
 0x985   : > { %v6041_v38 = vadd.f32 %v6040_v48, %v15380_v9  ;;  %v6154_v29 = vadd.f32 %v6153_v42, %v15392_v6  ;;  %10840 = vmatprep.subr.bf16.mxu0 %v11409_v53  ;;  %10904 = vmatprep.subr.bf16.mxu1 %v11411_v60  ;;  %v6461_v49 = vmax.f32 %v6037_v63, 0.0  ;;  %v6463_v26 = vmax.f32 %v6150_v30, 0.0  ;;  %v11417_v63 = vld [vmem:[%s16345_s5 + $0x740] sm:$0xff]  }
 0x986   : > { %v6476_v17 = vmax.f32 %v6039_v32, 0.0  ;;  %v6478_v35 = vmax.f32 %v6152_v34, 0.0  ;;  %8116 = vmatmul.mubr.bf16.gmra.mrb[180].mxu0 %v15243_v13  ;;  %8213 = vmatmul.mubr.bf16.gmra.mrb[196].mxu1 %v15245_v59  ;;  %v11414_v13 = vld [vmem:[%s16345_s5 + $0x638] sm:$0xff]   ;;  %v11419_v30 = vld [vmem:[%s16345_s5 + $0x7c0] sm:$0xff]  }
 0x987   : > { %v6477_v53 = vmax.f32 %v6041_v38, 0.0  ;;  %v6479_v60 = vmax.f32 %v6154_v29, 0.0  ;;  %8123 = vmatprep.mubr.bf16.mxu0 %v15267_v7  ;;  %8220 = vmatprep.mubr.bf16.mxu1 %v15269_v16  ;;  %v11416_v59 = vld [vmem:[%s16345_s5 + $0x6b8] sm:$0xff]  }
 0x988   : > { %v15448_v3 = vpack.c.bf16 %v6476_v17, %v6460_v5  ;;  %v15450_v25 = vpack.c.bf16 %v6478_v35, %v6462_v27  ;;  %10841 = vmatpush3.bf16.msra.mxu0 %v11410_v23  ;;  %10905 = vmatpush3.bf16.msra.mxu1 %v11412_v20 }
 0x989   : > { %v15458_v15 = vpack.c.bf16 %v6477_v53, %v6461_v49  ;;  %v15460_v46 = vpack.c.bf16 %v6479_v60, %v6463_v26  ;;  %v6044_v7 = vpop.f32.mrb[76].mxu0  ;;  %v6157_v16 = vpop.f32.mrb[92].mxu1  ;;  %10842 = vmatprep.subr.bf16.mxu0 %v11413_v24  ;;  %10906 = vmatprep.subr.bf16.mxu1 %v11415_v56 }
 0x98a   : > { %v6045_v36 = vadd.f32 %v6044_v7, %v15370_v1  ;;  %v6158_v32 = vadd.f32 %v6157_v16, %v15374_v40  ;;  %v6046_v34 = vpop.f32.mrb[77].mxu0  ;;  %v6159_v48 = vpop.f32.mrb[93].mxu1 }
 0x98b   : > { %v6047_v42 = vadd.f32 %v6046_v34, %v15380_v9  ;;  %v6160_v23 = vadd.f32 %v6159_v48, %v15392_v6  ;;  %v6048_v20 = vpop.f32.mrb[78].mxu0  ;;  %v6161_v38 = vpop.f32.mrb[94].mxu1 }
 0x98c   : > { %v6049_v29 = vadd.f32 %v6048_v20, %v15370_v1  ;;  %v6162_v24 = vadd.f32 %v6161_v38, %v15374_v40  ;;  %v6050_v56 = vpop.f32.mrb[79].mxu0  ;;  %v6163_v5 = vpop.f32.mrb[95].mxu1  ;;  %10843 = vmatpush3.bf16.msra.mxu0 %v11414_v13  ;;  %10907 = vmatpush3.bf16.msra.mxu1 %v11416_v59  ;;  %v6492_v35 = vmax.f32 %v6045_v36, 0.0  ;;  %v6494_v49 = vmax.f32 %v6158_v32, 0.0 }
 0x98d   : > { %v6051_v27 = vadd.f32 %v6050_v56, %v15380_v9  ;;  %v6164_v17 = vadd.f32 %v6163_v5, %v15392_v6  ;;  %10956 = vmatprep.subr.bf16.mxu0 %v11417_v63  ;;  %11020 = vmatprep.subr.bf16.mxu1 %v11419_v30  ;;  %v6493_v60 = vmax.f32 %v6047_v42, 0.0  ;;  %v6495_v7 = vmax.f32 %v6160_v23, 0.0 }
 0x98e   : > { %v6508_v26 = vmax.f32 %v6049_v29, 0.0  ;;  %v6510_v53 = vmax.f32 %v6162_v24, 0.0  ;;  %8124 = vmatmul.mubr.bf16.gmra.mrb[184].mxu0 %v15263_v55  ;;  %8221 = vmatmul.mubr.bf16.gmra.mrb[200].mxu1 %v15265_v50 }
 0x98f   : > { %v6509_v16 = vmax.f32 %v6051_v27, 0.0  ;;  %v6511_v34 = vmax.f32 %v6164_v17, 0.0  ;;  %8131 = vmatprep.mubr.bf16.mxu0 %v15308_v51  ;;  %8228 = vmatprep.mubr.bf16.mxu1 %v15310_v10 }
 0x990   : > { %v15480_v13 = vpack.c.bf16 %v6508_v26, %v6492_v35  ;;  %v15482_v59 = vpack.c.bf16 %v6510_v53, %v6494_v49 }
 0x991   : > { %v15484_v63 = vpack.c.bf16 %v6509_v16, %v6493_v60  ;;  %v15486_v30 = vpack.c.bf16 %v6511_v34, %v6495_v7  ;;  %v6054_v36 = vpop.f32.mrb[80].mxu0  ;;  %v6167_v55 = vpop.f32.mrb[96].mxu1 }
 0x992   : > { %v6055_v50 = vadd.f32 %v6054_v36, %v15370_v1  ;;  %v6168_v32 = vadd.f32 %v6167_v55, %v15374_v40  ;;  %v6056_v48 = vpop.f32.mrb[81].mxu0  ;;  %v6169_v42 = vpop.f32.mrb[97].mxu1 }
 0x993   : > { %v6057_v51 = vadd.f32 %v6056_v48, %v15380_v9  ;;  %v6170_v10 = vadd.f32 %v6169_v42, %v15392_v6  ;;  %v6058_v23 = vpop.f32.mrb[82].mxu0  ;;  %v6171_v20 = vpop.f32.mrb[98].mxu1 }
 0x994   : > { %v6059_v38 = vadd.f32 %v6058_v23, %v15370_v1  ;;  %v6172_v29 = vadd.f32 %v6171_v20, %v15374_v40  ;;  %v6060_v24 = vpop.f32.mrb[83].mxu0  ;;  %v6173_v56 = vpop.f32.mrb[99].mxu1  ;;  %v6524_v17 = vmax.f32 %v6055_v50, 0.0  ;;  %v6526_v35 = vmax.f32 %v6168_v32, 0.0 }
 0x995   : > { %v6061_v5 = vadd.f32 %v6060_v24, %v15380_v9  ;;  %v6174_v27 = vadd.f32 %v6173_v56, %v15392_v6  ;;  %v6525_v53 = vmax.f32 %v6057_v51, 0.0  ;;  %v6527_v60 = vmax.f32 %v6170_v10, 0.0 }
 0x996   : > { %v6540_v49 = vmax.f32 %v6059_v38, 0.0  ;;  %v6542_v26 = vmax.f32 %v6172_v29, 0.0  ;;  %8132 = vmatmul.mubr.bf16.gmra.mrb[188].mxu0 %v15297_v4  ;;  %8229 = vmatmul.mubr.bf16.gmra.mrb[204].mxu1 %v15299_v22 }
 0x997   : > { %v6541_v7 = vmax.f32 %v6061_v5, 0.0  ;;  %v6543_v16 = vmax.f32 %v6174_v27, 0.0  ;;  %8139 = vmatprep.mubr.bf16.mxu0 %v15354_v44  ;;  %8236 = vmatprep.mubr.bf16.mxu1 %v15356_v8 }
 0x998   : > { %v15500_v34 = vpack.c.bf16 %v6540_v49, %v6524_v17  ;;  %v15502_v36 = vpack.c.bf16 %v6542_v26, %v6526_v35 }
 0x999   : > { %v15504_v55 = vpack.c.bf16 %v6541_v7, %v6525_v53  ;;  %v15506_v50 = vpack.c.bf16 %v6543_v16, %v6527_v60  ;;  %v6064_v32 = vpop.f32.mrb[84].mxu0  ;;  %v6177_v4 = vpop.f32.mrb[100].mxu1 }
 0x99a   : > { %v6065_v22 = vadd.f32 %v6064_v32, %v15370_v1  ;;  %v6178_v48 = vadd.f32 %v6177_v4, %v15374_v40  ;;  %v6066_v42 = vpop.f32.mrb[85].mxu0  ;;  %v6179_v51 = vpop.f32.mrb[101].mxu1 }
 0x99b   : > { %v6067_v44 = vadd.f32 %v6066_v42, %v15380_v9  ;;  %v6180_v8 = vadd.f32 %v6179_v51, %v15392_v6  ;;  %v6068_v10 = vpop.f32.mrb[86].mxu0  ;;  %v6181_v23 = vpop.f32.mrb[102].mxu1 }
 0x99c   : > { %v6069_v20 = vadd.f32 %v6068_v10, %v15370_v1  ;;  %v6182_v38 = vadd.f32 %v6181_v23, %v15374_v40  ;;  %v6070_v29 = vpop.f32.mrb[87].mxu0  ;;  %v6183_v24 = vpop.f32.mrb[103].mxu1  ;;  %v6556_v27 = vmax.f32 %v6065_v22, 0.0  ;;  %v6558_v17 = vmax.f32 %v6178_v48, 0.0 }
 0x99d   : > { %v6071_v56 = vadd.f32 %v6070_v29, %v15380_v9  ;;  %v6184_v5 = vadd.f32 %v6183_v24, %v15392_v6  ;;  %v6557_v26 = vmax.f32 %v6067_v44, 0.0  ;;  %v6559_v53 = vmax.f32 %v6180_v8, 0.0 }
 0x99e   : > { %v6572_v35 = vmax.f32 %v6069_v20, 0.0  ;;  %v6574_v49 = vmax.f32 %v6182_v38, 0.0  ;;  %8140 = vmatmul.mubr.bf16.gmra.mrb[192].mxu0 %v15339_v43  ;;  %8237 = vmatmul.mubr.bf16.gmra.mrb[208].mxu1 %v15341_v47 }
 0x99f   : > { %v6573_v60 = vmax.f32 %v6071_v56, 0.0  ;;  %v6575_v7 = vmax.f32 %v6184_v5, 0.0  ;;  %8147 = vmatprep.mubr.bf16.mxu0 %v15414_v54  ;;  %8244 = vmatprep.mubr.bf16.mxu1 %v15416_v37 }
 0x9a0   : > { %v15520_v16 = vpack.c.bf16 %v6572_v35, %v6556_v27  ;;  %v15522_v32 = vpack.c.bf16 %v6574_v49, %v6558_v17 }
 0x9a1   : > { %v15524_v4 = vpack.c.bf16 %v6573_v60, %v6557_v26  ;;  %v15526_v22 = vpack.c.bf16 %v6575_v7, %v6559_v53  ;;  %v6074_v48 = vpop.f32.mrb[88].mxu0  ;;  %v6187_v43 = vpop.f32.mrb[104].mxu1 }
 0x9a2   : > { %v6075_v47 = vadd.f32 %v6074_v48, %v15370_v1  ;;  %v6188_v42 = vadd.f32 %v6187_v43, %v15374_v40  ;;  %v6076_v51 = vpop.f32.mrb[89].mxu0  ;;  %v6189_v44 = vpop.f32.mrb[105].mxu1 }
 0x9a3   : > { %v6077_v54 = vadd.f32 %v6076_v51, %v15380_v9  ;;  %v6190_v37 = vadd.f32 %v6189_v44, %v15392_v6  ;;  %v6078_v8 = vpop.f32.mrb[90].mxu0  ;;  %v6191_v10 = vpop.f32.mrb[106].mxu1 }
 0x9a4   : > { %v6079_v23 = vadd.f32 %v6078_v8, %v15370_v1  ;;  %v6192_v20 = vadd.f32 %v6191_v10, %v15374_v40  ;;  %v6080_v38 = vpop.f32.mrb[91].mxu0  ;;  %v6193_v29 = vpop.f32.mrb[107].mxu1  ;;  %v6588_v5 = vmax.f32 %v6075_v47, 0.0  ;;  %v6590_v27 = vmax.f32 %v6188_v42, 0.0  ;;  %v11418_v10 = vld [vmem:[%s16345_s5 + $0x700] sm:$0xff]  }
 0x9a5   : > { %v6081_v24 = vadd.f32 %v6080_v38, %v15380_v9  ;;  %v6194_v56 = vadd.f32 %v6193_v29, %v15392_v6  ;;  %v6589_v49 = vmax.f32 %v6077_v54, 0.0  ;;  %v6591_v26 = vmax.f32 %v6190_v37, 0.0 }
 0x9a6   : > { %v6604_v17 = vmax.f32 %v6079_v23, 0.0  ;;  %v6606_v35 = vmax.f32 %v6192_v20, 0.0  ;;  %8148 = vmatmul.mubr.bf16.gmra.mrb[196].mxu0 %v15404_v12  ;;  %8245 = vmatmul.mubr.bf16.gmra.mrb[212].mxu1 %v15406_v14 }
 0x9a7   : > { %v6605_v53 = vmax.f32 %v6081_v24, 0.0  ;;  %v6607_v60 = vmax.f32 %v6194_v56, 0.0  ;;  %8285 = vmatprep.mubr.bf16.mxu0 %v15458_v15  ;;  %8382 = vmatprep.mubr.bf16.mxu1 %v15460_v46  ;;  %v11420_v24 = vld [vmem:[%s16345_s5 + $0x780] sm:$0xff]  }
 0x9a8   : > { %v15540_v7 = vpack.c.bf16 %v6604_v17, %v6588_v5  ;;  %v15542_v48 = vpack.c.bf16 %v6606_v35, %v6590_v27  ;;  %v11421_v27 = vld [vmem:[%s16345_s5 + $0x748] sm:$0xff]  }
 0x9a9   : > { %v15544_v43 = vpack.c.bf16 %v6605_v53, %v6589_v49  ;;  %v15546_v47 = vpack.c.bf16 %v6607_v60, %v6591_v26  ;;  %v6084_v42 = vpop.f32.mrb[92].mxu0  ;;  %v6197_v12 = vpop.f32.mrb[108].mxu1  ;;  %v11423_v17 = vld [vmem:[%s16345_s5 + $0x7c8] sm:$0xff]  }
 0x9aa   : > { %v6085_v14 = vadd.f32 %v6084_v42, %v15370_v1  ;;  %v6198_v51 = vadd.f32 %v6197_v12, %v15374_v40  ;;  %v6086_v44 = vpop.f32.mrb[93].mxu0  ;;  %v6199_v54 = vpop.f32.mrb[109].mxu1 }
 0x9ab   : > { %v6087_v15 = vadd.f32 %v6086_v44, %v15380_v9  ;;  %v6200_v46 = vadd.f32 %v6199_v54, %v15392_v6  ;;  %v6088_v37 = vpop.f32.mrb[94].mxu0  ;;  %v6201_v8 = vpop.f32.mrb[110].mxu1  ;;  %v11422_v54 = vld [vmem:[%s16345_s5 + $0x708] sm:$0xff]  }
 0x9ac   : > { %v6089_v23 = vadd.f32 %v6088_v37, %v15370_v1  ;;  %v6202_v20 = vadd.f32 %v6201_v8, %v15374_v40  ;;  %v6090_v38 = vpop.f32.mrb[95].mxu0  ;;  %v6203_v29 = vpop.f32.mrb[111].mxu1  ;;  %v6620_v35 = vmax.f32 %v6085_v14, 0.0  ;;  %v6622_v49 = vmax.f32 %v6198_v51, 0.0 }
 0x9ad   : > { %v6091_v56 = vadd.f32 %v6090_v38, %v15380_v9  ;;  %v6204_v5 = vadd.f32 %v6203_v29, %v15392_v6  ;;  %v6621_v60 = vmax.f32 %v6087_v15, 0.0  ;;  %v6623_v42 = vmax.f32 %v6200_v46, 0.0 }
 0x9ae   : > { %v6636_v26 = vmax.f32 %v6089_v23, 0.0  ;;  %v6638_v53 = vmax.f32 %v6202_v20, 0.0  ;;  %8286 = vmatmul.mubr.bf16.vlgmr.msra.gmra.mrb[200].mxu0 %v15448_v3  ;;  %8383 = vmatmul.mubr.bf16.vlgmr.msra.gmra.mrb[216].mxu1 %v15450_v25  ;;  %v11424_v3 = vld [vmem:[%s16345_s5 + $0x788] sm:$0xff]   ;;  %v11425_v25 = vld [vmem:[%s16345_s5 + $0x750] sm:$0xff]  }
 0x9af   : > { %v6637_v12 = vmax.f32 %v6091_v56, 0.0  ;;  %v6639_v44 = vmax.f32 %v6204_v5, 0.0  ;;  %10957 = vmatpush3.bf16.msra.mxu0 %v11418_v10  ;;  %8293 = vmatprep.mubr.bf16.mxu0 %v15484_v63 }
 0x9b0   : > { %v15574_v37 = vpack.c.bf16 %v6636_v26, %v6620_v35  ;;  %v15576_v14 = vpack.c.bf16 %v6638_v53, %v6622_v49  ;;  %8390 = vmatprep.mubr.bf16.mxu1 %v15486_v30  ;;  %11021 = vmatpush3.bf16.msra.mxu1 %v11420_v24  ;;  %v11427_v30 = vld [vmem:[%s16345_s5 + $0x7d0] sm:$0xff]  }
 0x9b1   : > { %v15585_v63 = vpack.c.bf16 %v6637_v12, %v6621_v60  ;;  %v15587_v51 = vpack.c.bf16 %v6639_v44, %v6623_v42  ;;  %v6094_v15 = vpop.f32.mrb[96].mxu0  ;;  %v6207_v46 = vpop.f32.mrb[112].mxu1  ;;  %10958 = vmatprep.subr.bf16.mxu0 %v11421_v27  ;;  %11022 = vmatprep.subr.bf16.mxu1 %v11423_v17  ;;  %v11426_v49 = vld [vmem:[%s16345_s5 + $0x710] sm:$0xff]   ;;  %v11429_v42 = vld [vmem:[%s16345_s5 + $0x758] sm:$0xff]  }
 0x9b2   : > { %v6095_v8 = vadd.f32 %v6094_v15, %v15370_v1  ;;  %v6208_v10 = vadd.f32 %v6207_v46, %v15374_v40  ;;  %v6096_v23 = vpop.f32.mrb[97].mxu0  ;;  %v6209_v20 = vpop.f32.mrb[113].mxu1  ;;  %v11428_v26 = vld [vmem:[%s16345_s5 + $0x790] sm:$0xff]   ;;  %v11431_v12 = vld [vmem:[%s16345_s5 + $0x7d8] sm:$0xff]  }
 0x9b3   : > { %v6097_v38 = vadd.f32 %v6096_v23, %v15380_v9  ;;  %v6210_v29 = vadd.f32 %v6209_v20, %v15392_v6  ;;  %v6098_v24 = vpop.f32.mrb[98].mxu0  ;;  %v6211_v56 = vpop.f32.mrb[114].mxu1  ;;  %10959 = vmatpush3.bf16.msra.mxu0 %v11422_v54 }
 0x9b4   : > { %v6099_v5 = vadd.f32 %v6098_v24, %v15370_v1  ;;  %v6212_v27 = vadd.f32 %v6211_v56, %v15374_v40  ;;  %v6100_v17 = vpop.f32.mrb[99].mxu0  ;;  %v6213_v35 = vpop.f32.mrb[115].mxu1  ;;  %11023 = vmatpush3.bf16.msra.mxu1 %v11424_v3  ;;  %10960 = vmatprep.subr.bf16.mxu0 %v11425_v25  ;;  %v6652_v44 = vmax.f32 %v6095_v8, 0.0  ;;  %v6654_v54 = vmax.f32 %v6208_v10, 0.0 }
 0x9b5   : > { %v6101_v53 = vadd.f32 %v6100_v17, %v15380_v9  ;;  %v6214_v60 = vadd.f32 %v6213_v35, %v15392_v6  ;;  %11024 = vmatprep.subr.bf16.mxu1 %v11427_v30  ;;  %v6653_v15 = vmax.f32 %v6097_v38, 0.0  ;;  %v6655_v46 = vmax.f32 %v6210_v29, 0.0  ;;  %v11433_v38 = vld [vmem:[%s16345_s5 + $0x760] sm:$0xff]  }
 0x9b6   : > { %v6668_v3 = vmax.f32 %v6099_v5, 0.0  ;;  %v6670_v25 = vmax.f32 %v6212_v27, 0.0  ;;  %8294 = vmatmul.mubr.bf16.gmra.mrb[204].mxu0 %v15480_v13  ;;  %8391 = vmatmul.mubr.bf16.gmra.mrb[220].mxu1 %v15482_v59  ;;  %v11430_v13 = vld [vmem:[%s16345_s5 + $0x718] sm:$0xff]   ;;  %v11435_v29 = vld [vmem:[%s16345_s5 + $0x7e0] sm:$0xff]  }
 0x9b7   : > { %v6669_v23 = vmax.f32 %v6101_v53, 0.0  ;;  %v6671_v30 = vmax.f32 %v6214_v60, 0.0  ;;  %8301 = vmatprep.mubr.bf16.mxu0 %v15504_v55  ;;  %8398 = vmatprep.mubr.bf16.mxu1 %v15506_v50  ;;  %v11432_v59 = vld [vmem:[%s16345_s5 + $0x798] sm:$0xff]   ;;  %v15642_v60 = vrot.slane %v15346_v57, %v12738_v28 }
 0x9b8   : > { %v15616_v20 = vpack.c.bf16 %v6668_v3, %v6652_v44  ;;  %v15618_v24 = vpack.c.bf16 %v6670_v25, %v6654_v54  ;;  %10961 = vmatpush3.bf16.msra.mxu0 %v11426_v49  ;;  %11025 = vmatpush3.bf16.msra.mxu1 %v11428_v26  ;;  %v15652_v25 = vrot.slane %v15346_v57, %v12754_v62 }
 0x9b9   : > { %v15626_v8 = vpack.c.bf16 %v6669_v23, %v6653_v15  ;;  %v15628_v10 = vpack.c.bf16 %v6671_v30, %v6655_v46  ;;  %v6104_v55 = vpop.f32.mrb[100].mxu0  ;;  %v6217_v50 = vpop.f32.mrb[116].mxu1  ;;  %10962 = vmatprep.subr.bf16.mxu0 %v11429_v42  ;;  %11026 = vmatprep.subr.bf16.mxu1 %v11431_v12  ;;  %v15646_v42 = vrot.slane %v15346_v57, %v12741_v61  ;;  %v11434_v15 = vld [vmem:[%s16345_s5 + $0x720] sm:$0xff]   ;;  %v11437_v23 = vld [vmem:[%s16345_s5 + $0x768] sm:$0xff]  }
 0x9ba   : > { %v6105_v56 = vadd.f32 %v6104_v55, %v15370_v1  ;;  %v6218_v5 = vadd.f32 %v6217_v50, %v15374_v40  ;;  %v6106_v27 = vpop.f32.mrb[101].mxu0  ;;  %v6219_v17 = vpop.f32.mrb[117].mxu1  ;;  %v11436_v61 = vld [vmem:[%s16345_s5 + $0x7a0] sm:$0xff]   ;;  %v15664_v46 = vrot.slane %v15346_v57, %v12767_v18  ;;  %v11439_v30 = vld [vmem:[%s16345_s5 + $0x7e8] sm:$0xff]  }
 0x9bb   : > { %v6107_v35 = vadd.f32 %v6106_v27, %v15380_v9  ;;  %v6220_v49 = vadd.f32 %v6219_v17, %v15392_v6  ;;  %v6108_v26 = vpop.f32.mrb[102].mxu0  ;;  %v6221_v53 = vpop.f32.mrb[118].mxu1  ;;  %v11441_v27 = vld [vmem:[%s16345_s5 + $0x770] sm:$0xff]  }
 0x9bc   : > { %v6109_v12 = vadd.f32 %v6108_v26, %v15370_v1  ;;  %v6222_v44 = vadd.f32 %v6221_v53, %v15374_v40  ;;  %v6110_v54 = vpop.f32.mrb[103].mxu0  ;;  %v6223_v3 = vpop.f32.mrb[119].mxu1  ;;  %10963 = vmatpush3.bf16.msra.mxu0 %v11430_v13  ;;  %11027 = vmatpush3.bf16.msra.mxu1 %v11432_v59  ;;  %v6684_v13 = vmax.f32 %v6105_v56, 0.0  ;;  %v6686_v59 = vmax.f32 %v6218_v5, 0.0  ;;  %v11443_v17 = vld [vmem:[%s16345_s5 + $0x7f0] sm:$0xff]  }
 0x9bd   : > { %v6111_v1 = vadd.f32 %v6110_v54, %v15380_v9  ;;  %v6224_v40 = vadd.f32 %v6223_v3, %v15392_v6  ;;  %10964 = vmatprep.subr.bf16.mxu0 %v11433_v38  ;;  %11028 = vmatprep.subr.bf16.mxu1 %v11435_v29  ;;  %v6685_v18 = vmax.f32 %v6107_v35, 0.0  ;;  %v6687_v57 = vmax.f32 %v6220_v49, 0.0 }
 0x9be   : > { %v6700_v55 = vmax.f32 %v6109_v12, 0.0  ;;  %v6702_v9 = vmax.f32 %v6222_v44, 0.0  ;;  %8302 = vmatmul.mubr.bf16.gmra.mrb[208].mxu0 %v15500_v34  ;;  %8399 = vmatmul.mubr.bf16.gmra.mrb[224].mxu1 %v15502_v36  ;;  %v11438_v34 = vld [vmem:[%s16345_s5 + $0x728] sm:$0xff]  }
 0x9bf   : > { %v6701_v6 = vmax.f32 %v6111_v1, 0.0  ;;  %v6703_v50 = vmax.f32 %v6224_v40, 0.0  ;;  %8309 = vmatprep.mubr.bf16.mxu0 %v15524_v4  ;;  %8406 = vmatprep.mubr.bf16.mxu1 %v15526_v22  ;;  %v11440_v36 = vld [vmem:[%s16345_s5 + $0x7a8] sm:$0xff]  }
 0x9c0   : > { %v15676_v38 = vpack.c.bf16 %v6700_v55, %v6684_v13  ;;  %v15678_v29 = vpack.c.bf16 %v6702_v9, %v6686_v59  ;;  %10965 = vmatpush3.bf16.msra.mxu0 %v11434_v15  ;;  %11029 = vmatpush3.bf16.msra.mxu1 %v11436_v61  ;;  %v11445_v55 = vld [vmem:[%s16345_s5 + $0x778] sm:$0xff]  }
 0x9c1   : > { %v15686_v56 = vpack.c.bf16 %v6701_v6, %v6685_v18  ;;  %v15688_v5 = vpack.c.bf16 %v6703_v50, %v6687_v57  ;;  %v6260_v4 = vpop.f32.mrb[104].mxu0  ;;  %v6373_v22 = vpop.f32.mrb[120].mxu1  ;;  %10966 = vmatprep.subr.bf16.mxu0 %v11437_v23  ;;  %11030 = vmatprep.subr.bf16.mxu1 %v11439_v30  ;;  %v11442_v23 = vld [vmem:[%s16345_s5 + $0x730] sm:$0xff]   ;;  %v11447_v9 = vld [vmem:[%s16345_s5 + $0x7f8] sm:$0xff]  }
 0x9c2   : > { %v6261_v35 = vadd.f32 %v6260_v4, %v15642_v60  ;;  %v6374_v49 = vadd.f32 %v6373_v22, %v15646_v42  ;;  %v6262_v26 = vpop.f32.mrb[105].mxu0  ;;  %v6375_v53 = vpop.f32.mrb[121].mxu1  ;;  %v11444_v30 = vld [vmem:[%s16345_s5 + $0x7b0] sm:$0xff]  }
 0x9c3   : > { %v6263_v12 = vadd.f32 %v6262_v26, %v15652_v25  ;;  %v6376_v44 = vadd.f32 %v6375_v53, %v15664_v46  ;;  %v6264_v54 = vpop.f32.mrb[106].mxu0  ;;  %v6377_v3 = vpop.f32.mrb[122].mxu1 }
 0x9c4   : > { %v6265_v15 = vadd.f32 %v6264_v54, %v15642_v60  ;;  %v6378_v61 = vadd.f32 %v6377_v3, %v15646_v42  ;;  %v6266_v1 = vpop.f32.mrb[107].mxu0  ;;  %v6379_v40 = vpop.f32.mrb[123].mxu1  ;;  %10967 = vmatpush3.bf16.msra.mxu0 %v11438_v34  ;;  %11031 = vmatpush3.bf16.msra.mxu1 %v11440_v36  ;;  %v6464_v18 = vmax.f32 %v6261_v35, 0.0  ;;  %v6466_v57 = vmax.f32 %v6374_v49, 0.0 }
 0x9c5   : > { %v6267_v13 = vadd.f32 %v6266_v1, %v15652_v25  ;;  %v6380_v59 = vadd.f32 %v6379_v40, %v15664_v46  ;;  %10968 = vmatprep.subr.bf16.mxu0 %v11441_v27  ;;  %11032 = vmatprep.subr.bf16.mxu1 %v11443_v17  ;;  %v6465_v34 = vmax.f32 %v6263_v12, 0.0  ;;  %v6467_v36 = vmax.f32 %v6376_v44, 0.0 }
 0x9c6   : > { %v6480_v6 = vmax.f32 %v6265_v15, 0.0  ;;  %v6482_v50 = vmax.f32 %v6378_v61, 0.0  ;;  %8310 = vmatmul.mubr.bf16.gmra.mrb[212].mxu0 %v15520_v16  ;;  %8407 = vmatmul.mubr.bf16.gmra.mrb[228].mxu1 %v15522_v32  ;;  %v11446_v16 = vld [vmem:[%s16345_s5 + $0x738] sm:$0xff]  }
 0x9c7   : > { %v6481_v4 = vmax.f32 %v6267_v13, 0.0  ;;  %v6483_v22 = vmax.f32 %v6380_v59, 0.0  ;;  %8317 = vmatprep.mubr.bf16.mxu0 %v15544_v43  ;;  %8414 = vmatprep.mubr.bf16.mxu1 %v15546_v47  ;;  %v11448_v32 = vld [vmem:[%s16345_s5 + $0x7b8] sm:$0xff]  }
 0x9c8   : > { %v15720_v27 = vpack.c.bf16 %v6480_v6, %v6464_v18  ;;  %v15722_v17 = vpack.c.bf16 %v6482_v50, %v6466_v57  ;;  %10969 = vmatpush3.bf16.msra.mxu0 %v11442_v23  ;;  %11033 = vmatpush3.bf16.msra.mxu1 %v11444_v30 }
 0x9c9   : > { %v15730_v35 = vpack.c.bf16 %v6481_v4, %v6465_v34  ;;  %v15732_v49 = vpack.c.bf16 %v6483_v22, %v6467_v36  ;;  %v6270_v43 = vpop.f32.mrb[108].mxu0  ;;  %v6383_v47 = vpop.f32.mrb[124].mxu1  ;;  %10970 = vmatprep.subr.bf16.mxu0 %v11445_v55  ;;  %11034 = vmatprep.subr.bf16.mxu1 %v11447_v9 }
 0x9ca   : > { %v6271_v26 = vadd.f32 %v6270_v43, %v15642_v60  ;;  %v6384_v53 = vadd.f32 %v6383_v47, %v15646_v42  ;;  %v6272_v12 = vpop.f32.mrb[109].mxu0  ;;  %v6385_v44 = vpop.f32.mrb[125].mxu1 }
 0x9cb   : > { %v6273_v54 = vadd.f32 %v6272_v12, %v15652_v25  ;;  %v6386_v3 = vadd.f32 %v6385_v44, %v15664_v46  ;;  %v6274_v15 = vpop.f32.mrb[110].mxu0  ;;  %v6387_v61 = vpop.f32.mrb[126].mxu1 }
 0x9cc   : > { %v6275_v1 = vadd.f32 %v6274_v15, %v15642_v60  ;;  %v6388_v40 = vadd.f32 %v6387_v61, %v15646_v42  ;;  %v6276_v23 = vpop.f32.mrb[111].mxu0  ;;  %v6389_v30 = vpop.f32.mrb[127].mxu1  ;;  %10971 = vmatpush3.bf16.msra.mxu0 %v11446_v16  ;;  %11035 = vmatpush3.bf16.msra.mxu1 %v11448_v32  ;;  %v6496_v55 = vmax.f32 %v6271_v26, 0.0  ;;  %v6498_v9 = vmax.f32 %v6384_v53, 0.0 }
 0x9cd   : > { %v6277_v13 = vadd.f32 %v6276_v23, %v15652_v25  ;;  %v6390_v59 = vadd.f32 %v6389_v30, %v15664_v46  ;;  %v6497_v6 = vmax.f32 %v6273_v54, 0.0  ;;  %v6499_v50 = vmax.f32 %v6386_v3, 0.0 }
 0x9ce   : > { %v6512_v18 = vmax.f32 %v6275_v1, 0.0  ;;  %v6514_v57 = vmax.f32 %v6388_v40, 0.0  ;;  %8318 = vmatmul.mubr.bf16.gmra.mrb[216].mxu0 %v15540_v7  ;;  %8415 = vmatmul.mubr.bf16.gmra.mrb[232].mxu1 %v15542_v48 }
 0x9cf   : > { %v6513_v34 = vmax.f32 %v6277_v13, 0.0  ;;  %v6515_v36 = vmax.f32 %v6390_v59, 0.0  ;;  %8325 = vmatprep.mubr.bf16.mxu0 %v15585_v63  ;;  %8422 = vmatprep.mubr.bf16.mxu1 %v15587_v51 }
 0x9d0   : > { %v15746_v4 = vpack.c.bf16 %v6512_v18, %v6496_v55  ;;  %v15748_v22 = vpack.c.bf16 %v6514_v57, %v6498_v9 }
 0x9d1   : > { %v15750_v16 = vpack.c.bf16 %v6513_v34, %v6497_v6  ;;  %v15752_v32 = vpack.c.bf16 %v6515_v36, %v6499_v50  ;;  %v6280_v43 = vpop.f32.mrb[112].mxu0  ;;  %v6393_v7 = vpop.f32.mrb[128].mxu1 }
 0x9d2   : > { %v6281_v48 = vadd.f32 %v6280_v43, %v15642_v60  ;;  %v6394_v47 = vadd.f32 %v6393_v7, %v15646_v42  ;;  %v6282_v26 = vpop.f32.mrb[113].mxu0  ;;  %v6395_v53 = vpop.f32.mrb[129].mxu1 }
 0x9d3   : > { %v6283_v63 = vadd.f32 %v6282_v26, %v15652_v25  ;;  %v6396_v51 = vadd.f32 %v6395_v53, %v15664_v46  ;;  %v6284_v12 = vpop.f32.mrb[114].mxu0  ;;  %v6397_v44 = vpop.f32.mrb[130].mxu1 }
 0x9d4   : > { %v6285_v54 = vadd.f32 %v6284_v12, %v15642_v60  ;;  %v6398_v3 = vadd.f32 %v6397_v44, %v15646_v42  ;;  %v6286_v15 = vpop.f32.mrb[115].mxu0  ;;  %v6399_v61 = vpop.f32.mrb[131].mxu1  ;;  %v6528_v23 = vmax.f32 %v6281_v48, 0.0  ;;  %v6530_v30 = vmax.f32 %v6394_v47, 0.0 }
 0x9d5   : > { %v6287_v1 = vadd.f32 %v6286_v15, %v15652_v25  ;;  %v6400_v40 = vadd.f32 %v6399_v61, %v15664_v46  ;;  %v6529_v55 = vmax.f32 %v6283_v63, 0.0  ;;  %v6531_v9 = vmax.f32 %v6396_v51, 0.0 }
 0x9d6   : > { %v6544_v13 = vmax.f32 %v6285_v54, 0.0  ;;  %v6546_v59 = vmax.f32 %v6398_v3, 0.0  ;;  %8326 = vmatmul.mubr.bf16.gmra.mrb[220].mxu0 %v15574_v37  ;;  %8423 = vmatmul.mubr.bf16.gmra.mrb[236].mxu1 %v15576_v14 }
 0x9d7   : > { %v6545_v18 = vmax.f32 %v6287_v1, 0.0  ;;  %v6547_v57 = vmax.f32 %v6400_v40, 0.0  ;;  %8333 = vmatprep.mubr.bf16.mxu0 %v15626_v8  ;;  %8430 = vmatprep.mubr.bf16.mxu1 %v15628_v10 }
 0x9d8   : > { %v15766_v6 = vpack.c.bf16 %v6544_v13, %v6528_v23  ;;  %v15768_v50 = vpack.c.bf16 %v6546_v59, %v6530_v30 }
 0x9d9   : > { %v15770_v34 = vpack.c.bf16 %v6545_v18, %v6529_v55  ;;  %v15772_v36 = vpack.c.bf16 %v6547_v57, %v6531_v9  ;;  %v6290_v43 = vpop.f32.mrb[116].mxu0  ;;  %v6403_v37 = vpop.f32.mrb[132].mxu1 }
 0x9da   : > { %v6291_v14 = vadd.f32 %v6290_v43, %v15642_v60  ;;  %v6404_v7 = vadd.f32 %v6403_v37, %v15646_v42  ;;  %v6292_v48 = vpop.f32.mrb[117].mxu0  ;;  %v6405_v47 = vpop.f32.mrb[133].mxu1 }
 0x9db   : > { %v6293_v8 = vadd.f32 %v6292_v48, %v15652_v25  ;;  %v6406_v10 = vadd.f32 %v6405_v47, %v15664_v46  ;;  %v6294_v26 = vpop.f32.mrb[118].mxu0  ;;  %v6407_v53 = vpop.f32.mrb[134].mxu1 }
 0x9dc   : > { %v6295_v63 = vadd.f32 %v6294_v26, %v15642_v60  ;;  %v6408_v51 = vadd.f32 %v6407_v53, %v15646_v42  ;;  %v6296_v12 = vpop.f32.mrb[119].mxu0  ;;  %v6409_v44 = vpop.f32.mrb[135].mxu1  ;;  %v6560_v15 = vmax.f32 %v6291_v14, 0.0  ;;  %v6562_v61 = vmax.f32 %v6404_v7, 0.0 }
 0x9dd   : > { %v6297_v54 = vadd.f32 %v6296_v12, %v15652_v25  ;;  %v6410_v3 = vadd.f32 %v6409_v44, %v15664_v46  ;;  %v6561_v23 = vmax.f32 %v6293_v8, 0.0  ;;  %v6563_v30 = vmax.f32 %v6406_v10, 0.0 }
 0x9de   : > { %v6576_v1 = vmax.f32 %v6295_v63, 0.0  ;;  %v6578_v40 = vmax.f32 %v6408_v51, 0.0  ;;  %8334 = vmatmul.mubr.bf16.gmra.mrb[224].mxu0 %v15616_v20  ;;  %8431 = vmatmul.mubr.bf16.gmra.mrb[240].mxu1 %v15618_v24 }
 0x9df   : > { %v6577_v13 = vmax.f32 %v6297_v54, 0.0  ;;  %v6579_v59 = vmax.f32 %v6410_v3, 0.0  ;;  %8341 = vmatprep.mubr.bf16.mxu0 %v15686_v56  ;;  %8438 = vmatprep.mubr.bf16.mxu1 %v15688_v5 }
 0x9e0   : > { %v15786_v55 = vpack.c.bf16 %v6576_v1, %v6560_v15  ;;  %v15788_v9 = vpack.c.bf16 %v6578_v40, %v6562_v61 }
 0x9e1   : > { %v15790_v18 = vpack.c.bf16 %v6577_v13, %v6561_v23  ;;  %v15792_v57 = vpack.c.bf16 %v6579_v59, %v6563_v30  ;;  %v6300_v43 = vpop.f32.mrb[120].mxu0  ;;  %v6413_v20 = vpop.f32.mrb[136].mxu1 }
 0x9e2   : > { %v6301_v24 = vadd.f32 %v6300_v43, %v15642_v60  ;;  %v6414_v37 = vadd.f32 %v6413_v20, %v15646_v42  ;;  %v6302_v14 = vpop.f32.mrb[121].mxu0  ;;  %v6415_v7 = vpop.f32.mrb[137].mxu1 }
 0x9e3   : > { %v6303_v56 = vadd.f32 %v6302_v14, %v15652_v25  ;;  %v6416_v5 = vadd.f32 %v6415_v7, %v15664_v46  ;;  %v6304_v48 = vpop.f32.mrb[122].mxu0  ;;  %v6417_v47 = vpop.f32.mrb[138].mxu1 }
 0x9e4   : > { %v6305_v8 = vadd.f32 %v6304_v48, %v15642_v60  ;;  %v6418_v10 = vadd.f32 %v6417_v47, %v15646_v42  ;;  %v6306_v26 = vpop.f32.mrb[123].mxu0  ;;  %v6419_v53 = vpop.f32.mrb[139].mxu1  ;;  %v6592_v12 = vmax.f32 %v6301_v24, 0.0  ;;  %v6594_v44 = vmax.f32 %v6414_v37, 0.0 }
 0x9e5   : > { %v6307_v63 = vadd.f32 %v6306_v26, %v15652_v25  ;;  %v6420_v51 = vadd.f32 %v6419_v53, %v15664_v46  ;;  %v6593_v15 = vmax.f32 %v6303_v56, 0.0  ;;  %v6595_v61 = vmax.f32 %v6416_v5, 0.0 }
 0x9e6   : > { %v6608_v54 = vmax.f32 %v6305_v8, 0.0  ;;  %v6610_v3 = vmax.f32 %v6418_v10, 0.0  ;;  %8342 = vmatmul.mubr.bf16.gmra.mrb[228].mxu0 %v15676_v38  ;;  %8439 = vmatmul.mubr.bf16.gmra.mrb[244].mxu1 %v15678_v29 }
 0x9e7   : > { %v6609_v1 = vmax.f32 %v6307_v63, 0.0  ;;  %v6611_v40 = vmax.f32 %v6420_v51, 0.0  ;;  %8479 = vmatprep.mubr.bf16.mxu0 %v15730_v35  ;;  %8576 = vmatprep.mubr.bf16.mxu1 %v15732_v49 }
 0x9e8   : > { %v15806_v23 = vpack.c.bf16 %v6608_v54, %v6592_v12  ;;  %v15808_v30 = vpack.c.bf16 %v6610_v3, %v6594_v44 }
 0x9e9   : > { %v15810_v13 = vpack.c.bf16 %v6609_v1, %v6593_v15  ;;  %v15812_v59 = vpack.c.bf16 %v6611_v40, %v6595_v61  ;;  %v6310_v43 = vpop.f32.mrb[124].mxu0  ;;  %v6423_v38 = vpop.f32.mrb[140].mxu1 }
 0x9ea   : > { %v6311_v29 = vadd.f32 %v6310_v43, %v15642_v60  ;;  %v6424_v20 = vadd.f32 %v6423_v38, %v15646_v42  ;;  %v6312_v24 = vpop.f32.mrb[125].mxu0  ;;  %v6425_v37 = vpop.f32.mrb[141].mxu1 }
 0x9eb   : > { %v6313_v35 = vadd.f32 %v6312_v24, %v15652_v25  ;;  %v6426_v49 = vadd.f32 %v6425_v37, %v15664_v46  ;;  %v6314_v14 = vpop.f32.mrb[126].mxu0  ;;  %v6427_v7 = vpop.f32.mrb[142].mxu1 }
 0x9ec   : > { %v6315_v56 = vadd.f32 %v6314_v14, %v15642_v60  ;;  %v6428_v5 = vadd.f32 %v6427_v7, %v15646_v42  ;;  %v6316_v48 = vpop.f32.mrb[127].mxu0  ;;  %v6429_v47 = vpop.f32.mrb[143].mxu1  ;;  %v6624_v26 = vmax.f32 %v6311_v29, 0.0  ;;  %v6626_v53 = vmax.f32 %v6424_v20, 0.0 }
 0x9ed   : > { %v6317_v8 = vadd.f32 %v6316_v48, %v15652_v25  ;;  %v6430_v10 = vadd.f32 %v6429_v47, %v15664_v46  ;;  %v6625_v12 = vmax.f32 %v6313_v35, 0.0  ;;  %v6627_v44 = vmax.f32 %v6426_v49, 0.0 }
 0x9ee   : > { %v6640_v63 = vmax.f32 %v6315_v56, 0.0  ;;  %v6642_v51 = vmax.f32 %v6428_v5, 0.0  ;;  %8480 = vmatmul.mubr.bf16.vlgmr.msra.gmra.mrb[232].mxu0 %v15720_v27  ;;  %8577 = vmatmul.mubr.bf16.vlgmr.msra.gmra.mrb[248].mxu1 %v15722_v17 }
 0x9ef   : > { %v6641_v54 = vmax.f32 %v6317_v8, 0.0  ;;  %v6643_v3 = vmax.f32 %v6430_v10, 0.0  ;;  %8487 = vmatprep.mubr.bf16.mxu0 %v15750_v16  ;;  %8584 = vmatprep.mubr.bf16.mxu1 %v15752_v32 }
 0x9f0   : > { %v15826_v15 = vpack.c.bf16 %v6640_v63, %v6624_v26  ;;  %v15828_v61 = vpack.c.bf16 %v6642_v51, %v6626_v53 }
 0x9f1   : > { %v15830_v1 = vpack.c.bf16 %v6641_v54, %v6625_v12  ;;  %v15832_v40 = vpack.c.bf16 %v6643_v3, %v6627_v44  ;;  %v6320_v43 = vpop.f32.mrb[128].mxu0  ;;  %v6433_v27 = vpop.f32.mrb[144].mxu1 }
 0x9f2   : > { %v6321_v17 = vadd.f32 %v6320_v43, %v15642_v60  ;;  %v6434_v38 = vadd.f32 %v6433_v27, %v15646_v42  ;;  %v6322_v29 = vpop.f32.mrb[129].mxu0  ;;  %v6435_v20 = vpop.f32.mrb[145].mxu1 }
 0x9f3   : > { %v6323_v16 = vadd.f32 %v6322_v29, %v15652_v25  ;;  %v6436_v32 = vadd.f32 %v6435_v20, %v15664_v46  ;;  %v6324_v24 = vpop.f32.mrb[130].mxu0  ;;  %v6437_v37 = vpop.f32.mrb[146].mxu1 }
 0x9f4   : > { %v6325_v35 = vadd.f32 %v6324_v24, %v15642_v60  ;;  %v6438_v49 = vadd.f32 %v6437_v37, %v15646_v42  ;;  %v6326_v14 = vpop.f32.mrb[131].mxu0  ;;  %v6439_v7 = vpop.f32.mrb[147].mxu1  ;;  %v6656_v48 = vmax.f32 %v6321_v17, 0.0  ;;  %v6658_v47 = vmax.f32 %v6434_v38, 0.0 }
 0x9f5   : > { %v6327_v56 = vadd.f32 %v6326_v14, %v15652_v25  ;;  %v6440_v5 = vadd.f32 %v6439_v7, %v15664_v46  ;;  %v6657_v26 = vmax.f32 %v6323_v16, 0.0  ;;  %v6659_v53 = vmax.f32 %v6436_v32, 0.0 }
 0x9f6   : > { %v6672_v8 = vmax.f32 %v6325_v35, 0.0  ;;  %v6674_v10 = vmax.f32 %v6438_v49, 0.0  ;;  %8488 = vmatmul.mubr.bf16.gmra.mrb[236].mxu0 %v15746_v4  ;;  %8585 = vmatmul.mubr.bf16.gmra.mrb[252].mxu1 %v15748_v22 }
 0x9f7   : > { %v6673_v63 = vmax.f32 %v6327_v56, 0.0  ;;  %v6675_v51 = vmax.f32 %v6440_v5, 0.0  ;;  %8495 = vmatprep.mubr.bf16.mxu0 %v15770_v34  ;;  %8592 = vmatprep.mubr.bf16.mxu1 %v15772_v36 }
 0x9f8   : > { %v15846_v12 = vpack.c.bf16 %v6672_v8, %v6656_v48  ;;  %v15848_v44 = vpack.c.bf16 %v6674_v10, %v6658_v47 }
 0x9f9   : > { %v15850_v54 = vpack.c.bf16 %v6673_v63, %v6657_v26  ;;  %v15852_v3 = vpack.c.bf16 %v6675_v51, %v6659_v53  ;;  %v6330_v43 = vpop.f32.mrb[132].mxu0  ;;  %v6443_v4 = vpop.f32.mrb[148].mxu1 }
 0x9fa   : > { %v6331_v22 = vadd.f32 %v6330_v43, %v15642_v60  ;;  %v6444_v27 = vadd.f32 %v6443_v4, %v15646_v42  ;;  %v6332_v17 = vpop.f32.mrb[133].mxu0  ;;  %v6445_v38 = vpop.f32.mrb[149].mxu1 }
 0x9fb   : > { %v6333_v34 = vadd.f32 %v6332_v17, %v15652_v25  ;;  %v6446_v36 = vadd.f32 %v6445_v38, %v15664_v46  ;;  %v6334_v29 = vpop.f32.mrb[134].mxu0  ;;  %v6447_v20 = vpop.f32.mrb[150].mxu1 }
 0x9fc   : > { %v6335_v16 = vadd.f32 %v6334_v29, %v15642_v60  ;;  %v6448_v32 = vadd.f32 %v6447_v20, %v15646_v42  ;;  %v6336_v24 = vpop.f32.mrb[135].mxu0  ;;  %v6449_v37 = vpop.f32.mrb[151].mxu1  ;;  %v6688_v14 = vmax.f32 %v6331_v22, 0.0  ;;  %v6690_v7 = vmax.f32 %v6444_v27, 0.0 }
 0x9fd   : > { %v6337_v35 = vadd.f32 %v6336_v24, %v15652_v25  ;;  %v6450_v49 = vadd.f32 %v6449_v37, %v15664_v46  ;;  %v6689_v48 = vmax.f32 %v6333_v34, 0.0  ;;  %v6691_v47 = vmax.f32 %v6446_v36, 0.0 }
 0x9fe   : > { %v6704_v56 = vmax.f32 %v6335_v16, 0.0  ;;  %v6706_v5 = vmax.f32 %v6448_v32, 0.0  ;;  %8496 = vmatmul.mubr.bf16.gmra.mrb[240].mxu0 %v15766_v6  ;;  %8593 = vmatmul.mubr.bf16.gmra.mrb[0].mxu1 %v15768_v50  ;;  %v11599_v50 = vld [vmem:[%s16342_s2 + $0x8] sm:$0xff] }
 0x9ff   : > { %v6705_v8 = vmax.f32 %v6337_v35, 0.0  ;;  %v6707_v60 = vmax.f32 %v6450_v49, 0.0  ;;  %8503 = vmatprep.mubr.bf16.mxu0 %v15790_v18  ;;  %8600 = vmatprep.mubr.bf16.mxu1 %v15792_v57  ;;  %v15878_v53 = vrot.slane %v11599_v50, %v12497_v11 }
 0xa00   : > { %v15866_v42 = vpack.c.bf16 %v6704_v56, %v6688_v14  ;;  %v15868_v25 = vpack.c.bf16 %v6706_v5, %v6690_v7 }
 0xa01   : > { %v15870_v46 = vpack.c.bf16 %v6705_v8, %v6689_v48  ;;  %v15872_v10 = vpack.c.bf16 %v6707_v60, %v6691_v47  ;;  %v10588_v26 = vpop.f32.mrb[136].mxu0  ;;  %v10652_v6 = vpop.f32.mrb[152].mxu1 }
 0xa02   : > { %v10589_v18 = vpop.f32.mrb[137].mxu0  ;;  %v10653_v63 = vpop.f32.mrb[153].mxu1 }
 0xa03   : > { %v10590_v57 = vadd.f32 %v10589_v18, %v10588_v26  ;;  %v10654_v51 = vadd.f32 %v10653_v63, %v10652_v6  ;;  %v10591_v43 = vpop.f32.mrb[138].mxu0  ;;  %v10655_v4 = vpop.f32.mrb[154].mxu1 }
 0xa04   : > { %v10592_v22 = vpop.f32.mrb[139].mxu0  ;;  %v10656_v27 = vpop.f32.mrb[155].mxu1 }
 0xa05   : > { %v7900_v17 = vadd.f32 %v10590_v57, %v15878_v53  ;;  %v10593_v38 = vadd.f32 %v10592_v22, %v10591_v43  ;;  %v10657_v34 = vadd.f32 %v10656_v27, %v10655_v4 }
 0xa06   : > { %8504 = vmatmul.mubr.bf16.gmra.mrb[244].mxu0 %v15786_v55  ;;  %8601 = vmatmul.mubr.bf16.gmra.mrb[4].mxu1 %v15788_v9 }
 0xa07   : > { %v15883_v36 = vadd.f32 %v10654_v51, %v7900_v17  ;;  %v7903_v11 = vadd.f32 %v10593_v38, %v15878_v53  ;;  %8511 = vmatprep.mubr.bf16.mxu0 %v15810_v13  ;;  %8608 = vmatprep.mubr.bf16.mxu1 %v15812_v59 }
 0xa09   : > { %v15888_v29 = vadd.f32 %v10657_v34, %v7903_v11  ;;  %v10594_v20 = vpop.f32.mrb[140].mxu0  ;;  %v10658_v16 = vpop.f32.mrb[156].mxu1 }
 0xa0a   : > { %v10595_v32 = vpop.f32.mrb[141].mxu0  ;;  %v10659_v24 = vpop.f32.mrb[157].mxu1 }
 0xa0b   : > { %v10596_v37 = vadd.f32 %v10595_v32, %v10594_v20  ;;  %v10660_v35 = vadd.f32 %v10659_v24, %v10658_v16  ;;  %v10597_v49 = vpop.f32.mrb[142].mxu0  ;;  %v10661_v55 = vpop.f32.mrb[158].mxu1 }
 0xa0c   : > { %v10598_v14 = vpop.f32.mrb[143].mxu0  ;;  %v10662_v9 = vpop.f32.mrb[159].mxu1 }
 0xa0d   : > { %v7908_v7 = vadd.f32 %v10596_v37, %v15878_v53  ;;  %v10599_v56 = vadd.f32 %v10598_v14, %v10597_v49  ;;  %v10663_v5 = vadd.f32 %v10662_v9, %v10661_v55 }
 0xa0e   : > { %8512 = vmatmul.mubr.bf16.gmra.mrb[248].mxu0 %v15806_v23  ;;  %8609 = vmatmul.mubr.bf16.gmra.mrb[8].mxu1 %v15808_v30 }
 0xa0f   : > { %v15893_v13 = vadd.f32 %v10660_v35, %v7908_v7  ;;  %v7911_v59 = vadd.f32 %v10599_v56, %v15878_v53  ;;  %8519 = vmatprep.mubr.bf16.mxu0 %v15830_v1  ;;  %8616 = vmatprep.mubr.bf16.mxu1 %v15832_v40 }
 0xa11   : > { %v15898_v48 = vadd.f32 %v10663_v5, %v7911_v59  ;;  %v10600_v47 = vpop.f32.mrb[144].mxu0  ;;  %v10664_v8 = vpop.f32.mrb[160].mxu1 }
 0xa12   : > { %v10601_v60 = vpop.f32.mrb[145].mxu0  ;;  %v10665_v26 = vpop.f32.mrb[161].mxu1 }
 0xa13   : > { %v10602_v6 = vadd.f32 %v10601_v60, %v10600_v47  ;;  %v10666_v50 = vadd.f32 %v10665_v26, %v10664_v8  ;;  %v10603_v18 = vpop.f32.mrb[146].mxu0  ;;  %v10667_v23 = vpop.f32.mrb[162].mxu1 }
 0xa14   : > { %v10604_v63 = vpop.f32.mrb[147].mxu0  ;;  %v10668_v30 = vpop.f32.mrb[163].mxu1 }
 0xa15   : > { %v7916_v57 = vadd.f32 %v10602_v6, %v15878_v53  ;;  %v10605_v51 = vadd.f32 %v10604_v63, %v10603_v18  ;;  %v10669_v43 = vadd.f32 %v10668_v30, %v10667_v23 }
 0xa16   : > { %8520 = vmatmul.mubr.bf16.gmra.mrb[252].mxu0 %v15826_v15  ;;  %8617 = vmatmul.mubr.bf16.gmra.mrb[12].mxu1 %v15828_v61 }
 0xa17   : > { %v15903_v1 = vadd.f32 %v10666_v50, %v7916_v57  ;;  %v7919_v40 = vadd.f32 %v10605_v51, %v15878_v53  ;;  %8527 = vmatprep.mubr.bf16.mxu0 %v15850_v54  ;;  %8624 = vmatprep.mubr.bf16.mxu1 %v15852_v3 }
 0xa19   : > { %v15908_v4 = vadd.f32 %v10669_v43, %v7919_v40  ;;  %v10606_v22 = vpop.f32.mrb[148].mxu0  ;;  %v10670_v27 = vpop.f32.mrb[164].mxu1 }
 0xa1a   : > { %v10607_v17 = vpop.f32.mrb[149].mxu0  ;;  %v10671_v38 = vpop.f32.mrb[165].mxu1 }
 0xa1b   : > { %v10608_v34 = vadd.f32 %v10607_v17, %v10606_v22  ;;  %v10672_v11 = vadd.f32 %v10671_v38, %v10670_v27  ;;  %v10609_v20 = vpop.f32.mrb[150].mxu0  ;;  %v10673_v15 = vpop.f32.mrb[166].mxu1 }
 0xa1c   : > { %v10610_v16 = vpop.f32.mrb[151].mxu0  ;;  %v10674_v61 = vpop.f32.mrb[167].mxu1 }
 0xa1d   : > { %v7924_v32 = vadd.f32 %v10608_v34, %v15878_v53  ;;  %v10611_v24 = vadd.f32 %v10610_v16, %v10609_v20  ;;  %v10675_v37 = vadd.f32 %v10674_v61, %v10673_v15 }
 0xa1e   : > { %8528 = vmatmul.mubr.bf16.gmra.mrb[0].mxu0 %v15846_v12  ;;  %8625 = vmatmul.mubr.bf16.gmra.mrb[16].mxu1 %v15848_v44 }
 0xa1f   : > { %v15913_v54 = vadd.f32 %v10672_v11, %v7924_v32  ;;  %v7927_v3 = vadd.f32 %v10611_v24, %v15878_v53  ;;  %8535 = vmatprep.mubr.bf16.mxu0 %v15870_v46  ;;  %8632 = vmatprep.mubr.bf16.mxu1 %v15872_v10 }
 0xa21   : > { %v15918_v35 = vadd.f32 %v10675_v37, %v7927_v3  ;;  %v10612_v49 = vpop.f32.mrb[152].mxu0  ;;  %v10676_v55 = vpop.f32.mrb[168].mxu1 }
 0xa22   : > { %v10613_v14 = vpop.f32.mrb[153].mxu0  ;;  %v10677_v9 = vpop.f32.mrb[169].mxu1 }
 0xa23   : > { %v10614_v7 = vadd.f32 %v10613_v14, %v10612_v49  ;;  %v10678_v56 = vadd.f32 %v10677_v9, %v10676_v55  ;;  %v10615_v5 = vpop.f32.mrb[154].mxu0  ;;  %v10679_v12 = vpop.f32.mrb[170].mxu1 }
 0xa24   : > { %v10616_v59 = vpop.f32.mrb[155].mxu0  ;;  %v10680_v44 = vpop.f32.mrb[171].mxu1 }
 0xa25   : > { %v7932_v47 = vadd.f32 %v10614_v7, %v15878_v53  ;;  %v10617_v8 = vadd.f32 %v10616_v59, %v10615_v5  ;;  %v10681_v60 = vadd.f32 %v10680_v44, %v10679_v12 }
 0xa26   : > { %8536 = vmatmul.mubr.bf16.gmra.mrb[4].mxu0 %v15866_v42  ;;  %8633 = vmatmul.mubr.bf16.gmra.mrb[20].mxu1 %v15868_v25 }
 0xa27   : > { %v15923_v46 = vadd.f32 %v10678_v56, %v7932_v47  ;;  %v7935_v10 = vadd.f32 %v10617_v8, %v15878_v53 }
 0xa29   : > { %v15926_v26 = vadd.f32 %v10681_v60, %v7935_v10  ;;  %v10618_v6 = vpop.f32.mrb[156].mxu0  ;;  %v10682_v50 = vpop.f32.mrb[172].mxu1 }
 0xa2a   : > { %v10619_v18 = vpop.f32.mrb[157].mxu0  ;;  %v10683_v23 = vpop.f32.mrb[173].mxu1 }
 0xa2b   : > { %v10620_v63 = vadd.f32 %v10619_v18, %v10618_v6  ;;  %v10684_v30 = vadd.f32 %v10683_v23, %v10682_v50  ;;  %v10621_v57 = vpop.f32.mrb[158].mxu0  ;;  %v10685_v51 = vpop.f32.mrb[174].mxu1 }
 0xa2c   : > { %v10622_v43 = vpop.f32.mrb[159].mxu0  ;;  %v10686_v40 = vpop.f32.mrb[175].mxu1 }
 0xa2d   : > { %v7940_v42 = vadd.f32 %v10620_v63, %v15878_v53  ;;  %v10623_v22 = vadd.f32 %v10622_v43, %v10621_v57  ;;  %v10687_v25 = vadd.f32 %v10686_v40, %v10685_v51 }
 0xa2f   : > { %v15929_v27 = vadd.f32 %v10684_v30, %v7940_v42  ;;  %v7943_v17 = vadd.f32 %v10623_v22, %v15878_v53 }
 0xa31   : > { %v15932_v38 = vadd.f32 %v10687_v25, %v7943_v17  ;;  %v10624_v34 = vpop.f32.mrb[160].mxu0  ;;  %v10688_v11 = vpop.f32.mrb[176].mxu1 }
 0xa32   : > { %v10625_v20 = vpop.f32.mrb[161].mxu0  ;;  %v10689_v15 = vpop.f32.mrb[177].mxu1 }
 0xa33   : > { %v10626_v16 = vadd.f32 %v10625_v20, %v10624_v34  ;;  %v10690_v61 = vadd.f32 %v10689_v15, %v10688_v11  ;;  %v10627_v32 = vpop.f32.mrb[162].mxu0  ;;  %v10691_v24 = vpop.f32.mrb[178].mxu1 }
 0xa34   : > { %v10628_v37 = vpop.f32.mrb[163].mxu0  ;;  %v10692_v3 = vpop.f32.mrb[179].mxu1 }
 0xa35   : > { %v7948_v49 = vadd.f32 %v10626_v16, %v15878_v53  ;;  %v10629_v55 = vadd.f32 %v10628_v37, %v10627_v32  ;;  %v10693_v14 = vadd.f32 %v10692_v3, %v10691_v24 }
 0xa37   : > { %v15935_v9 = vadd.f32 %v10690_v61, %v7948_v49  ;;  %v7951_v7 = vadd.f32 %v10629_v55, %v15878_v53 }
 0xa39   : > { %v15938_v56 = vadd.f32 %v10693_v14, %v7951_v7  ;;  %v10630_v5 = vpop.f32.mrb[164].mxu0  ;;  %v10694_v12 = vpop.f32.mrb[180].mxu1 }
 0xa3a   : > { %v10631_v59 = vpop.f32.mrb[165].mxu0  ;;  %v10695_v44 = vpop.f32.mrb[181].mxu1 }
 0xa3b   : > { %v10632_v47 = vadd.f32 %v10631_v59, %v10630_v5  ;;  %v10696_v8 = vadd.f32 %v10695_v44, %v10694_v12  ;;  %v10633_v60 = vpop.f32.mrb[166].mxu0  ;;  %v10697_v10 = vpop.f32.mrb[182].mxu1 }
 0xa3c   : > { %v10634_v6 = vpop.f32.mrb[167].mxu0  ;;  %v10698_v50 = vpop.f32.mrb[183].mxu1 }
 0xa3d   : > { %v7956_v18 = vadd.f32 %v10632_v47, %v15878_v53  ;;  %v10635_v23 = vadd.f32 %v10634_v6, %v10633_v60  ;;  %v10699_v63 = vadd.f32 %v10698_v50, %v10697_v10 }
 0xa3f   : > { %v15941_v30 = vadd.f32 %v10696_v8, %v7956_v18  ;;  %v7959_v57 = vadd.f32 %v10635_v23, %v15878_v53 }
 0xa41   : > { %v15944_v51 = vadd.f32 %v10699_v63, %v7959_v57  ;;  %v10716_v43 = vpop.f32.mrb[168].mxu0  ;;  %v10780_v40 = vpop.f32.mrb[184].mxu1 }
 0xa42   : > { %v10717_v42 = vpop.f32.mrb[169].mxu0  ;;  %v10781_v22 = vpop.f32.mrb[185].mxu1 }
 0xa43   : > { %v10718_v25 = vadd.f32 %v10717_v42, %v10716_v43  ;;  %v10782_v17 = vadd.f32 %v10781_v22, %v10780_v40  ;;  %v10719_v34 = vpop.f32.mrb[170].mxu0  ;;  %v10783_v11 = vpop.f32.mrb[186].mxu1 }
 0xa44   : > { %v10720_v20 = vpop.f32.mrb[171].mxu0  ;;  %v10784_v15 = vpop.f32.mrb[187].mxu1 }
 0xa45   : > { %v8094_v16 = vadd.f32 %v10718_v25, %v15883_v36  ;;  %v10721_v61 = vadd.f32 %v10720_v20, %v10719_v34  ;;  %v10785_v32 = vadd.f32 %v10784_v15, %v10783_v11 }
 0xa47   : > { %v15947_v24 = vadd.f32 %v10782_v17, %v8094_v16  ;;  %v8097_v53 = vadd.f32 %v10721_v61, %v15888_v29 }
 0xa49   : > { %v15950_v37 = vadd.f32 %v10785_v32, %v8097_v53  ;;  %v10722_v3 = vpop.f32.mrb[172].mxu0  ;;  %v10786_v49 = vpop.f32.mrb[188].mxu1 }
 0xa4a   : > { %v10723_v55 = vpop.f32.mrb[173].mxu0  ;;  %v10787_v14 = vpop.f32.mrb[189].mxu1 }
 0xa4b   : > { %v10724_v7 = vadd.f32 %v10723_v55, %v10722_v3  ;;  %v10788_v5 = vadd.f32 %v10787_v14, %v10786_v49  ;;  %v10725_v12 = vpop.f32.mrb[174].mxu0  ;;  %v10789_v59 = vpop.f32.mrb[190].mxu1 }
 0xa4c   : > { %v10726_v44 = vpop.f32.mrb[175].mxu0  ;;  %v10790_v47 = vpop.f32.mrb[191].mxu1 }
 0xa4d   : > { %v8102_v36 = vadd.f32 %v10724_v7, %v15893_v13  ;;  %v10727_v8 = vadd.f32 %v10726_v44, %v10725_v12  ;;  %v10791_v60 = vadd.f32 %v10790_v47, %v10789_v59 }
 0xa4f   : > { %v15953_v10 = vadd.f32 %v10788_v5, %v8102_v36  ;;  %v8105_v29 = vadd.f32 %v10727_v8, %v15898_v48 }
 0xa51   : > { %v15956_v6 = vadd.f32 %v10791_v60, %v8105_v29  ;;  %v10728_v50 = vpop.f32.mrb[176].mxu0  ;;  %v10792_v18 = vpop.f32.mrb[192].mxu1 }
 0xa52   : > { %v10729_v23 = vpop.f32.mrb[177].mxu0  ;;  %v10793_v63 = vpop.f32.mrb[193].mxu1 }
 0xa53   : > { %v10730_v57 = vadd.f32 %v10729_v23, %v10728_v50  ;;  %v10794_v43 = vadd.f32 %v10793_v63, %v10792_v18  ;;  %v10731_v40 = vpop.f32.mrb[178].mxu0  ;;  %v10795_v42 = vpop.f32.mrb[194].mxu1 }
 0xa54   : > { %v10732_v22 = vpop.f32.mrb[179].mxu0  ;;  %v10796_v25 = vpop.f32.mrb[195].mxu1 }
 0xa55   : > { %v8110_v13 = vadd.f32 %v10730_v57, %v15903_v1  ;;  %v10733_v17 = vadd.f32 %v10732_v22, %v10731_v40  ;;  %v10797_v34 = vadd.f32 %v10796_v25, %v10795_v42 }
 0xa57   : > { %v15959_v11 = vadd.f32 %v10794_v43, %v8110_v13  ;;  %v8113_v48 = vadd.f32 %v10733_v17, %v15908_v4 }
 0xa59   : > { %v15962_v20 = vadd.f32 %v10797_v34, %v8113_v48  ;;  %v10734_v15 = vpop.f32.mrb[180].mxu0  ;;  %v10798_v16 = vpop.f32.mrb[196].mxu1 }
 0xa5a   : > { %v10735_v61 = vpop.f32.mrb[181].mxu0  ;;  %v10799_v32 = vpop.f32.mrb[197].mxu1 }
 0xa5b   : > { %v10736_v53 = vadd.f32 %v10735_v61, %v10734_v15  ;;  %v10800_v3 = vadd.f32 %v10799_v32, %v10798_v16  ;;  %v10737_v49 = vpop.f32.mrb[182].mxu0  ;;  %v10801_v55 = vpop.f32.mrb[198].mxu1 }
 0xa5c   : > { %v10738_v14 = vpop.f32.mrb[183].mxu0  ;;  %v10802_v7 = vpop.f32.mrb[199].mxu1 }
 0xa5d   : > { %v8118_v1 = vadd.f32 %v10736_v53, %v15913_v54  ;;  %v10739_v5 = vadd.f32 %v10738_v14, %v10737_v49  ;;  %v10803_v12 = vadd.f32 %v10802_v7, %v10801_v55 }
 0xa5f   : > { %v15965_v59 = vadd.f32 %v10800_v3, %v8118_v1  ;;  %v8121_v4 = vadd.f32 %v10739_v5, %v15918_v35 }
 0xa61   : > { %v15968_v44 = vadd.f32 %v10803_v12, %v8121_v4  ;;  %v10740_v47 = vpop.f32.mrb[184].mxu0  ;;  %v10804_v36 = vpop.f32.mrb[200].mxu1 }
 0xa62   : > { %v10741_v8 = vpop.f32.mrb[185].mxu0  ;;  %v10805_v60 = vpop.f32.mrb[201].mxu1 }
 0xa63   : > { %v10742_v29 = vadd.f32 %v10741_v8, %v10740_v47  ;;  %v10806_v50 = vadd.f32 %v10805_v60, %v10804_v36  ;;  %v10743_v18 = vpop.f32.mrb[186].mxu0  ;;  %v10807_v23 = vpop.f32.mrb[202].mxu1 }
 0xa64   : > { %v10744_v63 = vpop.f32.mrb[187].mxu0  ;;  %v10808_v57 = vpop.f32.mrb[203].mxu1 }
 0xa65   : > { %v8126_v54 = vadd.f32 %v10742_v29, %v15923_v46  ;;  %v10745_v43 = vadd.f32 %v10744_v63, %v10743_v18  ;;  %v10809_v40 = vadd.f32 %v10808_v57, %v10807_v23 }
 0xa67   : > { %v15971_v42 = vadd.f32 %v10806_v50, %v8126_v54  ;;  %v8129_v35 = vadd.f32 %v10745_v43, %v15926_v26 }
 0xa69   : > { %v15974_v22 = vadd.f32 %v10809_v40, %v8129_v35  ;;  %v10746_v25 = vpop.f32.mrb[188].mxu0  ;;  %v10810_v13 = vpop.f32.mrb[204].mxu1 }
 0xa6a   : > { %v10747_v17 = vpop.f32.mrb[189].mxu0  ;;  %v10811_v34 = vpop.f32.mrb[205].mxu1 }
 0xa6b   : > { %v10748_v48 = vadd.f32 %v10747_v17, %v10746_v25  ;;  %v10812_v15 = vadd.f32 %v10811_v34, %v10810_v13  ;;  %v10749_v16 = vpop.f32.mrb[190].mxu0  ;;  %v10813_v61 = vpop.f32.mrb[206].mxu1 }
 0xa6c   : > { %v10750_v32 = vpop.f32.mrb[191].mxu0  ;;  %v10814_v53 = vpop.f32.mrb[207].mxu1 }
 0xa6d   : > { %v8134_v46 = vadd.f32 %v10748_v48, %v15929_v27  ;;  %v10751_v3 = vadd.f32 %v10750_v32, %v10749_v16  ;;  %v10815_v49 = vadd.f32 %v10814_v53, %v10813_v61 }
 0xa6f   : > { %v15977_v55 = vadd.f32 %v10812_v15, %v8134_v46  ;;  %v8137_v26 = vadd.f32 %v10751_v3, %v15932_v38 }
 0xa71   : > { %v15980_v14 = vadd.f32 %v10815_v49, %v8137_v26  ;;  %v10752_v7 = vpop.f32.mrb[192].mxu0  ;;  %v10816_v1 = vpop.f32.mrb[208].mxu1 }
 0xa72   : > { %v10753_v5 = vpop.f32.mrb[193].mxu0  ;;  %v10817_v12 = vpop.f32.mrb[209].mxu1 }
 0xa73   : > { %v10754_v4 = vadd.f32 %v10753_v5, %v10752_v7  ;;  %v10818_v47 = vadd.f32 %v10817_v12, %v10816_v1  ;;  %v10755_v36 = vpop.f32.mrb[194].mxu0  ;;  %v10819_v8 = vpop.f32.mrb[210].mxu1 }
 0xa74   : > { %v10756_v60 = vpop.f32.mrb[195].mxu0  ;;  %v10820_v29 = vpop.f32.mrb[211].mxu1 }
 0xa75   : > { %v8142_v27 = vadd.f32 %v10754_v4, %v15935_v9  ;;  %v10757_v50 = vadd.f32 %v10756_v60, %v10755_v36  ;;  %v10821_v18 = vadd.f32 %v10820_v29, %v10819_v8 }
 0xa77   : > { %v15983_v23 = vadd.f32 %v10818_v47, %v8142_v27  ;;  %v8145_v38 = vadd.f32 %v10757_v50, %v15938_v56 }
 0xa79   : > { %v15986_v63 = vadd.f32 %v10821_v18, %v8145_v38  ;;  %v10758_v57 = vpop.f32.mrb[196].mxu0  ;;  %v10822_v54 = vpop.f32.mrb[212].mxu1 }
 0xa7a   : > { %v10759_v43 = vpop.f32.mrb[197].mxu0  ;;  %v10823_v40 = vpop.f32.mrb[213].mxu1 }
 0xa7b   : > { %v10760_v35 = vadd.f32 %v10759_v43, %v10758_v57  ;;  %v10824_v25 = vadd.f32 %v10823_v40, %v10822_v54  ;;  %v10761_v13 = vpop.f32.mrb[198].mxu0  ;;  %v10825_v17 = vpop.f32.mrb[214].mxu1 }
 0xa7c   : > { %v10762_v34 = vpop.f32.mrb[199].mxu0  ;;  %v10826_v48 = vpop.f32.mrb[215].mxu1 }
 0xa7d   : > { %v8150_v9 = vadd.f32 %v10760_v35, %v15941_v30  ;;  %v10763_v15 = vadd.f32 %v10762_v34, %v10761_v13  ;;  %v10827_v16 = vadd.f32 %v10826_v48, %v10825_v17 }
 0xa7f   : > { %v15989_v61 = vadd.f32 %v10824_v25, %v8150_v9  ;;  %v8153_v56 = vadd.f32 %v10763_v15, %v15944_v51 }
 0xa81   : > { %v15992_v32 = vadd.f32 %v10827_v16, %v8153_v56  ;;  %v10844_v53 = vpop.f32.mrb[200].mxu0  ;;  %v10908_v46 = vpop.f32.mrb[216].mxu1 }
 0xa82   : > { %v10845_v3 = vpop.f32.mrb[201].mxu0  ;;  %v10909_v49 = vpop.f32.mrb[217].mxu1 }
 0xa83   : > { %v10846_v26 = vadd.f32 %v10845_v3, %v10844_v53  ;;  %v10910_v7 = vadd.f32 %v10909_v49, %v10908_v46  ;;  %v10847_v1 = vpop.f32.mrb[202].mxu0  ;;  %v10911_v5 = vpop.f32.mrb[218].mxu1 }
 0xa84   : > { %v10848_v12 = vpop.f32.mrb[203].mxu0  ;;  %v10912_v4 = vpop.f32.mrb[219].mxu1 }
 0xa85   : > { %v8288_v30 = vadd.f32 %v10846_v26, %v15947_v24  ;;  %v10849_v47 = vadd.f32 %v10848_v12, %v10847_v1  ;;  %v10913_v36 = vadd.f32 %v10912_v4, %v10911_v5 }
 0xa87   : > { %v15995_v8 = vadd.f32 %v10910_v7, %v8288_v30  ;;  %v8291_v51 = vadd.f32 %v10849_v47, %v15950_v37 }
 0xa89   : > { %v15998_v60 = vadd.f32 %v10913_v36, %v8291_v51  ;;  %v10850_v29 = vpop.f32.mrb[204].mxu0  ;;  %v10914_v27 = vpop.f32.mrb[220].mxu1 }
 0xa8a   : > { %v10851_v50 = vpop.f32.mrb[205].mxu0  ;;  %v10915_v18 = vpop.f32.mrb[221].mxu1 }
 0xa8b   : > { %v10852_v38 = vadd.f32 %v10851_v50, %v10850_v29  ;;  %v10916_v57 = vadd.f32 %v10915_v18, %v10914_v27  ;;  %v10853_v54 = vpop.f32.mrb[206].mxu0  ;;  %v10917_v43 = vpop.f32.mrb[222].mxu1 }
 0xa8c   : > { %v10854_v40 = vpop.f32.mrb[207].mxu0  ;;  %v10918_v35 = vpop.f32.mrb[223].mxu1 }
 0xa8d   : > { %v8296_v24 = vadd.f32 %v10852_v38, %v15953_v10  ;;  %v10855_v25 = vadd.f32 %v10854_v40, %v10853_v54  ;;  %v10919_v13 = vadd.f32 %v10918_v35, %v10917_v43 }
 0xa8f   : > { %v16001_v17 = vadd.f32 %v10916_v57, %v8296_v24  ;;  %v8299_v37 = vadd.f32 %v10855_v25, %v15956_v6 }
 0xa91   : > { %v16004_v34 = vadd.f32 %v10919_v13, %v8299_v37  ;;  %v10856_v48 = vpop.f32.mrb[208].mxu0  ;;  %v10920_v9 = vpop.f32.mrb[224].mxu1 }
 0xa92   : > { %v10857_v15 = vpop.f32.mrb[209].mxu0  ;;  %v10921_v16 = vpop.f32.mrb[225].mxu1 }
 0xa93   : > { %v10858_v56 = vadd.f32 %v10857_v15, %v10856_v48  ;;  %v10922_v53 = vadd.f32 %v10921_v16, %v10920_v9  ;;  %v10859_v46 = vpop.f32.mrb[210].mxu0  ;;  %v10923_v3 = vpop.f32.mrb[226].mxu1 }
 0xa94   : > { %v10860_v49 = vpop.f32.mrb[211].mxu0  ;;  %v10924_v26 = vpop.f32.mrb[227].mxu1 }
 0xa95   : > { %v8304_v10 = vadd.f32 %v10858_v56, %v15959_v11  ;;  %v10861_v7 = vadd.f32 %v10860_v49, %v10859_v46  ;;  %v10925_v1 = vadd.f32 %v10924_v26, %v10923_v3 }
 0xa97   : > { %v16007_v5 = vadd.f32 %v10922_v53, %v8304_v10  ;;  %v8307_v6 = vadd.f32 %v10861_v7, %v15962_v20 }
 0xa99   : > { %v16010_v12 = vadd.f32 %v10925_v1, %v8307_v6  ;;  %v10862_v4 = vpop.f32.mrb[212].mxu0  ;;  %v10926_v30 = vpop.f32.mrb[228].mxu1 }
 0xa9a   : > { %v10863_v47 = vpop.f32.mrb[213].mxu0  ;;  %v10927_v36 = vpop.f32.mrb[229].mxu1 }
 0xa9b   : > { %v10864_v51 = vadd.f32 %v10863_v47, %v10862_v4  ;;  %v10928_v29 = vadd.f32 %v10927_v36, %v10926_v30  ;;  %v10865_v27 = vpop.f32.mrb[214].mxu0  ;;  %v10929_v50 = vpop.f32.mrb[230].mxu1 }
 0xa9c   : > { %v10866_v18 = vpop.f32.mrb[215].mxu0  ;;  %v10930_v38 = vpop.f32.mrb[231].mxu1 }
 0xa9d   : > { %v8312_v11 = vadd.f32 %v10864_v51, %v15965_v59  ;;  %v10867_v57 = vadd.f32 %v10866_v18, %v10865_v27  ;;  %v10931_v54 = vadd.f32 %v10930_v38, %v10929_v50 }
 0xa9f   : > { %v16013_v43 = vadd.f32 %v10928_v29, %v8312_v11  ;;  %v8315_v20 = vadd.f32 %v10867_v57, %v15968_v44 }
 0xaa1   : > { %v16016_v40 = vadd.f32 %v10931_v54, %v8315_v20  ;;  %v10868_v35 = vpop.f32.mrb[216].mxu0  ;;  %v10932_v24 = vpop.f32.mrb[232].mxu1 }
 0xaa2   : > { %v10869_v25 = vpop.f32.mrb[217].mxu0  ;;  %v10933_v13 = vpop.f32.mrb[233].mxu1 }
 0xaa3   : > { %v10870_v37 = vadd.f32 %v10869_v25, %v10868_v35  ;;  %v10934_v48 = vadd.f32 %v10933_v13, %v10932_v24  ;;  %v10871_v9 = vpop.f32.mrb[218].mxu0  ;;  %v10935_v15 = vpop.f32.mrb[234].mxu1 }
 0xaa4   : > { %v10872_v16 = vpop.f32.mrb[219].mxu0  ;;  %v10936_v56 = vpop.f32.mrb[235].mxu1 }
 0xaa5   : > { %v8320_v59 = vadd.f32 %v10870_v37, %v15971_v42  ;;  %v10873_v53 = vadd.f32 %v10872_v16, %v10871_v9  ;;  %v10937_v46 = vadd.f32 %v10936_v56, %v10935_v15 }
 0xaa7   : > { %v16019_v3 = vadd.f32 %v10934_v48, %v8320_v59  ;;  %v8323_v44 = vadd.f32 %v10873_v53, %v15974_v22 }
 0xaa9   : > { %v16022_v49 = vadd.f32 %v10937_v46, %v8323_v44  ;;  %v10874_v26 = vpop.f32.mrb[220].mxu0  ;;  %v10938_v10 = vpop.f32.mrb[236].mxu1 }
 0xaaa   : > { %v10875_v7 = vpop.f32.mrb[221].mxu0  ;;  %v10939_v1 = vpop.f32.mrb[237].mxu1 }
 0xaab   : > { %v10876_v6 = vadd.f32 %v10875_v7, %v10874_v26  ;;  %v10940_v4 = vadd.f32 %v10939_v1, %v10938_v10  ;;  %v10877_v30 = vpop.f32.mrb[222].mxu0  ;;  %v10941_v47 = vpop.f32.mrb[238].mxu1 }
 0xaac   : > { %v10878_v36 = vpop.f32.mrb[223].mxu0  ;;  %v10942_v51 = vpop.f32.mrb[239].mxu1 }
 0xaad   : > { %v8328_v42 = vadd.f32 %v10876_v6, %v15977_v55  ;;  %v10879_v29 = vadd.f32 %v10878_v36, %v10877_v30  ;;  %v10943_v27 = vadd.f32 %v10942_v51, %v10941_v47 }
 0xaaf   : > { %v16025_v50 = vadd.f32 %v10940_v4, %v8328_v42  ;;  %v8331_v22 = vadd.f32 %v10879_v29, %v15980_v14 }
 0xab1   : > { %v16028_v18 = vadd.f32 %v10943_v27, %v8331_v22  ;;  %v10880_v38 = vpop.f32.mrb[224].mxu0  ;;  %v10944_v11 = vpop.f32.mrb[240].mxu1 }
 0xab2   : > { %v10881_v57 = vpop.f32.mrb[225].mxu0  ;;  %v10945_v54 = vpop.f32.mrb[241].mxu1 }
 0xab3   : > { %v10882_v20 = vadd.f32 %v10881_v57, %v10880_v38  ;;  %v10946_v35 = vadd.f32 %v10945_v54, %v10944_v11  ;;  %v10883_v24 = vpop.f32.mrb[226].mxu0  ;;  %v10947_v25 = vpop.f32.mrb[242].mxu1 }
 0xab4   : > { %v10884_v13 = vpop.f32.mrb[227].mxu0  ;;  %v10948_v37 = vpop.f32.mrb[243].mxu1 }
 0xab5   : > { %v8336_v55 = vadd.f32 %v10882_v20, %v15983_v23  ;;  %v10885_v48 = vadd.f32 %v10884_v13, %v10883_v24  ;;  %v10949_v9 = vadd.f32 %v10948_v37, %v10947_v25 }
 0xab7   : > { %v16031_v15 = vadd.f32 %v10946_v35, %v8336_v55  ;;  %v8339_v14 = vadd.f32 %v10885_v48, %v15986_v63 }
 0xab9   : > { %v16034_v16 = vadd.f32 %v10949_v9, %v8339_v14  ;;  %v10886_v56 = vpop.f32.mrb[228].mxu0  ;;  %v10950_v59 = vpop.f32.mrb[244].mxu1 }
 0xaba   : > { %v10887_v53 = vpop.f32.mrb[229].mxu0  ;;  %v10951_v46 = vpop.f32.mrb[245].mxu1 }
 0xabb   : > { %v10888_v44 = vadd.f32 %v10887_v53, %v10886_v56  ;;  %v10952_v26 = vadd.f32 %v10951_v46, %v10950_v59  ;;  %v10889_v10 = vpop.f32.mrb[230].mxu0  ;;  %v10953_v7 = vpop.f32.mrb[246].mxu1 }
 0xabc   : > { %v10890_v1 = vpop.f32.mrb[231].mxu0  ;;  %v10954_v6 = vpop.f32.mrb[247].mxu1 }
 0xabd   : > { %v8344_v23 = vadd.f32 %v10888_v44, %v15989_v61  ;;  %v10891_v4 = vadd.f32 %v10890_v1, %v10889_v10  ;;  %v10955_v30 = vadd.f32 %v10954_v6, %v10953_v7 }
 0xabf   : > { %v16037_v47 = vadd.f32 %v10952_v26, %v8344_v23  ;;  %v8347_v63 = vadd.f32 %v10891_v4, %v15992_v32 }
 0xac1   : > { %v16040_v36 = vadd.f32 %v10955_v30, %v8347_v63  ;;  %v10972_v51 = vpop.f32.mrb[232].mxu0  ;;  %v11036_v42 = vpop.f32.mrb[248].mxu1 }
 0xac2   : > { %v10973_v29 = vpop.f32.mrb[233].mxu0  ;;  %v11037_v27 = vpop.f32.mrb[249].mxu1 }
 0xac3   : > { %v10974_v22 = vadd.f32 %v10973_v29, %v10972_v51  ;;  %v11038_v38 = vadd.f32 %v11037_v27, %v11036_v42  ;;  %v10975_v11 = vpop.f32.mrb[234].mxu0  ;;  %v11039_v57 = vpop.f32.mrb[250].mxu1 }
 0xac4   : > { %v10976_v54 = vpop.f32.mrb[235].mxu0  ;;  %v11040_v20 = vpop.f32.mrb[251].mxu1 }
 0xac5   : > { %v8482_v61 = vadd.f32 %v10974_v22, %v15995_v8  ;;  %v10977_v35 = vadd.f32 %v10976_v54, %v10975_v11  ;;  %v11041_v24 = vadd.f32 %v11040_v20, %v11039_v57 }
 0xac7   : > { %v8579_v25 = vadd.f32 %v11038_v38, %v8482_v61  ;;  %v8485_v13 = vadd.f32 %v10977_v35, %v15998_v60 }
 0xac9   : > { %v8582_v32 = vadd.f32 %v11041_v24, %v8485_v13  ;;  %v10978_v37 = vpop.f32.mrb[236].mxu0  ;;  %v11042_v55 = vpop.f32.mrb[252].mxu1  ;;  %v16045_v48 = vadd.f32 %v8579_v25, %v14346_v2 }
 0xaca   : > { %v10979_v9 = vpop.f32.mrb[237].mxu0  ;;  %v11043_v14 = vpop.f32.mrb[253].mxu1 }
 0xacb   : > { %v10980_v56 = vadd.f32 %v10979_v9, %v10978_v37  ;;  %v11044_v59 = vadd.f32 %v11043_v14, %v11042_v55  ;;  %v10981_v53 = vpop.f32.mrb[238].mxu0  ;;  %v11045_v46 = vpop.f32.mrb[254].mxu1  ;;  %v8657_v8 = vsel %vm371_vm0, %v16045_v48, 0.0  ;;  %v16050_v44 = vadd.f32 %v8582_v32, %v14349_v41 }
 0xacc   : > { %v10982_v26 = vpop.f32.mrb[239].mxu0  ;;  %v11046_v60 = vpop.f32.mrb[255].mxu1  ;;  %8658 = vadd.xlane.f32.xlu0 %v8657_v8 }
 0xacd   : > { %v8490_v10 = vadd.f32 %v10980_v56, %v16001_v17  ;;  %v10983_v7 = vadd.f32 %v10982_v26, %v10981_v53  ;;  %v11047_v2 = vadd.f32 %v11046_v60, %v11045_v46  ;;  %v8660_v1 = vsel %vm371_vm0, %v16050_v44, 0.0 }
 0xace   : > { %8661 = vadd.xlane.f32.xlu1 %v8660_v1 }
 0xacf   : > { %v8587_v6 = vadd.f32 %v11044_v59, %v8490_v10  ;;  %v8493_v23 = vadd.f32 %v10983_v7, %v16004_v34 }
 0xad1   : > { %v8590_v4 = vadd.f32 %v11047_v2, %v8493_v23  ;;  %v10984_v30 = vpop.f32.mrb[240].mxu0  ;;  %v11048_v63 = vpop.f32.mrb[0].mxu1  ;;  %v16057_v41 = vadd.f32 %v8587_v6, %v14399_v52 }
 0xad2   : > { %v10985_v51 = vpop.f32.mrb[241].mxu0  ;;  %v11049_v42 = vpop.f32.mrb[1].mxu1 }
 0xad3   : > { %v10986_v29 = vadd.f32 %v10985_v51, %v10984_v30  ;;  %v11050_v27 = vadd.f32 %v11049_v42, %v11048_v63  ;;  %v10987_v17 = vpop.f32.mrb[242].mxu0  ;;  %v11051_v22 = vpop.f32.mrb[2].mxu1  ;;  %v8663_v38 = vsel %vm371_vm0, %v16057_v41, 0.0  ;;  %v16062_v11 = vadd.f32 %v8590_v4, %v14391_v0 }
 0xad4   : > { %v10988_v57 = vpop.f32.mrb[243].mxu0  ;;  %v11052_v34 = vpop.f32.mrb[3].mxu1  ;;  %8664 = vadd.xlane.f32.xlu0 %v8663_v38 }
 0xad5   : > { %v8498_v54 = vadd.f32 %v10986_v29, %v16007_v5  ;;  %v10989_v20 = vadd.f32 %v10988_v57, %v10987_v17  ;;  %v11053_v52 = vadd.f32 %v11052_v34, %v11051_v22  ;;  %v8666_v61 = vsel %vm371_vm0, %v16062_v11, 0.0 }
 0xad6   : > { %8667 = vadd.xlane.f32.xlu1 %v8666_v61 }
 0xad7   : > { %v8595_v35 = vadd.f32 %v11050_v27, %v8498_v54  ;;  %v8501_v24 = vadd.f32 %v10989_v20, %v16010_v12 }
 0xad9   : > { %v8598_v25 = vadd.f32 %v11053_v52, %v8501_v24  ;;  %v10990_v13 = vpop.f32.mrb[244].mxu0  ;;  %v11054_v32 = vpop.f32.mrb[4].mxu1  ;;  %v16069_v0 = vadd.f32 %v8595_v35, %v14449_v31 }
 0xada   : > { %v10991_v37 = vpop.f32.mrb[245].mxu0  ;;  %v11055_v55 = vpop.f32.mrb[5].mxu1 }
 0xadb   : > { %v10992_v9 = vadd.f32 %v10991_v37, %v10990_v13  ;;  %v11056_v14 = vadd.f32 %v11055_v55, %v11054_v32  ;;  %v10993_v5 = vpop.f32.mrb[246].mxu0  ;;  %v11057_v56 = vpop.f32.mrb[6].mxu1  ;;  %v8669_v59 = vsel %vm371_vm0, %v16069_v0, 0.0  ;;  %v16074_v53 = vadd.f32 %v8598_v25, %v14452_v33 }
 0xadc   : > { %v10994_v46 = vpop.f32.mrb[247].mxu0  ;;  %v11058_v12 = vpop.f32.mrb[7].mxu1  ;;  %8670 = vadd.xlane.f32.xlu0 %v8669_v59 }
 0xadd   : > { %v8506_v8 = vadd.f32 %v10992_v9, %v16013_v43  ;;  %v10995_v26 = vadd.f32 %v10994_v46, %v10993_v5  ;;  %v11059_v31 = vadd.f32 %v11058_v12, %v11057_v56  ;;  %v8672_v60 = vsel %vm371_vm0, %v16074_v53, 0.0 }
 0xade   : > { %8673 = vadd.xlane.f32.xlu1 %v8672_v60 }
 0xadf   : > { %v8603_v10 = vadd.f32 %v11056_v14, %v8506_v8  ;;  %v8509_v7 = vadd.f32 %v10995_v26, %v16016_v40 }
 0xae1   : > { %v8606_v2 = vadd.f32 %v11059_v31, %v8509_v7  ;;  %v10996_v1 = vpop.f32.mrb[248].mxu0  ;;  %v11060_v6 = vpop.f32.mrb[8].mxu1  ;;  %v16081_v33 = vadd.f32 %v8603_v10, %v14472_v19 }
 0xae2   : > { %v10997_v23 = vpop.f32.mrb[249].mxu0  ;;  %v11061_v4 = vpop.f32.mrb[9].mxu1 }
 0xae3   : > { %v10998_v30 = vadd.f32 %v10997_v23, %v10996_v1  ;;  %v11062_v63 = vadd.f32 %v11061_v4, %v11060_v6  ;;  %v10999_v43 = vpop.f32.mrb[250].mxu0  ;;  %v11063_v51 = vpop.f32.mrb[10].mxu1  ;;  %v8675_v42 = vsel %vm371_vm0, %v16081_v33, 0.0  ;;  %v16086_v29 = vadd.f32 %v8606_v2, %v14469_v58  ;;  %v16378_v1 = vld [vmem:[#allocation4_spill] sm:$0xff] }
 0xae4   : > { %v11000_v27 = vpop.f32.mrb[251].mxu0  ;;  %v11064_v40 = vpop.f32.mrb[11].mxu1  ;;  %8676 = vadd.xlane.f32.xlu0 %v8675_v42 }
 0xae5   : > { %v8514_v17 = vadd.f32 %v10998_v30, %v16019_v3  ;;  %v11001_v22 = vadd.f32 %v11000_v27, %v10999_v43  ;;  %v11065_v19 = vadd.f32 %v11064_v40, %v11063_v51  ;;  %v8678_v38 = vsel %vm371_vm0, %v16086_v29, 0.0 }
 0xae6   : > { %8679 = vadd.xlane.f32.xlu1 %v8678_v38 }
 0xae7   : > { %v8611_v57 = vadd.f32 %v11062_v63, %v8514_v17  ;;  %v8517_v34 = vadd.f32 %v11001_v22, %v16022_v49  ;;  %v16379_v17 = vld [vmem:[#allocation3_spill] sm:$0xff] }
 0xae9   : > { %v8614_v54 = vadd.f32 %v11065_v19, %v8517_v34  ;;  %v11002_v20 = vpop.f32.mrb[252].mxu0  ;;  %v11066_v52 = vpop.f32.mrb[12].mxu1  ;;  %v16093_v58 = vadd.f32 %v8611_v57, %v14489_v45 }
 0xaea   : > { %v11003_v61 = vpop.f32.mrb[253].mxu0  ;;  %v11067_v35 = vpop.f32.mrb[13].mxu1 }
 0xaeb   : > { %v11004_v24 = vadd.f32 %v11003_v61, %v11002_v20  ;;  %v11068_v25 = vadd.f32 %v11067_v35, %v11066_v52  ;;  %v11005_v3 = vpop.f32.mrb[254].mxu0  ;;  %v11069_v13 = vpop.f32.mrb[14].mxu1  ;;  %v8681_v32 = vsel %vm371_vm0, %v16093_v58, 0.0  ;;  %v16098_v37 = vadd.f32 %v8614_v54, %v14492_v39  ;;  %v16380_v52 = vld [vmem:[#allocation6_spill] sm:$0xff] }
 0xaec   : > { %v11006_v55 = vpop.f32.mrb[255].mxu0  ;;  %v11070_v49 = vpop.f32.mrb[15].mxu1  ;;  %8682 = vadd.xlane.f32.xlu0 %v8681_v32 }
 0xaed   : > { %v8522_v9 = vadd.f32 %v11004_v24, %v16025_v50  ;;  %v11007_v14 = vadd.f32 %v11006_v55, %v11005_v3  ;;  %v11071_v45 = vadd.f32 %v11070_v49, %v11069_v13  ;;  %v8684_v5 = vsel %vm371_vm0, %v16098_v37, 0.0 }
 0xaee   : > { %8685 = vadd.xlane.f32.xlu1 %v8684_v5  ;;  %v16382_v5 = vld [vmem:[#allocation5_spill] sm:$0xff] }
 0xaef   : > { %v8619_v56 = vadd.f32 %v11068_v25, %v8522_v9  ;;  %v8525_v59 = vadd.f32 %v11007_v14, %v16028_v18  ;;  %v16381_v9 = vld [vmem:[#allocation2_spill] sm:$0xff] }
 0xaf1   : > { %v8622_v46 = vadd.f32 %v11071_v45, %v8525_v59  ;;  %v11008_v12 = vpop.f32.mrb[0].mxu0  ;;  %v11072_v8 = vpop.f32.mrb[16].mxu1  ;;  %v16105_v39 = vadd.f32 %v8619_v56, %v14512_v21  ;;  %v11449_v59 = vld [vmem:[%s16346_s6] sm:$0xff]  }
 0xaf2   : > { %v11009_v26 = vpop.f32.mrb[1].mxu0  ;;  %v11073_v31 = vpop.f32.mrb[17].mxu1  ;;  %11144 = vmatprep.subr.bf16.mxu0 %v11449_v59 }
 0xaf3   : > { %v11010_v60 = vadd.f32 %v11009_v26, %v11008_v12  ;;  %v11074_v10 = vadd.f32 %v11073_v31, %v11072_v8  ;;  %v11011_v50 = vpop.f32.mrb[2].mxu0  ;;  %v11075_v7 = vpop.f32.mrb[18].mxu1  ;;  %v8687_v2 = vsel %vm371_vm0, %v16105_v39, 0.0  ;;  %v16110_v6 = vadd.f32 %v8622_v46, %v16378_v1  ;;  %11145 = vmatpush3.bf16.msra.mxu0 %v11449_v59 }
 0xaf4   : > { %v11012_v23 = vpop.f32.mrb[3].mxu0  ;;  %v11076_v18 = vpop.f32.mrb[19].mxu1  ;;  %8688 = vadd.xlane.f32.xlu0 %v8687_v2 }
 0xaf5   : > { %v8530_v4 = vadd.f32 %v11010_v60, %v16031_v15  ;;  %v11013_v30 = vadd.f32 %v11012_v23, %v11011_v50  ;;  %v11077_v21 = vadd.f32 %v11076_v18, %v11075_v7  ;;  %v8690_v63 = vsel %vm371_vm0, %v16110_v6, 0.0 }
 0xaf6   : > { %8691 = vadd.xlane.f32.xlu1 %v8690_v63 }
 0xaf7   : > { %v8627_v43 = vadd.f32 %v11074_v10, %v8530_v4  ;;  %v8533_v51 = vadd.f32 %v11013_v30, %v16034_v16 }
 0xaf9   : > { %v8630_v42 = vadd.f32 %v11077_v21, %v8533_v51  ;;  %v11014_v27 = vpop.f32.mrb[4].mxu0  ;;  %v11078_v40 = vpop.f32.mrb[20].mxu1  ;;  %v16117_v22 = vadd.f32 %v8627_v43, %v16379_v17 }
 0xafa   : > { %v11015_v19 = vpop.f32.mrb[5].mxu0  ;;  %v11079_v38 = vpop.f32.mrb[21].mxu1 }
 0xafb   : > { %v11016_v57 = vadd.f32 %v11015_v19, %v11014_v27  ;;  %v11080_v34 = vadd.f32 %v11079_v38, %v11078_v40  ;;  %v11017_v15 = vpop.f32.mrb[6].mxu0  ;;  %v11081_v54 = vpop.f32.mrb[22].mxu1  ;;  %v8693_v20 = vsel %vm371_vm0, %v16117_v22, 0.0  ;;  %v16122_v61 = vadd.f32 %v8630_v42, %v16380_v52 }
 0xafc   : > { %v11018_v35 = vpop.f32.mrb[7].mxu0  ;;  %v11082_v16 = vpop.f32.mrb[23].mxu1  ;;  %8694 = vadd.xlane.f32.xlu0 %v8693_v20 }
 0xafd   : > { %v8538_v24 = vadd.f32 %v11016_v57, %v16037_v47  ;;  %v11019_v25 = vadd.f32 %v11018_v35, %v11017_v15  ;;  %v11083_v3 = vadd.f32 %v11082_v16, %v11081_v54  ;;  %v8696_v13 = vsel %vm371_vm0, %v16122_v61, 0.0 }
 0xafe   : > { %8697 = vadd.xlane.f32.xlu1 %v8696_v13 }
 0xaff   : > { %v8635_v32 = vadd.f32 %v11080_v34, %v8538_v24  ;;  %v8541_v55 = vadd.f32 %v11019_v25, %v16040_v36 }
 0xb01   : > { %v8638_v49 = vadd.f32 %v11083_v3, %v8541_v55  ;;  %v16129_v14 = vadd.f32 %v8635_v32, %v16381_v9 }
 0xb03   : > { %v8699_v45 = vsel %vm371_vm0, %v16129_v14, 0.0  ;;  %v16134_v56 = vadd.f32 %v8638_v49, %v16382_v5 }
 0xb04   : > { %8700 = vadd.xlane.f32.xlu0 %v8699_v45 }
 0xb05   : > { %v8702_v47 = vsel %vm371_vm0, %v16134_v56, 0.0 }
 0xb06   : > { %8703 = vadd.xlane.f32.xlu1 %v8702_v47 }
 0xb59   : > { %v8659_v36 = vpop.xlane.xlu0 %8658 }
 0xb5a   : > { %v8705_v46 = vmul.f32 0.015625, %v8659_v36 }
 0xb5b   : > { %v8662_v12 = vpop.xlane.xlu1 %8661 }
 0xb5c   : > { %v16142_v8 = vsub.f32 %v16045_v48, %v8705_v46  ;;  %v8706_v26 = vmul.f32 0.015625, %v8662_v12  ;;  %v11451_v12 = vld [vmem:[%s16346_s6 + $0x10] sm:$0xff]  }
 0xb5e   : > { %v16145_v31 = vsub.f32 %v16050_v44, %v8706_v26  ;;  %v8737_v60 = vmul.f32 %v16142_v8, %v16142_v8 }
 0xb60   : > { %v8753_v10 = vsel %vm371_vm0, %v8737_v60, 0.0  ;;  %v8738_v50 = vmul.f32 %v16145_v31, %v16145_v31 }
 0xb61   : > { %v8665_v7 = vpop.xlane.xlu0 %8664  ;;  %8754 = vadd.xlane.f32.xlu0 %v8753_v10 }
 0xb62   : > { %v8707_v2 = vmul.f32 0.015625, %v8665_v7  ;;  %v8756_v1 = vsel %vm371_vm0, %v8738_v50, 0.0  ;;  %v11452_v7 = vld [vmem:[%s16346_s6 + $0x18] sm:$0xff]  }
 0xb63   : > { %v8668_v23 = vpop.xlane.xlu1 %8667  ;;  %8757 = vadd.xlane.f32.xlu1 %v8756_v1 }
 0xb64   : > { %v16154_v48 = vsub.f32 %v16057_v41, %v8707_v2  ;;  %v8708_v44 = vmul.f32 0.015625, %v8668_v23 }
 0xb66   : > { %v16157_v18 = vsub.f32 %v16062_v11, %v8708_v44  ;;  %v8739_v4 = vmul.f32 %v16154_v48, %v16154_v48 }
 0xb68   : > { %v8759_v30 = vsel %vm371_vm0, %v8739_v4, 0.0  ;;  %v8740_v21 = vmul.f32 %v16157_v18, %v16157_v18 }
 0xb69   : > { %v8671_v63 = vpop.xlane.xlu0 %8670  ;;  %8760 = vadd.xlane.f32.xlu0 %v8759_v30 }
 0xb6a   : > { %v8709_v43 = vmul.f32 0.015625, %v8671_v63  ;;  %v8762_v51 = vsel %vm371_vm0, %v8740_v21, 0.0 }
 0xb6b   : > { %v8674_v42 = vpop.xlane.xlu1 %8673  ;;  %8763 = vadd.xlane.f32.xlu1 %v8762_v51 }
 0xb6c   : > { %v16166_v41 = vsub.f32 %v16069_v0, %v8709_v43  ;;  %v8710_v11 = vmul.f32 0.015625, %v8674_v42 }
 0xb6e   : > { %v16169_v27 = vsub.f32 %v16074_v53, %v8710_v11  ;;  %v8741_v40 = vmul.f32 %v16166_v41, %v16166_v41 }
 0xb70   : > { %v8765_v17 = vsel %vm371_vm0, %v8741_v40, 0.0  ;;  %v8742_v19 = vmul.f32 %v16169_v27, %v16169_v27 }
 0xb71   : > { %v8677_v38 = vpop.xlane.xlu0 %8676  ;;  %8766 = vadd.xlane.f32.xlu0 %v8765_v17 }
 0xb72   : > { %v8711_v57 = vmul.f32 0.015625, %v8677_v38  ;;  %v8768_v34 = vsel %vm371_vm0, %v8742_v19, 0.0 }
 0xb73   : > { %v8680_v15 = vpop.xlane.xlu1 %8679  ;;  %8769 = vadd.xlane.f32.xlu1 %v8768_v34 }
 0xb74   : > { %v16178_v0 = vsub.f32 %v16081_v33, %v8711_v57  ;;  %v8712_v53 = vmul.f32 0.015625, %v8680_v15 }
 0xb76   : > { %v16181_v54 = vsub.f32 %v16086_v29, %v8712_v53  ;;  %v8743_v20 = vmul.f32 %v16178_v0, %v16178_v0 }
 0xb78   : > { %v8771_v52 = vsel %vm371_vm0, %v8743_v20, 0.0  ;;  %v8744_v35 = vmul.f32 %v16181_v54, %v16181_v54 }
 0xb79   : > { %v8683_v16 = vpop.xlane.xlu0 %8682  ;;  %8772 = vadd.xlane.f32.xlu0 %v8771_v52 }
 0xb7a   : > { %v8713_v24 = vmul.f32 0.015625, %v8683_v16  ;;  %v8774_v25 = vsel %vm371_vm0, %v8744_v35, 0.0 }
 0xb7b   : > { %v8686_v3 = vpop.xlane.xlu1 %8685  ;;  %8775 = vadd.xlane.f32.xlu1 %v8774_v25  ;;  %v11600_v25 = vld [vmem:[%s16342_s2 + $0x8] sm:$0xff] }
 0xb7c   : > { %v16190_v33 = vsub.f32 %v16093_v58, %v8713_v24  ;;  %v8714_v29 = vmul.f32 0.015625, %v8686_v3  ;;  %v11450_v58 = vld [vmem:[%s16346_s6 + $0x8] sm:$0xff]   ;;  %v16250_v3 = vrot.slane %v11600_v25, %v12738_v28 }
 0xb7d   : > { %11146 = vmatprep.subr.bf16.mxu0 %v11450_v58 }
 0xb7e   : > { %v16193_v13 = vsub.f32 %v16098_v37, %v8714_v29  ;;  %v8745_v32 = vmul.f32 %v16190_v33, %v16190_v33  ;;  %11147 = vmatpush3.bf16.msra.mxu0 %v11450_v58 }
 0xb7f   : > { %11148 = vmatprep.subr.bf16.mxu0 %v11451_v12 }
 0xb80   : > { %v8777_v55 = vsel %vm371_vm0, %v8745_v32, 0.0  ;;  %v8746_v49 = vmul.f32 %v16193_v13, %v16193_v13 }
 0xb81   : > { %v8689_v9 = vpop.xlane.xlu0 %8688  ;;  %8778 = vadd.xlane.f32.xlu0 %v8777_v55 }
 0xb82   : > { %v8715_v45 = vmul.f32 0.015625, %v8689_v9  ;;  %v8780_v5 = vsel %vm371_vm0, %v8746_v49, 0.0  ;;  %11149 = vmatpush3.bf16.msra.mxu0 %v11451_v12 }
 0xb83   : > { %v8692_v47 = vpop.xlane.xlu1 %8691  ;;  %8781 = vadd.xlane.f32.xlu1 %v8780_v5  ;;  %11150 = vmatprep.subr.bf16.mxu0 %v11452_v7  ;;  %v16255_v5 = vrot.slane %v11600_v25, %v12754_v62 }
 0xb84   : > { %v16205_v37 = vsub.f32 %v16105_v39, %v8715_v45  ;;  %v8716_v59 = vmul.f32 0.015625, %v8692_v47 }
 0xb86   : > { %v16208_v36 = vsub.f32 %v16110_v6, %v8716_v59  ;;  %v8747_v46 = vmul.f32 %v16205_v37, %v16205_v37  ;;  %11151 = vmatpush3.bf16.msra.mxu0 %v11452_v7 }
 0xb88   : > { %v8783_v26 = vsel %vm371_vm0, %v8747_v46, 0.0  ;;  %v8748_v60 = vmul.f32 %v16208_v36, %v16208_v36 }
 0xb89   : > { %v8695_v39 = vpop.xlane.xlu0 %8694  ;;  %8784 = vadd.xlane.f32.xlu0 %v8783_v26 }
 0xb8a   : > { %v8717_v10 = vmul.f32 0.015625, %v8695_v39  ;;  %v8786_v6 = vsel %vm371_vm0, %v8748_v60, 0.0 }
 0xb8b   : > { %v8698_v50 = vpop.xlane.xlu1 %8697  ;;  %8787 = vadd.xlane.f32.xlu1 %v8786_v6 }
 0xb8c   : > { %v16223_v2 = vsub.f32 %v16117_v22, %v8717_v10  ;;  %v8718_v1 = vmul.f32 0.015625, %v8698_v50 }
 0xb8e   : > { %v16226_v23 = vsub.f32 %v16122_v61, %v8718_v1  ;;  %v8749_v44 = vmul.f32 %v16223_v2, %v16223_v2 }
 0xb90   : > { %v8789_v4 = vsel %vm371_vm0, %v8749_v44, 0.0  ;;  %v8750_v30 = vmul.f32 %v16226_v23, %v16226_v23 }
 0xb91   : > { %8790 = vadd.xlane.f32.xlu0 %v8789_v4  ;;  %v8701_v21 = vpop.xlane.xlu0 %8700 }
 0xb92   : > { %v8719_v63 = vmul.f32 0.015625, %v8701_v21  ;;  %v8792_v22 = vsel %vm371_vm0, %v8750_v30, 0.0 }
 0xb93   : > { %8793 = vadd.xlane.f32.xlu1 %v8792_v22  ;;  %v8704_v43 = vpop.xlane.xlu1 %8703 }
 0xb94   : > { %v16235_v51 = vsub.f32 %v16129_v14, %v8719_v63  ;;  %v8720_v61 = vmul.f32 0.015625, %v8704_v43 }
 0xb96   : > { %v16238_v42 = vsub.f32 %v16134_v56, %v8720_v61  ;;  %v8751_v11 = vmul.f32 %v16235_v51, %v16235_v51 }
 0xb98   : > { %v8795_v40 = vsel %vm371_vm0, %v8751_v11, 0.0  ;;  %v8752_v17 = vmul.f32 %v16238_v42, %v16238_v42 }
 0xb99   : > { %8796 = vadd.xlane.f32.xlu0 %v8795_v40 }
 0xb9a   : > { %v8798_v19 = vsel %vm371_vm0, %v8752_v17, 0.0 }
 0xb9b   : > { %8799 = vadd.xlane.f32.xlu1 %v8798_v19 }
 0xbee   : > { %v8755_v38 = vpop.xlane.xlu0 %8754 }
 0xbef   : > { %v8801_v57 = vmul.f32 0.015625, %v8755_v38 }
 0xbf0   : > { %v8758_v14 = vpop.xlane.xlu1 %8757 }
 0xbf1   : > { %v8817_v34 = vadd.f32 1e-05, %v8801_v57  ;;  %v8802_v15 = vmul.f32 0.015625, %v8758_v14 }
 0xbf3   : > { %11549 = vrsqrt.f32 %v8817_v34  ;;  %v8818_v56 = vadd.f32 1e-05, %v8802_v15 }
 0xbf5   : > { %11551 = vrsqrt.f32 %v8818_v56 }
 0xbf6   : > { %v8761_v53 = vpop.xlane.xlu0 %8760 }
 0xbf7   : > { %v8803_v20 = vmul.f32 0.015625, %v8761_v53 }
 0xbf8   : > { %v8764_v52 = vpop.xlane.xlu1 %8763 }
 0xbf9   : > { %v8819_v35 = vadd.f32 1e-05, %v8803_v20  ;;  %v8804_v16 = vmul.f32 0.015625, %v8764_v52 }
 0xbfb   : > { %11553 = vrsqrt.f32 %v8819_v35  ;;  %v8820_v24 = vadd.f32 1e-05, %v8804_v16 }
 0xbfd   : > { %v11550_v29 = vpop.eup %11549  ;;  %11555 = vrsqrt.f32 %v8820_v24 }
 0xbfe   : > { %v8849_v32 = vmul.f32 %v11550_v29, %v16142_v8  ;;  %v8767_v55 = vpop.xlane.xlu0 %8766 }
 0xbff   : > { %v11552_v49 = vpop.eup %11551  ;;  %v8805_v9 = vmul.f32 0.015625, %v8767_v55 }
 0xc00   : > { %v8850_v45 = vmul.f32 %v11552_v49, %v16145_v31  ;;  %v8770_v47 = vpop.xlane.xlu1 %8769  ;;  %v8869_v58 = vmul.f32 %v16250_v3, %v8849_v32 }
 0xc01   : > { %v8821_v59 = vadd.f32 1e-05, %v8805_v9  ;;  %v8806_v46 = vmul.f32 0.015625, %v8770_v47 }
 0xc02   : > { %v8870_v28 = vmul.f32 %v16250_v3, %v8850_v45  ;;  %v8889_v26 = vadd.f32 %v16255_v5, %v8869_v58 }
 0xc03   : > { %11557 = vrsqrt.f32 %v8821_v59  ;;  %v8822_v12 = vadd.f32 1e-05, %v8806_v46 }
 0xc04   : > { %v8890_v8 = vadd.f32 %v16255_v5, %v8870_v28 }
 0xc05   : > { %v11554_v60 = vpop.eup %11553  ;;  %11559 = vrsqrt.f32 %v8822_v12 }
 0xc06   : > { %v8851_v31 = vmul.f32 %v11554_v60, %v16154_v48  ;;  %v8773_v39 = vpop.xlane.xlu0 %8772  ;;  %v8905_v62 = vpack.c.bf16 %v8890_v8, %v8889_v26 }
 0xc07   : > { %v11556_v10 = vpop.eup %11555  ;;  %v8807_v6 = vmul.f32 0.015625, %v8773_v39 }
 0xc08   : > { %v8871_v50 = vmul.f32 %v16250_v3, %v8851_v31  ;;  %v8852_v7 = vmul.f32 %v11556_v10, %v16157_v18  ;;  %v8776_v1 = vpop.xlane.xlu1 %8775  ;;  %11152 = vmatprep.mubr.msk.bf16.mxu0 %vm371_vm0, %v8905_v62 }
 0xc09   : > { %v8823_v44 = vadd.f32 1e-05, %v8807_v6  ;;  %v8808_v4 = vmul.f32 0.015625, %v8776_v1 }
 0xc0a   : > { %v8872_v30 = vmul.f32 %v16250_v3, %v8852_v7  ;;  %v8891_v63 = vadd.f32 %v16255_v5, %v8871_v50 }
 0xc0b   : > { %11561 = vrsqrt.f32 %v8823_v44  ;;  %v8824_v21 = vadd.f32 1e-05, %v8808_v4 }
 0xc0c   : > { %v8892_v48 = vadd.f32 %v16255_v5, %v8872_v30 }
 0xc0d   : > { %v11558_v22 = vpop.eup %11557  ;;  %11563 = vrsqrt.f32 %v8824_v21 }
 0xc0e   : > { %v8906_v43 = vpack.c.bf16 %v8892_v48, %v8891_v63  ;;  %v8853_v61 = vmul.f32 %v11558_v22, %v16166_v41  ;;  %v8779_v11 = vpop.xlane.xlu0 %8778 }
 0xc0f   : > { %v11560_v18 = vpop.eup %11559  ;;  %v8809_v40 = vmul.f32 0.015625, %v8779_v11 }
 0xc10   : > { %v8854_v17 = vmul.f32 %v11560_v18, %v16169_v27  ;;  %v8782_v19 = vpop.xlane.xlu1 %8781  ;;  %11153 = vmatmul.mubr.msk.bf16.vlgmr.msra.gmra.mrb[8].mxu0 %vm371_vm0, %v8906_v43  ;;  %v8873_v38 = vmul.f32 %v16250_v3, %v8853_v61 }
 0xc11   : > { %v8825_v57 = vadd.f32 1e-05, %v8809_v40  ;;  %v8810_v14 = vmul.f32 0.015625, %v8782_v19 }
 0xc12   : > { %v8874_v34 = vmul.f32 %v16250_v3, %v8854_v17  ;;  %v8893_v56 = vadd.f32 %v16255_v5, %v8873_v38 }
 0xc13   : > { %11565 = vrsqrt.f32 %v8825_v57  ;;  %v8826_v15 = vadd.f32 1e-05, %v8810_v14 }
 0xc14   : > { %v8894_v41 = vadd.f32 %v16255_v5, %v8874_v34 }
 0xc15   : > { %v11562_v53 = vpop.eup %11561  ;;  %11567 = vrsqrt.f32 %v8826_v15 }
 0xc16   : > { %v8855_v20 = vmul.f32 %v11562_v53, %v16178_v0  ;;  %v8785_v27 = vpop.xlane.xlu0 %8784  ;;  %v8907_v52 = vpack.c.bf16 %v8894_v41, %v8893_v56 }
 0xc17   : > { %v11564_v35 = vpop.eup %11563  ;;  %v8811_v16 = vmul.f32 0.015625, %v8785_v27 }
 0xc18   : > { %v8875_v24 = vmul.f32 %v16250_v3, %v8855_v20  ;;  %v8856_v25 = vmul.f32 %v11564_v35, %v16181_v54  ;;  %v8788_v29 = vpop.xlane.xlu1 %8787  ;;  %11156 = vmatprep.mubr.msk.bf16.mxu0 %vm371_vm0, %v8907_v52 }
 0xc19   : > { %v8827_v32 = vadd.f32 1e-05, %v8811_v16  ;;  %v8812_v55 = vmul.f32 0.015625, %v8788_v29 }
 0xc1a   : > { %v8876_v49 = vmul.f32 %v16250_v3, %v8856_v25  ;;  %v8895_v45 = vadd.f32 %v16255_v5, %v8875_v24 }
 0xc1b   : > { %11569 = vrsqrt.f32 %v8827_v32  ;;  %v8828_v9 = vadd.f32 1e-05, %v8812_v55 }
 0xc1c   : > { %v8896_v0 = vadd.f32 %v16255_v5, %v8876_v49 }
 0xc1d   : > { %v11566_v47 = vpop.eup %11565  ;;  %11571 = vrsqrt.f32 %v8828_v9 }
 0xc1e   : > { %v8908_v58 = vpack.c.bf16 %v8896_v0, %v8895_v45  ;;  %v8857_v59 = vmul.f32 %v11566_v47, %v16190_v33  ;;  %v8791_v46 = vpop.xlane.xlu0 %8790 }
 0xc1f   : > { %v11568_v54 = vpop.eup %11567  ;;  %v8813_v28 = vmul.f32 0.015625, %v8791_v46 }
 0xc20   : > { %v8858_v12 = vmul.f32 %v11568_v54, %v16193_v13  ;;  %v8794_v26 = vpop.xlane.xlu1 %8793  ;;  %11157 = vmatmul.mubr.msk.bf16.gmra.mrb[12].mxu0 %vm371_vm0, %v8908_v58  ;;  %v8877_v8 = vmul.f32 %v16250_v3, %v8857_v59 }
 0xc21   : > { %v8829_v60 = vadd.f32 1e-05, %v8813_v28  ;;  %v8814_v31 = vmul.f32 0.015625, %v8794_v26 }
 0xc22   : > { %v8878_v39 = vmul.f32 %v16250_v3, %v8858_v12  ;;  %v8897_v10 = vadd.f32 %v16255_v5, %v8877_v8 }
 0xc23   : > { %11573 = vrsqrt.f32 %v8829_v60  ;;  %v8830_v62 = vadd.f32 1e-05, %v8814_v31 }
 0xc24   : > { %v8898_v33 = vadd.f32 %v16255_v5, %v8878_v39 }
 0xc25   : > { %v11570_v6 = vpop.eup %11569  ;;  %11575 = vrsqrt.f32 %v8830_v62 }
 0xc26   : > { %v8859_v50 = vmul.f32 %v11570_v6, %v16205_v37  ;;  %v8797_v13 = vpop.xlane.xlu0 %8796  ;;  %v8909_v7 = vpack.c.bf16 %v8898_v33, %v8897_v10 }
 0xc27   : > { %v11572_v1 = vpop.eup %11571  ;;  %v8815_v44 = vmul.f32 0.015625, %v8797_v13 }
 0xc28   : > { %v8879_v4 = vmul.f32 %v16250_v3, %v8859_v50  ;;  %v8860_v30 = vmul.f32 %v11572_v1, %v16208_v36  ;;  %v8800_v21 = vpop.xlane.xlu1 %8799  ;;  %11160 = vmatprep.mubr.msk.bf16.mxu0 %vm371_vm0, %v8909_v7 }
 0xc29   : > { %v8831_v63 = vadd.f32 1e-05, %v8815_v44  ;;  %v8816_v48 = vmul.f32 0.015625, %v8800_v21 }
 0xc2a   : > { %v8880_v22 = vmul.f32 %v16250_v3, %v8860_v30  ;;  %v8899_v61 = vadd.f32 %v16255_v5, %v8879_v4 }
 0xc2b   : > { %11577 = vrsqrt.f32 %v8831_v63  ;;  %v8832_v43 = vadd.f32 1e-05, %v8816_v48 }
 0xc2c   : > { %v8900_v37 = vadd.f32 %v16255_v5, %v8880_v22 }
 0xc2d   : > { %v11574_v11 = vpop.eup %11573  ;;  %11579 = vrsqrt.f32 %v8832_v43 }
 0xc2e   : > { %v8910_v18 = vpack.c.bf16 %v8900_v37, %v8899_v61  ;;  %v8861_v40 = vmul.f32 %v11574_v11, %v16223_v2 }
 0xc2f   : > { %v11576_v17 = vpop.eup %11575 }
 0xc30   : > { %v8862_v36 = vmul.f32 %v11576_v17, %v16226_v23  ;;  %11161 = vmatmul.mubr.msk.bf16.gmra.mrb[16].mxu0 %vm371_vm0, %v8910_v18  ;;  %v8881_v19 = vmul.f32 %v16250_v3, %v8861_v40 }
 0xc32   : > { %v8882_v38 = vmul.f32 %v16250_v3, %v8862_v36  ;;  %v8901_v57 = vadd.f32 %v16255_v5, %v8881_v19 }
 0xc34   : > { %v8902_v14 = vadd.f32 %v16255_v5, %v8882_v38 }
 0xc35   : > { %v11578_v34 = vpop.eup %11577 }
 0xc36   : > { %v8863_v15 = vmul.f32 %v11578_v34, %v16235_v51  ;;  %v8911_v56 = vpack.c.bf16 %v8902_v14, %v8901_v57  ;;  %v10021_v51 = vld [vmem:[%s16347_s7] ss:$0 sm:$0xff] }
 0xc37   : > { %v11580_v41 = vpop.eup %11579 }
 0xc38   : > { %v8883_v2 = vmul.f32 %v16250_v3, %v8863_v15  ;;  %v8864_v23 = vmul.f32 %v11580_v41, %v16238_v42  ;;  %11164 = vmatprep.mubr.msk.bf16.mxu0 %vm371_vm0, %v8911_v56 }
 0xc3a   : > { %v8884_v53 = vmul.f32 %v16250_v3, %v8864_v23  ;;  %v8903_v20 = vadd.f32 %v16255_v5, %v8883_v2 }
 0xc3c   : > { %v8904_v27 = vadd.f32 %v16255_v5, %v8884_v53 }
 0xc3e   : > { %v8912_v52 = vpack.c.bf16 %v8904_v27, %v8903_v20 }
 0xc40   : > { %11165 = vmatmul.mubr.msk.bf16.gmra.mrb[20].mxu0 %vm371_vm0, %v8912_v52 }
 0xce3   : > { %v11154_v42 = vpop.f32.mrb[8].mxu0 }
 0xce4   : > { %v9019_v3 = vadd.f32 %v11154_v42, %v10021_v51  ;;  %v9010_v5 = vpop.f32.mrb[9].mxu0 }
 0xce5   : > { %v9011_v35 = vadd.f32 %v10021_v51, %v9010_v5  ;;  %v11155_v16 = vpop.f32.mrb[10].mxu0 }
 0xce6   : > { %9075 = vst [vmem:[%s16319_s10 + $0x10] sm:$0xff] %v9019_v3  ;;  %v9022_v24 = vadd.f32 %v11155_v16, %v10021_v51  ;;  %v9013_v25 = vpop.f32.mrb[11].mxu0 }
 0xce7   : > { %9073 = vst [vmem:[%s16319_s10] sm:$0xff] %v9011_v35  ;;  %v9014_v29 = vadd.f32 %v10021_v51, %v9013_v25 }
 0xce8   : > { %9076 = vst [vmem:[%s16319_s10 + $0x18] sm:$0xff] %v9022_v24 }
 0xce9   : > { %9074 = vst [vmem:[%s16319_s10 + $0x8] sm:$0xff] %v9014_v29 }
 0xcf3   : > { %v11158_v32 = vpop.f32.mrb[12].mxu0 }
 0xcf4   : > { %v9035_v55 = vadd.f32 %v11158_v32, %v10021_v51  ;;  %v9026_v49 = vpop.f32.mrb[13].mxu0 }
 0xcf5   : > { %v9027_v9 = vadd.f32 %v10021_v51, %v9026_v49  ;;  %v11159_v45 = vpop.f32.mrb[14].mxu0 }
 0xcf6   : > { %9079 = vst [vmem:[%s16319_s10 + $0x30] sm:$0xff] %v9035_v55  ;;  %v9038_v0 = vadd.f32 %v11159_v45, %v10021_v51  ;;  %v9029_v47 = vpop.f32.mrb[15].mxu0 }
 0xcf7   : > { %9077 = vst [vmem:[%s16319_s10 + $0x20] sm:$0xff] %v9027_v9  ;;  %v9030_v58 = vadd.f32 %v10021_v51, %v9029_v47 }
 0xcf8   : > { %9080 = vst [vmem:[%s16319_s10 + $0x38] sm:$0xff] %v9038_v0 }
 0xcf9   : > { %9078 = vst [vmem:[%s16319_s10 + $0x28] sm:$0xff] %v9030_v58 }
 0xd03   : > { %v11162_v59 = vpop.f32.mrb[16].mxu0 }
 0xd04   : > { %v9051_v46 = vadd.f32 %v11162_v59, %v10021_v51  ;;  %v9042_v54 = vpop.f32.mrb[17].mxu0 }
 0xd05   : > { %v9043_v28 = vadd.f32 %v10021_v51, %v9042_v54  ;;  %v11163_v12 = vpop.f32.mrb[18].mxu0 }
 0xd06   : > { %9083 = vst [vmem:[%s16319_s10 + $0x50] sm:$0xff] %v9051_v46  ;;  %v9054_v26 = vadd.f32 %v11163_v12, %v10021_v51  ;;  %v9045_v8 = vpop.f32.mrb[19].mxu0 }
 0xd07   : > { %9081 = vst [vmem:[%s16319_s10 + $0x40] sm:$0xff] %v9043_v28  ;;  %v9046_v60 = vadd.f32 %v10021_v51, %v9045_v8 }
 0xd08   : > { %9084 = vst [vmem:[%s16319_s10 + $0x58] sm:$0xff] %v9054_v26 }
 0xd09   : > { %9082 = vst [vmem:[%s16319_s10 + $0x48] sm:$0xff] %v9046_v60 }
 0xd13   : > { %v11166_v31 = vpop.f32.mrb[20].mxu0 }
 0xd14   : > { %v9067_v39 = vadd.f32 %v11166_v31, %v10021_v51  ;;  %v9058_v62 = vpop.f32.mrb[21].mxu0 }
 0xd15   : > { %v9059_v10 = vadd.f32 %v10021_v51, %v9058_v62  ;;  %v11167_v33 = vpop.f32.mrb[22].mxu0 }
 0xd16   : > { %9087 = vst [vmem:[%s16319_s10 + $0x70] sm:$0xff] %v9067_v39  ;;  %v9070_v6 = vadd.f32 %v11167_v33, %v10021_v51  ;;  %v9061_v50 = vpop.f32.mrb[23].mxu0 }
 0xd17   : > { %9085 = vst [vmem:[%s16319_s10 + $0x60] sm:$0xff] %v9059_v10  ;;  %v9062_v13 = vadd.f32 %v10021_v51, %v9061_v50 }
 0xd18   : > { %9088 = vst [vmem:[%s16319_s10 + $0x78] sm:$0xff] %v9070_v6 }
 0xd19   : > { %9086 = vst [vmem:[%s16319_s10 + $0x68] sm:$0xff] %v9062_v13 }
 0xd1a PF: > { %s18_s27 = sadd.s32 1, %s11607_s27  }
 0xd1b   : > { %p15_p4 = scmp.ge.s32.totalorder %s18_s27, 4  }
 0xd1d   :  { %17 = sbr.rel (!%p15_p4) target bundleno = 1 (0x1), region = 87 }

</bundles_post_ra>
